<compile_context>
chip_gen: v6e
topology: v6e:2x2x1
jax: 0.10.0
libtpu: 0.0.40
codegen_flags: <defaults>
</compile_context>

<pallas_src>
import functools

import numpy as np
import jax
import jax.numpy as jnp
from jax.experimental import pallas as pl
from jax.experimental.pallas import tpu as pltpu


_TAPS = tuple((dy - 1, dx - 1) for dy in range(3) for dx in range(3))
_CENTER = 4                     # tap (0, 0)
_P_CHUNK = 8                    # spatial positions of fc1 weight streamed per grid step


def _make_tap_masks(B, H, W):
    """(B*H*W, 9) f32 validity mask per 3x3 tap; rows ordered r = (h*W + w)*B + b."""
    r = np.arange(B * H * W)
    p = r // B
    h = p // W
    w = p % W
    cols = []
    for oy, ox in _TAPS:
        cols.append(((h + oy >= 0) & (h + oy < H) &
                     (w + ox >= 0) & (w + ox < W)).astype(np.float32))
    return np.stack(cols, axis=1)


# ---------------------------------------------------------------------------
# Fused, pipelined whole-network kernel
# ---------------------------------------------------------------------------
def _dqn_kernel(x_ref, m_ref, w1_ref, b1_ref, w2_ref, b2_ref, w3_ref, b3_ref,
                f1w_ref, f1b_ref, f2w_ref, f2b_ref, o_ref,
                aflat_ref, accf_ref, *, B, H, W, n_chunks, p_chunk):
    pid = pl.program_id(0)

    # -------- step 0: conv stack + flatten (activations never leave VMEM) ----------
    @pl.when(pid == 0)
    def _():
        HW = H * W
        BHW = B * HW
        masks = m_ref[...]                                   # (BHW, 9) f32

        def shifted(a, t, oy, ox):
            # s[r] = a[r + d] for valid taps; circular roll, wrapped/oob rows -> 0.
            d = (oy * W + ox) * B
            s = pltpu.roll(a, shift=(-d) % BHW, axis=0)
            return s * masks[:, t:t + 1]

        # conv1 (Cin=1): 9 VPU broadcast multiply-adds (MXU would be nearly empty).
        x = x_ref[...]                                       # (BHW, 1) f32
        w1 = w1_ref[...]                                     # (9, C1) f32
        acc1 = jnp.zeros((BHW, w1.shape[1]), jnp.float32)
        for t, (oy, ox) in enumerate(_TAPS):
            xw = x * w1[t:t + 1, :]                          # (BHW, C1)
            acc1 = acc1 + (xw if t == _CENTER else shifted(xw, t, oy, ox))
        a1 = jnp.maximum(acc1 + b1_ref[...], 0.0)

        # conv2 / conv3: in-VMEM im2col -> one large-K bf16 MXU matmul per layer.
        def conv(a, w_ref, b_ref):
            cols = [a if t == _CENTER else shifted(a, t, oy, ox)
                    for t, (oy, ox) in enumerate(_TAPS)]
            pat = jnp.concatenate(cols, axis=1).astype(jnp.bfloat16)  # (BHW, 9*Cin)
            y = jnp.dot(pat, w_ref[...], preferred_element_type=jnp.float32)
            return jnp.maximum(y + b_ref[...], 0.0)

        a2 = conv(a1, w2_ref, b2_ref)                        # (BHW, 64)
        a3 = conv(a2, w3_ref, b3_ref)                        # (BHW, 64), rows (p, b)

        # Flatten with the torch NCHW order folded into f1w's host-side layout:
        # aflat[ci][b, j*C + c] = a3[(ci*p_chunk + j)*B + b, c].
        for ci in range(n_chunks):
            pieces = [a3[(ci * p_chunk + j) * B:(ci * p_chunk + j + 1) * B, :]
                      for j in range(p_chunk)]
            aflat_ref[ci] = jnp.concatenate(pieces, axis=1).astype(jnp.bfloat16)
        accf_ref[...] = jnp.zeros_like(accf_ref)

    # -------- every step: one fc1 K-chunk under the streamed f1w block --------------
    accf_ref[...] += jnp.dot(aflat_ref[pid], f1w_ref[...],
                             preferred_element_type=jnp.float32)

    # -------- last step: fc1 bias/ReLU, fc2, store -----------------------------------
    @pl.when(pid == pl.num_programs(0) - 1)
    def _():
        h1 = jnp.maximum(accf_ref[...] + f1b_ref[...], 0.0)
        y = jnp.dot(h1, f2w_ref[...], preferred_element_type=jnp.float32) + f2b_ref[...]
        o_ref[...] = y.astype(o_ref.dtype)


# ---------------------------------------------------------------------------
# Parameter prep (one-time, host side): torch layout -> fused-kernel layout
# ---------------------------------------------------------------------------
def prepare_params(params, B, H, W):
    HW = H * W

    def conv_w(w):          # (Cout, Cin, 3, 3) -> (9*Cin, Cout), rows ordered (tap, cin)
        cout, cin = w.shape[0], w.shape[1]
        return jnp.transpose(w, (2, 3, 1, 0)).reshape(9 * cin, cout)

    c3 = params["c3w"].shape[0]
    n1 = params["f1w"].shape[1]
    # torch flatten row index is c*HW + p; the kernel feeds rows ordered p*C + c.
    f1w = jnp.transpose(params["f1w"].reshape(c3, HW, n1), (1, 0, 2)).reshape(HW * c3, n1)
    return {
        "masks": jnp.asarray(_make_tap_masks(B, H, W)),
        "w1": conv_w(params["c1w"]),                          # (9, 32) f32 (Cin = 1)
        "b1": params["c1b"].reshape(1, -1),
        "w2": conv_w(params["c2w"]).astype(jnp.bfloat16),     # (288, 64) bf16
        "b2": params["c2b"].reshape(1, -1),
        "w3": conv_w(params["c3w"]).astype(jnp.bfloat16),     # (576, 64) bf16
        "b3": params["c3b"].reshape(1, -1),
        "f1w": f1w.astype(jnp.bfloat16),                      # (HW*64, 512) bf16
        "f1b": params["f1b"].reshape(1, -1),
        "f2w": params["f2w"],
        "f2b": params["f2b"].reshape(1, -1),
    }


def _pinned(shape):
    zeros = (0,) * len(shape)
    return pl.BlockSpec(shape, lambda i, _z=zeros: _z)


def dqn_forward(x_nchw, kp, *, B, H, W):
    """x: (B, 1, H, W) f32 -> (B, 5) f32 via a single pipelined Pallas kernel."""
    HW = H * W
    assert HW % _P_CHUNK == 0
    n_chunks = HW // _P_CHUNK
    c3 = kp["w3"].shape[1]
    k_chunk = _P_CHUNK * c3
    n1 = kp["f1b"].shape[1]
    n2 = kp["f2w"].shape[1]

    # activation rows ordered r = (h*W + w)*B + b (position-major); tiny host shuffle.
    x2d = jnp.transpose(x_nchw[:, 0, :, :], (1, 2, 0)).reshape(HW * B, 1)

    operands = (x2d, kp["masks"], kp["w1"], kp["b1"], kp["w2"], kp["b2"],
                kp["w3"], kp["b3"], kp["f1w"], kp["f1b"], kp["f2w"], kp["f2b"])

    in_specs = [_pinned(a.shape) for a in operands]
    in_specs[8] = pl.BlockSpec((k_chunk, n1), lambda i: (i, 0))   # f1w streamed per step

    c1 = kp["w1"].shape[1]
    ci2, c2 = kp["w2"].shape
    ci3, _ = kp["w3"].shape
    flops = (2 * B * HW * (9 * c1 + ci2 * c2 + ci3 * c3)
             + 2 * B * (HW * c3) * n1 + 2 * B * n1 * n2)
    bytes_accessed = sum(int(np.prod(a.shape)) * a.dtype.itemsize for a in operands) \
        + B * n2 * 4

    kernel = functools.partial(_dqn_kernel, B=B, H=H, W=W,
                               n_chunks=n_chunks, p_chunk=_P_CHUNK)
    return pl.pallas_call(
        kernel,
        out_shape=jax.ShapeDtypeStruct((B, n2), jnp.float32),
        grid=(n_chunks,),
        in_specs=in_specs,
        out_specs=_pinned((B, n2)),
        scratch_shapes=[
            pltpu.VMEM((n_chunks, B, k_chunk), jnp.bfloat16),   # flattened conv3 act
            pltpu.VMEM((B, n1), jnp.float32),                   # fc1 f32 accumulator
        ],
        compiler_params=pltpu.CompilerParams(
            dimension_semantics=("arbitrary",),
        ),
        cost_estimate=pl.CostEstimate(flops=flops, transcendentals=0,
                                      bytes_accessed=bytes_accessed),
    )(*operands)


# ---------------------------------------------------------------------------
# Pure-JAX reference (torch-equivalent semantics) for correctness check
# ---------------------------------------------------------------------------
def reference_forward(x_nchw, params):
    def conv(x, w, b):
        y = jax.lax.conv_general_dilated(
            x, w, (1, 1), "SAME", dimension_numbers=("NCHW", "OIHW", "NCHW"))
        return jax.nn.relu(y + b[None, :, None, None])

    h = conv(x_nchw, params["c1w"], params["c1b"])
    h = conv(h, params["c2w"], params["c2b"])
    h = conv(h, params["c3w"], params["c3b"])
    h = h.reshape(h.shape[0], -1)
    h = jax.nn.relu(h @ params["f1w"] + params["f1b"])
    return h @ params["f2w"] + params["f2b"]


def init_params(key, H, W):
    ks = jax.random.split(key, 10)
    s = 0.05
    flat = 64 * H * W
    return {
        "c1w": s * jax.random.normal(ks[0], (32, 1, 3, 3), jnp.float32),
        "c1b": s * jax.random.normal(ks[1], (32,), jnp.float32),
        "c2w": s * jax.random.normal(ks[2], (64, 32, 3, 3), jnp.float32),
        "c2b": s * jax.random.normal(ks[3], (64,), jnp.float32),
        "c3w": s * jax.random.normal(ks[4], (64, 64, 3, 3), jnp.float32),
        "c3b": s * jax.random.normal(ks[5], (64,), jnp.float32),
        # stored matmul-ready (in, out) == torch Linear weight transposed;
        # row index follows torch.nn.Flatten order c*H*W + h*W + w.
        "f1w": s * jax.random.normal(ks[6], (flat, 512), jnp.float32),
        "f1b": s * jax.random.normal(ks[7], (512,), jnp.float32),
        "f2w": s * jax.random.normal(ks[8], (512, 5), jnp.float32),
        "f2b": s * jax.random.normal(ks[9], (5,), jnp.float32),
    }


if __name__ == "__main__":
    # screen_setup.x_boxes = screen_setup.y_boxes = 8  ->  input_size = 64
    B, H, W = 2, 8, 8
    key = jax.random.PRNGKey(0)
    kx, kparam = jax.random.split(key)
    x = jax.random.normal(kx, (B, 1, H, W), jnp.float32)
    params = init_params(kparam, H, W)

    kp = prepare_params(params, B, H, W)          # one-time layout / bf16 prep
    fwd = jax.jit(functools.partial(dqn_forward, B=B, H=H, W=W))

    out = jax.block_until_ready(fwd(x, kp))
    ref = jax.block_until_ready(reference_forward(x, params))

    assert out.shape == (B, 5), out.shape
    assert jnp.allclose(out, ref, atol=2e-2, rtol=2e-2), (
        "mismatch", float(jnp.max(jnp.abs(out - ref))))
    print("KERNEL_OK")
</pallas_src>

<mosaic_0001>
module attributes {stable_mosaic.version = 11 : i64} {
  func.func @_dqn_kernel(%arg0: i32, %arg1: memref<128x1xf32, #tpu.memory_space<vmem>>, %arg2: memref<128x9xf32, #tpu.memory_space<vmem>>, %arg3: memref<9x32xf32, #tpu.memory_space<vmem>>, %arg4: memref<1x32xf32, #tpu.memory_space<vmem>>, %arg5: memref<288x64xbf16, #tpu.memory_space<vmem>>, %arg6: memref<1x64xf32, #tpu.memory_space<vmem>>, %arg7: memref<576x64xbf16, #tpu.memory_space<vmem>>, %arg8: memref<1x64xf32, #tpu.memory_space<vmem>>, %arg9: memref<512x512xbf16, #tpu.memory_space<vmem>>, %arg10: memref<1x512xf32, #tpu.memory_space<vmem>>, %arg11: memref<512x5xf32, #tpu.memory_space<vmem>>, %arg12: memref<1x5xf32, #tpu.memory_space<vmem>>, %arg13: memref<2x5xf32, #tpu.memory_space<vmem>>, %arg14: memref<8x2x512xbf16, #tpu.memory_space<vmem>>, %arg15: memref<2x512xf32, #tpu.memory_space<vmem>>) attributes {dimension_semantics = [#tpu.dimension_semantics<arbitrary>], iteration_bounds = array<i64: 8>, scalar_prefetch = 0 : i64, scratch_operands = 2 : i64, tpu.core_type = #tpu.core_type<tc>, window_params = [{pipeline_mode = #tpu.pipeline_mode<synchronous>, transform_indices = @transform_0, window_bounds = array<i64: 128, 1>}, {pipeline_mode = #tpu.pipeline_mode<synchronous>, transform_indices = @transform_1, window_bounds = array<i64: 128, 9>}, {pipeline_mode = #tpu.pipeline_mode<synchronous>, transform_indices = @transform_2, window_bounds = array<i64: 9, 32>}, {pipeline_mode = #tpu.pipeline_mode<synchronous>, transform_indices = @transform_3, window_bounds = array<i64: 1, 32>}, {pipeline_mode = #tpu.pipeline_mode<synchronous>, transform_indices = @transform_4, window_bounds = array<i64: 288, 64>}, {pipeline_mode = #tpu.pipeline_mode<synchronous>, transform_indices = @transform_5, window_bounds = array<i64: 1, 64>}, {pipeline_mode = #tpu.pipeline_mode<synchronous>, transform_indices = @transform_6, window_bounds = array<i64: 576, 64>}, {pipeline_mode = #tpu.pipeline_mode<synchronous>, transform_indices = @transform_7, window_bounds = array<i64: 1, 64>}, {transform_indices = @transform_8, window_bounds = array<i64: 512, 512>}, {pipeline_mode = #tpu.pipeline_mode<synchronous>, transform_indices = @transform_9, window_bounds = array<i64: 1, 512>}, {pipeline_mode = #tpu.pipeline_mode<synchronous>, transform_indices = @transform_10, window_bounds = array<i64: 512, 5>}, {pipeline_mode = #tpu.pipeline_mode<synchronous>, transform_indices = @transform_11, window_bounds = array<i64: 1, 5>}, {pipeline_mode = #tpu.pipeline_mode<synchronous>, transform_indices = @transform_12, window_bounds = array<i64: 2, 5>}]} {
    %c0_i32 = arith.constant 0 : i32
    %0 = arith.cmpi eq, %arg0, %c0_i32 : i32
    %1 = arith.extui %0 : i1 to i32
    %c0_i32_0 = arith.constant 0 : i32
    %2 = arith.cmpi ne, %1, %c0_i32_0 : i32
    scf.if %2 {
      %c0_9 = arith.constant 0 : index
      %c0_10 = arith.constant 0 : index
      %14 = vector.load %arg2[%c0_9, %c0_10] : memref<128x9xf32, #tpu.memory_space<vmem>>, vector<128x9xf32>
      %c0_11 = arith.constant 0 : index
      %c0_12 = arith.constant 0 : index
      %15 = vector.load %arg1[%c0_11, %c0_12] : memref<128x1xf32, #tpu.memory_space<vmem>>, vector<128x1xf32>
      %c0_13 = arith.constant 0 : index
      %c0_14 = arith.constant 0 : index
      %16 = vector.load %arg3[%c0_13, %c0_14] : memref<9x32xf32, #tpu.memory_space<vmem>>, vector<9x32xf32>
      %cst_15 = arith.constant 0.000000e+00 : f32
      %17 = vector.broadcast %cst_15 : f32 to vector<128x32xf32>
      %18 = vector.extract_strided_slice %16 {offsets = [0, 0], sizes = [1, 32], strides = [1, 1]} : vector<9x32xf32> to vector<1x32xf32>
      %19 = vector.broadcast %15 : vector<128x1xf32> to vector<128x32xf32>
      %20 = vector.broadcast %18 : vector<1x32xf32> to vector<128x32xf32>
      %21 = arith.mulf %19, %20 : vector<128x32xf32>
      %c18_i32 = arith.constant 18 : i32
      %22 = tpu.dynamic_rotate %21 by %c18_i32 dim 0 : vector<128x32xf32>, i32 -> vector<128x32xf32>
      %23 = vector.extract_strided_slice %14 {offsets = [0, 0], sizes = [128, 1], strides = [1, 1]} : vector<128x9xf32> to vector<128x1xf32>
      %24 = vector.broadcast %23 : vector<128x1xf32> to vector<128x32xf32>
      %25 = arith.mulf %22, %24 : vector<128x32xf32>
      %26 = arith.addf %17, %25 : vector<128x32xf32>
      %27 = vector.extract_strided_slice %16 {offsets = [1, 0], sizes = [1, 32], strides = [1, 1]} : vector<9x32xf32> to vector<1x32xf32>
      %28 = vector.broadcast %15 : vector<128x1xf32> to vector<128x32xf32>
      %29 = vector.broadcast %27 : vector<1x32xf32> to vector<128x32xf32>
      %30 = arith.mulf %28, %29 : vector<128x32xf32>
      %c16_i32 = arith.constant 16 : i32
      %31 = tpu.dynamic_rotate %30 by %c16_i32 dim 0 : vector<128x32xf32>, i32 -> vector<128x32xf32>
      %32 = vector.extract_strided_slice %14 {offsets = [0, 1], sizes = [128, 1], strides = [1, 1]} : vector<128x9xf32> to vector<128x1xf32>
      %33 = vector.broadcast %32 : vector<128x1xf32> to vector<128x32xf32>
      %34 = arith.mulf %31, %33 : vector<128x32xf32>
      %35 = arith.addf %26, %34 : vector<128x32xf32>
      %36 = vector.extract_strided_slice %16 {offsets = [2, 0], sizes = [1, 32], strides = [1, 1]} : vector<9x32xf32> to vector<1x32xf32>
      %37 = vector.broadcast %15 : vector<128x1xf32> to vector<128x32xf32>
      %38 = vector.broadcast %36 : vector<1x32xf32> to vector<128x32xf32>
      %39 = arith.mulf %37, %38 : vector<128x32xf32>
      %c14_i32 = arith.constant 14 : i32
      %40 = tpu.dynamic_rotate %39 by %c14_i32 dim 0 : vector<128x32xf32>, i32 -> vector<128x32xf32>
      %41 = vector.extract_strided_slice %14 {offsets = [0, 2], sizes = [128, 1], strides = [1, 1]} : vector<128x9xf32> to vector<128x1xf32>
      %42 = vector.broadcast %41 : vector<128x1xf32> to vector<128x32xf32>
      %43 = arith.mulf %40, %42 : vector<128x32xf32>
      %44 = arith.addf %35, %43 : vector<128x32xf32>
      %45 = vector.extract_strided_slice %16 {offsets = [3, 0], sizes = [1, 32], strides = [1, 1]} : vector<9x32xf32> to vector<1x32xf32>
      %46 = vector.broadcast %15 : vector<128x1xf32> to vector<128x32xf32>
      %47 = vector.broadcast %45 : vector<1x32xf32> to vector<128x32xf32>
      %48 = arith.mulf %46, %47 : vector<128x32xf32>
      %c2_i32 = arith.constant 2 : i32
      %49 = tpu.dynamic_rotate %48 by %c2_i32 dim 0 : vector<128x32xf32>, i32 -> vector<128x32xf32>
      %50 = vector.extract_strided_slice %14 {offsets = [0, 3], sizes = [128, 1], strides = [1, 1]} : vector<128x9xf32> to vector<128x1xf32>
      %51 = vector.broadcast %50 : vector<128x1xf32> to vector<128x32xf32>
      %52 = arith.mulf %49, %51 : vector<128x32xf32>
      %53 = arith.addf %44, %52 : vector<128x32xf32>
      %54 = vector.extract_strided_slice %16 {offsets = [4, 0], sizes = [1, 32], strides = [1, 1]} : vector<9x32xf32> to vector<1x32xf32>
      %55 = vector.broadcast %15 : vector<128x1xf32> to vector<128x32xf32>
      %56 = vector.broadcast %54 : vector<1x32xf32> to vector<128x32xf32>
      %57 = arith.mulf %55, %56 : vector<128x32xf32>
      %58 = arith.addf %53, %57 : vector<128x32xf32>
      %59 = vector.extract_strided_slice %16 {offsets = [5, 0], sizes = [1, 32], strides = [1, 1]} : vector<9x32xf32> to vector<1x32xf32>
      %60 = vector.broadcast %15 : vector<128x1xf32> to vector<128x32xf32>
      %61 = vector.broadcast %59 : vector<1x32xf32> to vector<128x32xf32>
      %62 = arith.mulf %60, %61 : vector<128x32xf32>
      %c126_i32 = arith.constant 126 : i32
      %63 = tpu.dynamic_rotate %62 by %c126_i32 dim 0 : vector<128x32xf32>, i32 -> vector<128x32xf32>
      %64 = vector.extract_strided_slice %14 {offsets = [0, 5], sizes = [128, 1], strides = [1, 1]} : vector<128x9xf32> to vector<128x1xf32>
      %65 = vector.broadcast %64 : vector<128x1xf32> to vector<128x32xf32>
      %66 = arith.mulf %63, %65 : vector<128x32xf32>
      %67 = arith.addf %58, %66 : vector<128x32xf32>
      %68 = vector.extract_strided_slice %16 {offsets = [6, 0], sizes = [1, 32], strides = [1, 1]} : vector<9x32xf32> to vector<1x32xf32>
      %69 = vector.broadcast %15 : vector<128x1xf32> to vector<128x32xf32>
      %70 = vector.broadcast %68 : vector<1x32xf32> to vector<128x32xf32>
      %71 = arith.mulf %69, %70 : vector<128x32xf32>
      %c114_i32 = arith.constant 114 : i32
      %72 = tpu.dynamic_rotate %71 by %c114_i32 dim 0 : vector<128x32xf32>, i32 -> vector<128x32xf32>
      %73 = vector.extract_strided_slice %14 {offsets = [0, 6], sizes = [128, 1], strides = [1, 1]} : vector<128x9xf32> to vector<128x1xf32>
      %74 = vector.broadcast %73 : vector<128x1xf32> to vector<128x32xf32>
      %75 = arith.mulf %72, %74 : vector<128x32xf32>
      %76 = arith.addf %67, %75 : vector<128x32xf32>
      %77 = vector.extract_strided_slice %16 {offsets = [7, 0], sizes = [1, 32], strides = [1, 1]} : vector<9x32xf32> to vector<1x32xf32>
      %78 = vector.broadcast %15 : vector<128x1xf32> to vector<128x32xf32>
      %79 = vector.broadcast %77 : vector<1x32xf32> to vector<128x32xf32>
      %80 = arith.mulf %78, %79 : vector<128x32xf32>
      %c112_i32 = arith.constant 112 : i32
      %81 = tpu.dynamic_rotate %80 by %c112_i32 dim 0 : vector<128x32xf32>, i32 -> vector<128x32xf32>
      %82 = vector.extract_strided_slice %14 {offsets = [0, 7], sizes = [128, 1], strides = [1, 1]} : vector<128x9xf32> to vector<128x1xf32>
      %83 = vector.broadcast %82 : vector<128x1xf32> to vector<128x32xf32>
      %84 = arith.mulf %81, %83 : vector<128x32xf32>
      %85 = arith.addf %76, %84 : vector<128x32xf32>
      %86 = vector.extract_strided_slice %16 {offsets = [8, 0], sizes = [1, 32], strides = [1, 1]} : vector<9x32xf32> to vector<1x32xf32>
      %87 = vector.broadcast %15 : vector<128x1xf32> to vector<128x32xf32>
      %88 = vector.broadcast %86 : vector<1x32xf32> to vector<128x32xf32>
      %89 = arith.mulf %87, %88 : vector<128x32xf32>
      %c110_i32 = arith.constant 110 : i32
      %90 = tpu.dynamic_rotate %89 by %c110_i32 dim 0 : vector<128x32xf32>, i32 -> vector<128x32xf32>
      %91 = vector.extract_strided_slice %14 {offsets = [0, 8], sizes = [128, 1], strides = [1, 1]} : vector<128x9xf32> to vector<128x1xf32>
      %92 = vector.broadcast %91 : vector<128x1xf32> to vector<128x32xf32>
      %93 = arith.mulf %90, %92 : vector<128x32xf32>
      %94 = arith.addf %85, %93 : vector<128x32xf32>
      %c0_16 = arith.constant 0 : index
      %c0_17 = arith.constant 0 : index
      %95 = vector.load %arg4[%c0_16, %c0_17] : memref<1x32xf32, #tpu.memory_space<vmem>>, vector<1x32xf32>
      %96 = vector.broadcast %95 : vector<1x32xf32> to vector<128x32xf32>
      %97 = arith.addf %94, %96 : vector<128x32xf32>
      %cst_18 = arith.constant 0.000000e+00 : f32
      %98 = vector.broadcast %cst_18 : f32 to vector<128x32xf32>
      %99 = arith.maximumf %97, %98 : vector<128x32xf32>
      %c18_i32_19 = arith.constant 18 : i32
      %100 = tpu.dynamic_rotate %99 by %c18_i32_19 dim 0 : vector<128x32xf32>, i32 -> vector<128x32xf32>
      %101 = vector.extract_strided_slice %14 {offsets = [0, 0], sizes = [128, 1], strides = [1, 1]} : vector<128x9xf32> to vector<128x1xf32>
      %102 = vector.broadcast %101 : vector<128x1xf32> to vector<128x32xf32>
      %103 = arith.mulf %100, %102 : vector<128x32xf32>
      %c16_i32_20 = arith.constant 16 : i32
      %104 = tpu.dynamic_rotate %99 by %c16_i32_20 dim 0 : vector<128x32xf32>, i32 -> vector<128x32xf32>
      %105 = vector.extract_strided_slice %14 {offsets = [0, 1], sizes = [128, 1], strides = [1, 1]} : vector<128x9xf32> to vector<128x1xf32>
      %106 = vector.broadcast %105 : vector<128x1xf32> to vector<128x32xf32>
      %107 = arith.mulf %104, %106 : vector<128x32xf32>
      %c14_i32_21 = arith.constant 14 : i32
      %108 = tpu.dynamic_rotate %99 by %c14_i32_21 dim 0 : vector<128x32xf32>, i32 -> vector<128x32xf32>
      %109 = vector.extract_strided_slice %14 {offsets = [0, 2], sizes = [128, 1], strides = [1, 1]} : vector<128x9xf32> to vector<128x1xf32>
      %110 = vector.broadcast %109 : vector<128x1xf32> to vector<128x32xf32>
      %111 = arith.mulf %108, %110 : vector<128x32xf32>
      %c2_i32_22 = arith.constant 2 : i32
      %112 = tpu.dynamic_rotate %99 by %c2_i32_22 dim 0 : vector<128x32xf32>, i32 -> vector<128x32xf32>
      %113 = vector.extract_strided_slice %14 {offsets = [0, 3], sizes = [128, 1], strides = [1, 1]} : vector<128x9xf32> to vector<128x1xf32>
      %114 = vector.broadcast %113 : vector<128x1xf32> to vector<128x32xf32>
      %115 = arith.mulf %112, %114 : vector<128x32xf32>
      %c126_i32_23 = arith.constant 126 : i32
      %116 = tpu.dynamic_rotate %99 by %c126_i32_23 dim 0 : vector<128x32xf32>, i32 -> vector<128x32xf32>
      %117 = vector.extract_strided_slice %14 {offsets = [0, 5], sizes = [128, 1], strides = [1, 1]} : vector<128x9xf32> to vector<128x1xf32>
      %118 = vector.broadcast %117 : vector<128x1xf32> to vector<128x32xf32>
      %119 = arith.mulf %116, %118 : vector<128x32xf32>
      %c114_i32_24 = arith.constant 114 : i32
      %120 = tpu.dynamic_rotate %99 by %c114_i32_24 dim 0 : vector<128x32xf32>, i32 -> vector<128x32xf32>
      %121 = vector.extract_strided_slice %14 {offsets = [0, 6], sizes = [128, 1], strides = [1, 1]} : vector<128x9xf32> to vector<128x1xf32>
      %122 = vector.broadcast %121 : vector<128x1xf32> to vector<128x32xf32>
      %123 = arith.mulf %120, %122 : vector<128x32xf32>
      %c112_i32_25 = arith.constant 112 : i32
      %124 = tpu.dynamic_rotate %99 by %c112_i32_25 dim 0 : vector<128x32xf32>, i32 -> vector<128x32xf32>
      %125 = vector.extract_strided_slice %14 {offsets = [0, 7], sizes = [128, 1], strides = [1, 1]} : vector<128x9xf32> to vector<128x1xf32>
      %126 = vector.broadcast %125 : vector<128x1xf32> to vector<128x32xf32>
      %127 = arith.mulf %124, %126 : vector<128x32xf32>
      %c110_i32_26 = arith.constant 110 : i32
      %128 = tpu.dynamic_rotate %99 by %c110_i32_26 dim 0 : vector<128x32xf32>, i32 -> vector<128x32xf32>
      %129 = vector.extract_strided_slice %14 {offsets = [0, 8], sizes = [128, 1], strides = [1, 1]} : vector<128x9xf32> to vector<128x1xf32>
      %130 = vector.broadcast %129 : vector<128x1xf32> to vector<128x32xf32>
      %131 = arith.mulf %128, %130 : vector<128x32xf32>
      %132 = tpu.concatenate %103, %107, %111, %115, %99, %119, %123, %127, %131 in 1 : vector<128x32xf32>, vector<128x32xf32>, vector<128x32xf32>, vector<128x32xf32>, vector<128x32xf32>, vector<128x32xf32>, vector<128x32xf32>, vector<128x32xf32>, vector<128x32xf32> -> vector<128x288xf32>
      %133 = arith.truncf %132 : vector<128x288xf32> to vector<128x288xbf16>
      %c0_27 = arith.constant 0 : index
      %c0_28 = arith.constant 0 : index
      %134 = vector.load %arg5[%c0_27, %c0_28] : memref<288x64xbf16, #tpu.memory_space<vmem>>, vector<288x64xbf16>
      %cst_29 = arith.constant dense<0.000000e+00> : vector<128x64xf32>
      %135 = tpu.matmul %133, %134, %cst_29 {dimension_numbers = #tpu.dot_dimension_numbers<[1], [0], [0], [1], [0, 0, 1, 1], [], []>} : vector<128x288xbf16>, vector<288x64xbf16>, vector<128x64xf32> -> vector<128x64xf32>
      %c0_30 = arith.constant 0 : index
      %c0_31 = arith.constant 0 : index
      %136 = vector.load %arg6[%c0_30, %c0_31] : memref<1x64xf32, #tpu.memory_space<vmem>>, vector<1x64xf32>
      %137 = vector.broadcast %136 : vector<1x64xf32> to vector<128x64xf32>
      %138 = arith.addf %135, %137 : vector<128x64xf32>
      %cst_32 = arith.constant 0.000000e+00 : f32
      %139 = vector.broadcast %cst_32 : f32 to vector<128x64xf32>
      %140 = arith.maximumf %138, %139 : vector<128x64xf32>
      %c18_i32_33 = arith.constant 18 : i32
      %141 = tpu.dynamic_rotate %140 by %c18_i32_33 dim 0 : vector<128x64xf32>, i32 -> vector<128x64xf32>
      %142 = vector.extract_strided_slice %14 {offsets = [0, 0], sizes = [128, 1], strides = [1, 1]} : vector<128x9xf32> to vector<128x1xf32>
      %143 = vector.broadcast %142 : vector<128x1xf32> to vector<128x64xf32>
      %144 = arith.mulf %141, %143 : vector<128x64xf32>
      %c16_i32_34 = arith.constant 16 : i32
      %145 = tpu.dynamic_rotate %140 by %c16_i32_34 dim 0 : vector<128x64xf32>, i32 -> vector<128x64xf32>
      %146 = vector.extract_strided_slice %14 {offsets = [0, 1], sizes = [128, 1], strides = [1, 1]} : vector<128x9xf32> to vector<128x1xf32>
      %147 = vector.broadcast %146 : vector<128x1xf32> to vector<128x64xf32>
      %148 = arith.mulf %145, %147 : vector<128x64xf32>
      %c14_i32_35 = arith.constant 14 : i32
      %149 = tpu.dynamic_rotate %140 by %c14_i32_35 dim 0 : vector<128x64xf32>, i32 -> vector<128x64xf32>
      %150 = vector.extract_strided_slice %14 {offsets = [0, 2], sizes = [128, 1], strides = [1, 1]} : vector<128x9xf32> to vector<128x1xf32>
      %151 = vector.broadcast %150 : vector<128x1xf32> to vector<128x64xf32>
      %152 = arith.mulf %149, %151 : vector<128x64xf32>
      %c2_i32_36 = arith.constant 2 : i32
      %153 = tpu.dynamic_rotate %140 by %c2_i32_36 dim 0 : vector<128x64xf32>, i32 -> vector<128x64xf32>
      %154 = vector.extract_strided_slice %14 {offsets = [0, 3], sizes = [128, 1], strides = [1, 1]} : vector<128x9xf32> to vector<128x1xf32>
      %155 = vector.broadcast %154 : vector<128x1xf32> to vector<128x64xf32>
      %156 = arith.mulf %153, %155 : vector<128x64xf32>
      %c126_i32_37 = arith.constant 126 : i32
      %157 = tpu.dynamic_rotate %140 by %c126_i32_37 dim 0 : vector<128x64xf32>, i32 -> vector<128x64xf32>
      %158 = vector.extract_strided_slice %14 {offsets = [0, 5], sizes = [128, 1], strides = [1, 1]} : vector<128x9xf32> to vector<128x1xf32>
      %159 = vector.broadcast %158 : vector<128x1xf32> to vector<128x64xf32>
      %160 = arith.mulf %157, %159 : vector<128x64xf32>
      %c114_i32_38 = arith.constant 114 : i32
      %161 = tpu.dynamic_rotate %140 by %c114_i32_38 dim 0 : vector<128x64xf32>, i32 -> vector<128x64xf32>
      %162 = vector.extract_strided_slice %14 {offsets = [0, 6], sizes = [128, 1], strides = [1, 1]} : vector<128x9xf32> to vector<128x1xf32>
      %163 = vector.broadcast %162 : vector<128x1xf32> to vector<128x64xf32>
      %164 = arith.mulf %161, %163 : vector<128x64xf32>
      %c112_i32_39 = arith.constant 112 : i32
      %165 = tpu.dynamic_rotate %140 by %c112_i32_39 dim 0 : vector<128x64xf32>, i32 -> vector<128x64xf32>
      %166 = vector.extract_strided_slice %14 {offsets = [0, 7], sizes = [128, 1], strides = [1, 1]} : vector<128x9xf32> to vector<128x1xf32>
      %167 = vector.broadcast %166 : vector<128x1xf32> to vector<128x64xf32>
      %168 = arith.mulf %165, %167 : vector<128x64xf32>
      %c110_i32_40 = arith.constant 110 : i32
      %169 = tpu.dynamic_rotate %140 by %c110_i32_40 dim 0 : vector<128x64xf32>, i32 -> vector<128x64xf32>
      %170 = vector.extract_strided_slice %14 {offsets = [0, 8], sizes = [128, 1], strides = [1, 1]} : vector<128x9xf32> to vector<128x1xf32>
      %171 = vector.broadcast %170 : vector<128x1xf32> to vector<128x64xf32>
      %172 = arith.mulf %169, %171 : vector<128x64xf32>
      %173 = tpu.concatenate %144, %148, %152, %156, %140, %160, %164, %168, %172 in 1 : vector<128x64xf32>, vector<128x64xf32>, vector<128x64xf32>, vector<128x64xf32>, vector<128x64xf32>, vector<128x64xf32>, vector<128x64xf32>, vector<128x64xf32>, vector<128x64xf32> -> vector<128x576xf32>
      %174 = arith.truncf %173 : vector<128x576xf32> to vector<128x576xbf16>
      %c0_41 = arith.constant 0 : index
      %c0_42 = arith.constant 0 : index
      %175 = vector.load %arg7[%c0_41, %c0_42] : memref<576x64xbf16, #tpu.memory_space<vmem>>, vector<576x64xbf16>
      %cst_43 = arith.constant dense<0.000000e+00> : vector<128x64xf32>
      %176 = tpu.matmul %174, %175, %cst_43 {dimension_numbers = #tpu.dot_dimension_numbers<[1], [0], [0], [1], [0, 0, 1, 1], [], []>} : vector<128x576xbf16>, vector<576x64xbf16>, vector<128x64xf32> -> vector<128x64xf32>
      %c0_44 = arith.constant 0 : index
      %c0_45 = arith.constant 0 : index
      %177 = vector.load %arg8[%c0_44, %c0_45] : memref<1x64xf32, #tpu.memory_space<vmem>>, vector<1x64xf32>
      %178 = vector.broadcast %177 : vector<1x64xf32> to vector<128x64xf32>
      %179 = arith.addf %176, %178 : vector<128x64xf32>
      %cst_46 = arith.constant 0.000000e+00 : f32
      %180 = vector.broadcast %cst_46 : f32 to vector<128x64xf32>
      %181 = arith.maximumf %179, %180 : vector<128x64xf32>
      %182 = vector.extract_strided_slice %181 {offsets = [0, 0], sizes = [2, 64], strides = [1, 1]} : vector<128x64xf32> to vector<2x64xf32>
      %183 = vector.extract_strided_slice %181 {offsets = [2, 0], sizes = [2, 64], strides = [1, 1]} : vector<128x64xf32> to vector<2x64xf32>
      %184 = vector.extract_strided_slice %181 {offsets = [4, 0], sizes = [2, 64], strides = [1, 1]} : vector<128x64xf32> to vector<2x64xf32>
      %185 = vector.extract_strided_slice %181 {offsets = [6, 0], sizes = [2, 64], strides = [1, 1]} : vector<128x64xf32> to vector<2x64xf32>
      %186 = vector.extract_strided_slice %181 {offsets = [8, 0], sizes = [2, 64], strides = [1, 1]} : vector<128x64xf32> to vector<2x64xf32>
      %187 = vector.extract_strided_slice %181 {offsets = [10, 0], sizes = [2, 64], strides = [1, 1]} : vector<128x64xf32> to vector<2x64xf32>
      %188 = vector.extract_strided_slice %181 {offsets = [12, 0], sizes = [2, 64], strides = [1, 1]} : vector<128x64xf32> to vector<2x64xf32>
      %189 = vector.extract_strided_slice %181 {offsets = [14, 0], sizes = [2, 64], strides = [1, 1]} : vector<128x64xf32> to vector<2x64xf32>
      %190 = tpu.concatenate %182, %183, %184, %185, %186, %187, %188, %189 in 1 : vector<2x64xf32>, vector<2x64xf32>, vector<2x64xf32>, vector<2x64xf32>, vector<2x64xf32>, vector<2x64xf32>, vector<2x64xf32>, vector<2x64xf32> -> vector<2x512xf32>
      %191 = arith.truncf %190 : vector<2x512xf32> to vector<2x512xbf16>
      %c0_47 = arith.constant 0 : index
      %c0_48 = arith.constant 0 : index
      %c0_49 = arith.constant 0 : index
      %192 = vector.load %arg14[%c0_47, %c0_48, %c0_49] : memref<8x2x512xbf16, #tpu.memory_space<vmem>>, vector<1x2x512xbf16>
      %193 = vector.shape_cast %192 : vector<1x2x512xbf16> to vector<2x512xbf16>
      %194 = vector.shape_cast %191 : vector<2x512xbf16> to vector<1x2x512xbf16>
      tpu.vector_store %arg14[%c0_47, %c0_48, %c0_49], %194 {strides = array<i32>} : memref<8x2x512xbf16, #tpu.memory_space<vmem>>, vector<1x2x512xbf16>,
      %195 = vector.extract_strided_slice %181 {offsets = [16, 0], sizes = [2, 64], strides = [1, 1]} : vector<128x64xf32> to vector<2x64xf32>
      %196 = vector.extract_strided_slice %181 {offsets = [18, 0], sizes = [2, 64], strides = [1, 1]} : vector<128x64xf32> to vector<2x64xf32>
      %197 = vector.extract_strided_slice %181 {offsets = [20, 0], sizes = [2, 64], strides = [1, 1]} : vector<128x64xf32> to vector<2x64xf32>
      %198 = vector.extract_strided_slice %181 {offsets = [22, 0], sizes = [2, 64], strides = [1, 1]} : vector<128x64xf32> to vector<2x64xf32>
      %199 = vector.extract_strided_slice %181 {offsets = [24, 0], sizes = [2, 64], strides = [1, 1]} : vector<128x64xf32> to vector<2x64xf32>
      %200 = vector.extract_strided_slice %181 {offsets = [26, 0], sizes = [2, 64], strides = [1, 1]} : vector<128x64xf32> to vector<2x64xf32>
      %201 = vector.extract_strided_slice %181 {offsets = [28, 0], sizes = [2, 64], strides = [1, 1]} : vector<128x64xf32> to vector<2x64xf32>
      %202 = vector.extract_strided_slice %181 {offsets = [30, 0], sizes = [2, 64], strides = [1, 1]} : vector<128x64xf32> to vector<2x64xf32>
      %203 = tpu.concatenate %195, %196, %197, %198, %199, %200, %201, %202 in 1 : vector<2x64xf32>, vector<2x64xf32>, vector<2x64xf32>, vector<2x64xf32>, vector<2x64xf32>, vector<2x64xf32>, vector<2x64xf32>, vector<2x64xf32> -> vector<2x512xf32>
      %204 = arith.truncf %203 : vector<2x512xf32> to vector<2x512xbf16>
      %c1 = arith.constant 1 : index
      %c0_50 = arith.constant 0 : index
      %c0_51 = arith.constant 0 : index
      %205 = vector.load %arg14[%c1, %c0_50, %c0_51] : memref<8x2x512xbf16, #tpu.memory_space<vmem>>, vector<1x2x512xbf16>
      %206 = vector.shape_cast %205 : vector<1x2x512xbf16> to vector<2x512xbf16>
      %207 = vector.shape_cast %204 : vector<2x512xbf16> to vector<1x2x512xbf16>
      tpu.vector_store %arg14[%c1, %c0_50, %c0_51], %207 {strides = array<i32>} : memref<8x2x512xbf16, #tpu.memory_space<vmem>>, vector<1x2x512xbf16>,
      %208 = vector.extract_strided_slice %181 {offsets = [32, 0], sizes = [2, 64], strides = [1, 1]} : vector<128x64xf32> to vector<2x64xf32>
      %209 = vector.extract_strided_slice %181 {offsets = [34, 0], sizes = [2, 64], strides = [1, 1]} : vector<128x64xf32> to vector<2x64xf32>
      %210 = vector.extract_strided_slice %181 {offsets = [36, 0], sizes = [2, 64], strides = [1, 1]} : vector<128x64xf32> to vector<2x64xf32>
      %211 = vector.extract_strided_slice %181 {offsets = [38, 0], sizes = [2, 64], strides = [1, 1]} : vector<128x64xf32> to vector<2x64xf32>
      %212 = vector.extract_strided_slice %181 {offsets = [40, 0], sizes = [2, 64], strides = [1, 1]} : vector<128x64xf32> to vector<2x64xf32>
      %213 = vector.extract_strided_slice %181 {offsets = [42, 0], sizes = [2, 64], strides = [1, 1]} : vector<128x64xf32> to vector<2x64xf32>
      %214 = vector.extract_strided_slice %181 {offsets = [44, 0], sizes = [2, 64], strides = [1, 1]} : vector<128x64xf32> to vector<2x64xf32>
      %215 = vector.extract_strided_slice %181 {offsets = [46, 0], sizes = [2, 64], strides = [1, 1]} : vector<128x64xf32> to vector<2x64xf32>
      %216 = tpu.concatenate %208, %209, %210, %211, %212, %213, %214, %215 in 1 : vector<2x64xf32>, vector<2x64xf32>, vector<2x64xf32>, vector<2x64xf32>, vector<2x64xf32>, vector<2x64xf32>, vector<2x64xf32>, vector<2x64xf32> -> vector<2x512xf32>
      %217 = arith.truncf %216 : vector<2x512xf32> to vector<2x512xbf16>
      %c2 = arith.constant 2 : index
      %c0_52 = arith.constant 0 : index
      %c0_53 = arith.constant 0 : index
      %218 = vector.load %arg14[%c2, %c0_52, %c0_53] : memref<8x2x512xbf16, #tpu.memory_space<vmem>>, vector<1x2x512xbf16>
      %219 = vector.shape_cast %218 : vector<1x2x512xbf16> to vector<2x512xbf16>
      %220 = vector.shape_cast %217 : vector<2x512xbf16> to vector<1x2x512xbf16>
      tpu.vector_store %arg14[%c2, %c0_52, %c0_53], %220 {strides = array<i32>} : memref<8x2x512xbf16, #tpu.memory_space<vmem>>, vector<1x2x512xbf16>,
      %221 = vector.extract_strided_slice %181 {offsets = [48, 0], sizes = [2, 64], strides = [1, 1]} : vector<128x64xf32> to vector<2x64xf32>
      %222 = vector.extract_strided_slice %181 {offsets = [50, 0], sizes = [2, 64], strides = [1, 1]} : vector<128x64xf32> to vector<2x64xf32>
      %223 = vector.extract_strided_slice %181 {offsets = [52, 0], sizes = [2, 64], strides = [1, 1]} : vector<128x64xf32> to vector<2x64xf32>
      %224 = vector.extract_strided_slice %181 {offsets = [54, 0], sizes = [2, 64], strides = [1, 1]} : vector<128x64xf32> to vector<2x64xf32>
      %225 = vector.extract_strided_slice %181 {offsets = [56, 0], sizes = [2, 64], strides = [1, 1]} : vector<128x64xf32> to vector<2x64xf32>
      %226 = vector.extract_strided_slice %181 {offsets = [58, 0], sizes = [2, 64], strides = [1, 1]} : vector<128x64xf32> to vector<2x64xf32>
      %227 = vector.extract_strided_slice %181 {offsets = [60, 0], sizes = [2, 64], strides = [1, 1]} : vector<128x64xf32> to vector<2x64xf32>
      %228 = vector.extract_strided_slice %181 {offsets = [62, 0], sizes = [2, 64], strides = [1, 1]} : vector<128x64xf32> to vector<2x64xf32>
      %229 = tpu.concatenate %221, %222, %223, %224, %225, %226, %227, %228 in 1 : vector<2x64xf32>, vector<2x64xf32>, vector<2x64xf32>, vector<2x64xf32>, vector<2x64xf32>, vector<2x64xf32>, vector<2x64xf32>, vector<2x64xf32> -> vector<2x512xf32>
      %230 = arith.truncf %229 : vector<2x512xf32> to vector<2x512xbf16>
      %c3 = arith.constant 3 : index
      %c0_54 = arith.constant 0 : index
      %c0_55 = arith.constant 0 : index
      %231 = vector.load %arg14[%c3, %c0_54, %c0_55] : memref<8x2x512xbf16, #tpu.memory_space<vmem>>, vector<1x2x512xbf16>
      %232 = vector.shape_cast %231 : vector<1x2x512xbf16> to vector<2x512xbf16>
      %233 = vector.shape_cast %230 : vector<2x512xbf16> to vector<1x2x512xbf16>
      tpu.vector_store %arg14[%c3, %c0_54, %c0_55], %233 {strides = array<i32>} : memref<8x2x512xbf16, #tpu.memory_space<vmem>>, vector<1x2x512xbf16>,
      %234 = vector.extract_strided_slice %181 {offsets = [64, 0], sizes = [2, 64], strides = [1, 1]} : vector<128x64xf32> to vector<2x64xf32>
      %235 = vector.extract_strided_slice %181 {offsets = [66, 0], sizes = [2, 64], strides = [1, 1]} : vector<128x64xf32> to vector<2x64xf32>
      %236 = vector.extract_strided_slice %181 {offsets = [68, 0], sizes = [2, 64], strides = [1, 1]} : vector<128x64xf32> to vector<2x64xf32>
      %237 = vector.extract_strided_slice %181 {offsets = [70, 0], sizes = [2, 64], strides = [1, 1]} : vector<128x64xf32> to vector<2x64xf32>
      %238 = vector.extract_strided_slice %181 {offsets = [72, 0], sizes = [2, 64], strides = [1, 1]} : vector<128x64xf32> to vector<2x64xf32>
      %239 = vector.extract_strided_slice %181 {offsets = [74, 0], sizes = [2, 64], strides = [1, 1]} : vector<128x64xf32> to vector<2x64xf32>
      %240 = vector.extract_strided_slice %181 {offsets = [76, 0], sizes = [2, 64], strides = [1, 1]} : vector<128x64xf32> to vector<2x64xf32>
      %241 = vector.extract_strided_slice %181 {offsets = [78, 0], sizes = [2, 64], strides = [1, 1]} : vector<128x64xf32> to vector<2x64xf32>
      %242 = tpu.concatenate %234, %235, %236, %237, %238, %239, %240, %241 in 1 : vector<2x64xf32>, vector<2x64xf32>, vector<2x64xf32>, vector<2x64xf32>, vector<2x64xf32>, vector<2x64xf32>, vector<2x64xf32>, vector<2x64xf32> -> vector<2x512xf32>
      %243 = arith.truncf %242 : vector<2x512xf32> to vector<2x512xbf16>
      %c4 = arith.constant 4 : index
      %c0_56 = arith.constant 0 : index
      %c0_57 = arith.constant 0 : index
      %244 = vector.load %arg14[%c4, %c0_56, %c0_57] : memref<8x2x512xbf16, #tpu.memory_space<vmem>>, vector<1x2x512xbf16>
      %245 = vector.shape_cast %244 : vector<1x2x512xbf16> to vector<2x512xbf16>
      %246 = vector.shape_cast %243 : vector<2x512xbf16> to vector<1x2x512xbf16>
      tpu.vector_store %arg14[%c4, %c0_56, %c0_57], %246 {strides = array<i32>} : memref<8x2x512xbf16, #tpu.memory_space<vmem>>, vector<1x2x512xbf16>,
      %247 = vector.extract_strided_slice %181 {offsets = [80, 0], sizes = [2, 64], strides = [1, 1]} : vector<128x64xf32> to vector<2x64xf32>
      %248 = vector.extract_strided_slice %181 {offsets = [82, 0], sizes = [2, 64], strides = [1, 1]} : vector<128x64xf32> to vector<2x64xf32>
      %249 = vector.extract_strided_slice %181 {offsets = [84, 0], sizes = [2, 64], strides = [1, 1]} : vector<128x64xf32> to vector<2x64xf32>
      %250 = vector.extract_strided_slice %181 {offsets = [86, 0], sizes = [2, 64], strides = [1, 1]} : vector<128x64xf32> to vector<2x64xf32>
      %251 = vector.extract_strided_slice %181 {offsets = [88, 0], sizes = [2, 64], strides = [1, 1]} : vector<128x64xf32> to vector<2x64xf32>
      %252 = vector.extract_strided_slice %181 {offsets = [90, 0], sizes = [2, 64], strides = [1, 1]} : vector<128x64xf32> to vector<2x64xf32>
      %253 = vector.extract_strided_slice %181 {offsets = [92, 0], sizes = [2, 64], strides = [1, 1]} : vector<128x64xf32> to vector<2x64xf32>
      %254 = vector.extract_strided_slice %181 {offsets = [94, 0], sizes = [2, 64], strides = [1, 1]} : vector<128x64xf32> to vector<2x64xf32>
      %255 = tpu.concatenate %247, %248, %249, %250, %251, %252, %253, %254 in 1 : vector<2x64xf32>, vector<2x64xf32>, vector<2x64xf32>, vector<2x64xf32>, vector<2x64xf32>, vector<2x64xf32>, vector<2x64xf32>, vector<2x64xf32> -> vector<2x512xf32>
      %256 = arith.truncf %255 : vector<2x512xf32> to vector<2x512xbf16>
      %c5 = arith.constant 5 : index
      %c0_58 = arith.constant 0 : index
      %c0_59 = arith.constant 0 : index
      %257 = vector.load %arg14[%c5, %c0_58, %c0_59] : memref<8x2x512xbf16, #tpu.memory_space<vmem>>, vector<1x2x512xbf16>
      %258 = vector.shape_cast %257 : vector<1x2x512xbf16> to vector<2x512xbf16>
      %259 = vector.shape_cast %256 : vector<2x512xbf16> to vector<1x2x512xbf16>
      tpu.vector_store %arg14[%c5, %c0_58, %c0_59], %259 {strides = array<i32>} : memref<8x2x512xbf16, #tpu.memory_space<vmem>>, vector<1x2x512xbf16>,
      %260 = vector.extract_strided_slice %181 {offsets = [96, 0], sizes = [2, 64], strides = [1, 1]} : vector<128x64xf32> to vector<2x64xf32>
      %261 = vector.extract_strided_slice %181 {offsets = [98, 0], sizes = [2, 64], strides = [1, 1]} : vector<128x64xf32> to vector<2x64xf32>
      %262 = vector.extract_strided_slice %181 {offsets = [100, 0], sizes = [2, 64], strides = [1, 1]} : vector<128x64xf32> to vector<2x64xf32>
      %263 = vector.extract_strided_slice %181 {offsets = [102, 0], sizes = [2, 64], strides = [1, 1]} : vector<128x64xf32> to vector<2x64xf32>
      %264 = vector.extract_strided_slice %181 {offsets = [104, 0], sizes = [2, 64], strides = [1, 1]} : vector<128x64xf32> to vector<2x64xf32>
      %265 = vector.extract_strided_slice %181 {offsets = [106, 0], sizes = [2, 64], strides = [1, 1]} : vector<128x64xf32> to vector<2x64xf32>
      %266 = vector.extract_strided_slice %181 {offsets = [108, 0], sizes = [2, 64], strides = [1, 1]} : vector<128x64xf32> to vector<2x64xf32>
      %267 = vector.extract_strided_slice %181 {offsets = [110, 0], sizes = [2, 64], strides = [1, 1]} : vector<128x64xf32> to vector<2x64xf32>
      %268 = tpu.concatenate %260, %261, %262, %263, %264, %265, %266, %267 in 1 : vector<2x64xf32>, vector<2x64xf32>, vector<2x64xf32>, vector<2x64xf32>, vector<2x64xf32>, vector<2x64xf32>, vector<2x64xf32>, vector<2x64xf32> -> vector<2x512xf32>
      %269 = arith.truncf %268 : vector<2x512xf32> to vector<2x512xbf16>
      %c6 = arith.constant 6 : index
      %c0_60 = arith.constant 0 : index
      %c0_61 = arith.constant 0 : index
      %270 = vector.load %arg14[%c6, %c0_60, %c0_61] : memref<8x2x512xbf16, #tpu.memory_space<vmem>>, vector<1x2x512xbf16>
      %271 = vector.shape_cast %270 : vector<1x2x512xbf16> to vector<2x512xbf16>
      %272 = vector.shape_cast %269 : vector<2x512xbf16> to vector<1x2x512xbf16>
      tpu.vector_store %arg14[%c6, %c0_60, %c0_61], %272 {strides = array<i32>} : memref<8x2x512xbf16, #tpu.memory_space<vmem>>, vector<1x2x512xbf16>,
      %273 = vector.extract_strided_slice %181 {offsets = [112, 0], sizes = [2, 64], strides = [1, 1]} : vector<128x64xf32> to vector<2x64xf32>
      %274 = vector.extract_strided_slice %181 {offsets = [114, 0], sizes = [2, 64], strides = [1, 1]} : vector<128x64xf32> to vector<2x64xf32>
      %275 = vector.extract_strided_slice %181 {offsets = [116, 0], sizes = [2, 64], strides = [1, 1]} : vector<128x64xf32> to vector<2x64xf32>
      %276 = vector.extract_strided_slice %181 {offsets = [118, 0], sizes = [2, 64], strides = [1, 1]} : vector<128x64xf32> to vector<2x64xf32>
      %277 = vector.extract_strided_slice %181 {offsets = [120, 0], sizes = [2, 64], strides = [1, 1]} : vector<128x64xf32> to vector<2x64xf32>
      %278 = vector.extract_strided_slice %181 {offsets = [122, 0], sizes = [2, 64], strides = [1, 1]} : vector<128x64xf32> to vector<2x64xf32>
      %279 = vector.extract_strided_slice %181 {offsets = [124, 0], sizes = [2, 64], strides = [1, 1]} : vector<128x64xf32> to vector<2x64xf32>
      %280 = vector.extract_strided_slice %181 {offsets = [126, 0], sizes = [2, 64], strides = [1, 1]} : vector<128x64xf32> to vector<2x64xf32>
      %281 = tpu.concatenate %273, %274, %275, %276, %277, %278, %279, %280 in 1 : vector<2x64xf32>, vector<2x64xf32>, vector<2x64xf32>, vector<2x64xf32>, vector<2x64xf32>, vector<2x64xf32>, vector<2x64xf32>, vector<2x64xf32> -> vector<2x512xf32>
      %282 = arith.truncf %281 : vector<2x512xf32> to vector<2x512xbf16>
      %c7 = arith.constant 7 : index
      %c0_62 = arith.constant 0 : index
      %c0_63 = arith.constant 0 : index
      %283 = vector.load %arg14[%c7, %c0_62, %c0_63] : memref<8x2x512xbf16, #tpu.memory_space<vmem>>, vector<1x2x512xbf16>
      %284 = vector.shape_cast %283 : vector<1x2x512xbf16> to vector<2x512xbf16>
      %285 = vector.shape_cast %282 : vector<2x512xbf16> to vector<1x2x512xbf16>
      tpu.vector_store %arg14[%c7, %c0_62, %c0_63], %285 {strides = array<i32>} : memref<8x2x512xbf16, #tpu.memory_space<vmem>>, vector<1x2x512xbf16>,
      %cst_64 = arith.constant 0.000000e+00 : f32
      %286 = vector.broadcast %cst_64 : f32 to vector<2x512xf32>
      %c0_65 = arith.constant 0 : index
      %c0_66 = arith.constant 0 : index
      %287 = vector.load %arg15[%c0_65, %c0_66] : memref<2x512xf32, #tpu.memory_space<vmem>>, vector<2x512xf32>
      tpu.vector_store %arg15[%c0_65, %c0_66], %286 {strides = array<i32>} : memref<2x512xf32, #tpu.memory_space<vmem>>, vector<2x512xf32>,
    } else {
    }
    %c0 = arith.constant 0 : index
    %c0_1 = arith.constant 0 : index
    %3 = vector.load %arg15[%c0, %c0_1] : memref<2x512xf32, #tpu.memory_space<vmem>>, vector<2x512xf32>
    %4 = arith.index_cast %arg0 : i32 to index
    %c0_2 = arith.constant 0 : index
    %c0_3 = arith.constant 0 : index
    %5 = vector.load %arg14[%4, %c0_2, %c0_3] : memref<8x2x512xbf16, #tpu.memory_space<vmem>>, vector<1x2x512xbf16>
    %6 = vector.shape_cast %5 : vector<1x2x512xbf16> to vector<2x512xbf16>
    %c0_4 = arith.constant 0 : index
    %c0_5 = arith.constant 0 : index
    %7 = vector.load %arg9[%c0_4, %c0_5] : memref<512x512xbf16, #tpu.memory_space<vmem>>, vector<512x512xbf16>
    %cst = arith.constant dense<0.000000e+00> : vector<2x512xf32>
    %8 = tpu.matmul %6, %7, %cst {dimension_numbers = #tpu.dot_dimension_numbers<[1], [0], [0], [1], [0, 0, 1, 1], [], []>} : vector<2x512xbf16>, vector<512x512xbf16>, vector<2x512xf32> -> vector<2x512xf32>
    %9 = arith.addf %3, %8 : vector<2x512xf32>
    %c0_6 = arith.constant 0 : index
    %c0_7 = arith.constant 0 : index
    %10 = vector.load %arg15[%c0_6, %c0_7] : memref<2x512xf32, #tpu.memory_space<vmem>>, vector<2x512xf32>
    tpu.vector_store %arg15[%c0_6, %c0_7], %9 {strides = array<i32>} : memref<2x512xf32, #tpu.memory_space<vmem>>, vector<2x512xf32>,
    %c7_i32 = arith.constant 7 : i32
    %11 = arith.cmpi eq, %arg0, %c7_i32 : i32
    %12 = arith.extui %11 : i1 to i32
    %c0_i32_8 = arith.constant 0 : i32
    %13 = arith.cmpi ne, %12, %c0_i32_8 : i32
    scf.if %13 {
      %c0_9 = arith.constant 0 : index
      %c0_10 = arith.constant 0 : index
      %14 = vector.load %arg15[%c0_9, %c0_10] : memref<2x512xf32, #tpu.memory_space<vmem>>, vector<2x512xf32>
      %c0_11 = arith.constant 0 : index
      %c0_12 = arith.constant 0 : index
      %15 = vector.load %arg10[%c0_11, %c0_12] : memref<1x512xf32, #tpu.memory_space<vmem>>, vector<1x512xf32>
      %16 = vector.broadcast %15 : vector<1x512xf32> to vector<2x512xf32>
      %17 = arith.addf %14, %16 : vector<2x512xf32>
      %cst_13 = arith.constant 0.000000e+00 : f32
      %18 = vector.broadcast %cst_13 : f32 to vector<2x512xf32>
      %19 = arith.maximumf %17, %18 : vector<2x512xf32>
      %c0_14 = arith.constant 0 : index
      %c0_15 = arith.constant 0 : index
      %20 = vector.load %arg11[%c0_14, %c0_15] : memref<512x5xf32, #tpu.memory_space<vmem>>, vector<512x5xf32>
      %cst_16 = arith.constant dense<0.000000e+00> : vector<2x5xf32>
      %21 = tpu.matmul %19, %20, %cst_16 {dimension_numbers = #tpu.dot_dimension_numbers<[1], [0], [0], [1], [0, 0, 1, 1], [], []>} : vector<2x512xf32>, vector<512x5xf32>, vector<2x5xf32> -> vector<2x5xf32>
      %c0_17 = arith.constant 0 : index
      %c0_18 = arith.constant 0 : index
      %22 = vector.load %arg12[%c0_17, %c0_18] : memref<1x5xf32, #tpu.memory_space<vmem>>, vector<1x5xf32>
      %23 = vector.broadcast %22 : vector<1x5xf32> to vector<2x5xf32>
      %24 = arith.addf %21, %23 : vector<2x5xf32>
      %c0_19 = arith.constant 0 : index
      %c0_20 = arith.constant 0 : index
      %25 = vector.load %arg13[%c0_19, %c0_20] : memref<2x5xf32, #tpu.memory_space<vmem>>, vector<2x5xf32>
      tpu.vector_store %arg13[%c0_19, %c0_20], %24 {strides = array<i32>} : memref<2x5xf32, #tpu.memory_space<vmem>>, vector<2x5xf32>,
    } else {
    }
    return
  }
  func.func @transform_0(%arg0: i32) -> (i32, i32) {
    %c0_i32 = arith.constant 0 : i32
    %c0_i32_0 = arith.constant 0 : i32
    %c0_i32_1 = arith.constant 0 : i32
    return %c0_i32, %c0_i32_0 : i32, i32
  }
  func.func @transform_1(%arg0: i32) -> (i32, i32) {
    %c0_i32 = arith.constant 0 : i32
    %c0_i32_0 = arith.constant 0 : i32
    %c0_i32_1 = arith.constant 0 : i32
    return %c0_i32, %c0_i32_0 : i32, i32
  }
  func.func @transform_2(%arg0: i32) -> (i32, i32) {
    %c0_i32 = arith.constant 0 : i32
    %c0_i32_0 = arith.constant 0 : i32
    %c0_i32_1 = arith.constant 0 : i32
    return %c0_i32, %c0_i32_0 : i32, i32
  }
  func.func @transform_3(%arg0: i32) -> (i32, i32) {
    %c0_i32 = arith.constant 0 : i32
    %c0_i32_0 = arith.constant 0 : i32
    %c0_i32_1 = arith.constant 0 : i32
    return %c0_i32, %c0_i32_0 : i32, i32
  }
  func.func @transform_4(%arg0: i32) -> (i32, i32) {
    %c0_i32 = arith.constant 0 : i32
    %c0_i32_0 = arith.constant 0 : i32
    %c0_i32_1 = arith.constant 0 : i32
    return %c0_i32, %c0_i32_0 : i32, i32
  }
  func.func @transform_5(%arg0: i32) -> (i32, i32) {
    %c0_i32 = arith.constant 0 : i32
    %c0_i32_0 = arith.constant 0 : i32
    %c0_i32_1 = arith.constant 0 : i32
    return %c0_i32, %c0_i32_0 : i32, i32
  }
  func.func @transform_6(%arg0: i32) -> (i32, i32) {
    %c0_i32 = arith.constant 0 : i32
    %c0_i32_0 = arith.constant 0 : i32
    %c0_i32_1 = arith.constant 0 : i32
    return %c0_i32, %c0_i32_0 : i32, i32
  }
  func.func @transform_7(%arg0: i32) -> (i32, i32) {
    %c0_i32 = arith.constant 0 : i32
    %c0_i32_0 = arith.constant 0 : i32
    %c0_i32_1 = arith.constant 0 : i32
    return %c0_i32, %c0_i32_0 : i32, i32
  }
  func.func @transform_8(%arg0: i32) -> (i32, i32) {
    %c0_i32 = arith.constant 0 : i32
    %c0_i32_0 = arith.constant 0 : i32
    return %arg0, %c0_i32 : i32, i32
  }
  func.func @transform_9(%arg0: i32) -> (i32, i32) {
    %c0_i32 = arith.constant 0 : i32
    %c0_i32_0 = arith.constant 0 : i32
    %c0_i32_1 = arith.constant 0 : i32
    return %c0_i32, %c0_i32_0 : i32, i32
  }
  func.func @transform_10(%arg0: i32) -> (i32, i32) {
    %c0_i32 = arith.constant 0 : i32
    %c0_i32_0 = arith.constant 0 : i32
    %c0_i32_1 = arith.constant 0 : i32
    return %c0_i32, %c0_i32_0 : i32, i32
  }
  func.func @transform_11(%arg0: i32) -> (i32, i32) {
    %c0_i32 = arith.constant 0 : i32
    %c0_i32_0 = arith.constant 0 : i32
    %c0_i32_1 = arith.constant 0 : i32
    return %c0_i32, %c0_i32_0 : i32, i32
  }
  func.func @transform_12(%arg0: i32) -> (i32, i32) {
    %c0_i32 = arith.constant 0 : i32
    %c0_i32_0 = arith.constant 0 : i32
    %c0_i32_1 = arith.constant 0 : i32
    return %c0_i32, %c0_i32_0 : i32, i32
  }
}

</mosaic_0001>

<bundles_post_ra>
// kernel: dqn_forward.1
= control target key start
LH: loop header
LB: loop body
LE: loop exit
PB: predicated region body
PF: predicated region fallthrough
CT: control target
= control target key end

     0   :  { %s12006_s0 = inlined_call_operand.vmem [shape: f32[128,1], index: 0, kind: input, shape index: {}]   ;;  %s12007_s1 = inlined_call_operand.vmem [shape: f32[128,9], index: 1, kind: input, shape index: {}]   ;;  %s12008_s2 = inlined_call_operand.hbm [shape: f32[9,32], index: 2, kind: input, shape index: {}]   ;;  %s12009_s3 = inlined_call_operand.hbm [shape: f32[1,32], index: 3, kind: input, shape index: {}]   ;;  %s12010_s4 = inlined_call_operand.vmem [shape: bf16[288,64], index: 4, kind: input, shape index: {}]   ;;  %s12011_s5 = inlined_call_operand.hbm [shape: f32[1,64], index: 5, kind: input, shape index: {}]   ;;  %s12012_s6 = inlined_call_operand.vmem [shape: bf16[576,64], index: 6, kind: input, shape index: {}]   ;;  %s12013_s7 = inlined_call_operand.hbm [shape: f32[1,64], index: 7, kind: input, shape index: {}]   ;;  %s12014_s8 = inlined_call_operand.hbm [shape: bf16[4096,512], index: 8, kind: input, shape index: {}]   ;;  %s12015_s9 = inlined_call_operand.hbm [shape: f32[1,512], index: 9, kind: input, shape index: {}]   ;;  %s12016_s10 = inlined_call_operand.vmem [shape: f32[512,5], index: 10, kind: input, shape index: {}]   ;;  %s12017_s11 = inlined_call_operand.hbm [shape: f32[1,5], index: 11, kind: input, shape index: {}]   ;;  %s12018_s12 = inlined_call_operand.hbm [shape: f32[2,5], index: 12, kind: output, shape index: {}]  }
   0x1   :  { %12369 = sst [smem:[#allocation177_spill]] %s12008_s2 }
   0x2   :  { %12370 = sst [smem:[#allocation178_spill]] %s12009_s3 }
   0x3   :  { %17 = vsyncpa [#allocation5], 0 }
   0x4   :  { %18 = vsyncpa [#allocation8], 0 }
   0x5   :  { %19 = vsyncpa [#allocation11], 0 }
   0x6   :  { %20 = vsyncpa [#allocation6], 0  ;;  %s7828_s21 = smov 0   ;;  %s7830_s22 = smov 0  }
   0x7   :  { %s7832_s23 = smov 0   ;;  %s7834_s24 = smov 0  }
   0x8 LB: > { %s7736_s25 = smov [#allocation7]   ;;  %s7849_s27 = sadd.s32 4294967295, %s7734_s24   ;;  %s7734_s24 = sphi %s7834_s24, %s13130_s24   ;;  %s7730_s23 = sphi %s7832_s23, %s13129_s23   ;;  %s7726_s22 = sphi %s7830_s22, %s13128_s22   ;;  %s7722_s21 = sphi %s7828_s21, %s13127_s21  }
   0x9   : > { %s341_s26 = sshll.u32 %s7736_s25, 4  ;;  %p5963_p0 = scmp.ge.s32.totalorder %s7734_s24, 1  ;;  %s342_s26 = int_to_ptr.vmem [resolvable:$true] %s341_s26 }
   0xa   : > { %p12019_p1 = scmp.eq.s32.totalorder %s7849_s27, 0  ;;  %p309_p2 = scmp.lt.s32.totalorder %s7734_s24, 9 }
   0xb   : > { %s7737_s29 = smov [#allocation4]   ;;  %s7738_s14 = smov [#allocation9]  }
   0xc   : > { %p7855_p4 = pnand %p5963_p0, %p309_p2  ;;  %s327_s30 = sshll.u32 %s7737_s29, 4  ;;  %s7861_s30 = int_to_ptr.vmem [resolvable:$true] %s327_s30 }
   0xd   : > { %s355_s15 = sshll.u32 %s7738_s14, 4  ;;  %s7479_s17 = scalar_lea.vmem %s342_s26, 16  ;;  %s7869_s15 = int_to_ptr.vmem [resolvable:$true] %s355_s15 }
   0xe   : > { %s12371_s28 = scalar_select %p7855_p4, 1, 0 }
   0xf   : > { %p6578_p5 = pneg %p7855_p4  ;;  %p7480_p8 = scmp.ne.s32.totalorder %s342_s26, %s7479_s17 }
  0x10   : > { %s7486_s18 = scalar_lea.vmem %s342_s26, 32  ;;  %p7487_p11 = scmp.lt.s32.totalorder %s342_s26, %s342_s26 }
  0x11   : > { %p7865_p6 = pnand %p6578_p5, %p12019_p1  ;;  %p7488_p12 = scmp.lt.s32.totalorder %s7486_s18, %s7479_s17 }
  0x13   : > { %p7873_p7 = pneg %p7865_p6  ;;  %p7489_p13 = por %p7488_p12, %p7487_p11 }
  0x15   : > { %p7482_p9 = pnand %p7480_p8, %p7873_p7 }
  0x17   : > { %p7483_p10 = pneg %p7482_p9 }
  0x19   : > { %p7490_p0 = pnand %p7489_p13, %p7483_p10 }
  0x1b   : > { %7493 = shalt.err (!%p7490_p0)
}
  0x1c   : > { %s12374_s3 = sld [smem:[#allocation178_spill]]  ;;  %s7505_s25 = scalar_lea.vmem %s7861_s30, 256 }
  0x1d   : > { %p7506_p2 = scmp.ne.s32.totalorder %s7861_s30, %s7505_s25  ;;  %p7513_p9 = scmp.lt.s32.totalorder %s7861_s30, %s7861_s30 }
  0x1e   : > { %p7514_p11 = scmp.lt.s32.totalorder %s7505_s25, %s7505_s25 }
  0x1f   : > { %p7508_p5 = pnand %p7506_p2, %p7873_p7 }
  0x20   : > { %p7515_p10 = por %p7514_p11, %p7513_p9 }
  0x21   : > { %p7509_p8 = pneg %p7508_p5 }
  0x22   : > { %6584 = dma.hbm_to_vmem [thread:$0]  (!%p7865_p6), %s12374_s3, 16, %s342_s26, [#allocation8]  }
  0x23   : > { %p7516_p12 = pnand %p7515_p10, %p7509_p8 }
  0x25   : > { %7519 = shalt.err (!%p7516_p12)
}
  0x26   : > { %s7739_s29 = smov 128   ;;  %s7740_s26 = smov 8  }
  0x27   : > { %s12375_s2 = sld [smem:[#allocation177_spill]]  ;;  %s7531_s18 = scalar_lea.vmem %s7869_s15, 16 }
  0x28   : > { %p7532_p13 = scmp.ne.s32.totalorder %s7869_s15, %s7531_s18  ;;  %s7538_s19 = scalar_lea.vmem %s7869_s15, 32 }
  0x29   : > { %p7539_p5 = scmp.lt.s32.totalorder %s7869_s15, %s7869_s15  ;;  %p7540_p8 = scmp.lt.s32.totalorder %s7538_s19, %s7531_s18 }
  0x2a   : > { %p7534_p0 = pnand %p7532_p13, %p7873_p7 }
  0x2b   : > { %p7541_p9 = por %p7540_p8, %p7539_p5 }
  0x2c   : > { %p7535_p2 = pneg %p7534_p0 }
  0x2d   : > { %6581 = dma.hbm_to_vmem [thread:$0]  (!%p7865_p6), %s12375_s2, 256, %s7861_s30, [#allocation5], %s7739_s29, %s7739_s29, %s7740_s26  }
  0x2e   : > { %p7542_p11 = pnand %p7541_p9, %p7535_p2 }
  0x30   : > { %7545 = shalt.err (!%p7542_p11)
}
  0x31   : > { %6587 = dma.hbm_to_vmem [thread:$0]  (!%p7865_p6), %s12011_s5, 16, %s7869_s15, [#allocation8]  }
  0x32   : > { %s7741_s30 = smov [#allocation10]   ;;  %s7742_s26 = smov [#allocation13]  }
  0x33   : > { %s369_s29 = sshll.u32 %s7741_s30, 4  ;;  %s380_s14 = sshll.u32 %s7742_s26, 4  ;;  %s370_s29 = int_to_ptr.vmem [resolvable:$true] %s369_s29  ;;  %s381_s14 = int_to_ptr.vmem [resolvable:$true] %s380_s14 }
  0x34   : > { %s7557_s17 = scalar_lea.vmem %s370_s29, 16  ;;  %s7564_s18 = scalar_lea.vmem %s370_s29, 32 }
  0x35   : > { %p7558_p10 = scmp.ne.s32.totalorder %s370_s29, %s7557_s17  ;;  %p7565_p0 = scmp.lt.s32.totalorder %s370_s29, %s370_s29 }
  0x36   : > { %p7566_p2 = scmp.lt.s32.totalorder %s7564_s18, %s7557_s17 }
  0x37   : > { %p7560_p12 = pnand %p7558_p10, %p7873_p7 }
  0x38   : > { %p7567_p5 = por %p7566_p2, %p7565_p0 }
  0x39   : > { %p7561_p13 = pneg %p7560_p12 }
  0x3b   : > { %p7568_p8 = pnand %p7567_p5, %p7561_p13 }
  0x3d   : > { %7571 = shalt.err (!%p7568_p8)
}
  0x3e   : > { %6590 = dma.hbm_to_vmem [thread:$0]  (!%p7865_p6), %s12013_s7, 16, %s370_s29, [#allocation11]  }
  0x3f   : > { %s7583_s20 = scalar_lea.vmem %s381_s14, 64  ;;  %p7591_p12 = scmp.lt.s32.totalorder %s381_s14, %s381_s14 }
  0x40   : > { %p7584_p9 = scmp.ne.s32.totalorder %s381_s14, %s7583_s20  ;;  %p7592_p3 = scmp.lt.s32.totalorder %s7583_s20, %s7583_s20 }
  0x42   : > { %p7586_p11 = pnand %p7584_p9, %p7873_p7  ;;  %p7593_p1 = por %p7592_p3, %p7591_p12 }
  0x44   : > { %p7587_p10 = pneg %p7586_p11 }
  0x46   : > { %p7594_p4 = pnand %p7593_p1, %p7587_p10 }
  0x48   : > { %7597 = shalt.err (!%p7594_p4)
}
  0x49   : > { %6593 = dma.hbm_to_vmem [thread:$0]  (!%p7865_p6), %s12015_s9, 64, %s381_s14, [#allocation8]  }
  0x4a   : > { %s7743_s26 = smov [#allocation14]  }
  0x4b   : > { %s394_s29 = sshll.u32 %s7743_s26, 4  ;;  %s395_s29 = int_to_ptr.vmem [resolvable:$true] %s394_s29 }
  0x4c   : > { %s7609_s17 = scalar_lea.vmem %s395_s29, 16  ;;  %s7616_s18 = scalar_lea.vmem %s395_s29, 32 }
  0x4d   : > { %p7610_p13 = scmp.ne.s32.totalorder %s395_s29, %s7609_s17  ;;  %p7617_p5 = scmp.lt.s32.totalorder %s395_s29, %s395_s29 }
  0x4e   : > { %p7618_p3 = scmp.lt.s32.totalorder %s7616_s18, %s7609_s17 }
  0x4f   : > { %p7612_p0 = pnand %p7610_p13, %p7873_p7 }
  0x50   : > { %p7619_p1 = por %p7618_p3, %p7617_p5 }
  0x51   : > { %p7613_p2 = pneg %p7612_p0 }
  0x53   : > { %p7620_p4 = pnand %p7619_p1, %p7613_p2 }
  0x55   : > { %7623 = shalt.err (!%p7620_p4)
}
  0x56   : > { %6596 = dma.hbm_to_vmem [thread:$0]  (!%p7865_p6), %s12017_s11, 16, %s395_s29, [#allocation11]  }
  0x57   : > { %s7931_s16 = sadd.s32 1, %s7734_s24   ;;  %s201_s13 = sadd.s32 1, %s7730_s23 }
  0x58   : > { %s198_s14 = ssub.s32 %s7734_s24, %s7931_s16  ;;  %p208_p7 = scmp.ne.s32.totalorder %s7730_s23, %s7726_s22 }
  0x59   : > { %p199_p8 = scmp.eq.s32.totalorder %s198_s14, 0  ;;  %p209_p9 = scmp.eq.s32.totalorder %s7734_s24, 0 }
  0x5a   : > { %p214_p11 = scmp.ne.s32.totalorder %s7726_s22, %s7722_s21  ;;  %p6607_p10 = scmp.lt.s32.totalorder %s7734_s24, 8 }
  0x5b   : > { %s7943_s20 = scalar_select %p199_p8, %s7730_s23, %s201_s13  }
  0x5c   : > { %p210_p12 = por %p209_p9, %p208_p7  ;;  %p12376_p13 = scmp.eq.s32.totalorder %s7849_s27, 0 }
  0x5d   : > { %s405_s30 = sand.u32 1, %s7734_s24   ;;  %s407_s26 = sand.u32 1, %s7730_s23  }
  0x5e   : > { %p7947_p0 = por %p12376_p13, %p214_p11  ;;  %s5971_s29 = sshll.u32 %s407_s26, 10 }
  0x5f   : > { %s6219_s17 = sshll.u32 %s7734_s24, 14  ;;  %s409_s21 = scalar_lea.vmem [#allocation12], %s5971_s29 }
  0x60   : > { %s12377_s25 = scalar_select %p7947_p0, 1, 0 }
  0x61   : > { %s7957_s15 = scalar_lea.hbm %s12014_s8, %s6219_s17  ;;  %s417_s13 = sshll.u32 %s409_s21, 4  ;;  %s7959_s13 = int_to_ptr.vmem [resolvable:$true] %s417_s13 }
  0x62   : > { %p7961_p6 = pnand %p6607_p10, %p210_p12  ;;  %s7965_s2 = scalar_lea.sflag [#allocation5], %s405_s30 }
  0x63   : > { %s7624_s24 = scalar_lea.hbm %s7957_s15, 16384  ;;  %s7629_s29 = scalar_lea.hbm %s12014_s8, 131072 }
  0x64   : > { %p7625_p2 = scmp.ne.s32.totalorder %s7957_s15, %s7624_s24  ;;  %p7626_p5 = pneg %p7961_p6 }
  0x65   : > { %p7630_p4 = scmp.lt.s32.totalorder %s7957_s15, %s12014_s8  ;;  %p7631_p7 = scmp.lt.s32.totalorder %s7629_s29, %s7624_s24 }
  0x66   : > { %p7627_p3 = pnand %p7626_p5, %p7625_p2 }
  0x67   : > { %p7632_p8 = por %p7631_p7, %p7630_p4 }
  0x68   : > { %p7628_p1 = pneg %p7627_p3 }
  0x6a   : > { %p7633_p9 = pnand %p7632_p8, %p7628_p1 }
  0x6c   : > { %7636 = shalt.err (!%p7633_p9)
}
  0x6d   : > { %s7637_s30 = scalar_lea.vmem %s7959_s13, 16384  ;;  %s7744_s21 = smov [#allocation12]  }
  0x6e   : > { %p7638_p11 = scmp.ne.s32.totalorder %s7959_s13, %s7637_s30  ;;  %s7642_s3 = sshll.u32 %s7744_s21, 4  ;;  %s7643_s3 = int_to_ptr.vmem [resolvable:$false] %s7642_s3 }
  0x6f   : > { %s7644_s26 = scalar_lea.vmem %s7643_s3, 32768  ;;  %p7645_p13 = scmp.lt.s32.totalorder %s7959_s13, %s7643_s3 }
  0x70   : > { %p7640_p10 = pnand %p7638_p11, %p7626_p5  ;;  %p7646_p2 = scmp.lt.s32.totalorder %s7644_s26, %s7637_s30 }
  0x72   : > { %p7641_p12 = pneg %p7640_p10  ;;  %p7647_p3 = por %p7646_p2, %p7645_p13 }
  0x74   : > { %p7648_p0 = pnand %p7647_p3, %p7641_p12 }
  0x76   : > { %7651 = shalt.err (!%p7648_p0)
}
  0x77   : > { %s7745_s24 = smov 256   ;;  %s7746_s17 = smov 16  }
  0x78   : > { %6600 = dma.hbm_to_vmem [thread:$0]  (!%p7961_p6), %s7957_s15, 16384, %s7959_s13, %s7965_s2, %s7745_s24, %s7745_s24, %s7746_s17  }
  0x79   : > { %p12379_p5 = scmp.ne.s32.totalorder %s12371_s28, 0 }
  0x7a   : > { %p12380_p1 = scmp.eq.s32.totalorder (!%p12379_p5), %s7849_s27, 0 }
  0x7b   : > { %429 = sbr.rel (%p12379_p5) target bundleno = 2199 (0x897), region = 68 }
  0x80   : > { %7693 = dma.done.wait (%p12380_p1), [#allocation5], 256   ;;  %p12381_p4 = pmov %p12380_p1 }
  0x81   : > { %p12382_p7 = pmov %p12380_p1 }
  0x82   : > { %7695 = vsyncadd (%p12381_p4), [#allocation5], 4294967040 }
  0x83   : > { %7697 = dma.done.wait (%p12382_p7), [#allocation8], 32   ;;  %p12383_p0 = pmov %p12380_p1 }
  0x85   : > { %7699 = vsyncadd (%p12383_p0), [#allocation8], 4294967264  ;;  %p12384_p8 = pmov %p12383_p0 }
  0x86   : > { %p12385_p6 = pmov %p12383_p0 }
  0x87   : > { %7701 = dma.done.wait (%p12384_p8), [#allocation11], 16  }
  0x88   : > { %7703 = vsyncadd (%p12385_p6), [#allocation11], 4294967280  ;;  %s447_s2 = sand.u32 1, %s7849_s27   ;;  %s449_s3 = sand.u32 1, %s7726_s22  }
  0x89   : > { %s5980_s28 = sshll.u32 %s449_s3, 10  ;;  %s448_s15 = scalar_lea.sflag [#allocation5], %s447_s2 }
  0x8a   : > { %s8002_s13 = scalar_lea.vmem [#allocation12], %s5980_s28  ;;  %p12386_p9 = scmp.ne.s32.totalorder %s12377_s25, 0 }
  0x8c   : > { %7705 = dma.done.wait (%p12386_p9), %s448_s15, 16384  }
  0x8d   : > { %7707 = vsyncadd (%p12386_p9), %s448_s15, 4294950912  ;;  %p12387_p11 = pmov %p12383_p0 }
  0x8e   : > { %p12388_p10 = pmov %p12383_p0 }
  0x8f   : > { %7709 = dma.done.wait (%p12387_p11), [#allocation8], 64  }
  0x90   : > { %7711 = vsyncadd (%p12388_p10), [#allocation8], 4294967232  ;;  %p12389_p12 = pmov %p12383_p0 }
  0x91   : > { %p12390_p13 = pmov %p12383_p0 }
  0x92   : > { %7713 = dma.done.wait (%p12389_p12), [#allocation11], 16  }
  0x93   : > { %7715 = vsyncadd (%p12390_p13), [#allocation11], 4294967280  ;;  %p12391_p2 = scmp.ne.s32.totalorder %s7849_s27, 0 }
  0x95   : > { %500 = sbr.rel (%p12391_p2) target bundleno = 1611 (0x64b), region = 100 }
  0x9a   : > { %v519_v0 = vld [vmem:[%s12006_s0 + $0x10] sm:$0xff]  ;;  %v517_v1 = vld [vmem:[%s12006_s0] sm:$0xff]  ;;  %v7747_v2 = vmov 0   ;;  %v520_v3 = vld [vmem:[%s12006_s0 + $0x18] sm:$0xff]  ;;  %v12034_v32 = vmov 1   ;;  %v12032_v33 = vmov 6   ;;  %v615_v43 = vlaneseq }
  0x9b   : > { %6675 = vset.pattern.permute.xlu1 %v7747_v2  ;;  %6674 = vset.pattern.permute.xlu0 %v7747_v2  ;;  %v518_v4 = vld [vmem:[%s12006_s0 + $0x8] sm:$0xff]  ;;  %v521_v6 = vld [vmem:[%s12006_s0 + $0x20] sm:$0xff]  ;;  %v524_v7 = vld [vmem:[%s12006_s0 + $0x38] sm:$0xff]  ;;  %v12030_v35 = vmov 2   ;;  %v12026_v36 = vmov 3   ;;  %v12028_v37 = vmov 7  }
  0x9c   : > { %547 = vperm.xlu1 %6675, %v519_v0   ;;  %537 = vperm.xlu0 %6674, %v517_v1   ;;  %v522_v5 = vld [vmem:[%s12006_s0 + $0x28] sm:$0xff]  ;;  %v523_v8 = vld [vmem:[%s12006_s0 + $0x30] sm:$0xff]  ;;  %v525_v10 = vld [vmem:[%s12006_s0 + $0x40] sm:$0xff]  ;;  %v12036_v38 = vmov 5   ;;  %v8221_v46 = vshrl.u32 %v615_v43, 7  ;;  %s7755_s25 = smov 32  }
  0x9d   : > { %v526_v9 = vld [vmem:[%s12006_s0 + $0x48] sm:$0xff]  ;;  %v528_v11 = vld [vmem:[%s12006_s0 + $0x58] sm:$0xff]  ;;  %v527_v12 = vld [vmem:[%s12006_s0 + $0x50] sm:$0xff]  ;;  %s7756_s30 = smov 64   ;;  %s7757_s24 = smov 96   ;;  %vm2406_vm2 = vcmask 261120  }
  0x9e   : > { %v530_v13 = vld [vmem:[%s12006_s0 + $0x68] sm:$0xff]  ;;  %v529_v14 = vld [vmem:[%s12006_s0 + $0x60] sm:$0xff]  ;;  %v532_v15 = vld [vmem:[%s12006_s0 + $0x78] sm:$0xff]  ;;  %12396 = vst [vmem:[#allocation27_spill] sm:$0xff] %v8221_v46  ;;  %v617_v49 = vsub.s32 0, %v8221_v46  ;;  %vm653_vm0 = vcmp.lt.s32.totalorder %v8221_v46, 2 }
  0x9f   : > { %v531_v16 = vld [vmem:[%s12006_s0 + $0x70] sm:$0xff]  ;;  %v8071_v17 = vld [vmem:[%s12007_s1 + $0x8] sm:$0xff]  ;;  %v8076_v18 = vld [vmem:[%s12007_s1] sm:$0xff]  ;;  %vm934_vm1 = vcmp.lt.s32.totalorder %v8221_v46, 6  ;;  %vm2423_vm3 = vcmask 523264   ;;  %vm2440_vm4 = vcmask 785408  }
  0xa0   : > { %552 = vperm.xlu1 %6675, %v520_v3   ;;  %542 = vperm.xlu0 %6674, %v518_v4   ;;  %v8081_v19 = vld [vmem:[%s12007_s1 + $0x18] sm:$0xff]  ;;  %v8086_v20 = vld [vmem:[%s12007_s1 + $0x10] sm:$0xff]  ;;  %v8093_v21 = vld [vmem:[%s12007_s1 + $0x28] sm:$0xff] }
  0xa1   : > { %v8098_v22 = vld [vmem:[%s12007_s1 + $0x20] sm:$0xff]  ;;  %v8105_v23 = vld [vmem:[%s12007_s1 + $0x38] sm:$0xff]  ;;  %v8110_v24 = vld [vmem:[%s12007_s1 + $0x30] sm:$0xff] }
  0xa2   : > { %v8119_v25 = vld [vmem:[%s12007_s1 + $0x48] sm:$0xff]  ;;  %v8124_v26 = vld [vmem:[%s12007_s1 + $0x40] sm:$0xff]  ;;  %v8131_v27 = vld [vmem:[%s12007_s1 + $0x58] sm:$0xff] }
  0xa3   : > { %12392 = vst [vmem:[#allocation23_spill] sm:$0xff] %v8124_v26  ;;  %12393 = vst [vmem:[#allocation24_spill] sm:$0xff] %v8131_v27  ;;  %v8136_v28 = vld [vmem:[%s12007_s1 + $0x50] sm:$0xff]  ;;  %v8143_v29 = vld [vmem:[%s12007_s1 + $0x68] sm:$0xff] }
  0xa4   : > { %562 = vperm.xlu1 %6675, %v522_v5   ;;  %557 = vperm.xlu0 %6674, %v521_v6   ;;  %12394 = vst [vmem:[#allocation25_spill] sm:$0xff] %v8136_v28  ;;  %v8148_v30 = vld [vmem:[%s12007_s1 + $0x60] sm:$0xff]  ;;  %v8155_v31 = vld [vmem:[%s12007_s1 + $0x78] sm:$0xff]  ;;  %v8166_v34 = vld [vmem:[%s12007_s1 + $0x70] sm:$0xff] }
  0xa5   : > { %v8234_v52 = vld [vmem:[#allocation4] sm:$0xff] }
  0xa6   : > { %v8241_v53 = vrot.slane %v8234_v52, %v617_v49  ;;  %v8336_v49 = vld [vmem:[#allocation4 + $0x8] ss:$0 sm:$0xff] }
  0xa7   : > { %12422 = vst [vmem:[#allocation53_spill] sm:$0xff] %v8336_v49 }
  0xa8   : > { %572 = vperm.xlu1 %6675, %v524_v7   ;;  %567 = vperm.xlu0 %6674, %v523_v8   ;;  %12401 = vst [vmem:[#allocation32_spill] sm:$0xff] %v8241_v53 }
  0xac   : > { %582 = vperm.xlu1 %6675, %v526_v9   ;;  %577 = vperm.xlu0 %6674, %v525_v10  }
  0xb0   : > { %592 = vperm.xlu1 %6675, %v528_v11   ;;  %587 = vperm.xlu0 %6674, %v527_v12  }
  0xb4   : > { %602 = vperm.xlu1 %6675, %v530_v13   ;;  %597 = vperm.xlu0 %6674, %v529_v14  }
  0xb8   : > { %612 = vperm.xlu1 %6675, %v532_v15   ;;  %607 = vperm.xlu0 %6674, %v531_v16  }
  0xbc   : > { %677 = vperm.xlu1 %6675, %v8071_v17   ;;  %672 = vperm.xlu0 %6674, %v8076_v18  }
  0xc0   : > { %687 = vperm.xlu1 %6675, %v8081_v19   ;;  %682 = vperm.xlu0 %6674, %v8086_v20  }
  0xc4   : > { %697 = vperm.xlu1 %6675, %v8093_v21   ;;  %692 = vperm.xlu0 %6674, %v8098_v22  }
  0xc8   : > { %707 = vperm.xlu1 %6675, %v8105_v23   ;;  %702 = vperm.xlu0 %6674, %v8110_v24  }
  0xcc   : > { %717 = vperm.xlu1 %6675, %v8119_v25   ;;  %712 = vperm.xlu0 %6674, %v8124_v26  }
  0xd0   : > { %727 = vperm.xlu1 %6675, %v8131_v27   ;;  %722 = vperm.xlu0 %6674, %v8136_v28  }
  0xd4   : > { %737 = vperm.xlu1 %6675, %v8143_v29   ;;  %732 = vperm.xlu0 %6674, %v8148_v30  }
  0xd8   : > { %6676 = vset.pattern.permute.xlu1 %v12034_v32  ;;  %747 = vperm.xlu0 %6674, %v8155_v31  }
  0xd9   : > { %807 = vperm.xlu1 %6676, %v8071_v17  }
  0xdc   : > { %6684 = vset.pattern.permute.xlu0 %v12032_v33 }
  0xdd   : > { %811 = vperm.xlu1 %6676, %v8086_v20   ;;  %1432 = vperm.xlu0 %6684, %v8076_v18  }
  0xe1   : > { %6677 = vset.pattern.permute.xlu1 %v7747_v2  ;;  %1488 = vperm.xlu0 %6684, %v8166_v34  }
  0xe2   : > { %742 = vperm.xlu1 %6677, %v8166_v34  }
  0xe5   : > { %1452 = vperm.xlu0 %6684, %v8093_v21  }
  0xe6   : > { %6678 = vset.pattern.permute.xlu1 %v12034_v32 }
  0xe7   : > { %859 = vperm.xlu1 %6678, %v8166_v34  }
  0xe9   : > { %1456 = vperm.xlu0 %6684, %v8110_v24  }
  0xeb   : > { %863 = vperm.xlu1 %6678, %v8155_v31  }
  0xed   : > { %6704 = vset.pattern.permute.xlu0 %v12034_v32 }
  0xee   : > { %803 = vperm.xlu0 %6704, %v8076_v18  }
  0xef   : > { %6679 = vset.pattern.permute.xlu1 %v12030_v35 }
  0xf0   : > { %956 = vperm.xlu1 %6679, %v8071_v17  }
  0xf2   : > { %815 = vperm.xlu0 %6704, %v8081_v19  }
  0xf4   : > { %960 = vperm.xlu1 %6679, %v8086_v20  }
  0xf6   : > { %819 = vperm.xlu0 %6704, %v8098_v22  }
  0xf8   : > { %1008 = vperm.xlu1 %6679, %v8166_v34  }
  0xfa   : > { %827 = vperm.xlu0 %6704, %v8110_v24  }
  0xfc   : > { %6680 = vset.pattern.permute.xlu1 %v12026_v36 }
  0xfd   : > { %1100 = vperm.xlu1 %6680, %v8076_v18  }
  0xfe   : > { %839 = vperm.xlu0 %6704, %v8119_v25  }
 0x101   : > { %1108 = vperm.xlu1 %6680, %v8086_v20  }
 0x102   : > { %843 = vperm.xlu0 %6704, %v8136_v28  }
 0x105   : > { %1112 = vperm.xlu1 %6680, %v8081_v19  }
 0x106   : > { %6709 = vset.pattern.permute.xlu0 %v12028_v37 }
 0x107   : > { %1552 = vperm.xlu0 %6709, %v8071_v17  }
 0x109   : > { %1160 = vperm.xlu1 %6680, %v8155_v31  }
 0x10b   : > { %1560 = vperm.xlu0 %6709, %v8081_v19  }
 0x10d   : > { %6681 = vset.pattern.permute.xlu1 %v12036_v38 }
 0x10e   : > { %1284 = vperm.xlu1 %6681, %v8076_v18  }
 0x10f   : > { %1608 = vperm.xlu0 %6709, %v8155_v31  }
 0x112   : > { %1288 = vperm.xlu1 %6681, %v8071_v17  }
 0x113   : > { %1576 = vperm.xlu0 %6709, %v8105_v23  }
 0x116   : > { %6682 = vset.pattern.permute.xlu1 %v12034_v32 }
 0x117   : > { %v8201_v39 = vpop.permute.xlu1 %547  ;;  %v8203_v40 = vpop.permute.xlu0 %537  ;;  %823 = vperm.xlu1 %6682, %v8093_v21   ;;  %1580 = vperm.xlu0 %6709, %v8124_v26  }
 0x11b   : > { %v8207_v41 = vpop.permute.xlu1 %552  ;;  %v8209_v42 = vpop.permute.xlu0 %542  ;;  %6683 = vset.pattern.permute.xlu1 %v12036_v38  ;;  %6715 = vset.pattern.permute.xlu0 %v12036_v38 }
 0x11c   : > { %1296 = vperm.xlu1 %6683, %v8081_v19   ;;  %1292 = vperm.xlu0 %6715, %v8086_v20  }
 0x11f   : > { %v8215_v44 = vpop.permute.xlu1 %562  ;;  %v8217_v45 = vpop.permute.xlu0 %557 }
 0x120   : > { %12395 = vst [vmem:[#allocation26_spill] sm:$0xff] %v8215_v44  ;;  %1340 = vperm.xlu1 %6683, %v8166_v34   ;;  %1320 = vperm.xlu0 %6715, %v8119_v25  }
 0x123   : > { %v8223_v47 = vpop.permute.xlu1 %572  ;;  %v8225_v48 = vpop.permute.xlu0 %567 }
 0x124   : > { %12397 = vst [vmem:[#allocation28_spill] sm:$0xff] %v8223_v47  ;;  %12398 = vst [vmem:[#allocation29_spill] sm:$0xff] %v8225_v48  ;;  %1344 = vperm.xlu1 %6683, %v8155_v31   ;;  %1324 = vperm.xlu0 %6715, %v8136_v28  }
 0x127   : > { %v8230_v50 = vpop.permute.xlu1 %582  ;;  %v8232_v51 = vpop.permute.xlu0 %577 }
 0x128   : > { %12399 = vst [vmem:[#allocation30_spill] sm:$0xff] %v8230_v50  ;;  %12400 = vst [vmem:[#allocation31_spill] sm:$0xff] %v8232_v51  ;;  %6685 = vset.pattern.permute.xlu1 %v12032_v33  ;;  %6719 = vset.pattern.permute.xlu0 %v12030_v35 }
 0x129   : > { %1436 = vperm.xlu1 %6685, %v8071_v17   ;;  %952 = vperm.xlu0 %6719, %v8076_v18  }
 0x12b   : > { %v8243_v54 = vpop.permute.xlu1 %592  ;;  %v8245_v55 = vpop.permute.xlu0 %587 }
 0x12c   : > { %12402 = vst [vmem:[#allocation33_spill] sm:$0xff] %v8243_v54  ;;  %12403 = vst [vmem:[#allocation34_spill] sm:$0xff] %v8245_v55  ;;  %v8249_v56 = vmul.f32 %v8241_v53, %v8245_v55  ;;  %v8253_v57 = vmul.f32 %v8241_v53, %v8243_v54  ;;  %v8417_v54 = vmul.f32 %v8336_v49, %v8203_v40 }
 0x12d   : > { %1440 = vperm.xlu1 %6685, %v8086_v20   ;;  %964 = vperm.xlu0 %6719, %v8081_v19  }
 0x12e   : > { %12404 = vst [vmem:[#allocation35_spill] sm:$0xff] %v8249_v56  ;;  %v12022_v58 = vrot.slane %v8249_v56, 6  ;;  %v12023_v59 = vrot.slane %v8253_v57, 6  ;;  %12446 = vst [vmem:[#allocation74_spill] sm:$0xff] %v8417_v54  ;;  %v12066_v50 = vrot.slane %v8417_v54, 2 }
 0x12f   : > { %v8259_v60 = vpop.permute.xlu1 %602  ;;  %v8261_v61 = vpop.permute.xlu0 %597 }
 0x130   : > { %12405 = vst [vmem:[#allocation36_spill] sm:$0xff] %v8259_v60  ;;  %12406 = vst [vmem:[#allocation37_spill] sm:$0xff] %v8261_v61  ;;  %v8266_v62 = vmul.f32 %v8241_v53, %v8259_v60  ;;  %v8274_v63 = vsel %vm653_vm0, %v12022_v58, %v12023_v59  ;;  %v8278_v0 = vmul.f32 %v8241_v53, %v8261_v61 }
 0x131   : > { %12407 = vst [vmem:[#allocation38_spill] sm:$0xff] %v8274_v63  ;;  %1444 = vperm.xlu1 %6685, %v8081_v19   ;;  %1012 = vperm.xlu0 %6719, %v8155_v31   ;;  %v12440_v63 = vmov 1  }
 0x132   : > { %v12025_v1 = vrot.slane %v8266_v62, 6  ;;  %v12024_v2 = vrot.slane %v8278_v0, 6 }
 0x133   : > { %v8284_v3 = vpop.permute.xlu1 %612  ;;  %v8286_v4 = vpop.permute.xlu0 %607 }
 0x134   : > { %12408 = vst [vmem:[#allocation39_spill] sm:$0xff] %v8284_v3  ;;  %12409 = vst [vmem:[#allocation40_spill] sm:$0xff] %v8286_v4  ;;  %v8294_v5 = vsel %vm653_vm0, %v12024_v2, %v12025_v1  ;;  %v8347_v2 = vmul.f32 %v8336_v49, %v8201_v39  ;;  %v8351_v1 = vmul.f32 %v8336_v49, %v8209_v42 }
 0x135   : > { %6686 = vset.pattern.permute.xlu1 %v12026_v36  ;;  %968 = vperm.xlu0 %6719, %v8098_v22  }
 0x136   : > { %1116 = vperm.xlu1 %6686, %v8098_v22   ;;  %12425 = vst [vmem:[#allocation56_spill] sm:$0xff] %v8347_v2  ;;  %12426 = vst [vmem:[#allocation57_spill] sm:$0xff] %v8351_v1  ;;  %v12044_v35 = vrot.slane %v8347_v2, 2  ;;  %v1529_v2 = vsub.s32 7, %v8221_v46 }
 0x137   : > { %v8299_v6 = vpop.permute.xlu1 %677  ;;  %v8301_v7 = vpop.permute.xlu0 %672 }
 0x138   : > { %12410 = vst [vmem:[#allocation41_spill] sm:$0xff] %v8299_v6  ;;  %12411 = vst [vmem:[#allocation42_spill] sm:$0xff] %v8301_v7 }
 0x139   : > { %972 = vperm.xlu0 %6719, %v8093_v21  }
 0x13a   : > { %6687 = vset.pattern.permute.xlu1 %v12032_v33  ;;  %v12043_v33 = vrot.slane %v8351_v1, 2 }
 0x13b   : > { %v8305_v8 = vpop.permute.xlu1 %687  ;;  %1492 = vperm.xlu1 %6687, %v8155_v31   ;;  %v8308_v9 = vpop.permute.xlu0 %682 }
 0x13c   : > { %12412 = vst [vmem:[#allocation43_spill] sm:$0xff] %v8305_v8  ;;  %12413 = vst [vmem:[#allocation44_spill] sm:$0xff] %v8308_v9  ;;  %v8369_v38 = vsel %vm934_vm1, %v12043_v33, %v12044_v35  ;;  %v12435_v33 = vmov 5  }
 0x13d   : > { %976 = vperm.xlu0 %6719, %v8110_v24   ;;  %12429 = vst [vmem:[#allocation60_spill] sm:$0xff] %v8369_v38 }
 0x13f   : > { %v8311_v10 = vpop.permute.xlu1 %697  ;;  %6688 = vset.pattern.permute.xlu1 %v12028_v37  ;;  %v8314_v11 = vpop.permute.xlu0 %692 }
 0x140   : > { %12414 = vst [vmem:[#allocation45_spill] sm:$0xff] %v8311_v10  ;;  %12415 = vst [vmem:[#allocation46_spill] sm:$0xff] %v8314_v11  ;;  %1548 = vperm.xlu1 %6688, %v8076_v18   ;;  %v12457_v10 = vmov 3  }
 0x141   : > { %996 = vperm.xlu0 %6719, %v8131_v27  }
 0x143   : > { %v8318_v12 = vpop.permute.xlu1 %707  ;;  %v8320_v13 = vpop.permute.xlu0 %702 }
 0x144   : > { %12416 = vst [vmem:[#allocation47_spill] sm:$0xff] %v8318_v12  ;;  %12417 = vst [vmem:[#allocation48_spill] sm:$0xff] %v8320_v13  ;;  %1556 = vperm.xlu1 %6688, %v8086_v20   ;;  %v8430_v12 = vmul.f32 %v8336_v49, %v8284_v3  ;;  %v12451_v13 = vmov 2  }
 0x145   : > { %1000 = vperm.xlu0 %6719, %v8148_v30  }
 0x146   : > { %12450 = vst [vmem:[#allocation77_spill] sm:$0xff] %v8430_v12  ;;  %v12065_v51 = vrot.slane %v8430_v12, 2 }
 0x147   : > { %v8324_v14 = vpop.permute.xlu1 %717  ;;  %v8326_v15 = vpop.permute.xlu0 %712 }
 0x148   : > { %12418 = vst [vmem:[#allocation49_spill] sm:$0xff] %v8324_v14  ;;  %12419 = vst [vmem:[#allocation50_spill] sm:$0xff] %v8326_v15  ;;  %6689 = vset.pattern.permute.xlu1 %v12026_v36 }
 0x149   : > { %1120 = vperm.xlu1 %6689, %v8093_v21   ;;  %6721 = vset.pattern.permute.xlu0 %v12026_v36  ;;  %v12038_v36 = vmov 8  }
 0x14a   : > { %1104 = vperm.xlu0 %6721, %v8071_v17  }
 0x14b   : > { %v8332_v16 = vpop.permute.xlu1 %727  ;;  %v8334_v43 = vpop.permute.xlu0 %722 }
 0x14c   : > { %12420 = vst [vmem:[#allocation51_spill] sm:$0xff] %v8332_v16  ;;  %12421 = vst [vmem:[#allocation52_spill] sm:$0xff] %v8334_v43  ;;  %v12434_v43 = vmov 8  }
 0x14d   : > { %6690 = vset.pattern.permute.xlu1 %v12028_v37 }
 0x14e   : > { %1604 = vperm.xlu1 %6690, %v8166_v34   ;;  %1156 = vperm.xlu0 %6721, %v8166_v34  }
 0x14f   : > { %v8341_v58 = vpop.permute.xlu1 %737  ;;  %v8343_v59 = vpop.permute.xlu0 %732 }
 0x150   : > { %12423 = vst [vmem:[#allocation54_spill] sm:$0xff] %v8341_v58  ;;  %12424 = vst [vmem:[#allocation55_spill] sm:$0xff] %v8343_v59 }
 0x152   : > { %6691 = vset.pattern.permute.xlu1 %v12038_v36  ;;  %1128 = vperm.xlu0 %6721, %v8105_v23  }
 0x153   : > { %1696 = vperm.xlu1 %6691, %v8076_v18   ;;  %v8357_v37 = vpop.permute.xlu0 %747 }
 0x154   : > { %12427 = vst [vmem:[#allocation58_spill] sm:$0xff] %v8357_v37  ;;  %v8361_v32 = vpop.permute.xlu1 %807 }
 0x155   : > { %12428 = vst [vmem:[#allocation59_spill] sm:$0xff] %v8361_v32 }
 0x156   : > { %1132 = vperm.xlu0 %6721, %v8124_v26  }
 0x157   : > { %1704 = vperm.xlu1 %6691, %v8086_v20  }
 0x158   : > { %v8373_v18 = vpop.permute.xlu1 %811  ;;  %v8375_v36 = vpop.permute.xlu0 %1432 }
 0x159   : > { %12430 = vst [vmem:[#allocation61_spill] sm:$0xff] %v8373_v18  ;;  %12431 = vst [vmem:[#allocation62_spill] sm:$0xff] %v8375_v36  ;;  %v1233_v36 = vsub.s32 5, %v8221_v46 }
 0x15a   : > { %1152 = vperm.xlu0 %6721, %v8143_v29  }
 0x15b   : > { %1708 = vperm.xlu1 %6691, %v8081_v19  }
 0x15c   : > { %v8379_v59 = vpop.permute.xlu0 %1488 }
 0x15d   : > { %12432 = vst [vmem:[#allocation63_spill] sm:$0xff] %v8379_v59  ;;  %v8381_v56 = vpop.permute.xlu1 %742  ;;  %v1381_v59 = vsub.s32 6, %v8221_v46 }
 0x15e   : > { %12433 = vst [vmem:[#allocation64_spill] sm:$0xff] %v8381_v56  ;;  %6726 = vset.pattern.permute.xlu0 %v12434_v43  ;;  %v8546_v56 = vrot.slane %v8234_v52, %v1529_v2 }
 0x15f   : > { %6692 = vset.pattern.permute.xlu1 %v12435_v33  ;;  %1700 = vperm.xlu0 %6726, %v8071_v17  }
 0x160   : > { %1300 = vperm.xlu1 %6692, %v8098_v22   ;;  %v8387_v20 = vpop.permute.xlu0 %1452 }
 0x161   : > { %12436 = vst [vmem:[#allocation65_spill] sm:$0xff] %v8387_v20 }
 0x162   : > { %v8389_v35 = vpop.permute.xlu1 %859 }
 0x163   : > { %12437 = vst [vmem:[#allocation66_spill] sm:$0xff] %v8389_v35  ;;  %1756 = vperm.xlu0 %6726, %v8155_v31   ;;  %v8559_v35 = vrot.slane %v8234_v52, %v1233_v36  ;;  %v8606_v36 = vmul.f32 %v8241_v53, %v8209_v42 }
 0x164   : > { %6693 = vset.pattern.permute.xlu1 %v12434_v43  ;;  %v8393_v19 = vpop.permute.xlu0 %1456 }
 0x165   : > { %12438 = vst [vmem:[#allocation67_spill] sm:$0xff] %v8393_v19  ;;  %1752 = vperm.xlu1 %6693, %v8166_v34   ;;  %v12448_v19 = vmov 6   ;;  %12484 = vst [vmem:[#allocation108_spill] sm:$0xff] %v8559_v35 }
 0x166   : > { %v8396_v58 = vpop.permute.xlu1 %863  ;;  %12489 = vst [vmem:[#allocation113_spill] sm:$0xff] %v8606_v36 }
 0x167   : > { %12439 = vst [vmem:[#allocation68_spill] sm:$0xff] %v8396_v58  ;;  %1716 = vperm.xlu0 %6726, %v8093_v21  }
 0x169   : > { %6694 = vset.pattern.permute.xlu1 %v12440_v63  ;;  %v8400_v17 = vpop.permute.xlu0 %803 }
 0x16a   : > { %12441 = vst [vmem:[#allocation69_spill] sm:$0xff] %v8400_v17  ;;  %831 = vperm.xlu1 %6694, %v8105_v23  }
 0x16b   : > { %v8403_v16 = vpop.permute.xlu1 %956  ;;  %1728 = vperm.xlu0 %6726, %v8124_v26  }
 0x16c   : > { %12442 = vst [vmem:[#allocation70_spill] sm:$0xff] %v8403_v16 }
 0x16d   : > { %v8406_v31 = vpop.permute.xlu0 %815 }
 0x16e   : > { %12443 = vst [vmem:[#allocation71_spill] sm:$0xff] %v8406_v31  ;;  %6695 = vset.pattern.permute.xlu1 %v12435_v33 }
 0x16f   : > { %v8409_v14 = vpop.permute.xlu1 %960  ;;  %1304 = vperm.xlu1 %6695, %v8093_v21   ;;  %1740 = vperm.xlu0 %6726, %v8131_v27  }
 0x170   : > { %12444 = vst [vmem:[#allocation72_spill] sm:$0xff] %v8409_v14 }
 0x171   : > { %v8413_v34 = vpop.permute.xlu0 %819 }
 0x172   : > { %12445 = vst [vmem:[#allocation73_spill] sm:$0xff] %v8413_v34  ;;  %v12456_v34 = vmov 7  }
 0x173   : > { %v8419_v15 = vpop.permute.xlu1 %1008  ;;  %6696 = vset.pattern.permute.xlu1 %v12448_v19  ;;  %6728 = vset.pattern.permute.xlu0 %v12448_v19 }
 0x174   : > { %12447 = vst [vmem:[#allocation75_spill] sm:$0xff] %v8419_v15  ;;  %1448 = vperm.xlu1 %6696, %v8098_v22   ;;  %1476 = vperm.xlu0 %6728, %v8131_v27  }
 0x175   : > { %v8425_v55 = vpop.permute.xlu0 %827 }
 0x176   : > { %12449 = vst [vmem:[#allocation76_spill] sm:$0xff] %v8425_v55  ;;  %v8446_v55 = vsel %vm934_vm1, %v12065_v51, %v12066_v50 }
 0x177   : > { %12454 = vst [vmem:[#allocation80_spill] sm:$0xff] %v8446_v55 }
 0x178   : > { %6697 = vset.pattern.permute.xlu1 %v12451_v13  ;;  %v8433_v20 = vpop.permute.xlu1 %1100  ;;  %1480 = vperm.xlu0 %6728, %v8148_v30  }
 0x179   : > { %12452 = vst [vmem:[#allocation78_spill] sm:$0xff] %v8433_v20  ;;  %980 = vperm.xlu1 %6697, %v8105_v23   ;;  %v8438_v47 = vpop.permute.xlu0 %839 }
 0x17a   : > { %12453 = vst [vmem:[#allocation79_spill] sm:$0xff] %v8438_v47 }
 0x17c   : > { %v8448_v11 = vpop.permute.xlu1 %1108  ;;  %6732 = vset.pattern.permute.xlu0 %v12456_v34 }
 0x17d   : > { %12455 = vst [vmem:[#allocation81_spill] sm:$0xff] %v8448_v11  ;;  %6698 = vset.pattern.permute.xlu1 %v12457_v10  ;;  %1600 = vperm.xlu0 %6732, %v8143_v29   ;;  %v8453_v30 = vpop.permute.xlu0 %843 }
 0x17e   : > { %12458 = vst [vmem:[#allocation82_spill] sm:$0xff] %v8453_v30  ;;  %1124 = vperm.xlu1 %6698, %v8110_v24  }
 0x180   : > { %v8456_v47 = vpop.permute.xlu1 %1112 }
 0x181   : > { %12459 = vst [vmem:[#allocation83_spill] sm:$0xff] %v8456_v47  ;;  %7214 = vset.pattern.permute.xlu0 %v12434_v43 }
 0x182   : > { %6699 = vset.pattern.permute.xlu1 %v12456_v34  ;;  %v8460_v51 = vpop.permute.xlu0 %1552 }
 0x183   : > { %12460 = vst [vmem:[#allocation84_spill] sm:$0xff] %v8460_v51  ;;  %1564 = vperm.xlu1 %6699, %v8098_v22  }
 0x184   : > { %v8463_v50 = vpop.permute.xlu1 %1160 }
 0x185   : > { %12461 = vst [vmem:[#allocation85_spill] sm:$0xff] %v8463_v50 }
 0x186   : > { %v8465_v55 = vpop.permute.xlu0 %1560 }
 0x187   : > { %12462 = vst [vmem:[#allocation86_spill] sm:$0xff] %v8465_v55  ;;  %1568 = vperm.xlu1 %6699, %v8093_v21   ;;  %v1049_v55 = vsub.s32 3, %v8221_v46 }
 0x189   : > { %v8468_v29 = vpop.permute.xlu1 %1284 }
 0x18a   : > { %12463 = vst [vmem:[#allocation87_spill] sm:$0xff] %v8468_v29  ;;  %v8470_v12 = vpop.permute.xlu0 %1608  ;;  %v1197_v29 = vsub.s32 4, %v8221_v46 }
 0x18b   : > { %12464 = vst [vmem:[#allocation88_spill] sm:$0xff] %v8470_v12  ;;  %6700 = vset.pattern.permute.xlu1 %v12434_v43 }
 0x18c   : > { %1712 = vperm.xlu1 %6700, %v8098_v22   ;;  %v8562_v49 = vrot.slane %v8234_v52, %v1197_v29 }
 0x18d   : > { %v8474_v30 = vpop.permute.xlu1 %1288 }
 0x18e   : > { %12465 = vst [vmem:[#allocation89_spill] sm:$0xff] %v8474_v30  ;;  %v8476_v54 = vpop.permute.xlu0 %1576  ;;  %v784_v30 = vsub.s32 1, %v8221_v46 }
 0x18f   : > { %12466 = vst [vmem:[#allocation90_spill] sm:$0xff] %v8476_v54 }
 0x190   : > { %6701 = vset.pattern.permute.xlu1 %v12440_v63 }
 0x191   : > { %835 = vperm.xlu1 %6701, %v8124_v26  }
 0x192   : > { %v8480_v1 = vpop.permute.xlu1 %823  ;;  %v8482_v38 = vpop.permute.xlu0 %1580 }
 0x193   : > { %12467 = vst [vmem:[#allocation91_spill] sm:$0xff] %v8480_v1  ;;  %12468 = vst [vmem:[#allocation92_spill] sm:$0xff] %v8482_v38  ;;  %v900_v1 = vsub.s32 2, %v8221_v46 }
 0x195   : > { %6702 = vset.pattern.permute.xlu1 %v12435_v33 }
 0x196   : > { %1308 = vperm.xlu1 %6702, %v8110_v24  }
 0x197   : > { %v8486_v21 = vpop.permute.xlu1 %1296  ;;  %v8488_v12 = vpop.permute.xlu0 %1292 }
 0x198   : > { %12469 = vst [vmem:[#allocation93_spill] sm:$0xff] %v8486_v21  ;;  %12470 = vst [vmem:[#allocation94_spill] sm:$0xff] %v8488_v12  ;;  %v8531_v21 = vrot.slane %v8234_v52, %v784_v30 }
 0x19a   : > { %1312 = vperm.xlu1 %6702, %v8105_v23   ;;  %12480 = vst [vmem:[#allocation104_spill] sm:$0xff] %v8531_v21  ;;  %v8567_v2 = vmul.f32 %v8531_v21, %v8203_v40 }
 0x19b   : > { %v8491_v22 = vpop.permute.xlu1 %1340  ;;  %v8493_v54 = vpop.permute.xlu0 %1320 }
 0x19c   : > { %12471 = vst [vmem:[#allocation95_spill] sm:$0xff] %v8491_v22  ;;  %12472 = vst [vmem:[#allocation96_spill] sm:$0xff] %v8493_v54  ;;  %v8506_v22 = vrot.slane %v8234_v52, %v1381_v59  ;;  %v8509_v54 = vrot.slane %v8234_v52, %v900_v1  ;;  %v8528_v1 = vmul.f32 %v8241_v53, %v8203_v40 }
 0x19d   : > { %12485 = vst [vmem:[#allocation109_spill] sm:$0xff] %v8567_v2 }
 0x19e   : > { %6703 = vset.pattern.permute.xlu1 %v12451_v13  ;;  %12475 = vst [vmem:[#allocation99_spill] sm:$0xff] %v8506_v22  ;;  %12476 = vst [vmem:[#allocation100_spill] sm:$0xff] %v8509_v54  ;;  %v8522_v59 = vmul.f32 %v8509_v54, %v8286_v4  ;;  %v8535_v15 = vmul.f32 %v8506_v22, %v8201_v39  ;;  %v8554_v30 = vmul.f32 %v8506_v22, %v8203_v40 }
 0x19f   : > { %984 = vperm.xlu1 %6703, %v8124_v26   ;;  %v8499_v38 = vpop.permute.xlu1 %1344  ;;  %v8501_v51 = vpop.permute.xlu0 %1324  ;;  %v799_v13 = vmul.f32 %v8531_v21, %v8259_v60  ;;  %v8571_v11 = vmul.f32 %v8509_v54, %v8203_v40 }
 0x1a0   : > { %12473 = vst [vmem:[#allocation97_spill] sm:$0xff] %v8499_v38  ;;  %12474 = vst [vmem:[#allocation98_spill] sm:$0xff] %v8501_v51  ;;  %v8516_v51 = vrot.slane %v8234_v52, %v1049_v55  ;;  %v8539_v55 = vmul.f32 %v8509_v54, %v8259_v60  ;;  %v8588_v60 = vmul.f32 %v8559_v35, %v8203_v40  ;;  %v12492_v20 = vrot.slane %v8522_v59, 2 }
 0x1a1   : > { %12481 = vst [vmem:[#allocation105_spill] sm:$0xff] %v8535_v15  ;;  %v881_v16 = vmul.f32 %v8396_v58, %v799_v13  ;;  %v1384_v13 = vmul.f32 %v8506_v22, %v8209_v42 }
 0x1a2   : > { %12477 = vst [vmem:[#allocation101_spill] sm:$0xff] %v8516_v51  ;;  %v8550_v28 = vmul.f32 %v8516_v51, %v8286_v4  ;;  %v8575_v27 = vmul.f32 %v8516_v51, %v8203_v40  ;;  %v1053_v58 = vmul.f32 %v8516_v51, %v8201_v39  ;;  %v8610_v47 = vmul.f32 %v8516_v51, %v8209_v42 }
 0x1a3   : > { %988 = vperm.xlu1 %6703, %v8119_v25   ;;  %v8614_v63 = vmul.f32 %v8516_v51, %v8207_v41 }
 0x1a4   : > { %v8518_v48 = vpop.permute.xlu1 %1436  ;;  %v8524_v12 = vpop.permute.xlu0 %952  ;;  %12483 = vst [vmem:[#allocation107_spill] sm:$0xff] %v8550_v28  ;;  %12486 = vst [vmem:[#allocation110_spill] sm:$0xff] %v8575_v27  ;;  %v12496_v6 = vrot.slane %v8550_v28, 6  ;;  %v1069_v2 = vrot.slane %v1053_v58, 6  ;;  %v1236_v28 = vmul.f32 %v8559_v35, %v8209_v42  ;;  %v8655_v58 = vmul.f32 %v8559_v35, %v8217_v45 }
 0x1a5   : > { %12478 = vst [vmem:[#allocation102_spill] sm:$0xff] %v8518_v48  ;;  %12479 = vst [vmem:[#allocation103_spill] sm:$0xff] %v8524_v12  ;;  %v8543_v48 = vmul.f32 %v8516_v51, %v8284_v3  ;;  %v12501_v27 = vrot.slane %v8535_v15, 6  ;;  %v634_v15 = vmul.f32 %v8241_v53, %v8284_v3 }
 0x1a6   : > { %12490 = vst [vmem:[#allocation114_spill] sm:$0xff] %v8614_v63  ;;  %12498 = vst [vmem:[#allocation118_spill] sm:$0xff] %v8655_v58 }
 0x1a7   : > { %12482 = vst [vmem:[#allocation106_spill] sm:$0xff] %v8543_v48  ;;  %6705 = vset.pattern.permute.xlu1 %v12448_v19  ;;  %v765_v19 = vmul.f32 %v8357_v37, %v8294_v5  ;;  %v12493_v37 = vrot.slane %v8539_v55, 2 }
 0x1a8   : > { %1460 = vperm.xlu1 %6705, %v8105_v23   ;;  %v8579_v52 = vpop.permute.xlu1 %1440  ;;  %v8581_v29 = vpop.permute.xlu0 %964 }
 0x1a9   : > { %12487 = vst [vmem:[#allocation111_spill] sm:$0xff] %v8579_v52  ;;  %12488 = vst [vmem:[#allocation112_spill] sm:$0xff] %v8581_v29  ;;  %v8595_v52 = vmul.f32 %v8559_v35, %v8284_v3  ;;  %v936_v14 = vsel %vm934_vm1, %v12493_v37, %v12492_v20  ;;  %v897_v9 = vadd.f32 %v881_v16, %v765_v19  ;;  %v1251_v16 = vrot.slane %v8588_v60, 2 }
 0x1aa   : > { %v1400_v19 = vrot.slane %v1384_v13, 6  ;;  %v1238_v60 = vmul.f32 %v8559_v35, %v8207_v41  ;;  %v787_v13 = vmul.f32 %v8531_v21, %v8209_v42 }
 0x1ab   : > { %v12131_v20 = vrot.slane %v8595_v52, 2 }
 0x1ac   : > { %6706 = vset.pattern.permute.xlu1 %v12456_v34  ;;  %v8617_v5 = vpop.permute.xlu1 %1444  ;;  %v8625_v32 = vpop.permute.xlu0 %1012  ;;  %v8633_v34 = vmul.f32 %v8509_v54, %v8209_v42 }
 0x1ad   : > { %12491 = vst [vmem:[#allocation115_spill] sm:$0xff] %v8617_v5  ;;  %12494 = vst [vmem:[#allocation116_spill] sm:$0xff] %v8625_v32  ;;  %v1030_v51 = vmul.f32 %v8625_v32, %v936_v14  ;;  %1572 = vperm.xlu1 %6706, %v8110_v24   ;;  %v12495_v5 = vrot.slane %v8543_v48, 6  ;;  %v12134_v32 = vrot.slane %v8606_v36, 6 }
 0x1af   : > { %v1083_v37 = vsel %vm653_vm0, %v12496_v6, %v12495_v5  ;;  %v1046_v18 = vadd.f32 %v1030_v51, %v897_v9  ;;  %v1214_v9 = vmul.f32 %v8562_v49, %v8284_v3  ;;  %v919_v5 = vrot.slane %v8633_v34, 2 }
 0x1b0   : > { %v1178_v14 = vmul.f32 %v8463_v50, %v1083_v37  ;;  %v8649_v26 = vpop.permute.xlu0 %968  ;;  %v1237_v37 = vmul.f32 %v8559_v35, %v8201_v39  ;;  %v8682_v34 = vsel %vm653_vm0, %v1400_v19, %v12501_v27  ;;  %v1252_v27 = vrot.slane %v1236_v28, 2 }
 0x1b1   : > { %12497 = vst [vmem:[#allocation117_spill] sm:$0xff] %v8649_v26  ;;  %6707 = vset.pattern.permute.xlu1 %v12457_v10  ;;  %v8658_v51 = vpop.permute.xlu1 %1116  ;;  %v12502_v26 = vrot.slane %v8571_v11, 2 }
 0x1b2   : > { %v1194_v6 = vadd.f32 %v1178_v14, %v1046_v18  ;;  %12499 = vst [vmem:[#allocation119_spill] sm:$0xff] %v8658_v51  ;;  %v1282_v18 = vsel %vm934_vm1, %v12131_v20, %v1251_v16  ;;  %1136 = vperm.xlu1 %6707, %v8119_v25   ;;  %v12500_v14 = vrot.slane %v8528_v1, 6  ;;  %v633_v20 = vmul.f32 %v8241_v53, %v8286_v4 }
 0x1b3   : > { %v1362_v50 = vmul.f32 %v8499_v38, %v1282_v18  ;;  %v8691_v36 = vsel %vm934_vm1, %v12502_v26, %v919_v5  ;;  %v1254_v18 = vrot.slane %v1238_v60, 2  ;;  %v1253_v28 = vrot.slane %v1237_v37, 2 }
 0x1b4   : > { %v668_v48 = vsel %vm653_vm0, %v12500_v14, %v12134_v32  ;;  %v1230_v51 = vadd.f32 %v1214_v9, %v1194_v6  ;;  %v12503_v14 = vrot.slane %v8610_v47, 6  ;;  %v8699_v10 = vpop.permute.xlu0 %972  ;;  %v12505_v6 = vrot.slane %v8614_v63, 6 }
 0x1b5   : > { %12504 = vst [vmem:[#allocation120_spill] sm:$0xff] %v8699_v10  ;;  %v12506_v63 = vrot.slane %v8554_v30, 6  ;;  %v8727_v60 = vmul.f32 %v8546_v56, %v8215_v44  ;;  %v649_v38 = vrot.slane %v633_v20, 6  ;;  %v8745_v10 = vmul.f32 %v8562_v49, %v8201_v39 }
 0x1b6   : > { %v8697_v32 = vsel %vm653_vm0, %v12503_v14, %v1069_v2  ;;  %v8705_v9 = vsel %vm653_vm0, %v1069_v2, %v12505_v6  ;;  %v1378_v26 = vadd.f32 %v1362_v50, %v1230_v51  ;;  %v8712_v14 = vmul.f32 %v8509_v54, %v8284_v3  ;;  %6708 = vset.pattern.permute.xlu1 %v12434_v43  ;;  %v8719_v6 = vpop.permute.xlu1 %1492 }
 0x1b7   : > { %v1429_v2 = vsel %vm653_vm0, %v12506_v63, %v1400_v19  ;;  %12507 = vst [vmem:[#allocation121_spill] sm:$0xff] %v8719_v6  ;;  %v8723_v50 = vmul.f32 %v8509_v54, %v8261_v61  ;;  %v8731_v51 = vmul.f32 %v8509_v54, %v8201_v39  ;;  %1720 = vperm.xlu1 %6708, %v8110_v24   ;;  %v12511_v24 = vrot.slane %v8655_v58, 2 }
 0x1b8   : > { %v1510_v37 = vmul.f32 %v8719_v6, %v1429_v2  ;;  %v8737_v63 = vsel %vm934_vm1, %v1251_v16, %v1252_v27  ;;  %v8741_v19 = vsel %vm934_vm1, %v1252_v27, %v1253_v28  ;;  %v8747_v53 = vpop.permute.xlu0 %976  ;;  %v800_v2 = vmul.f32 %v8531_v21, %v8286_v4 }
 0x1b9   : > { %12508 = vst [vmem:[#allocation122_spill] sm:$0xff] %v8723_v50  ;;  %12509 = vst [vmem:[#allocation123_spill] sm:$0xff] %v8731_v51  ;;  %v8755_v20 = vsel %vm934_vm1, %v1254_v18, %v12511_v24  ;;  %v8759_v16 = vsel %vm934_vm1, %v1253_v28, %v1254_v18  ;;  %v650_v6 = vrot.slane %v634_v15, 6  ;;  %v8765_v54 = vmul.f32 %v8531_v21, %v8261_v61 }
 0x1ba   : > { %12510 = vst [vmem:[#allocation124_spill] sm:$0xff] %v8747_v53  ;;  %v8761_v27 = vadd.f32 %v1510_v37, %v1378_v26  ;;  %v933_v53 = vrot.slane %v8712_v14, 2  ;;  %v8770_v58 = vmul.f32 %v8506_v22, %v8207_v41  ;;  %v801_v24 = vmul.f32 %v8531_v21, %v8284_v3 }
 0x1bb   : > { %v8777_v18 = vmul.f32 %v8562_v49, %v8203_v40  ;;  %1724 = vperm.xlu1 %6708, %v8105_v23   ;;  %v8781_v26 = vpop.permute.xlu1 %1548  ;;  %v12513_v14 = vrot.slane %v8266_v62, 6  ;;  %v8789_v37 = vmul.f32 %v8506_v22, %v8284_v3  ;;  %v12515_v43 = vrot.slane %v8278_v0, 6 }
 0x1bc   : > { %12512 = vst [vmem:[#allocation125_spill] sm:$0xff] %v8781_v26  ;;  %v12516_v61 = vrot.slane %v8253_v57, 6  ;;  %v869_v23 = vmul.f32 %v8406_v31, %v787_v13  ;;  %v8800_v21 = vpop.permute.xlu0 %996  ;;  %v866_v62 = vmul.f32 %v8400_v17, %v800_v2  ;;  %v12518_v3 = vrot.slane %v8731_v51, 2  ;;  %v12532_v51 = vld [vmem:[#allocation110_spill] sm:$0xff] }
 0x1bd   : > { %v655_v28 = vsel %vm653_vm0, %v12513_v14, %v649_v38  ;;  %12514 = vst [vmem:[#allocation126_spill] sm:$0xff] %v8789_v37  ;;  %12517 = vst [vmem:[#allocation127_spill] sm:$0xff] %v8800_v21  ;;  %v1387_v14 = vmul.f32 %v8506_v22, %v8217_v45  ;;  %v8811_v57 = vmul.f32 %v8506_v22, %v8215_v44  ;;  %v12520_v2 = vrot.slane %v8522_v59, 2 }
 0x1be   : > { %v8797_v15 = vsel %vm653_vm0, %v12516_v61, %v12515_v43  ;;  %v948_v0 = vsel %vm934_vm1, %v919_v5, %v12518_v3  ;;  %v7215_v61 = vld [vmem:[%s12010_s4 + $0x88] sm:$0xff]   ;;  %v654_v43 = vsel %vm653_vm0, %v649_v38, %v650_v6  ;;  %v753_v13 = vmul.f32 %v8305_v8, %v668_v48  ;;  %v7216_v5 = vld [vmem:[%s12010_s4 + $0x80] sm:$0xff]  }
 0x1bf   : > { %12519 = vst [vmem:[#allocation128_spill] sm:$0xff] %v8811_v57  ;;  %v935_v21 = vsel %vm934_vm1, %v12520_v2, %v933_v53  ;;  %v1018_v3 = vmul.f32 %v8581_v29, %v948_v0  ;;  %v750_v31 = vmul.f32 %v8301_v7, %v655_v28  ;;  %v12521_v17 = vrot.slane %v8539_v55, 2  ;;  %6710 = vset.pattern.permute.xlu1 %v12435_v33  ;;  %v8838_v59 = vpop.permute.xlu1 %1556  ;;  %v12528_v7 = vld [vmem:[#allocation41_spill] sm:$0xff] }
 0x1c0   : > { %v12522_v22 = vrot.slane %v8723_v50, 2  ;;  %v1015_v48 = vmul.f32 %v8524_v12, %v935_v21  ;;  %12523 = vst [vmem:[#allocation129_spill] sm:$0xff] %v8838_v59  ;;  %6504 = vmatprep.subr.bf16.mxu1 %v7215_v61  ;;  %v12524_v0 = vrot.slane %v8528_v1, 6  ;;  %v885_v2 = vadd.f32 %v869_v23, %v753_v13  ;;  %v8850_v21 = vpop.permute.xlu0 %1000  ;;  %v12530_v23 = vld [vmem:[#allocation61_spill] sm:$0xff] }
 0x1c1   : > { %v8846_v55 = vmul.f32 %v8559_v35, %v8286_v4  ;;  %6505 = vmatpush3.bf16.msra.mxu1 %v7215_v61  ;;  %v751_v8 = vmul.f32 %v12528_v7, %v654_v43  ;;  %v882_v50 = vadd.f32 %v866_v62, %v750_v31  ;;  %v1403_v12 = vrot.slane %v1387_v14, 6  ;;  %v12534_v35 = vld [vmem:[#allocation106_spill] sm:$0xff]  ;;  %v12536_v62 = vld [vmem:[#allocation44_spill] sm:$0xff]  ;;  %v12537_v43 = vld [vmem:[#allocation59_spill] sm:$0xff] }
 0x1c2   : > { %v8834_v38 = vsel %vm934_vm1, %v12522_v22, %v12521_v17  ;;  %v669_v28 = vsel %vm653_vm0, %v650_v6, %v12524_v0  ;;  %v12526_v22 = vld [vmem:[#allocation23_spill] sm:$0xff]  ;;  %6506 = vmatprep.subr.bf16.mxu1 %v7216_v5  ;;  %v12529_v6 = vld [vmem:[#allocation109_spill] sm:$0xff]  ;;  %v12531_v0 = vrot.slane %v8571_v11, 2  ;;  %v12533_v33 = vrot.slane %v12532_v51, 6  ;;  %v12538_v11 = vld [vmem:[#allocation72_spill] sm:$0xff] }
 0x1c3   : > { %12525 = vst [vmem:[#allocation130_spill] sm:$0xff] %v8846_v55  ;;  %1316 = vperm.xlu1 %6710, %v12526_v22   ;;  %12527 = vst [vmem:[#allocation23_spill] sm:$0xff] %v8850_v21  ;;  %v868_v13 = vmul.f32 %v12530_v23, %v12529_v6  ;;  %v12535_v21 = vrot.slane %v12534_v35, 6  ;;  %v1034_v31 = vadd.f32 %v1018_v3, %v885_v2  ;;  %v12540_v29 = vmov 1   ;;  %v12542_v3 = vld [vmem:[#allocation36_spill] sm:$0xff] }
 0x1c4   : > { %v950_v17 = vsel %vm934_vm1, %v933_v53, %v12531_v0  ;;  %v752_v14 = vmul.f32 %v12536_v62, %v669_v28  ;;  %v867_v1 = vmul.f32 %v12537_v43, %v801_v24  ;;  %v1031_v7 = vadd.f32 %v1015_v48, %v882_v50  ;;  %v12539_v53 = vld [vmem:[#allocation83_spill] sm:$0xff]  ;;  %v12543_v28 = vld [vmem:[#allocation101_spill] sm:$0xff]  ;;  %v12545_v50 = vld [vmem:[#allocation70_spill] sm:$0xff] }
 0x1c5   : > { %v1098_v61 = vsel %vm653_vm0, %v12535_v21, %v12533_v33  ;;  %v1202_v6 = vmul.f32 %v8562_v49, %v8207_v41  ;;  %v1017_v23 = vmul.f32 %v12538_v11, %v8691_v36  ;;  %v1166_v0 = vmul.f32 %v12539_v53, %v8705_v9  ;;  %v8876_v33 = vpop.permute.xlu1 %1120  ;;  %6507 = vmatpush3.bf16.msra.mxu1 %v7216_v5  ;;  %v12546_v48 = vld [vmem:[#allocation78_spill] sm:$0xff]  ;;  %v12549_v43 = vld [vmem:[#allocation24_spill] sm:$0xff]  ;;  %v12551_v5 = vld [vmem:[#allocation81_spill] sm:$0xff] }
 0x1c6   : > { %12541 = vst [vmem:[#allocation109_spill] sm:$0xff] %v8876_v33  ;;  %v8880_v2 = vmul.f32 %v12543_v28, %v12542_v3  ;;  %v1016_v24 = vmul.f32 %v12545_v50, %v950_v17  ;;  %v1163_v21 = vmul.f32 %v12546_v48, %v1098_v61  ;;  %v12547_v36 = vrot.slane %v8770_v58, 6  ;;  %v8893_v33 = vpop.permute.xlu0 %1104 }
 0x1c7   : > { %6711 = vset.pattern.permute.xlu1 %v12540_v29  ;;  %v12548_v35 = vrot.slane %v8811_v57, 6  ;;  %12550 = vst [vmem:[#allocation106_spill] sm:$0xff] %v8893_v33  ;;  %v884_v3 = vadd.f32 %v868_v13, %v752_v14  ;;  %v1165_v17 = vmul.f32 %v12551_v5, %v8697_v32  ;;  %v1182_v50 = vadd.f32 %v1166_v0, %v1034_v31 }
 0x1c8   : > { %12544 = vst [vmem:[#allocation110_spill] sm:$0xff] %v8880_v2  ;;  %v1426_v9 = vsel %vm653_vm0, %v12547_v36, %v1403_v12  ;;  %847 = vperm.xlu1 %6711, %v12549_v43   ;;  %v12552_v61 = vrot.slane %v8610_v47, 6  ;;  %v12553_v48 = vrot.slane %v12532_v51, 6  ;;  %v883_v57 = vadd.f32 %v867_v1, %v751_v8  ;;  %v12554_v47 = vld [vmem:[#allocation53_spill] sm:$0xff]  ;;  %v12555_v51 = vld [vmem:[#allocation66_spill] sm:$0xff] }
 0x1c9   : > { %v1425_v62 = vsel %vm653_vm0, %v1403_v12, %v12548_v35  ;;  %v1179_v53 = vadd.f32 %v1163_v21, %v1031_v7  ;;  %v1533_v12 = vmul.f32 %v8546_v56, %v8201_v39  ;;  %v1033_v35 = vadd.f32 %v1017_v23, %v884_v3  ;;  %v8918_v0 = vpop.permute.xlu1 %1604 }
 0x1ca   : > { %v1097_v36 = vsel %vm653_vm0, %v12553_v48, %v12552_v61  ;;  %v1535_v13 = vmul.f32 %v8546_v56, %v8217_v45  ;;  %v12180_v32 = vrot.slane %v8880_v2, 6  ;;  %v8911_v31 = vmul.f32 %v12554_v47, %v8207_v41  ;;  %12557 = vst [vmem:[#allocation101_spill] sm:$0xff] %v8918_v0  ;;  %v8920_v23 = vpop.permute.xlu0 %1156  ;;  %v12559_v61 = vld [vmem:[#allocation107_spill] sm:$0xff]  ;;  %v12566_v2 = vld [vmem:[#allocation29_spill] sm:$0xff] }
 0x1cb   : > { %v1164_v43 = vmul.f32 %v8893_v33, %v1097_v36  ;;  %v880_v14 = vmul.f32 %v12555_v51, %v8765_v54  ;;  %v1032_v8 = vadd.f32 %v1016_v24, %v883_v57  ;;  %v1200_v7 = vmul.f32 %v8562_v49, %v8209_v42  ;;  %12558 = vst [vmem:[#allocation24_spill] sm:$0xff] %v8920_v23  ;;  %v12561_v57 = vld [vmem:[#allocation25_spill] sm:$0xff]  ;;  %v12562_v51 = vld [vmem:[#allocation64_spill] sm:$0xff] }
 0x1cc   : > { %v12556_v1 = vmov 2   ;;  %v8924_v3 = vmul.f32 %v12554_v47, %v8217_v45  ;;  %v1181_v48 = vadd.f32 %v1165_v17, %v1033_v35  ;;  %v1218_v21 = vadd.f32 %v1202_v6, %v1182_v50  ;;  %v12564_v17 = vld [vmem:[#allocation93_spill] sm:$0xff] }
 0x1cd   : > { %6712 = vset.pattern.permute.xlu1 %v12556_v1  ;;  %v12560_v36 = vrot.slane %v12559_v61, 6  ;;  %v1652_v24 = vmul.f32 %v12554_v47, %v8215_v44  ;;  %v764_v33 = vmul.f32 %v12562_v51, %v8797_v15  ;;  %v12563_v1 = vld [vmem:[#allocation75_spill] sm:$0xff]  ;;  %v1215_v6 = vadd.f32 %v8777_v18, %v1179_v53  ;;  %v12565_v61 = vld [vmem:[#allocation94_spill] sm:$0xff] }
 0x1ce   : > { %992 = vperm.xlu1 %6712, %v12561_v57   ;;  %v1029_v5 = vmul.f32 %v12563_v1, %v8834_v38  ;;  %v1180_v50 = vadd.f32 %v1164_v43, %v1032_v8  ;;  %v1350_v35 = vmul.f32 %v12564_v17, %v8755_v20  ;;  %v8947_v11 = vmul.f32 %v12554_v47, %v12566_v2  ;;  %v12567_v15 = vld [vmem:[#allocation87_spill] sm:$0xff]  ;;  %v8952_v18 = vpop.permute.xlu0 %1128  ;;  %v8958_v1 = vpop.permute.xlu1 %1696 }
 0x1cf   : > { %v1084_v54 = vsel %vm653_vm0, %v12180_v32, %v12560_v36  ;;  %v1349_v36 = vmul.f32 %v12565_v61, %v8759_v16  ;;  %v896_v44 = vadd.f32 %v880_v14, %v764_v33  ;;  %v1347_v51 = vmul.f32 %v12567_v15, %v8737_v63  ;;  %12568 = vst [vmem:[#allocation53_spill] sm:$0xff] %v8952_v18  ;;  %v12569_v43 = vld [vmem:[#allocation111_spill] sm:$0xff] }
 0x1d0   : > { %v1177_v38 = vmul.f32 %v8920_v23, %v1084_v54  ;;  %v1667_v53 = vrot.slane %v8924_v3, 2  ;;  %v1217_v20 = vadd.f32 %v8745_v10, %v1181_v48  ;;  %v1497_v16 = vmul.f32 %v12569_v43, %v1426_v9  ;;  %12571 = vst [vmem:[#allocation107_spill] sm:$0xff] %v8958_v1  ;;  %v12572_v3 = vld [vmem:[#allocation62_spill] sm:$0xff]  ;;  %v12573_v48 = vld [vmem:[#allocation115_spill] sm:$0xff] }
 0x1d1   : > { %v1366_v8 = vadd.f32 %v1350_v35, %v1218_v21  ;;  %v12570_v32 = vmov 6   ;;  %v1668_v17 = vrot.slane %v1652_v24, 2  ;;  %v1045_v33 = vadd.f32 %v1029_v5, %v896_v44  ;;  %v12575_v35 = vld [vmem:[#allocation56_spill] sm:$0xff]  ;;  %v12577_v5 = vld [vmem:[#allocation89_spill] sm:$0xff] }
 0x1d2   : > { %6713 = vset.pattern.permute.xlu1 %v12570_v32  ;;  %v1363_v14 = vadd.f32 %v1347_v51, %v1215_v6  ;;  %v1216_v61 = vadd.f32 %v1200_v7, %v1180_v50  ;;  %v1213_v63 = vmul.f32 %v8562_v49, %v8286_v4  ;;  %v1495_v54 = vmul.f32 %v12572_v3, %v8682_v34  ;;  %v8976_v6 = vpop.permute.xlu0 %1132  ;;  %v12629_v4 = vld [vmem:[#allocation112_spill] sm:$0xff] }
 0x1d3   : > { %1464 = vperm.xlu1 %6713, %v12526_v22   ;;  %v1365_v10 = vadd.f32 %v1349_v36, %v1217_v20  ;;  %v1498_v9 = vmul.f32 %v12573_v48, %v1425_v62  ;;  %v12574_v21 = vrot.slane %v8911_v31, 2  ;;  %v12576_v23 = vrot.slane %v12575_v35, 2  ;;  %12578 = vst [vmem:[#allocation25_spill] sm:$0xff] %v8976_v6  ;;  %v8980_v36 = vpop.permute.xlu1 %1704  ;;  %v12623_v6 = vld [vmem:[#allocation72_spill] sm:$0xff] }
 0x1d4   : > { %v1348_v51 = vmul.f32 %v12577_v5, %v8741_v19  ;;  %v1611_v7 = vmul.f32 %v8781_v26, %v1533_v12  ;;  %v1613_v22 = vmul.f32 %v8838_v59, %v1535_v13  ;;  %v1193_v24 = vadd.f32 %v1177_v38, %v1045_v33  ;;  %12579 = vst [vmem:[#allocation29_spill] sm:$0xff] %v8980_v36  ;;  %v12580_v38 = vld [vmem:[#allocation86_spill] sm:$0xff]  ;;  %v12588_v13 = vld [vmem:[#allocation95_spill] sm:$0xff] }
 0x1d5   : > { %v1691_v44 = vsel %vm934_vm1, %v12576_v23, %v12574_v21  ;;  %v1513_v34 = vadd.f32 %v1497_v16, %v1365_v10  ;;  %v1514_v50 = vadd.f32 %v1498_v9, %v1366_v8  ;;  %v1689_v62 = vsel %vm934_vm1, %v1667_v53, %v1668_v17 }
 0x1d6   : > { %v1511_v23 = vadd.f32 %v1495_v54, %v1363_v14  ;;  %v1364_v21 = vadd.f32 %v1348_v51, %v1216_v61  ;;  %v1759_v19 = vmul.f32 %v8958_v1, %v1691_v44  ;;  %v1761_v12 = vmul.f32 %v8980_v36, %v1689_v62  ;;  %v12584_v14 = vld [vmem:[#allocation105_spill] sm:$0xff]  ;;  %v12625_v36 = vld [vmem:[#allocation83_spill] sm:$0xff] }
 0x1d7   : > { %1468 = vperm.xlu1 %6713, %v8119_v25   ;;  %v1614_v16 = vmul.f32 %v12580_v38, %v8727_v60  ;;  %v12581_v8 = vrot.slane %v8595_v52, 2  ;;  %v12582_v33 = vrot.slane %v8846_v55, 2  ;;  %v12583_v61 = vrot.slane %v8770_v58, 6  ;;  %v12586_v25 = vld [vmem:[#allocation102_spill] sm:$0xff]  ;;  %v9002_v60 = vpop.permute.xlu0 %1152 }
 0x1d8   : > { %v12585_v54 = vrot.slane %v12584_v14, 6  ;;  %v1627_v44 = vadd.f32 %v1611_v7, %v1511_v23  ;;  %v1629_v51 = vadd.f32 %v1613_v22, %v1513_v34  ;;  %v1229_v62 = vadd.f32 %v1213_v63, %v1193_v24  ;;  %12587 = vst [vmem:[#allocation56_spill] sm:$0xff] %v9002_v60  ;;  %v9017_v34 = vld [vmem:[#allocation7] ss:$0 sm:$0xff] }
 0x1d9   : > { %v1267_v10 = vsel %vm934_vm1, %v12582_v33, %v12581_v8  ;;  %v1534_v52 = vmul.f32 %v8546_v56, %v8207_v41  ;;  %v12589_v8 = vrot.slane %v8947_v11, 2  ;;  %v9011_v33 = vpop.permute.xlu1 %1708  ;;  %v12591_v63 = vmov 3   ;;  %v12641_v60 = vld [vmem:[#allocation45_spill] sm:$0xff] }
 0x1da   : > { %v1427_v9 = vsel %vm653_vm0, %v12585_v54, %v12583_v61  ;;  %v1361_v20 = vmul.f32 %v12588_v13, %v1267_v10  ;;  %12590 = vst [vmem:[#allocation105_spill] sm:$0xff] %v9011_v33  ;;  %v1630_v61 = vadd.f32 %v1614_v16, %v1514_v50  ;;  %v1775_v14 = vadd.f32 %v1759_v19, %v1627_v44  ;;  %v12594_v19 = vld [vmem:[#allocation84_spill] sm:$0xff] }
 0x1db   : > { %v1496_v35 = vmul.f32 %v12586_v25, %v1427_v9  ;;  %v1688_v58 = vsel %vm934_vm1, %v1668_v17, %v12589_v8  ;;  %v1777_v54 = vadd.f32 %v1761_v12, %v1629_v51  ;;  %6714 = vset.pattern.permute.xlu1 %v12591_v63  ;;  %v1532_v24 = vmul.f32 %v8546_v56, %v8209_v42  ;;  %v12595_v9 = vld [vmem:[#allocation63_spill] sm:$0xff]  ;;  %v9032_v44 = vpop.permute.xlu0 %1700  ;;  %v12619_v13 = vld [vmem:[#allocation104_spill] sm:$0xff] }
 0x1dc   : > { %v1762_v7 = vmul.f32 %v9011_v33, %v1688_v58  ;;  %1140 = vperm.xlu1 %6714, %v12561_v57   ;;  %v12592_v23 = vrot.slane %v8554_v30, 6  ;;  %v12593_v17 = vrot.slane %v8789_v37, 6  ;;  %v1612_v12 = vmul.f32 %v12594_v19, %v1534_v52  ;;  %12597 = vst [vmem:[#allocation131_spill] sm:$0xff] %v9032_v44 }
 0x1dd   : > { %v1512_v22 = vadd.f32 %v1496_v35, %v1364_v21  ;;  %v1377_v16 = vadd.f32 %v1361_v20, %v1229_v62  ;;  %v12596_v35 = vrot.slane %v8911_v31, 2  ;;  %v1798_v30 = vadd.f32 %v9017_v34, %v1775_v14  ;;  %v9037_v58 = vpop.permute.xlu1 %1300  ;;  %v12599_v20 = vld [vmem:[#allocation88_spill] sm:$0xff] }
 0x1de   : > { %v1430_v50 = vsel %vm653_vm0, %v12593_v17, %v12592_v23  ;;  %v1778_v10 = vadd.f32 %v1762_v7, %v1630_v61  ;;  %v1800_v57 = vadd.f32 %v9017_v34, %v1777_v54  ;;  %12598 = vst [vmem:[#allocation132_spill] sm:$0xff] %v9037_v58  ;;  %v1626_v62 = vmul.f32 %v12599_v20, %v1532_v24  ;;  %v12603_v17 = vld [vmem:[#allocation60_spill] sm:$0xff] }
 0x1df   : > { %v1509_v21 = vmul.f32 %v12595_v9, %v1430_v50  ;;  %v1690_v42 = vsel %vm934_vm1, %v12596_v35, %v1667_v53  ;;  %v1628_v51 = vadd.f32 %v1612_v12, %v1512_v22  ;;  %v1531_v52 = vmul.f32 %v8546_v56, %v8203_v40  ;;  %v9046_v53 = vld [vmem:[%s12007_s1 + $0x58] sm:$0xff]  ;;  %v9051_v22 = vpop.permute.xlu0 %1756 }
 0x1e0   : > { %v1760_v8 = vmul.f32 %v9032_v44, %v1690_v42  ;;  %v1801_v31 = vadd.f32 %v9017_v34, %v1778_v10  ;;  %1144 = vperm.xlu1 %6714, %v9046_v53   ;;  %v1642_v7 = vadd.f32 %v1626_v62, %v8761_v27  ;;  %12600 = vst [vmem:[#allocation133_spill] sm:$0xff] %v9051_v22  ;;  %v9053_v24 = vmax.f32 %v1798_v30, 0.0  ;;  %v12608_v35 = vld [vmem:[#allocation74_spill] sm:$0xff] }
 0x1e1   : > { %v1525_v14 = vadd.f32 %v1509_v21, %v1377_v16  ;;  %v1625_v54 = vmul.f32 %v8918_v0, %v1531_v52  ;;  %v9055_v40 = vmax.f32 %v1800_v57, 0.0  ;;  %v1774_v50 = vmul.f32 %v9051_v22, %v12603_v17  ;;  %v12606_v16 = vld [vmem:[#allocation57_spill] sm:$0xff]  ;;  %v9069_v30 = vpop.permute.xlu1 %1752  ;;  %v7270_v52 = vld [vmem:[%s12007_s1 + $0x48] sm:$0xff] }
 0x1e2   : > { %v1776_v61 = vadd.f32 %v1760_v8, %v1628_v51  ;;  %12601 = vst [vmem:[#allocation134_spill] sm:$0xff] %v9053_v24  ;;  %v9060_v12 = vmax.f32 %v1801_v31, 0.0  ;;  %v12605_v10 = vmov 7   ;;  %v12607_v21 = vrot.slane %v12606_v16, 2  ;;  %12610 = vst [vmem:[#allocation57_spill] sm:$0xff] %v9069_v30 }
 0x1e3   : > { %12602 = vst [vmem:[#allocation135_spill] sm:$0xff] %v9055_v40  ;;  %v12609_v42 = vrot.slane %v12608_v35, 2  ;;  %v1790_v51 = vadd.f32 %v1774_v50, %v1642_v7  ;;  %v1641_v8 = vadd.f32 %v1625_v54, %v1525_v14  ;;  %v12187_v16 = vrot.slane %v9053_v24, 2 }
 0x1e4   : > { %v1799_v23 = vadd.f32 %v9017_v34, %v1776_v61  ;;  %12604 = vst [vmem:[#allocation60_spill] sm:$0xff] %v9060_v12  ;;  %6716 = vset.pattern.permute.xlu1 %v12605_v10  ;;  %v12186_v61 = vrot.slane %v9055_v40, 2  ;;  %v12196_v7 = vrot.slane %v9060_v12, 6  ;;  %v788_v37 = vmul.f32 %v12619_v13, %v8201_v39 }
 0x1e5   : > { %v1693_v27 = vsel %vm934_vm1, %v12609_v42, %v12607_v21  ;;  %1584 = vperm.xlu1 %6716, %v7270_v52   ;;  %v1813_v54 = vadd.f32 %v9017_v34, %v1790_v51  ;;  %v12612_v21 = vmov 8   ;;  %v9094_v35 = vpop.permute.xlu1 %831  ;;  %v1832_v42 = vrot.slane %v9055_v40, 6 }
 0x1e6   : > { %v9071_v57 = vmax.f32 %v1799_v23, 0.0  ;;  %v1773_v62 = vmul.f32 %v9069_v30, %v1693_v27  ;;  %12613 = vst [vmem:[#allocation136_spill] sm:$0xff] %v9094_v35 }
 0x1e8   : > { %12611 = vst [vmem:[#allocation74_spill] sm:$0xff] %v9071_v57  ;;  %v1895_v31 = vrot.slane %v9071_v57, 2  ;;  %v9079_v17 = vadd.f32 %v1773_v62, %v1641_v8  ;;  %v1831_v23 = vrot.slane %v9071_v57, 6  ;;  %v12614_v8 = vld [vmem:[#allocation32_spill] sm:$0xff] }
 0x1e9   : > { %6717 = vset.pattern.permute.xlu1 %v12612_v21  ;;  %v9100_v62 = vmul.f32 %v12614_v8, %v8207_v41  ;;  %v621_v20 = vmul.f32 %v12614_v8, %v8201_v39  ;;  %v9141_v39 = vld [vmem:[%s12007_s1 + $0x60] sm:$0xff] }
 0x1ea   : > { %v1923_v14 = vsel %vm934_vm1, %v1895_v31, %v12186_v61  ;;  %v1924_v50 = vsel %vm934_vm1, %v12187_v16, %v1895_v31  ;;  %1732 = vperm.xlu1 %6717, %v7270_v52   ;;  %v9105_v61 = vsel %vm653_vm0, %v1831_v23, %v1832_v42  ;;  %v12616_v31 = vld [vmem:[#allocation100_spill] sm:$0xff]  ;;  %v9115_v52 = vsel %vm653_vm0, %v1832_v42, %v12196_v7  ;;  %v9126_v55 = vpop.permute.xlu1 %1304  ;;  %v12621_v42 = vld [vmem:[#allocation26_spill] sm:$0xff] }
 0x1eb   : > { %v1958_v27 = vmul.f32 %v1924_v50, %v12567_v15  ;;  %v1959_v51 = vmul.f32 %v1923_v14, %v12577_v5  ;;  %12615 = vst [vmem:[#allocation32_spill] sm:$0xff] %v9105_v61  ;;  %v9109_v16 = vmul.f32 %v12616_v31, %v8217_v45  ;;  %12617 = vst [vmem:[#allocation100_spill] sm:$0xff] %v9115_v52  ;;  %v9117_v15 = vmax.f32 %v1813_v54, 0.0 }
 0x1ec   : > { %v1974_v5 = vmul.f32 %v9105_v61, %v12572_v3  ;;  %12620 = vst [vmem:[#allocation104_spill] sm:$0xff] %v9126_v55  ;;  %v9131_v54 = vmul.f32 %v12543_v28, %v8217_v45  ;;  %v905_v7 = vmul.f32 %v12616_v31, %v8207_v41  ;;  %v9155_v33 = vmul.f32 %v1924_v50, %v12623_v6  ;;  %v9180_v6 = vld [vmem:[%s12007_s1 + $0x68] sm:$0xff] }
 0x1ed   : > { %12618 = vst [vmem:[#allocation137_spill] sm:$0xff] %v9117_v15  ;;  %v6734_v0 = vpack.i.bf16 %v1959_v51, %v1958_v27  ;;  %v9135_v27 = vmul.f32 %v12543_v28, %v12621_v42  ;;  %v789_v51 = vmul.f32 %v12619_v13, %v8207_v41  ;;  %v9162_v57 = vmul.f32 %v1923_v14, %v9051_v22 }
 0x1ee   : > { %6718 = vset.pattern.permute.xlu1 %v12540_v29  ;;  %v1975_v29 = vmul.f32 %v9115_v52, %v12586_v25  ;;  %12624 = vst [vmem:[#allocation138_spill] sm:$0xff] %v9155_v33  ;;  %v9159_v25 = vmul.f32 %v9115_v52, %v12625_v36  ;;  %v9165_v41 = vmul.f32 %v1924_v50, %v9069_v30  ;;  %v12634_v36 = vld [vmem:[#allocation91_spill] sm:$0xff] }
 0x1ef   : > { %12622 = vst [vmem:[#allocation26_spill] sm:$0xff] %v9135_v27  ;;  %6735 = vrot.lane.b32.xlu0 %v6734_v0, %s7755_s25  ;;  %851 = vperm.xlu1 %6718, %v9141_v39   ;;  %v1991_v0 = vmul.f32 %v9060_v12, %v12594_v19  ;;  %12627 = vst [vmem:[#allocation140_spill] sm:$0xff] %v9162_v57  ;;  %v9168_v18 = vmul.f32 %v1923_v14, %v12629_v4  ;;  %v12631_v19 = vld [vmem:[#allocation81_spill] sm:$0xff]  ;;  %v9183_v14 = vpop.permute.xlu1 %1448  ;;  %v1830_v4 = vrot.slane %v9053_v24, 6  ;;  %v12652_v57 = vld [vmem:[#allocation123_spill] sm:$0xff] }
 0x1f0   : > { %v6744_v3 = vpack.i.bf16 %v1975_v29, %v1974_v5  ;;  %12626 = vst [vmem:[#allocation139_spill] sm:$0xff] %v9159_v25  ;;  %12628 = vst [vmem:[#allocation141_spill] sm:$0xff] %v9165_v41  ;;  %v9172_v5 = vmul.f32 %v9105_v61, %v12631_v19  ;;  %v1071_v29 = vrot.slane %v9131_v54, 6  ;;  %v1990_v50 = vmul.f32 %v9055_v40, %v8781_v26  ;;  %v12654_v24 = vld [vmem:[#allocation109_spill] sm:$0xff] }
 0x1f1   : > { %12630 = vst [vmem:[#allocation142_spill] sm:$0xff] %v9168_v18  ;;  %12633 = vst [vmem:[#allocation144_spill] sm:$0xff] %v9183_v14  ;;  %v637_v54 = vrot.slane %v621_v20, 6  ;;  %v921_v19 = vrot.slane %v905_v7, 2  ;;  %v871_v30 = vmul.f32 %v12634_v36, %v789_v51  ;;  %v9195_v52 = vsel %vm653_vm0, %v1830_v4, %v1831_v23  ;;  %v12645_v36 = vld [vmem:[#allocation73_spill] sm:$0xff] }
 0x1f2   : > { %12632 = vst [vmem:[#allocation143_spill] sm:$0xff] %v9172_v5  ;;  %v6754_v22 = vpack.i.bf16 %v1991_v0, %v1990_v50  ;;  %12635 = vst [vmem:[#allocation145_spill] sm:$0xff] %v9195_v52  ;;  %v12636_v61 = vrot.slane %v9117_v15, 6  ;;  %v12638_v20 = vrot.slane %v9100_v62, 6  ;;  %v12640_v0 = vld [vmem:[#allocation108_spill] sm:$0xff]  ;;  %v12643_v25 = vrot.slane %v9135_v27, 6 }
 0x1f3   : > { %6745 = vrot.lane.b32.xlu0 %v6744_v3, %s7756_s30  ;;  %855 = vperm.xlu1 %6718, %v9180_v6   ;;  %v12639_v3 = vrot.slane %v9109_v16, 2  ;;  %v9213_v23 = vmul.f32 %v12640_v0, %v12566_v2  ;;  %v870_v33 = vmul.f32 %v12645_v36, %v788_v37  ;;  %v1240_v18 = vmul.f32 %v12640_v0, %v12621_v42  ;;  %v12648_v50 = vld [vmem:[#allocation121_spill] sm:$0xff] }
 0x1f4   : > { %v9201_v26 = vsel %vm653_vm0, %v12636_v61, %v1830_v4  ;;  %v666_v7 = vsel %vm653_vm0, %v637_v54, %v12638_v20  ;;  %v12642_v61 = vld [vmem:[#allocation120_spill] sm:$0xff]  ;;  %v1093_v20 = vsel %vm653_vm0, %v1071_v29, %v12643_v25  ;;  %v9237_v25 = vmul.f32 %v9195_v52, %v12648_v50  ;;  %v12662_v50 = vld [vmem:[#allocation119_spill] sm:$0xff] }
 0x1f5   : > { %12637 = vst [vmem:[#allocation146_spill] sm:$0xff] %v9201_v26  ;;  %v946_v51 = vsel %vm934_vm1, %v921_v19, %v12639_v3  ;;  %v755_v4 = vmul.f32 %v12641_v60, %v666_v7  ;;  %v12644_v3 = vmov 5   ;;  %v9229_v7 = vpop.permute.xlu1 %980  ;;  %v1168_v15 = vmul.f32 %v12654_v24, %v1093_v20 }
 0x1f6   : > { %v1020_v5 = vmul.f32 %v12642_v61, %v946_v51  ;;  %12646 = vst [vmem:[#allocation108_spill] sm:$0xff] %v9229_v7  ;;  %v9233_v51 = vmul.f32 %v9201_v26, %v12595_v9  ;;  %12649 = vst [vmem:[#allocation148_spill] sm:$0xff] %v9237_v25  ;;  %v12653_v61 = vrot.slane %v12652_v57, 2  ;;  %v12655_v7 = vld [vmem:[#allocation46_spill] sm:$0xff]  ;;  %v12656_v26 = vld [vmem:[#allocation117_spill] sm:$0xff] }
 0x1f7   : > { %6755 = vrot.lane.b32.xlu0 %v6754_v22, %s7757_s24  ;;  %6720 = vset.pattern.permute.xlu1 %v12644_v3  ;;  %v12650_v22 = vld [vmem:[#allocation113_spill] sm:$0xff]  ;;  %v887_v41 = vadd.f32 %v871_v30, %v755_v4  ;;  %v1256_v4 = vrot.slane %v1240_v18, 2  ;;  %v12663_v18 = vrot.slane %v9213_v23, 2 }
 0x1f8   : > { %1328 = vperm.xlu1 %6720, %v9046_v53   ;;  %12647 = vst [vmem:[#allocation147_spill] sm:$0xff] %v9233_v51  ;;  %v12651_v60 = vrot.slane %v12650_v22, 6  ;;  %v947_v36 = vsel %vm934_vm1, %v12653_v61, %v921_v19  ;;  %v12659_v61 = vld [vmem:[#allocation114_spill] sm:$0xff] }
 0x1f9   : > { %v1019_v27 = vmul.f32 %v12656_v26, %v947_v36  ;;  %v1036_v52 = vadd.f32 %v1020_v5, %v887_v41  ;;  %v12660_v20 = vrot.slane %v12659_v61, 6  ;;  %v7273_v41 = vld [vmem:[%s12007_s1 + $0x50] sm:$0xff]  ;;  %v9267_v5 = vpop.permute.xlu1 %1124  ;;  %v12664_v61 = vld [vmem:[#allocation31_spill] sm:$0xff] }
 0x1fa   : > { %v667_v37 = vsel %vm653_vm0, %v12651_v60, %v637_v54  ;;  %v12657_v60 = vld [vmem:[#allocation99_spill] sm:$0xff]  ;;  %v12658_v54 = vld [vmem:[#allocation28_spill] sm:$0xff]  ;;  %12661 = vst [vmem:[#allocation113_spill] sm:$0xff] %v9267_v5 }
 0x1fb   : > { %v754_v9 = vmul.f32 %v12655_v7, %v667_v37  ;;  %v1389_v30 = vmul.f32 %v12657_v60, %v12566_v2  ;;  %v9257_v57 = vmul.f32 %v12657_v60, %v12658_v54  ;;  %v1094_v36 = vsel %vm653_vm0, %v12660_v20, %v1071_v29  ;;  %v12667_v7 = vld [vmem:[#allocation118_spill] sm:$0xff] }
 0x1fc   : > { %6722 = vset.pattern.permute.xlu1 %v12570_v32  ;;  %v1184_v37 = vadd.f32 %v1168_v15, %v1036_v52  ;;  %v1167_v51 = vmul.f32 %v12662_v50, %v1094_v36  ;;  %v9280_v20 = vmul.f32 %v12554_v47, %v12664_v61  ;;  %v1654_v25 = vmul.f32 %v12554_v47, %v12658_v54  ;;  %v12671_v50 = vld [vmem:[#allocation128_spill] sm:$0xff] }
 0x1fd   : > { %v886_v19 = vadd.f32 %v870_v33, %v754_v9  ;;  %1472 = vperm.xlu1 %6722, %v7273_v41   ;;  %v1276_v33 = vsel %vm934_vm1, %v1256_v4, %v12663_v18  ;;  %v1204_v9 = vmul.f32 %v8562_v49, %v12621_v42  ;;  %v1405_v52 = vrot.slane %v1389_v30, 6 }
 0x1fe   : > { %v1352_v15 = vmul.f32 %v9126_v55, %v1276_v33  ;;  %v9286_v18 = vpop.permute.xlu1 %1564  ;;  %v12668_v33 = vrot.slane %v12667_v7, 2  ;;  %v12669_v24 = vrot.slane %v9257_v57, 6  ;;  %v12672_v7 = vrot.slane %v12671_v50, 6 }
 0x1ff   : > { %v1035_v22 = vadd.f32 %v1019_v27, %v886_v19  ;;  %v1220_v27 = vadd.f32 %v1204_v9, %v1184_v37  ;;  %v12665_v19 = vmov 2   ;;  %12666 = vst [vmem:[#allocation123_spill] sm:$0xff] %v9286_v18  ;;  %v12670_v9 = vld [vmem:[#allocation65_spill] sm:$0xff] }
 0x200   : > { %v1277_v30 = vsel %vm934_vm1, %v12668_v33, %v1256_v4  ;;  %v1423_v37 = vsel %vm653_vm0, %v1405_v52, %v12669_v24  ;;  %v1424_v4 = vsel %vm653_vm0, %v12672_v7, %v1405_v52  ;;  %v1670_v33 = vrot.slane %v1654_v25, 2  ;;  %v9307_v24 = vpop.permute.xlu0 %1716 }
 0x201   : > { %6723 = vset.pattern.permute.xlu1 %v12665_v19  ;;  %v1183_v36 = vadd.f32 %v1167_v51, %v1035_v22  ;;  %v1368_v29 = vadd.f32 %v1352_v15, %v1220_v27  ;;  %v1203_v51 = vmul.f32 %v8562_v49, %v8217_v45  ;;  %v1351_v47 = vmul.f32 %v9037_v58, %v1277_v30 }
 0x202   : > { %1004 = vperm.xlu1 %6723, %v9180_v6   ;;  %v1500_v19 = vmul.f32 %v12670_v9, %v1423_v37  ;;  %v1538_v15 = vmul.f32 %v8546_v56, %v12658_v54  ;;  %12673 = vst [vmem:[#allocation99_spill] sm:$0xff] %v9307_v24  ;;  %v1499_v26 = vmul.f32 %v9183_v14, %v1424_v4  ;;  %v9313_v37 = vpop.permute.xlu1 %1568 }
 0x203   : > { %v1219_v27 = vadd.f32 %v1203_v51, %v1183_v36  ;;  %v1537_v30 = vmul.f32 %v8546_v56, %v12566_v2  ;;  %12674 = vst [vmem:[#allocation28_spill] sm:$0xff] %v9313_v37  ;;  %v12675_v36 = vrot.slane %v9280_v20, 2 }
 0x204   : > { %v1516_v50 = vadd.f32 %v1500_v19, %v1368_v29  ;;  %v1616_v22 = vmul.f32 %v9313_v37, %v1538_v15  ;;  %v12676_v29 = vrot.slane %v8947_v11, 2  ;;  %v1897_v11 = vrot.slane %v9060_v12, 2 }
 0x205   : > { %v1367_v52 = vadd.f32 %v1351_v47, %v1219_v27  ;;  %v1686_v25 = vsel %vm934_vm1, %v1670_v33, %v12675_v36  ;;  %v1615_v51 = vmul.f32 %v9286_v18, %v1537_v30 }
 0x206   : > { %6724 = vset.pattern.permute.xlu1 %v12591_v63  ;;  %v1764_v7 = vmul.f32 %v9307_v24, %v1686_v25  ;;  %v1632_v4 = vadd.f32 %v1616_v22, %v1516_v50  ;;  %v1687_v19 = vsel %vm934_vm1, %v12676_v29, %v1670_v33  ;;  %v12681_v50 = vrot.slane %v9055_v40, 2 }
 0x207   : > { %1148 = vperm.xlu1 %6724, %v9141_v39   ;;  %v1515_v9 = vadd.f32 %v1499_v26, %v1367_v52  ;;  %v9328_v47 = vpop.permute.xlu1 %1712  ;;  %v12684_v29 = vrot.slane %v9060_v12, 6 }
 0x208   : > { %v1780_v63 = vadd.f32 %v1764_v7, %v1632_v4  ;;  %12677 = vst [vmem:[#allocation114_spill] sm:$0xff] %v9328_v47  ;;  %v1763_v27 = vmul.f32 %v9328_v47, %v1687_v19  ;;  %v9347_v52 = vsel %vm934_vm1, %v12681_v50, %v1897_v11  ;;  %v12695_v47 = vld [vmem:[#allocation124_spill] sm:$0xff] }
 0x209   : > { %v1631_v15 = vadd.f32 %v1615_v51, %v1515_v9 }
 0x20a   : > { %v1803_v30 = vadd.f32 %v9017_v34, %v1780_v63 }
 0x20b   : > { %6725 = vset.pattern.permute.xlu1 %v12605_v10  ;;  %v1779_v36 = vadd.f32 %v1763_v27, %v1631_v15  ;;  %v12687_v27 = vld [vmem:[#allocation93_spill] sm:$0xff] }
 0x20c   : > { %1588 = vperm.xlu1 %6725, %v7273_v41   ;;  %v9332_v25 = vmax.f32 %v1803_v30, 0.0  ;;  %v9336_v22 = vpop.permute.xlu1 %835 }
 0x20d   : > { %v1802_v26 = vadd.f32 %v9017_v34, %v1779_v36  ;;  %12679 = vst [vmem:[#allocation118_spill] sm:$0xff] %v9336_v22  ;;  %v2006_v36 = vmul.f32 %v9347_v52, %v8958_v1 }
 0x20e   : > { %12678 = vst [vmem:[#allocation31_spill] sm:$0xff] %v9332_v25 }
 0x20f   : > { %v9339_v33 = vmax.f32 %v1802_v26, 0.0 }
 0x210   : > { %1592 = vperm.xlu1 %6725, %v9046_v53   ;;  %v12233_v53 = vrot.slane %v9332_v25, 6 }
 0x211   : > { %12680 = vst [vmem:[#allocation128_spill] sm:$0xff] %v9339_v33  ;;  %v12234_v9 = vrot.slane %v9339_v33, 2  ;;  %v1834_v51 = vrot.slane %v9339_v33, 6  ;;  %v9351_v7 = vpop.permute.xlu1 %1308 }
 0x212   : > { %12682 = vst [vmem:[#allocation149_spill] sm:$0xff] %v9351_v7 }
 0x213   : > { %v9357_v4 = vsel %vm934_vm1, %v1897_v11, %v12234_v9  ;;  %v9363_v63 = vsel %vm653_vm0, %v1834_v51, %v12233_v53  ;;  %v9369_v19 = vsel %vm653_vm0, %v12684_v29, %v1834_v51  ;;  %v623_v9 = vmul.f32 %v12614_v8, %v8217_v45 }
 0x214   : > { %6727 = vset.pattern.permute.xlu1 %v12612_v21  ;;  %12683 = vst [vmem:[#allocation150_spill] sm:$0xff] %v9363_v63  ;;  %12685 = vst [vmem:[#allocation151_spill] sm:$0xff] %v9369_v19  ;;  %v1961_v30 = vmul.f32 %v9357_v4, %v12687_v27  ;;  %v2007_v26 = vmul.f32 %v9357_v4, %v9032_v44  ;;  %v1976_v29 = vmul.f32 %v9369_v19, %v12569_v43  ;;  %v7218_v27 = vld [vmem:[%s12010_s4 + $0x38] sm:$0xff]  }
 0x215   : > { %1736 = vperm.xlu1 %6727, %v7273_v41   ;;  %v12686_v41 = vld [vmem:[#allocation94_spill] sm:$0xff]  ;;  %v9380_v11 = vpop.permute.xlu1 %1312  ;;  %v1977_v53 = vmul.f32 %v9363_v63, %v12573_v48  ;;  %v9403_v48 = vmul.f32 %v12616_v31, %v12566_v2 }
 0x216   : > { %v1960_v15 = vmul.f32 %v9347_v52, %v12686_v41  ;;  %12688 = vst [vmem:[#allocation152_spill] sm:$0xff] %v9380_v11  ;;  %v2507_v51 = vpack.c.bf16 %v2007_v26, %v2006_v36  ;;  %v9397_v36 = vmul.f32 %v12614_v8, %v12621_v42  ;;  %v1057_v26 = vmul.f32 %v12543_v28, %v12566_v2  ;;  %v7217_v41 = vld [vmem:[%s12010_s4 + $0x78] sm:$0xff]  }
 0x217   : > { %6220 = vmatprep.subr.bf16.mxu0 %v7217_v41  ;;  %v12698_v41 = vld [vmem:[#allocation26_spill] sm:$0xff] }
 0x218   : > { %v6764_v50 = vpack.i.bf16 %v1961_v30, %v1960_v15  ;;  %6508 = vmatprep.mubr.msk.bf16.mxu1 %vm2406_vm2, %v2507_v51  ;;  %v6774_v15 = vpack.i.bf16 %v1977_v53, %v1976_v29  ;;  %v1992_v30 = vmul.f32 %v9339_v33, %v8838_v59  ;;  %v639_v51 = vrot.slane %v623_v9, 6  ;;  %6221 = vmatpush3.bf16.msra.mxu0 %v7218_v27  ;;  %v7220_v27 = vld [vmem:[%s12010_s4 + $0x30] sm:$0xff]  }
 0x219   : > { %6729 = vset.pattern.permute.xlu1 %v12644_v3  ;;  %v907_v3 = vmul.f32 %v12616_v31, %v12621_v42  ;;  %v790_v53 = vmul.f32 %v12619_v13, %v8217_v45  ;;  %v1993_v29 = vmul.f32 %v9332_v25, %v12580_v38  ;;  %v9422_v45 = vmul.f32 %v12657_v60, %v12664_v61  ;;  %v12692_v38 = vld [vmem:[#allocation76_spill] sm:$0xff] }
 0x21a   : > { %1332 = vperm.xlu1 %6729, %v9141_v39   ;;  %6765 = vrot.lane.b32.xlu0 %v6764_v50, %s7755_s25  ;;  %v9406_v50 = vpop.permute.xlu1 %984  ;;  %v12699_v19 = vrot.slane %v12698_v41, 6 }
 0x21b   : > { %12689 = vst [vmem:[#allocation153_spill] sm:$0xff] %v9406_v50  ;;  %v923_v43 = vrot.slane %v907_v3, 2  ;;  %v6784_v59 = vpack.i.bf16 %v1993_v29, %v1992_v30  ;;  %v7219_v30 = vld [vmem:[%s12010_s4 + $0x70] sm:$0xff]   ;;  %v12691_v29 = vrot.slane %v9100_v62, 6  ;;  %v872_v44 = vmul.f32 %v12692_v38, %v790_v53 }
 0x21c   : > { %v9446_v62 = vmul.f32 %v12543_v28, %v12658_v54  ;;  %v1242_v53 = vmul.f32 %v12640_v0, %v12658_v54  ;;  %v1407_v38 = vrot.slane %v9422_v45, 6  ;;  %6222 = vmatprep.subr.bf16.mxu0 %v7219_v30 }
 0x21d   : > { %v665_v9 = vsel %vm653_vm0, %v12691_v29, %v639_v51  ;;  %v1812_v29 = vadd.f32 %v9017_v34, %v9079_v17  ;;  %v12697_v17 = vrot.slane %v9403_v48, 2  ;;  %6223 = vmatpush3.bf16.msra.mxu0 %v7220_v27  ;;  %v12707_v27 = vrot.slane %v9213_v23, 2  ;;  %v7224_v23 = vld [vmem:[%s12010_s4 + $0x20] sm:$0xff]  }
 0x21e   : > { %1336 = vperm.xlu1 %6729, %v9180_v6   ;;  %6775 = vrot.lane.b32.xlu0 %v6774_v15, %s7756_s30  ;;  %v1073_v15 = vrot.slane %v1057_v26, 6  ;;  %v9426_v3 = vpop.permute.xlu1 %988  ;;  %v791_v26 = vmul.f32 %v12619_v13, %v12621_v42  ;;  %v12694_v42 = vld [vmem:[#allocation48_spill] sm:$0xff]  ;;  %v1258_v41 = vrot.slane %v1242_v53, 2 }
 0x21f   : > { %12690 = vst [vmem:[#allocation154_spill] sm:$0xff] %v9426_v3  ;;  %v756_v24 = vmul.f32 %v12694_v42, %v665_v9  ;;  %v944_v63 = vsel %vm934_vm1, %v923_v43, %v12697_v17  ;;  %v12700_v9 = vld [vmem:[#allocation47_spill] sm:$0xff]  ;;  %v9481_v30 = vmax.f32 %v1812_v29, 0.0  ;;  %v12705_v29 = vrot.slane %v9257_v57, 6 }
 0x221   : > { %12703 = vst [vmem:[#allocation155_spill] sm:$0xff] %v9481_v30  ;;  %v1422_v53 = vsel %vm653_vm0, %v12705_v29, %v1407_v38 }
 0x222   : > { %6730 = vset.pattern.permute.xlu1 %v12570_v32  ;;  %6785 = vrot.lane.b32.xlu0 %v6784_v59, %s7757_s24  ;;  %v12693_v32 = vrot.slane %v9109_v16, 2  ;;  %v873_v16 = vmul.f32 %v9094_v35, %v791_v26  ;;  %v888_v26 = vadd.f32 %v872_v44, %v756_v24 }
 0x223   : > { %1484 = vperm.xlu1 %6730, %v9180_v6   ;;  %v9478_v17 = vpop.permute.xlu1 %1460 }
 0x224   : > { %v945_v1 = vsel %vm934_vm1, %v12693_v32, %v923_v43  ;;  %v12696_v32 = vrot.slane %v9397_v36, 6  ;;  %12702 = vst [vmem:[#allocation26_spill] sm:$0xff] %v9478_v17 }
 0x225   : > { %v1021_v59 = vmul.f32 %v12695_v47, %v945_v1  ;;  %v1092_v1 = vsel %vm653_vm0, %v12699_v19, %v1073_v15  ;;  %v9485_v47 = vmul.f32 %v12640_v0, %v12664_v61 }
 0x226   : > { %v664_v3 = vsel %vm653_vm0, %v639_v51, %v12696_v32  ;;  %v7221_v51 = vld [vmem:[%s12010_s4 + $0x68] sm:$0xff]   ;;  %v1169_v43 = vmul.f32 %v9267_v5, %v1092_v1 }
 0x227   : > { %v757_v45 = vmul.f32 %v12700_v9, %v664_v3  ;;  %v12701_v32 = vld [vmem:[#allocation108_spill] sm:$0xff]  ;;  %6731 = vset.pattern.permute.xlu1 %v12605_v10  ;;  %v1037_v44 = vadd.f32 %v1021_v59, %v888_v26  ;;  %6224 = vmatprep.subr.bf16.mxu0 %v7221_v51  ;;  %v12706_v59 = vrot.slane %v9446_v62, 6  ;;  %v12712_v51 = vld [vmem:[#allocation34_spill] sm:$0xff]  ;;  %v12714_v5 = vrot.slane %v9485_v47, 2 }
 0x228   : > { %v1022_v42 = vmul.f32 %v12701_v32, %v944_v63  ;;  %1596 = vperm.xlu1 %6731, %v9141_v39   ;;  %v7222_v10 = vld [vmem:[%s12010_s4 + $0x28] sm:$0xff]   ;;  %v12704_v63 = vld [vmem:[#allocation30_spill] sm:$0xff]  ;;  %v9509_v57 = vpop.permute.xlu1 %1572 }
 0x229   : > { %v889_v24 = vadd.f32 %v873_v16, %v757_v45  ;;  %v9493_v3 = vmul.f32 %v12657_v60, %v12704_v63  ;;  %v1185_v19 = vadd.f32 %v1169_v43, %v1037_v44  ;;  %v1091_v16 = vsel %vm653_vm0, %v1073_v15, %v12706_v59  ;;  %12708 = vst [vmem:[#allocation30_spill] sm:$0xff] %v9509_v57 }
 0x22a   : > { %v1275_v45 = vsel %vm934_vm1, %v12707_v27, %v1258_v41  ;;  %v1205_v44 = vmul.f32 %v8562_v49, %v12566_v2  ;;  %6225 = vmatpush3.bf16.msra.mxu0 %v7222_v10  ;;  %v12711_v27 = vld [vmem:[#allocation137_spill] sm:$0xff]  ;;  %v7223_v10 = vld [vmem:[%s12010_s4 + $0x60] sm:$0xff]  }
 0x22b   : > { %v1038_v1 = vadd.f32 %v1022_v42, %v889_v24  ;;  %v12709_v42 = vld [vmem:[#allocation53_spill] sm:$0xff]  ;;  %v1353_v15 = vmul.f32 %v9351_v7, %v1275_v45  ;;  %6226 = vmatprep.subr.bf16.mxu0 %v7223_v10  ;;  %v12723_v10 = vld [vmem:[#allocation103_spill] sm:$0xff] }
 0x22c   : > { %6733 = vset.pattern.permute.xlu1 %v12612_v21  ;;  %v1170_v43 = vmul.f32 %v12709_v42, %v1091_v16  ;;  %v12710_v24 = vld [vmem:[#allocation69_spill] sm:$0xff]  ;;  %v9520_v21 = vld [vmem:[#allocation4 + $0x8] ss:$0 sm:$0xff]  ;;  %v1909_v16 = vrot.slane %v12711_v27, 2  ;;  %v1221_v9 = vadd.f32 %v1205_v44, %v1185_v19  ;;  %v1274_v42 = vsel %vm934_vm1, %v1258_v41, %v12714_v5 }
 0x22d   : > { %1744 = vperm.xlu1 %6733, %v9141_v39   ;;  %v1878_v29 = vmul.f32 %v9481_v30, %v12710_v24  ;;  %v1656_v59 = vmul.f32 %v9520_v21, %v12704_v63  ;;  %v9527_v26 = vmul.f32 %v9520_v21, %v12712_v51  ;;  %v1206_v39 = vmul.f32 %v8562_v49, %v12658_v54  ;;  %v12713_v24 = vld [vmem:[#allocation67_spill] sm:$0xff] }
 0x22e   : > { %v1186_v45 = vadd.f32 %v1170_v43, %v1038_v1  ;;  %v1501_v7 = vmul.f32 %v12713_v24, %v1422_v53  ;;  %v12715_v1 = vld [vmem:[#allocation59_spill] sm:$0xff]  ;;  %v12716_v43 = vrot.slane %v9481_v30, 2  ;;  %v1369_v32 = vadd.f32 %v1353_v15, %v1221_v9  ;;  %v9554_v24 = vpop.permute.xlu1 %1136  ;;  %6227 = vmatpush3.bf16.msra.mxu0 %v7224_v23 }
 0x22f   : > { %v1879_v19 = vmul.f32 %v12711_v27, %v12715_v1  ;;  %v1354_v35 = vmul.f32 %v9380_v11, %v1274_v42  ;;  %v1539_v53 = vmul.f32 %v8546_v56, %v12664_v61  ;;  %12718 = vst [vmem:[#allocation156_spill] sm:$0xff] %v9554_v24  ;;  %v12719_v5 = vrot.slane %v9493_v3, 6 }
 0x230   : > { %v9548_v44 = vsel %vm934_vm1, %v12716_v43, %v1909_v16  ;;  %v1672_v27 = vrot.slane %v1656_v59, 2  ;;  %v12720_v43 = vld [vmem:[#allocation134_spill] sm:$0xff]  ;;  %v1222_v42 = vadd.f32 %v1206_v39, %v1186_v45  ;;  %v1517_v59 = vadd.f32 %v1501_v7, %v1369_v32 }
 0x231   : > { %12717 = vst [vmem:[#allocation34_spill] sm:$0xff] %v9548_v44  ;;  %1748 = vperm.xlu1 %6733, %v9180_v6   ;;  %v1421_v41 = vsel %vm653_vm0, %v1407_v38, %v12719_v5  ;;  %v6739_v1 = vpack.i.bf16 %v1879_v19, %v1878_v29  ;;  %v12721_v30 = vrot.slane %v12720_v43, 2  ;;  %v1617_v15 = vmul.f32 %v9509_v57, %v1539_v53  ;;  %v7225_v38 = vld [vmem:[%s12010_s4 + $0x58] sm:$0xff]  }
 0x232   : > { %v1502_v6 = vmul.f32 %v9478_v17, %v1421_v41  ;;  %v1926_v11 = vmul.f32 %v9548_v44, %v12723_v10  ;;  %v7226_v29 = vld [vmem:[%s12010_s4 + $0x18] sm:$0xff]   ;;  %v1370_v23 = vadd.f32 %v1354_v35, %v1222_v42  ;;  %6228 = vmatprep.subr.bf16.mxu0 %v7225_v38  ;;  %v1540_v39 = vmul.f32 %v8546_v56, %v12704_v63  ;;  %v9590_v41 = vpop.permute.xlu1 %1720 }
 0x233   : > { %v9564_v9 = vsel %vm934_vm1, %v1909_v16, %v12721_v30  ;;  %v9578_v30 = vmul.f32 %v12614_v8, %v12566_v2  ;;  %v12724_v16 = vld [vmem:[#allocation70_spill] sm:$0xff]  ;;  %v12725_v53 = vrot.slane %v9280_v20, 2  ;;  %12726 = vst [vmem:[#allocation158_spill] sm:$0xff] %v9590_v41  ;;  %6229 = vmatpush3.bf16.msra.mxu0 %v7226_v29  ;;  %v1633_v42 = vadd.f32 %v1617_v15, %v1517_v59  ;;  %v12734_v29 = vld [vmem:[#allocation71_spill] sm:$0xff] }
 0x234   : > { %12722 = vst [vmem:[#allocation157_spill] sm:$0xff] %v9564_v9  ;;  %v1927_v45 = vmul.f32 %v9564_v9, %v12724_v16  ;;  %v12727_v35 = vld [vmem:[#allocation78_spill] sm:$0xff]  ;;  %v9597_v10 = vmul.f32 %v12616_v31, %v12658_v54  ;;  %v12731_v9 = vld [vmem:[#allocation145_spill] sm:$0xff] }
 0x235   : > { %6740 = vrot.lane.b32.xlu1 %v6739_v1, %s7755_s25  ;;  %v1685_v5 = vsel %vm934_vm1, %v12725_v53, %v1672_v27  ;;  %v12728_v7 = vld [vmem:[#allocation146_spill] sm:$0xff]  ;;  %v1518_v1 = vadd.f32 %v1502_v6, %v1370_v23  ;;  %v12732_v6 = vrot.slane %v9527_v26, 2 }
 0x236   : > { %v1942_v32 = vmul.f32 %v12728_v7, %v12727_v35  ;;  %v1765_v38 = vmul.f32 %v9590_v41, %v1685_v5  ;;  %v6749_v16 = vpack.i.bf16 %v1927_v45, %v1926_v11  ;;  %v12729_v19 = vld [vmem:[#allocation90_spill] sm:$0xff]  ;;  %v9608_v11 = vpop.permute.xlu1 %1724  ;;  %v7227_v45 = vld [vmem:[%s12010_s4 + $0x50] sm:$0xff]  }
 0x237   : > { %v1618_v20 = vmul.f32 %v12729_v19, %v1540_v39  ;;  %v12730_v53 = vld [vmem:[#allocation106_spill] sm:$0xff]  ;;  %v1684_v15 = vsel %vm934_vm1, %v1672_v27, %v12732_v6  ;;  %12733 = vst [vmem:[#allocation159_spill] sm:$0xff] %v9608_v11  ;;  %v7229_v27 = vld [vmem:[%s12010_s4 + $0x48] sm:$0xff]   ;;  %v792_v6 = vmul.f32 %v12619_v13, %v12566_v2  ;;  %6230 = vmatprep.subr.bf16.mxu0 %v7227_v45 }
 0x238   : > { %v1781_v44 = vadd.f32 %v1765_v38, %v1633_v42  ;;  %v1943_v57 = vmul.f32 %v12731_v9, %v12730_v53  ;;  %v12735_v23 = vld [vmem:[#allocation74_spill] sm:$0xff]  ;;  %v1766_v42 = vmul.f32 %v9608_v11, %v1684_v15  ;;  %v12736_v53 = vld [vmem:[#allocation61_spill] sm:$0xff]  ;;  %v7230_v2 = vld [vmem:[%s12010_s4 + $0x8] sm:$0xff]   ;;  %v12739_v15 = vrot.slane %v9397_v36, 6 }
 0x239   : > { %6750 = vrot.lane.b32.xlu1 %v6749_v16, %s7756_s30  ;;  %v1881_v59 = vmul.f32 %v12735_v23, %v12734_v29  ;;  %v7228_v16 = vld [vmem:[%s12010_s4 + $0x10] sm:$0xff]   ;;  %v1634_v5 = vadd.f32 %v1618_v20, %v1518_v1  ;;  %v1880_v29 = vmul.f32 %v12720_v43, %v12736_v53  ;;  %v12738_v20 = vrot.slane %v9578_v30, 6 }
 0x23a   : > { %v1804_v39 = vadd.f32 %v9017_v34, %v1781_v44  ;;  %v6759_v38 = vpack.i.bf16 %v1943_v57, %v1942_v32  ;;  %v9630_v44 = vmul.f32 %v12543_v28, %v12664_v61  ;;  %v1899_v32 = vrot.slane %v9332_v25, 2  ;;  %6231 = vmatpush3.bf16.msra.mxu0 %v7228_v16  ;;  %v12747_v9 = vld [vmem:[#allocation29_spill] sm:$0xff] }
 0x23b   : > { %v1782_v57 = vadd.f32 %v1766_v42, %v1634_v5  ;;  %v663_v45 = vsel %vm653_vm0, %v12739_v15, %v12738_v20  ;;  %v6769_v35 = vpack.i.bf16 %v1881_v59, %v1880_v29  ;;  %6232 = vmatprep.subr.bf16.mxu0 %v7229_v27  ;;  %v7231_v5 = vld [vmem:[%s12010_s4 + $0x40] sm:$0xff]   ;;  %v12741_v53 = vrot.slane %v9339_v33, 2  ;;  %v12748_v11 = vld [vmem:[#allocation105_spill] sm:$0xff] }
 0x23c   : > { %v9632_v1 = vmax.f32 %v1804_v39, 0.0  ;;  %v874_v39 = vmul.f32 %v9336_v22, %v792_v6  ;;  %v12742_v29 = vld [vmem:[#allocation50_spill] sm:$0xff]  ;;  %v9663_v27 = vmul.f32 %v12640_v0, %v12704_v63  ;;  %v12744_v20 = vrot.slane %v9403_v48, 2 }
 0x23d   : > { %6760 = vrot.lane.b32.xlu1 %v6759_v38, %s7757_s24  ;;  %v1805_v16 = vadd.f32 %v9017_v34, %v1782_v57  ;;  %v9657_v36 = vsel %vm934_vm1, %v12741_v53, %v1899_v32  ;;  %v758_v59 = vmul.f32 %v12742_v29, %v663_v45  ;;  %v12743_v57 = vrot.slane %v9597_v10, 2 }
 0x23e   : > { %12737 = vst [vmem:[#allocation160_spill] sm:$0xff] %v9632_v1  ;;  %v9650_v42 = vpop.permute.xlu1 %1316  ;;  %v1836_v6 = vrot.slane %v9632_v1, 6  ;;  %v12746_v45 = vrot.slane %v9632_v1, 2  ;;  %6233 = vmatpush3.bf16.msra.mxu0 %v7230_v2  ;;  %v2008_v48 = vmul.f32 %v9657_v36, %v12747_v9  ;;  %v12756_v9 = vld [vmem:[#allocation138_spill] sm:$0xff] }
 0x23f   : > { %12740 = vst [vmem:[#allocation161_spill] sm:$0xff] %v9650_v42  ;;  %v943_v15 = vsel %vm934_vm1, %v12744_v20, %v12743_v57  ;;  %v9673_v7 = vmax.f32 %v1805_v16, 0.0  ;;  %v1962_v20 = vmul.f32 %v9657_v36, %v9037_v58  ;;  %6234 = vmatprep.subr.bf16.mxu0 %v7231_v5 }
 0x240   : > { %v1023_v53 = vmul.f32 %v9406_v50, %v943_v15  ;;  %v9680_v29 = vsel %vm934_vm1, %v1899_v32, %v12746_v45  ;;  %v12749_v32 = vrot.slane %v9332_v25, 6  ;;  %v7232_v45 = vld [vmem:[%s12010_s4] sm:$0xff]  }
 0x241   : > { %12745 = vst [vmem:[#allocation162_spill] sm:$0xff] %v9673_v7  ;;  %6770 = vrot.lane.b32.xlu1 %v6769_v35, %s7755_s25  ;;  %v2009_v57 = vmul.f32 %v9680_v29, %v12748_v11  ;;  %v1963_v16 = vmul.f32 %v9680_v29, %v9126_v55  ;;  %v890_v35 = vadd.f32 %v874_v39, %v758_v59  ;;  %v12752_v55 = vrot.slane %v9630_v44, 6  ;;  %v9708_v59 = vpop.permute.xlu0 %1728 }
 0x242   : > { %v9695_v2 = vsel %vm653_vm0, %v12749_v32, %v1836_v6  ;;  %v12753_v39 = vrot.slane %v9446_v62, 6  ;;  %12754 = vst [vmem:[#allocation165_spill] sm:$0xff] %v9708_v59  ;;  %v12755_v32 = vld [vmem:[#allocation142_spill] sm:$0xff]  ;;  %v12758_v19 = vrot.slane %v9673_v7, 6  ;;  %v12760_v62 = vld [vmem:[#allocation65_spill] sm:$0xff]  ;;  %6235 = vmatpush3.bf16.msra.mxu0 %v7232_v45  ;;  %v12765_v45 = vld [vmem:[#allocation139_spill] sm:$0xff] }
 0x243   : > { %12750 = vst [vmem:[#allocation163_spill] sm:$0xff] %v9695_v2  ;;  %v9700_v38 = vpop.permute.xlu1 %847  ;;  %v2510_v58 = vpack.c.bf16 %v2009_v57, %v2008_v48  ;;  %v6794_v11 = vpack.i.bf16 %v1963_v16, %v1962_v20  ;;  %v1039_v15 = vadd.f32 %v1023_v53, %v890_v35  ;;  %v12757_v41 = vpack.i.bf16 %v12755_v32, %v12756_v9  ;;  %v12763_v35 = vld [vmem:[#allocation33_spill] sm:$0xff] }
 0x244   : > { %12751 = vst [vmem:[#allocation164_spill] sm:$0xff] %v9700_v38  ;;  %v1090_v5 = vsel %vm653_vm0, %v12753_v39, %v12752_v55  ;;  %v9718_v48 = vsel %vm653_vm0, %v1836_v6, %v12758_v19  ;;  %v1978_v55 = vmul.f32 %v9695_v2, %v9183_v14  ;;  %v9729_v9 = vmul.f32 %v12657_v60, %v12712_v51  ;;  %v12762_v19 = vld [vmem:[#allocation91_spill] sm:$0xff] }
 0x245   : > { %6780 = vrot.lane.b32.xlu1 %v12757_v41, %s7756_s30  ;;  %12759 = vst [vmem:[#allocation142_spill] sm:$0xff] %v9718_v48  ;;  %6509 = vmatmul.mubr.msk.bf16.vlgmr.msra.gmra.mxu1 %vm2406_vm2, %v2510_v58  ;;  %v1979_v53 = vmul.f32 %v9718_v48, %v12760_v62  ;;  %v12761_v41 = vld [vmem:[#allocation25_spill] sm:$0xff]  ;;  %v1883_v6 = vmul.f32 %v9060_v12, %v12762_v19  ;;  %v12766_v62 = vld [vmem:[#allocation143_spill] sm:$0xff]  ;;  %v12770_v19 = vrot.slane %v9485_v47, 2 }
 0x246   : > { %6795 = vrot.lane.b32.xlu0 %v6794_v11, %s7755_s25  ;;  %v1171_v20 = vmul.f32 %v12761_v41, %v1090_v5  ;;  %v9736_v58 = vmul.f32 %v12614_v8, %v12658_v54  ;;  %v1995_v16 = vmul.f32 %v9673_v7, %v9313_v37  ;;  %v9742_v39 = vmul.f32 %v9520_v21, %v12763_v35 }
 0x247   : > { %v6804_v11 = vpack.i.bf16 %v1979_v53, %v1978_v55  ;;  %v9746_v5 = vmul.f32 %v12616_v31, %v12664_v61  ;;  %v12767_v14 = vpack.i.bf16 %v12765_v45, %v12766_v62  ;;  %v12768_v55 = vld [vmem:[#allocation73_spill] sm:$0xff]  ;;  %v12769_v37 = vrot.slane %v9663_v27, 2  ;;  %v9768_v62 = vpop.permute.xlu0 %1740 }
 0x248   : > { %v1187_v32 = vadd.f32 %v1171_v20, %v1039_v15  ;;  %v1882_v53 = vmul.f32 %v9055_v40, %v12768_v55  ;;  %v1994_v12 = vmul.f32 %v9632_v1, %v9286_v18  ;;  %12772 = vst [vmem:[#allocation33_spill] sm:$0xff] %v9768_v62  ;;  %v1207_v45 = vmul.f32 %v8562_v49, %v12664_v61 }
 0x249   : > { %v9748_v57 = vpop.permute.xlu1 %992  ;;  %6790 = vrot.lane.b32.xlu1 %v12767_v14, %s7757_s24  ;;  %v1273_v15 = vsel %vm934_vm1, %v12770_v19, %v12769_v37  ;;  %v9775_v37 = vmul.f32 %v12543_v28, %v12704_v63  ;;  %v12787_v62 = vrot.slane %v9742_v39, 2 }
 0x24a   : > { %12764 = vst [vmem:[#allocation138_spill] sm:$0xff] %v9748_v57  ;;  %6805 = vrot.lane.b32.xlu0 %v6804_v11, %s7756_s30  ;;  %v12771_v57 = vld [vmem:[#allocation120_spill] sm:$0xff]  ;;  %v1355_v47 = vmul.f32 %v9650_v42, %v1273_v15  ;;  %v6799_v55 = vpack.i.bf16 %v1883_v6, %v1882_v53  ;;  %v6814_v19 = vpack.i.bf16 %v1995_v16, %v1994_v12  ;;  %v12773_v11 = vld [vmem:[#allocation117_spill] sm:$0xff]  ;;  %v12774_v12 = vrot.slane %v9729_v9, 6  ;;  %v12780_v53 = vld [vmem:[#allocation150_spill] sm:$0xff] }
 0x24b   : > { %v1931_v14 = vmul.f32 %v9357_v4, %v12771_v57  ;;  %v1930_v20 = vmul.f32 %v9347_v52, %v12773_v11  ;;  %v793_v4 = vmul.f32 %v12619_v13, %v12658_v54  ;;  %v1541_v57 = vmul.f32 %v8546_v56, %v12712_v51  ;;  %v12779_v11 = vld [vmem:[#allocation109_spill] sm:$0xff] }
 0x24c   : > { %v1223_v40 = vadd.f32 %v1207_v45, %v1187_v32  ;;  %v12775_v16 = vrot.slane %v9493_v3, 6  ;;  %v12778_v45 = vld [vmem:[#allocation151_spill] sm:$0xff]  ;;  %v1947_v42 = vmul.f32 %v12780_v53, %v12779_v11  ;;  %v12781_v3 = vrot.slane %v9736_v58, 6 }
 0x24d   : > { %6800 = vrot.lane.b32.xlu1 %v6799_v55, %s7755_s25  ;;  %v6809_v54 = vpack.i.bf16 %v1931_v14, %v1930_v20  ;;  %v12777_v55 = vld [vmem:[#allocation119_spill] sm:$0xff]  ;;  %v12788_v53 = vrot.slane %v9527_v26, 2 }
 0x24e   : > { %v1420_v52 = vsel %vm653_vm0, %v12775_v16, %v12774_v12  ;;  %v9793_v15 = vpop.permute.xlu1 %1464  ;;  %6815 = vrot.lane.b32.xlu0 %v6814_v19, %s7757_s24  ;;  %v1371_v18 = vadd.f32 %v1355_v47, %v1223_v40  ;;  %v1946_v6 = vmul.f32 %v12778_v45, %v12777_v55  ;;  %v12782_v12 = vrot.slane %v9578_v30, 6  ;;  %v12783_v19 = vld [vmem:[#allocation79_spill] sm:$0xff]  ;;  %v12784_v40 = vld [vmem:[#allocation92_spill] sm:$0xff]  ;;  %v9810_v47 = vpop.permute.xlu0 %1476  ;;  %v12786_v55 = vld [vmem:[#allocation49_spill] sm:$0xff] }
 0x24f   : > { %12776 = vst [vmem:[#allocation139_spill] sm:$0xff] %v9793_v15  ;;  %v1503_v32 = vmul.f32 %v9793_v15, %v1420_v52  ;;  %v875_v20 = vmul.f32 %v12783_v19, %v793_v4  ;;  %v1619_v14 = vmul.f32 %v12784_v40, %v1541_v57  ;;  %12785 = vst [vmem:[#allocation143_spill] sm:$0xff] %v9810_v47  ;;  %v12790_v4 = vrot.slane %v9597_v10, 2 }
 0x250   : > { %v662_v16 = vsel %vm653_vm0, %v12782_v12, %v12781_v3  ;;  %v1683_v30 = vsel %vm934_vm1, %v12788_v53, %v12787_v62  ;;  %v12789_v3 = vrot.slane %v9746_v5, 2  ;;  %v6819_v45 = vpack.i.bf16 %v1947_v42, %v1946_v6 }
 0x251   : > { %v1519_v52 = vadd.f32 %v1503_v32, %v1371_v18  ;;  %6810 = vrot.lane.b32.xlu1 %v6809_v54, %s7756_s30  ;;  %v759_v11 = vmul.f32 %v12786_v55, %v662_v16  ;;  %v12792_v18 = vld [vmem:[#allocation76_spill] sm:$0xff]  ;;  %v1767_v32 = vmul.f32 %v9708_v59, %v1683_v30  ;;  %v12793_v16 = vld [vmem:[#allocation154_spill] sm:$0xff]  ;;  %v9834_v62 = vmul.f32 %v12640_v0, %v12712_v51 }
 0x252   : > { %v942_v57 = vsel %vm934_vm1, %v12790_v4, %v12789_v3  ;;  %v9826_v12 = vpop.permute.xlu1 %1468  ;;  %v1884_v54 = vmul.f32 %v9339_v33, %v12792_v18  ;;  %v12794_v10 = vrot.slane %v9775_v37, 6  ;;  %v12795_v53 = vrot.slane %v9630_v44, 6  ;;  %v12796_v4 = vld [vmem:[#allocation136_spill] sm:$0xff] }
 0x253   : > { %12791 = vst [vmem:[#allocation166_spill] sm:$0xff] %v9826_v12  ;;  %v1024_v55 = vmul.f32 %v12793_v16, %v942_v57  ;;  %v1635_v26 = vadd.f32 %v1619_v14, %v1519_v52  ;;  %v1885_v18 = vmul.f32 %v9332_v25, %v12796_v4  ;;  %v891_v33 = vadd.f32 %v875_v20, %v759_v11  ;;  %v9850_v14 = vpop.permute.xlu0 %1480  ;;  %v12815_v59 = vld [vmem:[#allocation96_spill] sm:$0xff] }
 0x254   : > { %v1089_v3 = vsel %vm653_vm0, %v12795_v53, %v12794_v10  ;;  %v9848_v42 = vmul.f32 %v12657_v60, %v12763_v35  ;;  %12797 = vst [vmem:[#allocation167_spill] sm:$0xff] %v9850_v14  ;;  %v12799_v53 = vld [vmem:[#allocation108_spill] sm:$0xff]  ;;  %v1901_v20 = vrot.slane %v9673_v7, 2 }
 0x255   : > { %v1172_v30 = vmul.f32 %v9554_v24, %v1089_v3  ;;  %v1783_v57 = vadd.f32 %v1767_v32, %v1635_v26  ;;  %6820 = vrot.lane.b32.xlu1 %v6819_v45, %s7757_s24  ;;  %v6829_v6 = vpack.i.bf16 %v1885_v18, %v1884_v54  ;;  %v1040_v44 = vadd.f32 %v1024_v55, %v891_v33  ;;  %v12800_v18 = vld [vmem:[#allocation124_spill] sm:$0xff]  ;;  %v12802_v3 = vld [vmem:[#allocation53_spill] sm:$0xff] }
 0x256   : > { %v1933_v11 = vmul.f32 %v9680_v29, %v12799_v53  ;;  %v12283_v32 = vrot.slane %v9834_v62, 2  ;;  %v1932_v54 = vmul.f32 %v9657_v36, %v12800_v18  ;;  %v12804_v36 = vrot.slane %v9663_v27, 2  ;;  %v12808_v18 = vld [vmem:[#allocation37_spill] sm:$0xff]  ;;  %v12809_v27 = vld [vmem:[#allocation114_spill] sm:$0xff] }
 0x257   : > { %v1806_v52 = vadd.f32 %v9017_v34, %v1783_v57  ;;  %v9853_v10 = vpop.permute.xlu1 %1140  ;;  %v1188_v45 = vadd.f32 %v1172_v30, %v1040_v44  ;;  %v1208_v34 = vmul.f32 %v8562_v49, %v12704_v63  ;;  %v1949_v57 = vmul.f32 %v9718_v48, %v12802_v3  ;;  %v9882_v33 = vpop.permute.xlu0 %1600  ;;  %v12811_v48 = vld [vmem:[#allocation149_spill] sm:$0xff] }
 0x258   : > { %12798 = vst [vmem:[#allocation168_spill] sm:$0xff] %v9853_v10  ;;  %v6839_v29 = vpack.i.bf16 %v1933_v11, %v1932_v54  ;;  %v12803_v44 = vrot.slane %v9632_v1, 2  ;;  %12805 = vst [vmem:[#allocation170_spill] sm:$0xff] %v9882_v33  ;;  %v12806_v54 = vld [vmem:[#allocation113_spill] sm:$0xff]  ;;  %v9893_v3 = vmul.f32 %v9520_v21, %v12808_v18  ;;  %v12813_v25 = vrot.slane %v9848_v42, 6 }
 0x259   : > { %v9859_v26 = vmax.f32 %v1806_v52, 0.0  ;;  %6830 = vrot.lane.b32.xlu1 %v6829_v6, %s7755_s25  ;;  %v1272_v52 = vsel %vm934_vm1, %v12804_v36, %v12283_v32  ;;  %v1224_v11 = vadd.f32 %v1208_v34, %v1188_v45  ;;  %v1948_v30 = vmul.f32 %v9695_v2, %v12806_v54  ;;  %v12810_v36 = vld [vmem:[#allocation99_spill] sm:$0xff]  ;;  %v12812_v34 = vld [vmem:[#allocation152_spill] sm:$0xff] }
 0x25a   : > { %v1918_v6 = vsel %vm934_vm1, %v12803_v44, %v1901_v20  ;;  %v12814_v54 = vrot.slane %v9729_v9, 6  ;;  %v1886_v9 = vmul.f32 %v9632_v1, %v9336_v22  ;;  %v12846_v1 = vld [vmem:[#allocation138_spill] sm:$0xff] }
 0x25b   : > { %v9867_v55 = vpop.permute.xlu1 %1144  ;;  %v12807_v53 = vrot.slane %v9859_v26, 2  ;;  %v2010_v4 = vmul.f32 %v1918_v6, %v12809_v27  ;;  %v1964_v45 = vmul.f32 %v1918_v6, %v12811_v48  ;;  %v1887_v27 = vmul.f32 %v9673_v7, %v12783_v19  ;;  %v12837_v19 = vld [vmem:[#allocation122_spill] sm:$0xff] }
 0x25c   : > { %12801 = vst [vmem:[#allocation169_spill] sm:$0xff] %v9867_v55  ;;  %v1419_v2 = vsel %vm653_vm0, %v12814_v54, %v12813_v25  ;;  %v12292_v25 = vrot.slane %v9893_v3, 2 }
 0x25d   : > { %6840 = vrot.lane.b32.xlu1 %v6839_v29, %s7756_s30  ;;  %v1917_v44 = vsel %vm934_vm1, %v1901_v20, %v12807_v53  ;;  %v1542_v53 = vmul.f32 %v8546_v56, %v12763_v35  ;;  %v6849_v20 = vpack.i.bf16 %v1949_v57, %v1948_v30  ;;  %v1504_v48 = vmul.f32 %v9826_v12, %v1419_v2 }
 0x25e   : > { %v2011_v32 = vmul.f32 %v1917_v44, %v12810_v36  ;;  %v1965_v29 = vmul.f32 %v1917_v44, %v12812_v34  ;;  %v1356_v36 = vmul.f32 %v12815_v59, %v1272_v52  ;;  %v6859_v2 = vpack.i.bf16 %v1887_v27, %v1886_v9 }
 0x25f   : > { %v1935_v52 = vmul.f32 %v1917_v44, %v12793_v16  ;;  %v10009_v16 = vmul.f32 %v12616_v31, %v12763_v35 }
 0x260   : > { %v9911_v33 = vpop.permute.xlu1 %1584  ;;  %v2513_v34 = vpack.c.bf16 %v2011_v32, %v2010_v4  ;;  %v6824_v14 = vpack.i.bf16 %v1965_v29, %v1964_v45  ;;  %v1372_v57 = vadd.f32 %v1356_v36, %v1224_v11  ;;  %v12817_v45 = vrot.slane %v9742_v39, 2 }
 0x261   : > { %12816 = vst [vmem:[#allocation37_spill] sm:$0xff] %v9911_v33  ;;  %v6736_v40 = vpop.permute.xlu0 %6735  ;;  %6850 = vrot.lane.b32.xlu1 %v6849_v20, %s7757_s24  ;;  %v1620_v30 = vmul.f32 %v9911_v33, %v1542_v53  ;;  %v1934_v36 = vmul.f32 %v1918_v6, %v9406_v50 }
 0x262   : > { %6512 = vmatprep.mubr.msk.bf16.mxu1 %vm2406_vm2, %v2513_v34  ;;  %6825 = vrot.lane.b32.xlu0 %v6824_v14, %s7755_s25  ;;  %v1520_v4 = vadd.f32 %v1504_v48, %v1372_v57  ;;  %v6737_v32 = vunpack.i.l.bf16 %v6736_v40  ;;  %v1682_v29 = vsel %vm934_vm1, %v12817_v45, %v12292_v25  ;;  %v6738_v27 = vunpack.i.h.bf16 %v6736_v40 }
 0x263   : > { %v6869_v53 = vpack.i.bf16 %v1935_v52, %v1934_v36  ;;  %v1838_v57 = vrot.slane %v9859_v26, 6  ;;  %v1061_v25 = vmul.f32 %v12543_v28, %v12712_v51 }
 0x264   : > { %v1636_v14 = vadd.f32 %v1620_v30, %v1520_v4  ;;  %v2457_v39 = vsel %vm2406_vm2, %v12720_v43, %v6737_v32  ;;  %v2458_v52 = vsel %vm2406_vm2, %v12735_v23, %v6738_v27 }
 0x265   : > { %v6746_v54 = vpop.permute.xlu0 %6745  ;;  %v9927_v11 = vpop.permute.xlu1 %1732  ;;  %6860 = vrot.lane.b32.xlu1 %v6859_v2, %s7755_s25  ;;  %v9936_v2 = vld [vmem:[#allocation7] ss:$0 sm:$0xff] }
 0x266   : > { %v1768_v44 = vmul.f32 %v9927_v11, %v1682_v29  ;;  %v6748_v48 = vunpack.i.h.bf16 %v6746_v54  ;;  %v6747_v34 = vunpack.i.l.bf16 %v6746_v54 }
 0x268   : > { %v1784_v20 = vadd.f32 %v1768_v44, %v1636_v14  ;;  %v2473_v54 = vsel %vm2423_vm3, %v2457_v39, %v6747_v34  ;;  %v2474_v45 = vsel %vm2423_vm3, %v2458_v52, %v6748_v48  ;;  %v627_v48 = vmul.f32 %v12614_v8, %v12664_v61  ;;  %v12823_v39 = vld [vmem:[#allocation67_spill] sm:$0xff] }
 0x269   : > { %v6756_v9 = vpop.permute.xlu0 %6755  ;;  %6870 = vrot.lane.b32.xlu1 %v6869_v53, %s7756_s30  ;;  %v9962_v34 = vmul.f32 %v12614_v8, %v12704_v63 }
 0x26a   : > { %v1807_v40 = vadd.f32 %v9936_v2, %v1784_v20  ;;  %v6758_v6 = vunpack.i.h.bf16 %v6756_v9  ;;  %v6757_v30 = vunpack.i.l.bf16 %v6756_v9  ;;  %v9939_v4 = vpop.permute.xlu1 %851  ;;  %v12820_v20 = vrot.slane %v9673_v7, 6  ;;  %v12847_v7 = vld [vmem:[#allocation56_spill] sm:$0xff] }
 0x26b   : > { %12818 = vst [vmem:[#allocation171_spill] sm:$0xff] %v9939_v4 }
 0x26c   : > { %v9945_v29 = vmax.f32 %v1807_v40, 0.0  ;;  %v2489_v32 = vsel %vm2440_vm4, %v2473_v54, %v6757_v30  ;;  %v2490_v36 = vsel %vm2440_vm4, %v2474_v45, %v6758_v6  ;;  %v9956_v27 = vsel %vm653_vm0, %v12820_v20, %v1838_v57 }
 0x26d   : > { %v2506_v14 = vpack.c.bf16 %v2490_v36, %v2489_v32  ;;  %12821 = vst [vmem:[#allocation173_spill] sm:$0xff] %v9956_v27  ;;  %v1980_v40 = vmul.f32 %v9956_v27, %v12823_v39  ;;  %v1950_v30 = vmul.f32 %v9956_v27, %v12761_v41  ;;  %v12825_v32 = vld [vmem:[#allocation90_spill] sm:$0xff]  ;;  %v911_v20 = vmul.f32 %v12616_v31, %v12704_v63 }
 0x26e   : > { %v9949_v44 = vpop.permute.xlu1 %855  ;;  %v12291_v53 = vrot.slane %v9945_v29, 6  ;;  %v1889_v36 = vmul.f32 %v9945_v29, %v9700_v38  ;;  %v794_v39 = vmul.f32 %v12619_v13, %v12664_v61 }
 0x26f   : > { %12819 = vst [vmem:[#allocation172_spill] sm:$0xff] %v9949_v44  ;;  %2736 = vmatprep.mubr.bf16.mxu0 %v2506_v14  ;;  %v643_v14 = vrot.slane %v627_v48, 6  ;;  %v12826_v48 = vld [vmem:[#allocation30_spill] sm:$0xff] }
 0x270   : > { %v9968_v9 = vsel %vm653_vm0, %v1838_v57, %v12291_v53  ;;  %v1997_v57 = vmul.f32 %v9945_v29, %v12825_v32  ;;  %v9988_v53 = vmul.f32 %v12616_v31, %v12712_v51  ;;  %v12829_v31 = vrot.slane %v9962_v34, 6 }
 0x271   : > { %12822 = vst [vmem:[#allocation174_spill] sm:$0xff] %v9968_v9  ;;  %v1981_v6 = vmul.f32 %v9968_v9, %v9478_v17  ;;  %v1951_v52 = vmul.f32 %v9968_v9, %v9554_v24 }
 0x273   : > { %v9978_v8 = vpop.permute.xlu1 %1328  ;;  %v6834_v54 = vpack.i.bf16 %v1981_v6, %v1980_v40  ;;  %v6879_v45 = vpack.i.bf16 %v1951_v52, %v1950_v30  ;;  %v9995_v6 = vmul.f32 %v12543_v28, %v12763_v35  ;;  %v1996_v30 = vmul.f32 %v9859_v26, %v12826_v48  ;;  %v12827_v52 = vld [vmem:[#allocation82_spill] sm:$0xff] }
 0x274   : > { %12824 = vst [vmem:[#allocation175_spill] sm:$0xff] %v9978_v8  ;;  %v1888_v17 = vmul.f32 %v9859_v26, %v12827_v52  ;;  %v795_v40 = vmul.f32 %v12619_v13, %v12704_v63  ;;  %v10017_v48 = vmul.f32 %v12640_v0, %v12763_v35  ;;  %v797_v63 = vmul.f32 %v12619_v13, %v12763_v35 }
 0x275   : > { %6835 = vrot.lane.b32.xlu0 %v6834_v54, %s7756_s30  ;;  %6880 = vrot.lane.b32.xlu1 %v6879_v45, %s7757_s24  ;;  %v10013_v54 = vmul.f32 %v12543_v28, %v12808_v18  ;;  %v6844_v45 = vpack.i.bf16 %v1997_v57, %v1996_v30  ;;  %v660_v28 = vsel %vm653_vm0, %v643_v14, %v12829_v31  ;;  %v927_v57 = vrot.slane %v911_v20, 2  ;;  %v12830_v30 = vld [vmem:[#allocation51_spill] sm:$0xff]  ;;  %v12833_v31 = vld [vmem:[#allocation54_spill] sm:$0xff] }
 0x276   : > { %v6889_v50 = vpack.i.bf16 %v1889_v36, %v1888_v17  ;;  %v877_v61 = vmul.f32 %v9700_v38, %v795_v40  ;;  %v1077_v17 = vrot.slane %v1061_v25, 6  ;;  %v761_v40 = vmul.f32 %v12830_v30, %v660_v28  ;;  %v12843_v30 = vld [vmem:[#allocation110_spill] sm:$0xff] }
 0x277   : > { %v879_v32 = vmul.f32 %v9949_v44, %v797_v63  ;;  %v12831_v38 = vrot.slane %v9736_v58, 6  ;;  %v10042_v25 = vmul.f32 %v12640_v0, %v12808_v18  ;;  %v1262_v28 = vrot.slane %v10017_v48, 2 }
 0x278   : > { %v10023_v41 = vpop.permute.xlu1 %1472  ;;  %v12834_v63 = vrot.slane %v9988_v53, 2  ;;  %v893_v36 = vadd.f32 %v877_v61, %v761_v40  ;;  %v12836_v22 = vrot.slane %v9995_v6, 6  ;;  %v12838_v48 = vrot.slane %v12837_v19, 2 }
 0x279   : > { %12828 = vst [vmem:[#allocation176_spill] sm:$0xff] %v10023_v41  ;;  %6845 = vrot.lane.b32.xlu0 %v6844_v45, %s7757_s24  ;;  %6890 = vrot.lane.b32.xlu1 %v6889_v50, %s7755_s25  ;;  %v661_v24 = vsel %vm653_vm0, %v12831_v38, %v643_v14  ;;  %v12832_v45 = vld [vmem:[#allocation38_spill] sm:$0xff]  ;;  %v876_v38 = vmul.f32 %v12827_v52, %v794_v39  ;;  %v12835_v14 = vrot.slane %v9746_v5, 2  ;;  %v12841_v39 = vld [vmem:[#allocation127_spill] sm:$0xff]  ;;  %v12845_v19 = vrot.slane %v10013_v54, 6 }
 0x27a   : > { %v763_v50 = vmul.f32 %v12833_v31, %v12832_v45  ;;  %v940_v58 = vsel %vm934_vm1, %v927_v57, %v12834_v63  ;;  %v1087_v45 = vsel %vm653_vm0, %v1077_v17, %v12836_v22  ;;  %v12839_v31 = vrot.slane %v10009_v16, 2 }
 0x27b   : > { %v941_v20 = vsel %vm934_vm1, %v12835_v14, %v927_v57  ;;  %v1026_v40 = vmul.f32 %v12841_v39, %v940_v58  ;;  %v1174_v5 = vmul.f32 %v9867_v55, %v1087_v45  ;;  %v12842_v14 = vld [vmem:[#allocation52_spill] sm:$0xff]  ;;  %v12844_v22 = vrot.slane %v12843_v30, 6 }
 0x27c   : > { %v938_v63 = vsel %vm934_vm1, %v12839_v31, %v12838_v48  ;;  %v895_v52 = vadd.f32 %v879_v32, %v763_v50  ;;  %v760_v9 = vmul.f32 %v12842_v14, %v661_v24  ;;  %v1025_v31 = vmul.f32 %v12846_v1, %v941_v20  ;;  %v12849_v14 = vld [vmem:[#allocation36_spill] sm:$0xff] }
 0x27d   : > { %v10066_v61 = vpop.permute.xlu1 %1004  ;;  %v1085_v27 = vsel %vm653_vm0, %v12845_v19, %v12844_v22  ;;  %v12848_v45 = vrot.slane %v9775_v37, 6  ;;  %v1042_v50 = vadd.f32 %v1026_v40, %v893_v36  ;;  %v1395_v30 = vmul.f32 %v12657_v60, %v12808_v18 }
 0x27e   : > { %12840 = vst [vmem:[#allocation38_spill] sm:$0xff] %v10066_v61  ;;  %v1028_v57 = vmul.f32 %v10066_v61, %v938_v63  ;;  %v1176_v58 = vmul.f32 %v12847_v7, %v1085_v27  ;;  %v892_v63 = vadd.f32 %v876_v38, %v760_v9  ;;  %v10089_v22 = vmul.f32 %v12657_v60, %v12849_v14  ;;  %v12851_v38 = vld [vmem:[#allocation40_spill] sm:$0xff] }
 0x27f   : > { %v1088_v32 = vsel %vm653_vm0, %v12848_v45, %v1077_v17  ;;  %v1190_v19 = vadd.f32 %v1174_v5, %v1042_v50  ;;  %v12850_v17 = vrot.slane %v10042_v25, 2  ;;  %v10105_v40 = vmul.f32 %v9520_v21, %v12851_v38 }
 0x280   : > { %v1044_v24 = vadd.f32 %v1028_v57, %v895_v52  ;;  %v1173_v20 = vmul.f32 %v9853_v10, %v1088_v32  ;;  %v1041_v37 = vadd.f32 %v1025_v31, %v892_v63  ;;  %v1210_v52 = vmul.f32 %v8562_v49, %v12763_v35 }
 0x281   : > { %v1270_v9 = vsel %vm934_vm1, %v1262_v28, %v12850_v17  ;;  %v1411_v5 = vrot.slane %v1395_v30, 6  ;;  %v12306_v57 = vrot.slane %v10089_v22, 6  ;;  %v1660_v31 = vmul.f32 %v9520_v21, %v12849_v14 }
 0x282   : > { %v10092_v48 = vadd.f32 %v1176_v58, %v1044_v24  ;;  %v10094_v27 = vpop.permute.xlu1 %1148  ;;  %v1358_v36 = vmul.f32 %v9978_v8, %v1270_v9  ;;  %v1189_v58 = vadd.f32 %v1173_v20, %v1041_v37  ;;  %v1226_v45 = vadd.f32 %v1210_v52, %v1190_v19  ;;  %v12855_v52 = vld [vmem:[#allocation98_spill] sm:$0xff] }
 0x283   : > { %v1209_v32 = vmul.f32 %v8562_v49, %v12712_v51  ;;  %v12311_v24 = vrot.slane %v10105_v40, 2  ;;  %v1417_v63 = vsel %vm653_vm0, %v1411_v5, %v12306_v57  ;;  %v12853_v20 = vrot.slane %v9834_v62, 2 }
 0x284   : > { %v1374_v35 = vadd.f32 %v1358_v36, %v1226_v45  ;;  %v1506_v21 = vmul.f32 %v9810_v47, %v1417_v63  ;;  %v12854_v37 = vrot.slane %v9848_v42, 6  ;;  %v1544_v9 = vmul.f32 %v8546_v56, %v12849_v14 }
 0x285   : > { %v1225_v30 = vadd.f32 %v1209_v32, %v1189_v58  ;;  %v1271_v19 = vsel %vm934_vm1, %v12853_v20, %v1262_v28  ;;  %v1676_v45 = vrot.slane %v1660_v31, 2  ;;  %v1543_v62 = vmul.f32 %v8546_v56, %v12808_v18 }
 0x286   : > { %v1418_v17 = vsel %vm653_vm0, %v12854_v37, %v1411_v5  ;;  %v1357_v36 = vmul.f32 %v12855_v52, %v1271_v19  ;;  %v1522_v28 = vadd.f32 %v1506_v21, %v1374_v35  ;;  %v12857_v19 = vld [vmem:[#allocation33_spill] sm:$0xff]  ;;  %v796_v37 = vmul.f32 %v12619_v13, %v12712_v51 }
 0x287   : > { %v10112_v50 = vpop.permute.xlu1 %1588  ;;  %v1505_v58 = vmul.f32 %v10023_v41, %v1418_v17  ;;  %v1680_v42 = vsel %vm934_vm1, %v1676_v45, %v12311_v24  ;;  %v12858_v21 = vrot.slane %v9893_v3, 2  ;;  %v1248_v3 = vmul.f32 %v12640_v0, %v12849_v14 }
 0x288   : > { %12852 = vst [vmem:[#allocation122_spill] sm:$0xff] %v10112_v50  ;;  %v1373_v5 = vadd.f32 %v1357_v36, %v1225_v30  ;;  %v1621_v20 = vmul.f32 %v10112_v50, %v1543_v62  ;;  %v1770_v31 = vmul.f32 %v12857_v19, %v1680_v42  ;;  %v878_v43 = vmul.f32 %v9939_v4, %v796_v37  ;;  %v12859_v30 = vld [vmem:[#allocation35_spill] sm:$0xff] }
 0x289   : > { %v12860_v36 = vrot.slane %v12859_v30, 6  ;;  %v12861_v62 = vrot.slane %v9962_v34, 6  ;;  %v1903_v34 = vrot.slane %v9945_v29, 2  ;;  %v12863_v37 = vrot.slane %v10009_v16, 2 }
 0x28a   : > { %v1521_v57 = vadd.f32 %v1505_v58, %v1373_v5  ;;  %v12862_v58 = vld [vmem:[#allocation55_spill] sm:$0xff]  ;;  %v12868_v16 = vrot.slane %v9995_v6, 6 }
 0x28b   : > { %v10134_v32 = vpop.permute.xlu1 %1592  ;;  %v659_v42 = vsel %vm653_vm0, %v12861_v62, %v12860_v36  ;;  %v12869_v62 = vrot.slane %v9859_v26, 2 }
 0x28c   : > { %12856 = vst [vmem:[#allocation110_spill] sm:$0xff] %v10134_v32  ;;  %v1622_v63 = vmul.f32 %v10134_v32, %v1544_v9  ;;  %v1681_v9 = vsel %vm934_vm1, %v12858_v21, %v1676_v45  ;;  %v1637_v13 = vadd.f32 %v1621_v20, %v1521_v57  ;;  %v10165_v45 = vmul.f32 %v12657_v60, %v12851_v38  ;;  %v12866_v21 = vld [vmem:[#allocation23_spill] sm:$0xff] }
 0x28d   : > { %v12864_v57 = vrot.slane %v9988_v53, 2 }
 0x28e   : > { %v1638_v17 = vadd.f32 %v1622_v63, %v1522_v28  ;;  %v762_v28 = vmul.f32 %v12862_v58, %v659_v42  ;;  %v1413_v30 = vrot.slane %v10165_v45, 6  ;;  %v1916_v42 = vsel %vm934_vm1, %v12869_v62, %v1903_v34 }
 0x28f   : > { %v939_v20 = vsel %vm934_vm1, %v12864_v57, %v12863_v37 }
 0x290   : > { %v1786_v35 = vadd.f32 %v1770_v31, %v1638_v17  ;;  %v10150_v23 = vpop.permute.xlu1 %1736  ;;  %v894_v31 = vadd.f32 %v878_v43, %v762_v28  ;;  %v1027_v60 = vmul.f32 %v12866_v21, %v939_v20  ;;  %v12867_v43 = vrot.slane %v10013_v54, 6  ;;  %v12870_v54 = vld [vmem:[#allocation130_spill] sm:$0xff]  ;;  %v12873_v20 = vld [vmem:[#allocation161_spill] sm:$0xff] }
 0x291   : > { %v1769_v51 = vmul.f32 %v10150_v23, %v1681_v9  ;;  %v1264_v9 = vrot.slane %v1248_v3, 2  ;;  %v1212_v28 = vmul.f32 %v8562_v49, %v12849_v14 }
 0x292   : > { %v1809_v63 = vadd.f32 %v9936_v2, %v1786_v35  ;;  %v1086_v53 = vsel %vm653_vm0, %v12868_v16, %v12867_v43  ;;  %v1936_v43 = vmul.f32 %v1916_v42, %v12846_v1 }
 0x293   : > { %v1785_v5 = vadd.f32 %v1769_v51, %v1637_v13  ;;  %v1043_v13 = vadd.f32 %v1027_v60, %v894_v31  ;;  %v1211_v51 = vmul.f32 %v8562_v49, %v12808_v18  ;;  %v1175_v3 = vmul.f32 %v10094_v27, %v1086_v53  ;;  %v12872_v49 = vld [vmem:[#allocation158_spill] sm:$0xff] }
 0x294   : > { %v10174_v17 = vmax.f32 %v1809_v63, 0.0  ;;  %v12871_v63 = vrot.slane %v12870_v54, 2  ;;  %v1228_v18 = vadd.f32 %v1212_v28, %v10092_v48  ;;  %v2012_v14 = vmul.f32 %v1916_v42, %v12872_v49  ;;  %v12875_v28 = vld [vmem:[#allocation159_spill] sm:$0xff] }
 0x295   : > { %v1808_v35 = vadd.f32 %v9936_v2, %v1785_v5  ;;  %v10177_v0 = vpop.permute.xlu1 %1332  ;;  %v12874_v48 = vrot.slane %v9945_v29, 6 }
 0x296   : > { %12865 = vst [vmem:[#allocation56_spill] sm:$0xff] %v10177_v0  ;;  %v1268_v6 = vsel %vm934_vm1, %v1264_v9, %v12871_v63  ;;  %v12309_v31 = vrot.slane %v10174_v17, 6 }
 0x297   : > { %v10187_v36 = vmax.f32 %v1808_v35, 0.0  ;;  %v1966_v35 = vmul.f32 %v1916_v42, %v12873_v20  ;;  %v1191_v42 = vadd.f32 %v1175_v3, %v1043_v13 }
 0x299   : > { %v10202_v45 = vpop.permute.xlu1 %1336  ;;  %v12310_v5 = vrot.slane %v10187_v36, 2  ;;  %v1840_v37 = vrot.slane %v10187_v36, 6 }
 0x29a   : > { %v1360_v57 = vmul.f32 %v10202_v45, %v1268_v6  ;;  %v12876_v6 = vrot.slane %v10042_v25, 2  ;;  %v6766_v25 = vpop.permute.xlu0 %6765 }
 0x29b   : > { %v1915_v60 = vsel %vm934_vm1, %v1903_v34, %v12310_v5  ;;  %v10220_v16 = vsel %vm653_vm0, %v1840_v37, %v12309_v31  ;;  %v10226_v53 = vsel %vm653_vm0, %v12874_v48, %v1840_v37  ;;  %v12877_v5 = vld [vmem:[#allocation126_spill] sm:$0xff] }
 0x29c   : > { %v1376_v62 = vadd.f32 %v1360_v57, %v1228_v18  ;;  %v2013_v54 = vmul.f32 %v1915_v60, %v12875_v28  ;;  %v1967_v63 = vmul.f32 %v1915_v60, %v12815_v59  ;;  %v1937_v34 = vmul.f32 %v1915_v60, %v12841_v39  ;;  %v12901_v59 = vld [vmem:[#allocation44_spill] sm:$0xff] }
 0x29d   : > { %v1269_v31 = vsel %vm934_vm1, %v12876_v6, %v1264_v9  ;;  %v12878_v24 = vrot.slane %v12877_v5, 6  ;;  %v1982_v37 = vmul.f32 %v10226_v53, %v9793_v15  ;;  %v1983_v13 = vmul.f32 %v10220_v16, %v9826_v12  ;;  %v12897_v15 = vld [vmem:[#allocation135_spill] sm:$0xff] }
 0x29e   : > { %v10241_v18 = vpop.permute.xlu1 %1484  ;;  %v2516_v57 = vpack.c.bf16 %v2013_v54, %v2012_v14  ;;  %v6854_v48 = vpack.i.bf16 %v1967_v63, %v1966_v35  ;;  %v6899_v20 = vpack.i.bf16 %v1937_v34, %v1936_v43  ;;  %v1359_v3 = vmul.f32 %v10177_v0, %v1269_v31  ;;  %v12880_v43 = vld [vmem:[#allocation92_spill] sm:$0xff] }
 0x29f   : > { %v1415_v1 = vsel %vm653_vm0, %v1413_v30, %v12878_v24  ;;  %12879 = vst [vmem:[#allocation36_spill] sm:$0xff] %v10241_v18  ;;  %v1952_v5 = vmul.f32 %v10226_v53, %v9853_v10  ;;  %v1953_v24 = vmul.f32 %v10220_v16, %v9867_v55  ;;  %v1227_v14 = vadd.f32 %v1211_v51, %v1191_v42 }
 0x2a0   : > { %v1508_v9 = vmul.f32 %v10241_v18, %v1415_v1  ;;  %6513 = vmatmul.mubr.msk.bf16.gmra.mxu1 %vm2406_vm2, %v2516_v57  ;;  %6855 = vrot.lane.b32.xlu0 %v6854_v48, %s7755_s25  ;;  %v6864_v60 = vpack.i.bf16 %v1983_v13, %v1982_v37  ;;  %v1998_v31 = vmul.f32 %v10187_v36, %v12880_v43  ;;  %v12882_v57 = vrot.slane %v10089_v22, 6  ;;  %v6776_v37 = vpop.permute.xlu0 %6775 }
 0x2a1   : > { %6900 = vrot.lane.b32.xlu1 %v6899_v20, %s7756_s30  ;;  %v1375_v54 = vadd.f32 %v1359_v3, %v1227_v14  ;;  %v1545_v1 = vmul.f32 %v8546_v56, %v12851_v38  ;;  %v6909_v34 = vpack.i.bf16 %v1953_v24, %v1952_v5  ;;  %v1890_v6 = vmul.f32 %v10187_v36, %v9939_v4  ;;  %v12885_v5 = vld [vmem:[#allocation77_spill] sm:$0xff]  ;;  %v12902_v4 = vld [vmem:[#allocation146_spill] sm:$0xff] }
 0x2a2   : > { %v1524_v35 = vadd.f32 %v1508_v9, %v1376_v62  ;;  %v1416_v51 = vsel %vm653_vm0, %v12882_v57, %v1413_v30  ;;  %v1999_v20 = vmul.f32 %v10174_v17, %v9911_v33  ;;  %v12883_v62 = vld [vmem:[#allocation167_spill] sm:$0xff]  ;;  %v1891_v48 = vmul.f32 %v10174_v17, %v9949_v44  ;;  %v12900_v33 = vld [vmem:[#allocation41_spill] sm:$0xff] }
 0x2a3   : > { %v10258_v63 = vpop.permute.xlu1 %1596  ;;  %v1507_v42 = vmul.f32 %v12883_v62, %v1416_v51  ;;  %v12884_v9 = vld [vmem:[#allocation155_spill] sm:$0xff]  ;;  %v12886_v24 = vrot.slane %v12885_v5, 2  ;;  %v12887_v14 = vrot.slane %v10105_v40, 2  ;;  %v6778_v5 = vunpack.i.h.bf16 %v6776_v37 }
 0x2a4   : > { %12881 = vst [vmem:[#allocation40_spill] sm:$0xff] %v10258_v63  ;;  %6865 = vrot.lane.b32.xlu0 %v6864_v60, %s7756_s30  ;;  %v1623_v38 = vmul.f32 %v10258_v63, %v1545_v1  ;;  %v6874_v13 = vpack.i.bf16 %v1999_v20, %v1998_v31  ;;  %v6919_v3 = vpack.i.bf16 %v1891_v48, %v1890_v6  ;;  %v1844_v30 = vrot.slane %v12884_v9, 6  ;;  %v12889_v1 = vld [vmem:[#allocation39_spill] sm:$0xff] }
 0x2a5   : > { %6910 = vrot.lane.b32.xlu1 %v6909_v34, %s7757_s24  ;;  %v1523_v22 = vadd.f32 %v1507_v42, %v1375_v54  ;;  %v1679_v60 = vsel %vm934_vm1, %v12887_v14, %v12886_v24  ;;  %v1546_v34 = vmul.f32 %v8546_v56, %v12889_v1  ;;  %v12890_v54 = vld [vmem:[#allocation170_spill] sm:$0xff]  ;;  %v6767_v20 = vunpack.i.l.bf16 %v6766_v25  ;;  %v6786_v42 = vpop.permute.xlu0 %6785  ;;  %v12891_v14 = vld [vmem:[#allocation137_spill] sm:$0xff] }
 0x2a6   : > { %v6768_v48 = vunpack.i.h.bf16 %v6766_v25  ;;  %v6777_v24 = vunpack.i.l.bf16 %v6776_v37  ;;  %v12892_v12 = vrot.slane %v12891_v14, 6  ;;  %v1905_v1 = vrot.slane %v10174_v17, 2  ;;  %v12896_v37 = vld [vmem:[#allocation145_spill] sm:$0xff] }
 0x2a7   : > { %v1639_v51 = vadd.f32 %v1623_v38, %v1523_v22  ;;  %v1624_v6 = vmul.f32 %v12890_v54, %v1546_v34  ;;  %v6788_v34 = vunpack.i.h.bf16 %v6786_v42  ;;  %v6787_v25 = vunpack.i.l.bf16 %v6786_v42 }
 0x2a8   : > { %v10281_v57 = vpop.permute.xlu1 %1744  ;;  %6875 = vrot.lane.b32.xlu0 %v6874_v13, %s7757_s24  ;;  %v10293_v13 = vsel %vm653_vm0, %v1844_v30, %v12892_v12  ;;  %v2459_v12 = vsel %vm2406_vm2, %v12897_v15, %v6767_v20  ;;  %v10320_v15 = vmul.f32 %v12902_v4, %v12901_v59  ;;  %v12905_v4 = vld [vmem:[#allocation34_spill] sm:$0xff] }
 0x2a9   : > { %12888 = vst [vmem:[#allocation33_spill] sm:$0xff] %v10281_v57  ;;  %v1771_v31 = vmul.f32 %v10281_v57, %v1679_v60  ;;  %6920 = vrot.lane.b32.xlu1 %v6919_v3, %s7755_s25  ;;  %v1640_v22 = vadd.f32 %v1624_v6, %v1524_v35  ;;  %v12894_v3 = vld [vmem:[#allocation80_spill] sm:$0xff]  ;;  %v2475_v42 = vsel %vm2423_vm3, %v2459_v12, %v6777_v24 }
 0x2aa   : > { %v12899_v6 = vld [vmem:[#allocation60_spill] sm:$0xff]  ;;  %v10330_v12 = vsel %vm2440_vm4, %v2475_v42, %v6787_v25 }
 0x2ab   : > { %v1787_v40 = vadd.f32 %v1771_v31, %v1639_v51  ;;  %v12895_v51 = vld [vmem:[#allocation43_spill] sm:$0xff] }
 0x2ac   : > { %v10295_v56 = vpop.permute.xlu1 %1748  ;;  %v10303_v31 = vmul.f32 %v12896_v37, %v12895_v51  ;;  %v1863_v37 = vmul.f32 %v10293_v13, %v12900_v33 }
 0x2ad   : > { %12893 = vst [vmem:[#allocation35_spill] sm:$0xff] %v10295_v56  ;;  %v1810_v38 = vadd.f32 %v9936_v2, %v1787_v40  ;;  %v1772_v60 = vmul.f32 %v10295_v56, %v12894_v3  ;;  %v12898_v40 = vrot.slane %v10187_v36, 2  ;;  %v2460_v3 = vsel %vm2406_vm2, %v12899_v6, %v6768_v48  ;;  %v12904_v48 = vld [vmem:[#allocation165_spill] sm:$0xff] }
 0x2ae   : > { %v2476_v20 = vsel %vm2423_vm3, %v2460_v3, %v6778_v5  ;;  %v2018_v5 = vmul.f32 %v12905_v4, %v10281_v57 }
 0x2af   : > { %v10307_v39 = vmax.f32 %v1810_v38, 0.0  ;;  %v1788_v43 = vadd.f32 %v1772_v60, %v1640_v22  ;;  %v1914_v35 = vsel %vm934_vm1, %v12898_v40, %v1905_v1  ;;  %v12903_v22 = vld [vmem:[#allocation157_spill] sm:$0xff]  ;;  %v10333_v33 = vsel %vm2440_vm4, %v2476_v20, %v6788_v34 }
 0x2b0   : > { %v6741_v51 = vpop.permute.xlu1 %6740  ;;  %v2019_v60 = vmul.f32 %v12903_v22, %v10295_v56  ;;  %v2014_v6 = vmul.f32 %v1914_v35, %v12904_v48  ;;  %v1938_v25 = vmul.f32 %v1914_v35, %v12866_v21 }
 0x2b1   : > { %v1811_v38 = vadd.f32 %v9936_v2, %v1788_v43  ;;  %v1906_v40 = vrot.slane %v10307_v39, 2  ;;  %v1842_v24 = vrot.slane %v10307_v39, 6  ;;  %v1968_v43 = vmul.f32 %v1914_v35, %v12855_v52 }
 0x2b2   : > { %v2525_v42 = vpack.c.bf16 %v2019_v60, %v2018_v5  ;;  %v6743_v20 = vunpack.i.h.bf16 %v6741_v51  ;;  %v12906_v52 = vrot.slane %v10174_v17, 6  ;;  %v12907_v60 = vrot.slane %v12884_v9, 2 }
 0x2b3   : > { %v10337_v3 = vmax.f32 %v1811_v38, 0.0  ;;  %v1913_v2 = vsel %vm934_vm1, %v1905_v1, %v1906_v40 }
 0x2b4   : > { %v6751_v59 = vpop.permute.xlu1 %6750  ;;  %v2015_v44 = vmul.f32 %v1913_v2, %v9927_v11  ;;  %v1969_v10 = vmul.f32 %v1913_v2, %v9978_v8  ;;  %v1939_v34 = vmul.f32 %v1913_v2, %v10066_v61  ;;  %v10352_v48 = vsel %vm653_vm0, %v12906_v52, %v1842_v24 }
 0x2b5   : > { %v1843_v55 = vrot.slane %v10337_v3, 6  ;;  %v1907_v38 = vrot.slane %v10337_v3, 2  ;;  %v6753_v2 = vunpack.i.h.bf16 %v6751_v59  ;;  %v2408_v61 = vsel %vm2406_vm2, %v1863_v37, %v6743_v20 }
 0x2b6   : > { %v2519_v56 = vpack.c.bf16 %v2015_v44, %v2014_v6  ;;  %v6884_v57 = vpack.i.bf16 %v1969_v10, %v1968_v43  ;;  %v6929_v1 = vpack.i.bf16 %v1939_v34, %v1938_v25  ;;  %v6742_v44 = vunpack.i.l.bf16 %v6741_v51  ;;  %v12908_v6 = vld [vmem:[#allocation42_spill] sm:$0xff] }
 0x2b7   : > { %v10356_v35 = vsel %vm653_vm0, %v1843_v55, %v1844_v30  ;;  %v1911_v5 = vsel %vm934_vm1, %v1907_v38, %v12907_v60  ;;  %v1912_v10 = vsel %vm934_vm1, %v1906_v40, %v1907_v38  ;;  %v6752_v60 = vunpack.i.l.bf16 %v6751_v59 }
 0x2b8   : > { %v1862_v43 = vmul.f32 %v10356_v35, %v12908_v6  ;;  %v6761_v25 = vpop.permute.xlu1 %6760  ;;  %6516 = vmatprep.mubr.msk.bf16.mxu1 %vm2406_vm2, %v2519_v56  ;;  %6885 = vrot.lane.b32.xlu0 %v6884_v57, %s7755_s25  ;;  %v6796_v52 = vpop.permute.xlu0 %6795  ;;  %v2016_v30 = vmul.f32 %v1912_v10, %v10150_v23  ;;  %v2017_v34 = vmul.f32 %v1911_v5, %v12857_v19 }
 0x2b9   : > { %v6763_v21 = vunpack.i.h.bf16 %v6761_v25  ;;  %v6762_v8 = vunpack.i.l.bf16 %v6761_v25  ;;  %6930 = vrot.lane.b32.xlu1 %v6929_v1, %s7756_s30  ;;  %v10375_v56 = vsel %vm653_vm0, %v1842_v24, %v1843_v55  ;;  %v1984_v57 = vmul.f32 %v10352_v48, %v10023_v41 }
 0x2ba   : > { %v2407_v51 = vsel %vm2406_vm2, %v1862_v43, %v6742_v44  ;;  %v2522_v40 = vpack.c.bf16 %v2017_v34, %v2016_v30  ;;  %v2425_v6 = vsel %vm2423_vm3, %v2408_v61, %v6753_v2  ;;  %v6798_v37 = vunpack.i.h.bf16 %v6796_v52 }
 0x2bb   : > { %v2424_v38 = vsel %vm2423_vm3, %v2407_v51, %v6752_v60  ;;  %v1985_v59 = vmul.f32 %v10375_v56, %v9810_v47  ;;  %v1954_v1 = vmul.f32 %v10352_v48, %v10094_v27  ;;  %v1955_v55 = vmul.f32 %v10375_v56, %v12847_v7 }
 0x2bc   : > { %v6771_v20 = vpop.permute.xlu1 %6770  ;;  %6517 = vmatmul.mubr.msk.bf16.gmra.mxu1 %vm2406_vm2, %v2522_v40  ;;  %v6806_v24 = vpop.permute.xlu0 %6805  ;;  %v2441_v44 = vsel %vm2440_vm4, %v2424_v38, %v6762_v8  ;;  %v2442_v43 = vsel %vm2440_vm4, %v2425_v6, %v6763_v21  ;;  %v2000_v61 = vmul.f32 %v10307_v39, %v10112_v50  ;;  %v2001_v2 = vmul.f32 %v10337_v3, %v10134_v32  ;;  %v12909_v40 = vld [vmem:[#allocation66_spill] sm:$0xff]  ;;  %v12910_v6 = vld [vmem:[#allocation68_spill] sm:$0xff]  ;;  %v12912_v32 = vld [vmem:[#allocation75_spill] sm:$0xff] }
 0x2bd   : > { %v6894_v25 = vpack.i.bf16 %v1985_v59, %v1984_v57  ;;  %6520 = vmatprep.mubr.msk.bf16.mxu1 %vm2406_vm2, %v2525_v42  ;;  %v2509_v30 = vpack.c.bf16 %v10333_v33, %v10330_v12  ;;  %v6797_v34 = vunpack.i.l.bf16 %v6796_v52  ;;  %v6939_v60 = vpack.i.bf16 %v1955_v55, %v1954_v1  ;;  %v12911_v59 = vld [vmem:[#allocation31_spill] sm:$0xff] }
 0x2be   : > { %v2505_v51 = vpack.c.bf16 %v2442_v43, %v2441_v44  ;;  %v1892_v8 = vmul.f32 %v10307_v39, %v12909_v40  ;;  %v6773_v38 = vunpack.i.h.bf16 %v6771_v20  ;;  %v6772_v21 = vunpack.i.l.bf16 %v6771_v20 }
 0x2bf   : > { %6895 = vrot.lane.b32.xlu0 %v6894_v25, %s7756_s30  ;;  %v6808_v42 = vunpack.i.h.bf16 %v6806_v24  ;;  %v1893_v57 = vmul.f32 %v10337_v3, %v12910_v6  ;;  %v2462_v47 = vsel %vm2406_vm2, %v12911_v59, %v6798_v37  ;;  %6940 = vrot.lane.b32.xlu1 %v6939_v60, %s7757_s24  ;;  %v6807_v33 = vunpack.i.l.bf16 %v6806_v24  ;;  %v12913_v37 = vld [vmem:[#allocation116_spill] sm:$0xff] }
 0x2c0   : > { %2737 = vmatmul.mubr.bf16.vlgmr.msra.gmra.mxu0 %v2505_v51  ;;  %v6781_v12 = vpop.permute.xlu1 %6780  ;;  %v6816_v52 = vpop.permute.xlu0 %6815  ;;  %v1970_v1 = vmul.f32 %v1912_v10, %v10177_v0  ;;  %v1971_v55 = vmul.f32 %v1911_v5, %v10202_v45  ;;  %v6904_v43 = vpack.i.bf16 %v2001_v2, %v2000_v61  ;;  %v1940_v40 = vmul.f32 %v1912_v10, %v12912_v32  ;;  %v12914_v60 = vld [vmem:[#allocation128_spill] sm:$0xff] }
 0x2c1   : > { %v6783_v20 = vunpack.i.h.bf16 %v6781_v12  ;;  %v6782_v44 = vunpack.i.l.bf16 %v6781_v12  ;;  %v6949_v25 = vpack.i.bf16 %v1893_v57, %v1892_v8  ;;  %2744 = vmatprep.mubr.bf16.mxu0 %v2509_v30  ;;  %v6818_v41 = vunpack.i.h.bf16 %v6816_v52  ;;  %v12915_v10 = vld [vmem:[#allocation140_spill] sm:$0xff]  ;;  %v12916_v30 = vld [vmem:[#allocation141_spill] sm:$0xff] }
 0x2c2   : > { %v6817_v50 = vunpack.i.l.bf16 %v6816_v52  ;;  %v1941_v59 = vmul.f32 %v1911_v5, %v12913_v37  ;;  %v2461_v24 = vsel %vm2406_vm2, %v12914_v60, %v6797_v34  ;;  %v2410_v51 = vsel %vm2406_vm2, %v10303_v31, %v6773_v38 }
 0x2c3   : > { %v2409_v0 = vsel %vm2406_vm2, %v10320_v15, %v6772_v21  ;;  %v2478_v12 = vsel %vm2423_vm3, %v2462_v47, %v6808_v42  ;;  %6905 = vrot.lane.b32.xlu0 %v6904_v43, %s7757_s24  ;;  %v2477_v61 = vsel %vm2423_vm3, %v2461_v24, %v6807_v33  ;;  %6950 = vrot.lane.b32.xlu1 %v6949_v25, %s7755_s25  ;;  %v12918_v42 = vld [vmem:[#allocation24_spill] sm:$0xff]  ;;  %v12920_v24 = vld [vmem:[#allocation95_spill] sm:$0xff] }
 0x2c4   : > { %v2426_v2 = vsel %vm2423_vm3, %v2409_v0, %v6782_v44  ;;  %v6791_v5 = vpop.permute.xlu1 %6790  ;;  %v12917_v34 = vpack.c.bf16 %v12915_v10, %v12916_v30  ;;  %v6914_v31 = vpack.i.bf16 %v1971_v55, %v1970_v1  ;;  %v2427_v8 = vsel %vm2423_vm3, %v2410_v51, %v6783_v20  ;;  %v12921_v10 = vld [vmem:[#allocation97_spill] sm:$0xff] }
 0x2c5   : > { %v6793_v15 = vunpack.i.h.bf16 %v6791_v5  ;;  %v6792_v38 = vunpack.i.l.bf16 %v6791_v5  ;;  %v1986_v47 = vmul.f32 %v10356_v35, %v12883_v62  ;;  %v6959_v21 = vpack.i.bf16 %v1941_v59, %v1940_v40  ;;  %v12919_v40 = vld [vmem:[#allocation85_spill] sm:$0xff] }
 0x2c6   : > { %6521 = vmatmul.mubr.msk.bf16.gmra.mxu1 %vm2406_vm2, %v12917_v34  ;;  %v1956_v0 = vmul.f32 %v10356_v35, %v12918_v42  ;;  %v2493_v57 = vsel %vm2440_vm4, %v2477_v61, %v6817_v50  ;;  %v2494_v33 = vsel %vm2440_vm4, %v2478_v12, %v6818_v41  ;;  %v1987_v52 = vmul.f32 %v10293_v13, %v10241_v18  ;;  %v12922_v34 = vld [vmem:[#allocation46_spill] sm:$0xff] }
 0x2c7   : > { %6915 = vrot.lane.b32.xlu0 %v6914_v31, %s7755_s25  ;;  %v2443_v1 = vsel %vm2440_vm4, %v2426_v2, %v6792_v38  ;;  %v2444_v55 = vsel %vm2440_vm4, %v2427_v8, %v6793_v15  ;;  %6960 = vrot.lane.b32.xlu1 %v6959_v21, %s7756_s30  ;;  %v1957_v44 = vmul.f32 %v10293_v13, %v12919_v40  ;;  %v12923_v31 = vld [vmem:[#allocation32_spill] sm:$0xff]  ;;  %v12924_v15 = vld [vmem:[#allocation45_spill] sm:$0xff] }
 0x2c8   : > { %v6801_v20 = vpop.permute.xlu1 %6800  ;;  %v2508_v35 = vpack.c.bf16 %v2444_v55, %v2443_v1  ;;  %v2002_v50 = vmul.f32 %v12884_v9, %v10258_v63  ;;  %v6924_v41 = vpack.i.bf16 %v1987_v52, %v1986_v47  ;;  %v2512_v43 = vpack.c.bf16 %v2494_v33, %v2493_v57  ;;  %v12925_v38 = vld [vmem:[#allocation100_spill] sm:$0xff] }
 0x2c9   : > { %v6969_v25 = vpack.i.bf16 %v1957_v44, %v1956_v0  ;;  %v2003_v59 = vmul.f32 %v12891_v14, %v12890_v54  ;;  %v1972_v13 = vmul.f32 %v12905_v4, %v12920_v24  ;;  %v6803_v51 = vunpack.i.h.bf16 %v6801_v20 }
 0x2ca   : > { %2745 = vmatmul.mubr.bf16.gmra.mxu0 %v2508_v35  ;;  %v6802_v12 = vunpack.i.l.bf16 %v6801_v20  ;;  %v1973_v30 = vmul.f32 %v12903_v22, %v12921_v10  ;;  %v1866_v8 = vmul.f32 %v12923_v31, %v12922_v34  ;;  %v1867_v47 = vmul.f32 %v12925_v38, %v12924_v15  ;;  %v12933_v38 = vld [vmem:[#allocation48_spill] sm:$0xff]  ;;  %v12980_v15 = vld [vmem:[#allocation71_spill] sm:$0xff] }
 0x2cb   : > { %6925 = vrot.lane.b32.xlu0 %v6924_v41, %s7756_s30  ;;  %2752 = vmatprep.mubr.bf16.mxu0 %v2512_v43  ;;  %v6934_v61 = vpack.i.bf16 %v2003_v59, %v2002_v50  ;;  %v12926_v50 = vld [vmem:[#allocation88_spill] sm:$0xff]  ;;  %v12927_v41 = vld [vmem:[#allocation74_spill] sm:$0xff]  ;;  %v12929_v59 = vld [vmem:[#allocation147_spill] sm:$0xff] }
 0x2cc   : > { %6970 = vrot.lane.b32.xlu1 %v6969_v25, %s7757_s24  ;;  %v6811_v60 = vpop.permute.xlu1 %6810  ;;  %v6944_v0 = vpack.i.bf16 %v1973_v30, %v1972_v13  ;;  %v2412_v4 = vsel %vm2406_vm2, %v1867_v47, %v6803_v51  ;;  %v2411_v57 = vsel %vm2406_vm2, %v1866_v8, %v6802_v12  ;;  %v2005_v43 = vmul.f32 %v12927_v41, %v12926_v50  ;;  %v12928_v25 = vld [vmem:[#allocation148_spill] sm:$0xff]  ;;  %v12931_v13 = vld [vmem:[#allocation101_spill] sm:$0xff]  ;;  %v12932_v51 = vld [vmem:[#allocation134_spill] sm:$0xff] }
 0x2cd   : > { %v6813_v2 = vunpack.i.h.bf16 %v6811_v60  ;;  %v6812_v5 = vunpack.i.l.bf16 %v6811_v60  ;;  %v12930_v60 = vpack.i.bf16 %v12928_v25, %v12929_v59  ;;  %v2004_v12 = vmul.f32 %v12932_v51, %v12931_v13  ;;  %v12934_v47 = vld [vmem:[#allocation151_spill] sm:$0xff] }
 0x2cf   : > { %6935 = vrot.lane.b32.xlu0 %v6934_v61, %s7757_s24  ;;  %v2428_v1 = vsel %vm2423_vm3, %v2411_v57, %v6812_v5  ;;  %v2429_v22 = vsel %vm2423_vm3, %v2412_v4, %v6813_v2  ;;  %v6964_v30 = vpack.i.bf16 %v2005_v43, %v2004_v12  ;;  %v12936_v4 = vld [vmem:[#allocation150_spill] sm:$0xff] }
 0x2d0   : > { %v6821_v21 = vpop.permute.xlu1 %6820 }
 0x2d1   : > { %v6823_v33 = vunpack.i.h.bf16 %v6821_v21  ;;  %v6822_v52 = vunpack.i.l.bf16 %v6821_v21  ;;  %v1868_v21 = vmul.f32 %v12934_v47, %v12933_v38  ;;  %v12940_v47 = vld [vmem:[#allocation163_spill] sm:$0xff]  ;;  %v7259_v38 = vld [vmem:[%s12012_s6 + $0x98] sm:$0xff]  }
 0x2d3   : > { %6945 = vrot.lane.b32.xlu0 %v6944_v0, %s7755_s25  ;;  %v2445_v55 = vsel %vm2440_vm4, %v2428_v1, %v6822_v52  ;;  %v2446_v20 = vsel %vm2440_vm4, %v2429_v22, %v6823_v33  ;;  %v12935_v0 = vld [vmem:[#allocation47_spill] sm:$0xff] }
 0x2d4   : > { %v6831_v44 = vpop.permute.xlu1 %6830  ;;  %v2511_v35 = vpack.c.bf16 %v2446_v20, %v2445_v55  ;;  %v1869_v57 = vmul.f32 %v12936_v4, %v12935_v0  ;;  %v6826_v59 = vpop.permute.xlu0 %6825 }
 0x2d5   : > { %v6833_v2 = vunpack.i.h.bf16 %v6831_v44  ;;  %v6832_v5 = vunpack.i.l.bf16 %v6831_v44 }
 0x2d6   : > { %2753 = vmatmul.mubr.bf16.gmra.mxu0 %v2511_v35 }
 0x2d7   : > { %6955 = vrot.lane.b32.xlu0 %v12930_v60, %s7756_s30  ;;  %v2413_v52 = vsel %vm2406_vm2, %v1868_v21, %v6832_v5  ;;  %v2414_v1 = vsel %vm2406_vm2, %v1869_v57, %v6833_v2  ;;  %v12938_v5 = vld [vmem:[#allocation142_spill] sm:$0xff]  ;;  %v6828_v57 = vunpack.i.h.bf16 %v6826_v59 }
 0x2d8   : > { %v6841_v61 = vpop.permute.xlu1 %6840  ;;  %v12939_v2 = vld [vmem:[#allocation50_spill] sm:$0xff] }
 0x2d9   : > { %v6843_v31 = vunpack.i.h.bf16 %v6841_v61  ;;  %v6842_v8 = vunpack.i.l.bf16 %v6841_v61  ;;  %v12937_v61 = vld [vmem:[#allocation49_spill] sm:$0xff]  ;;  %v1870_v21 = vmul.f32 %v12940_v47, %v12939_v2 }
 0x2db   : > { %6965 = vrot.lane.b32.xlu0 %v6964_v30, %s7757_s24  ;;  %v2430_v20 = vsel %vm2423_vm3, %v2413_v52, %v6842_v8  ;;  %v2431_v44 = vsel %vm2423_vm3, %v2414_v1, %v6843_v31  ;;  %v1871_v30 = vmul.f32 %v12938_v5, %v12937_v61  ;;  %v12941_v5 = vld [vmem:[#allocation162_spill] sm:$0xff] }
 0x2dc   : > { %v6851_v33 = vpop.permute.xlu1 %6850  ;;  %v2464_v47 = vsel %vm2406_vm2, %v12941_v5, %v6828_v57  ;;  %v12944_v5 = vld [vmem:[#allocation173_spill] sm:$0xff] }
 0x2dd   : > { %v6853_v22 = vunpack.i.h.bf16 %v6851_v33  ;;  %v6852_v55 = vunpack.i.l.bf16 %v6851_v33  ;;  %v6827_v33 = vunpack.i.l.bf16 %v6826_v59 }
 0x2df   : > { %v2447_v35 = vsel %vm2440_vm4, %v2430_v20, %v6852_v55  ;;  %v2448_v41 = vsel %vm2440_vm4, %v2431_v44, %v6853_v22 }
 0x2e0   : > { %v6861_v43 = vpop.permute.xlu1 %6860  ;;  %v2514_v25 = vpack.c.bf16 %v2448_v41, %v2447_v35 }
 0x2e1   : > { %v6863_v60 = vunpack.i.h.bf16 %v6861_v43  ;;  %v6862_v51 = vunpack.i.l.bf16 %v6861_v43 }
 0x2e3   : > { %v2416_v52 = vsel %vm2406_vm2, %v1871_v30, %v6863_v60  ;;  %v2415_v1 = vsel %vm2406_vm2, %v1870_v21, %v6862_v51  ;;  %v12942_v60 = vld [vmem:[#allocation160_spill] sm:$0xff] }
 0x2e4   : > { %v6871_v12 = vpop.permute.xlu1 %6870  ;;  %v2463_v51 = vsel %vm2406_vm2, %v12942_v60, %v6827_v33  ;;  %v12943_v33 = vld [vmem:[#allocation52_spill] sm:$0xff] }
 0x2e5   : > { %v6873_v4 = vunpack.i.h.bf16 %v6871_v12  ;;  %v6872_v8 = vunpack.i.l.bf16 %v6871_v12 }
 0x2e7   : > { %v6836_v31 = vpop.permute.xlu0 %6835  ;;  %v2433_v41 = vsel %vm2423_vm3, %v2416_v52, %v6873_v4  ;;  %v2432_v43 = vsel %vm2423_vm3, %v2415_v1, %v6872_v8 }
 0x2e8   : > { %v6881_v22 = vpop.permute.xlu1 %6880  ;;  %v6838_v55 = vunpack.i.h.bf16 %v6836_v31  ;;  %v6837_v20 = vunpack.i.l.bf16 %v6836_v31 }
 0x2e9   : > { %v6883_v44 = vunpack.i.h.bf16 %v6881_v22  ;;  %v6882_v35 = vunpack.i.l.bf16 %v6881_v22 }
 0x2ea   : > { %v2479_v22 = vsel %vm2423_vm3, %v2463_v51, %v6837_v20  ;;  %v2480_v4 = vsel %vm2423_vm3, %v2464_v47, %v6838_v55 }
 0x2eb   : > { %v6846_v12 = vpop.permute.xlu0 %6845  ;;  %v2449_v18 = vsel %vm2440_vm4, %v2432_v43, %v6882_v35  ;;  %v2450_v59 = vsel %vm2440_vm4, %v2433_v41, %v6883_v44 }
 0x2ec   : > { %v6848_v30 = vunpack.i.h.bf16 %v6846_v12  ;;  %v6847_v21 = vunpack.i.l.bf16 %v6846_v12  ;;  %v2517_v31 = vpack.c.bf16 %v2450_v59, %v2449_v18  ;;  %v6891_v1 = vpop.permute.xlu1 %6890  ;;  %v1872_v12 = vmul.f32 %v12944_v5, %v12943_v33  ;;  %v12945_v18 = vld [vmem:[#allocation51_spill] sm:$0xff]  ;;  %v12946_v59 = vld [vmem:[#allocation174_spill] sm:$0xff] }
 0x2ed   : > { %v6893_v44 = vunpack.i.h.bf16 %v6891_v1  ;;  %v6892_v41 = vunpack.i.l.bf16 %v6891_v1  ;;  %v1873_v20 = vmul.f32 %v12946_v59, %v12945_v18 }
 0x2ee   : > { %v2495_v8 = vsel %vm2440_vm4, %v2479_v22, %v6847_v21  ;;  %v2496_v52 = vsel %vm2440_vm4, %v2480_v4, %v6848_v30 }
 0x2ef   : > { %v2515_v57 = vpack.c.bf16 %v2496_v52, %v2495_v8  ;;  %v2417_v30 = vsel %vm2406_vm2, %v1872_v12, %v6892_v41  ;;  %v2418_v21 = vsel %vm2406_vm2, %v1873_v20, %v6893_v44 }
 0x2f1   : > { %2760 = vmatprep.mubr.bf16.mxu0 %v2515_v57 }
 0x2f2   : > { %2761 = vmatmul.mubr.bf16.gmra.mxu0 %v2514_v25 }
 0x312   : > { %v6856_v35 = vpop.permute.xlu0 %6855 }
 0x313   : > { %v6901_v43 = vpop.permute.xlu1 %6900  ;;  %v6858_v47 = vunpack.i.h.bf16 %v6856_v35  ;;  %v6857_v25 = vunpack.i.l.bf16 %v6856_v35 }
 0x314   : > { %v6903_v60 = vunpack.i.h.bf16 %v6901_v43  ;;  %v6902_v55 = vunpack.i.l.bf16 %v6901_v43 }
 0x315   : > { %v2466_v59 = vsel %vm2406_vm2, %v9945_v29, %v6858_v47  ;;  %v2465_v35 = vsel %vm2406_vm2, %v9859_v26, %v6857_v25  ;;  %v1874_v26 = vmul.f32 %v10226_v53, %v12862_v58 }
 0x316   : > { %v6866_v51 = vpop.permute.xlu0 %6865  ;;  %v2434_v1 = vsel %vm2423_vm3, %v2417_v30, %v6902_v55  ;;  %v2435_v5 = vsel %vm2423_vm3, %v2418_v21, %v6903_v60 }
 0x317   : > { %v6911_v22 = vpop.permute.xlu1 %6910  ;;  %v6868_v52 = vunpack.i.h.bf16 %v6866_v51  ;;  %v6867_v57 = vunpack.i.l.bf16 %v6866_v51 }
 0x318   : > { %v6913_v4 = vunpack.i.h.bf16 %v6911_v22  ;;  %v6912_v8 = vunpack.i.l.bf16 %v6911_v22 }
 0x319   : > { %v2481_v51 = vsel %vm2423_vm3, %v2465_v35, %v6867_v57  ;;  %v2482_v55 = vsel %vm2423_vm3, %v2466_v59, %v6868_v52 }
 0x31a   : > { %v6876_v43 = vpop.permute.xlu0 %6875  ;;  %v2451_v62 = vsel %vm2440_vm4, %v2434_v1, %v6912_v8  ;;  %v2452_v41 = vsel %vm2440_vm4, %v2435_v5, %v6913_v4 }
 0x31b   : > { %v6878_v44 = vunpack.i.h.bf16 %v6876_v43  ;;  %v6877_v12 = vunpack.i.l.bf16 %v6876_v43  ;;  %v2520_v20 = vpack.c.bf16 %v2452_v41, %v2451_v62  ;;  %v6921_v47 = vpop.permute.xlu1 %6920  ;;  %v12947_v62 = vld [vmem:[#allocation54_spill] sm:$0xff] }
 0x31c   : > { %v6923_v4 = vunpack.i.h.bf16 %v6921_v47  ;;  %v6922_v8 = vunpack.i.l.bf16 %v6921_v47  ;;  %v1875_v25 = vmul.f32 %v10220_v16, %v12947_v62 }
 0x31d   : > { %v2497_v60 = vsel %vm2440_vm4, %v2481_v51, %v6877_v12  ;;  %v2498_v30 = vsel %vm2440_vm4, %v2482_v55, %v6878_v44 }
 0x31e   : > { %v2518_v29 = vpack.c.bf16 %v2498_v30, %v2497_v60  ;;  %v2419_v59 = vsel %vm2406_vm2, %v1874_v26, %v6922_v8  ;;  %v2420_v43 = vsel %vm2406_vm2, %v1875_v25, %v6923_v4 }
 0x320   : > { %2768 = vmatprep.mubr.bf16.mxu0 %v2518_v29 }
 0x321   : > { %2769 = vmatmul.mubr.bf16.gmra.mxu0 %v2517_v31 }
 0x32a   : > { %v6886_v21 = vpop.permute.xlu0 %6885 }
 0x32b   : > { %v6931_v22 = vpop.permute.xlu1 %6930  ;;  %v6888_v1 = vunpack.i.h.bf16 %v6886_v21  ;;  %v6887_v31 = vunpack.i.l.bf16 %v6886_v21 }
 0x32c   : > { %v6933_v57 = vunpack.i.h.bf16 %v6931_v22  ;;  %v6932_v52 = vunpack.i.l.bf16 %v6931_v22 }
 0x32d   : > { %v2468_v16 = vsel %vm2406_vm2, %v10174_v17, %v6888_v1  ;;  %v2467_v47 = vsel %vm2406_vm2, %v10187_v36, %v6887_v31  ;;  %v12949_v31 = vld [vmem:[#allocation58_spill] sm:$0xff] }
 0x32e   : > { %v2437_v55 = vsel %vm2423_vm3, %v2420_v43, %v6933_v57  ;;  %v2436_v53 = vsel %vm2423_vm3, %v2419_v59, %v6932_v52 }
 0x331   : > { %v6896_v5 = vpop.permute.xlu0 %6895  ;;  %v6941_v41 = vpop.permute.xlu1 %6940 }
 0x332   : > { %v6943_v35 = vunpack.i.h.bf16 %v6941_v41  ;;  %v6942_v44 = vunpack.i.l.bf16 %v6941_v41  ;;  %v6898_v12 = vunpack.i.h.bf16 %v6896_v5  ;;  %v6897_v51 = vunpack.i.l.bf16 %v6896_v5  ;;  %v12948_v41 = vld [vmem:[#allocation64_spill] sm:$0xff] }
 0x333   : > { %v1876_v36 = vmul.f32 %v10352_v48, %v12948_v41 }
 0x334   : > { %v2453_v30 = vsel %vm2440_vm4, %v2436_v53, %v6942_v44  ;;  %v2454_v29 = vsel %vm2440_vm4, %v2437_v55, %v6943_v35  ;;  %v2483_v26 = vsel %vm2423_vm3, %v2467_v47, %v6897_v51  ;;  %v2484_v25 = vsel %vm2423_vm3, %v2468_v16, %v6898_v12 }
 0x335   : > { %v6906_v60 = vpop.permute.xlu0 %6905  ;;  %v6951_v21 = vpop.permute.xlu1 %6950  ;;  %v2523_v8 = vpack.c.bf16 %v2454_v29, %v2453_v30  ;;  %v1877_v35 = vmul.f32 %v10375_v56, %v12949_v31 }
 0x336   : > { %v6908_v22 = vunpack.i.h.bf16 %v6906_v60  ;;  %v6907_v4 = vunpack.i.l.bf16 %v6906_v60  ;;  %v6953_v5 = vunpack.i.h.bf16 %v6951_v21  ;;  %v6952_v59 = vunpack.i.l.bf16 %v6951_v21 }
 0x338   : > { %v2499_v57 = vsel %vm2440_vm4, %v2483_v26, %v6907_v4  ;;  %v2500_v17 = vsel %vm2440_vm4, %v2484_v25, %v6908_v22  ;;  %v2421_v53 = vsel %vm2406_vm2, %v1876_v36, %v6952_v59  ;;  %v2422_v16 = vsel %vm2406_vm2, %v1877_v35, %v6953_v5 }
 0x339   : > { %v6916_v52 = vpop.permute.xlu0 %6915  ;;  %v2521_v1 = vpack.c.bf16 %v2500_v17, %v2499_v57  ;;  %v6961_v43 = vpop.permute.xlu1 %6960 }
 0x33a   : > { %v6963_v44 = vunpack.i.h.bf16 %v6961_v43  ;;  %v6962_v51 = vunpack.i.l.bf16 %v6961_v43  ;;  %v6918_v12 = vunpack.i.h.bf16 %v6916_v52  ;;  %v6917_v60 = vunpack.i.l.bf16 %v6916_v52 }
 0x33b   : > { %2776 = vmatprep.mubr.bf16.mxu0 %v2521_v1 }
 0x33c   : > { %2777 = vmatmul.mubr.bf16.gmra.mxu0 %v2520_v20  ;;  %v2438_v48 = vsel %vm2423_vm3, %v2421_v53, %v6962_v51  ;;  %v2439_v4 = vsel %vm2423_vm3, %v2422_v16, %v6963_v44  ;;  %v2470_v56 = vsel %vm2406_vm2, %v10337_v3, %v6918_v12  ;;  %v2469_v57 = vsel %vm2406_vm2, %v10307_v39, %v6917_v60 }
 0x33d   : > { %v6926_v55 = vpop.permute.xlu0 %6925 }
 0x33e   : > { %v6971_v30 = vpop.permute.xlu1 %6970  ;;  %v6928_v21 = vunpack.i.h.bf16 %v6926_v55  ;;  %v6927_v22 = vunpack.i.l.bf16 %v6926_v55 }
 0x33f   : > { %v6973_v29 = vunpack.i.h.bf16 %v6971_v30  ;;  %v6972_v47 = vunpack.i.l.bf16 %v6971_v30 }
 0x340   : > { %v2485_v5 = vsel %vm2423_vm3, %v2469_v57, %v6927_v22  ;;  %v2486_v59 = vsel %vm2423_vm3, %v2470_v56, %v6928_v21 }
 0x341   : > { %v6936_v20 = vpop.permute.xlu0 %6935  ;;  %v2455_v26 = vsel %vm2440_vm4, %v2438_v48, %v6972_v47  ;;  %v2456_v25 = vsel %vm2440_vm4, %v2439_v4, %v6973_v29  ;;  %v6510_v4 = vpop.f32.mrf.mxu1 }
 0x342   : > { %v6938_v17 = vunpack.i.h.bf16 %v6936_v20  ;;  %v6937_v52 = vunpack.i.l.bf16 %v6936_v20  ;;  %v2526_v1 = vpack.c.bf16 %v2456_v25, %v2455_v26 }
 0x344   : > { %v2501_v43 = vsel %vm2440_vm4, %v2485_v5, %v6937_v52  ;;  %v2502_v36 = vsel %vm2440_vm4, %v2486_v59, %v6938_v17  ;;  %v10560_v52 = vld [vmem:[#allocation9] ss:$0 sm:$0xff] }
 0x345   : > { %v6946_v3 = vpop.permute.xlu0 %6945  ;;  %v2524_v35 = vpack.c.bf16 %v2502_v36, %v2501_v43 }
 0x346   : > { %v6948_v51 = vunpack.i.h.bf16 %v6946_v3  ;;  %v6947_v12 = vunpack.i.l.bf16 %v6946_v3 }
 0x347   : > { %2784 = vmatprep.mubr.bf16.mxu0 %v2524_v35 }
 0x348   : > { %2785 = vmatmul.mubr.bf16.gmra.mxu0 %v2523_v8  ;;  %v2472_v16 = vsel %vm2406_vm2, %v12891_v14, %v6948_v51  ;;  %v2471_v60 = vsel %vm2406_vm2, %v12884_v9, %v6947_v12  ;;  %v2835_v14 = vpop.f32.mrf.mxu1 }
 0x349   : > { %v6956_v44 = vpop.permute.xlu0 %6955 }
 0x34a   : > { %v6958_v55 = vunpack.i.h.bf16 %v6956_v44  ;;  %v6957_v39 = vunpack.i.l.bf16 %v6956_v44  ;;  %v6511_v17 = vpop.f32.mrf.mxu1 }
 0x34c   : > { %v2487_v47 = vsel %vm2423_vm3, %v2471_v60, %v6957_v39  ;;  %v2488_v21 = vsel %vm2423_vm3, %v2472_v16, %v6958_v55  ;;  %v2838_v36 = vpop.f32.mrf.mxu1 }
 0x34d   : > { %v6966_v53 = vpop.permute.xlu0 %6965 }
 0x34e   : > { %v6968_v30 = vunpack.i.h.bf16 %v6966_v53  ;;  %v6967_v29 = vunpack.i.l.bf16 %v6966_v53 }
 0x350   : > { %v2503_v8 = vsel %vm2440_vm4, %v2487_v47, %v6967_v29  ;;  %v2504_v22 = vsel %vm2440_vm4, %v2488_v21, %v6968_v30 }
 0x351   : > { %v2527_v48 = vpack.c.bf16 %v2504_v22, %v2503_v8 }
 0x353   : > { %2792 = vmatprep.mubr.bf16.mxu0 %v2527_v48 }
 0x354   : > { %2793 = vmatmul.mubr.bf16.gmra.mxu0 %v2526_v1 }
 0x380   : > { %v6236_v56 = vpop.f32.mrf.mxu0 }
 0x382   : > { %v6237_v20 = vpop.f32.mrf.mxu0 }
 0x383   : > { %v6238_v9 = vadd.f32 %v6237_v20, %v6236_v56  ;;  %v6514_v56 = vpop.f32.mrf.mxu1 }
 0x384   : > { %v6239_v26 = vpop.f32.mrf.mxu0 }
 0x385   : > { %v2739_v43 = vadd.f32 %v6238_v9, %v10560_v52 }
 0x386   : > { %v6240_v25 = vpop.f32.mrf.mxu0 }
 0x387   : > { %v6241_v57 = vadd.f32 %v6240_v25, %v6239_v26  ;;  %v2836_v51 = vadd.f32 %v2835_v14, %v2739_v43  ;;  %v12952_v25 = vld [vmem:[#allocation133_spill] sm:$0xff] }
 0x388   : > { %v12955_v43 = vld [vmem:[#allocation57_spill] sm:$0xff] }
 0x389   : > { %v2742_v5 = vadd.f32 %v6241_v57, %v10560_v52  ;;  %v10567_v60 = vmax.f32 %v2836_v51, 0.0 }
 0x38a   : > { %v6242_v59 = vpop.f32.mrf.mxu0 }
 0x38b   : > { %v2839_v35 = vadd.f32 %v2838_v36, %v2742_v5  ;;  %v12335_v22 = vrot.slane %v10567_v60, 2  ;;  %v2851_v5 = vpop.f32.mrf.mxu1 }
 0x38c   : > { %v6243_v3 = vpop.f32.mrf.mxu0 }
 0x38d   : > { %v6244_v1 = vadd.f32 %v6243_v3, %v6242_v59  ;;  %v10565_v39 = vmax.f32 %v2839_v35, 0.0 }
 0x38e   : > { %v6245_v44 = vpop.f32.mrf.mxu0 }
 0x38f   : > { %v2747_v12 = vadd.f32 %v6244_v1, %v10560_v52  ;;  %12950 = vst [vmem:[#allocation130_spill] sm:$0xff] %v10565_v39  ;;  %v2979_v47 = vrot.slane %v10565_v39, 2  ;;  %v2965_v34 = vmul.f32 %v10565_v39, %v12980_v15 }
 0x390   : > { %v6246_v55 = vpop.f32.mrf.mxu0 }
 0x391   : > { %v2844_v53 = vadd.f32 %v6510_v4, %v2747_v12  ;;  %v6247_v16 = vadd.f32 %v6246_v55, %v6245_v44  ;;  %v10583_v26 = vsel %vm934_vm1, %v12335_v22, %v2979_v47 }
 0x393   : > { %v10569_v30 = vmax.f32 %v2844_v53, 0.0  ;;  %v2750_v29 = vadd.f32 %v6247_v16, %v10560_v52  ;;  %v12957_v16 = vld [vmem:[#allocation131_spill] sm:$0xff] }
 0x395   : > { %12951 = vst [vmem:[#allocation158_spill] sm:$0xff] %v10569_v30  ;;  %v2980_v21 = vrot.slane %v10569_v30, 2  ;;  %v2847_v4 = vadd.f32 %v6511_v17, %v2750_v29  ;;  %v10594_v17 = vmul.f32 %v10583_v26, %v12955_v43 }
 0x396   : > { %v6248_v8 = vpop.f32.mrf.mxu0 }
 0x397   : > { %v10577_v48 = vsel %vm934_vm1, %v2979_v47, %v2980_v21  ;;  %v10590_v59 = vmax.f32 %v2847_v4, 0.0  ;;  %12956 = vst [vmem:[#allocation155_spill] sm:$0xff] %v10594_v17  ;;  %v12959_v47 = vld [vmem:[#allocation107_spill] sm:$0xff] }
 0x398   : > { %v6249_v20 = vpop.f32.mrf.mxu0  ;;  %v10587_v9 = vmul.f32 %v10577_v48, %v12952_v25 }
 0x399   : > { %v6250_v14 = vadd.f32 %v6249_v20, %v6248_v8  ;;  %12954 = vst [vmem:[#allocation126_spill] sm:$0xff] %v10590_v59  ;;  %v2981_v1 = vrot.slane %v10590_v59, 2 }
 0x39a   : > { %12953 = vst [vmem:[#allocation159_spill] sm:$0xff] %v10587_v9  ;;  %v6251_v51 = vpop.f32.mrf.mxu0 }
 0x39b   : > { %v2755_v57 = vadd.f32 %v6250_v14, %v10560_v52  ;;  %v10608_v55 = vsel %vm934_vm1, %v2980_v21, %v2981_v1  ;;  %v6515_v14 = vpop.f32.mrf.mxu1 }
 0x39c   : > { %v6252_v53 = vpop.f32.mrf.mxu0  ;;  %v10616_v8 = vmul.f32 %v10608_v55, %v12959_v47 }
 0x39d   : > { %v2852_v36 = vadd.f32 %v2851_v5, %v2755_v57  ;;  %v6253_v4 = vadd.f32 %v6252_v53, %v6251_v51  ;;  %v2854_v57 = vpop.f32.mrf.mxu1 }
 0x39e   : > { %12960 = vst [vmem:[#allocation39_spill] sm:$0xff] %v10616_v8 }
 0x39f   : > { %v10598_v35 = vmax.f32 %v2852_v36, 0.0  ;;  %v2758_v25 = vadd.f32 %v6253_v4, %v10560_v52  ;;  %v10647_v20 = vpop.f32.mrf.mxu1 }
 0x3a1   : > { %v2982_v44 = vrot.slane %v10598_v35, 2  ;;  %v2855_v5 = vadd.f32 %v2854_v57, %v2758_v25  ;;  %v12962_v25 = vld [vmem:[#allocation29_spill] sm:$0xff] }
 0x3a3   : > { %v10604_v12 = vsel %vm934_vm1, %v2981_v1, %v2982_v44  ;;  %v10621_v36 = vmax.f32 %v2855_v5, 0.0  ;;  %v12964_v5 = vld [vmem:[#allocation105_spill] sm:$0xff] }
 0x3a4   : > { %v10612_v29 = vmul.f32 %v10604_v12, %v12957_v16 }
 0x3a5   : > { %12961 = vst [vmem:[#allocation170_spill] sm:$0xff] %v10621_v36  ;;  %v2983_v47 = vrot.slane %v10621_v36, 2  ;;  %v2919_v63 = vrot.slane %v10621_v36, 6 }
 0x3a6   : > { %12958 = vst [vmem:[#allocation77_spill] sm:$0xff] %v10612_v29 }
 0x3a7   : > { %v10630_v53 = vsel %vm934_vm1, %v2982_v44, %v2983_v47 }
 0x3a8   : > { %v10638_v57 = vmul.f32 %v10630_v53, %v12962_v25 }
 0x3aa   : > { %12963 = vst [vmem:[#allocation137_spill] sm:$0xff] %v10638_v57 }
 0x3b2   : > { %v6254_v21 = vpop.f32.mrf.mxu0 }
 0x3b4   : > { %v6255_v43 = vpop.f32.mrf.mxu0 }
 0x3b5   : > { %v6256_v1 = vadd.f32 %v6255_v43, %v6254_v21 }
 0x3b6   : > { %v6257_v21 = vpop.f32.mrf.mxu0 }
 0x3b7   : > { %v2763_v16 = vadd.f32 %v6256_v1, %v10560_v52 }
 0x3b8   : > { %v6258_v43 = vpop.f32.mrf.mxu0 }
 0x3b9   : > { %v2860_v3 = vadd.f32 %v6514_v56, %v2763_v16  ;;  %v6259_v1 = vadd.f32 %v6258_v43, %v6257_v21  ;;  %v7235_v21 = vld [vmem:[%s12012_s6 + $0x38] sm:$0xff]   ;;  %v2867_v43 = vpop.f32.mrf.mxu1 }
 0x3bb   : > { %v10625_v22 = vmax.f32 %v2860_v3, 0.0  ;;  %v2766_v44 = vadd.f32 %v6259_v1, %v10560_v52  ;;  %v7234_v3 = vld [vmem:[%s12012_s6 + $0xf8] sm:$0xff]   ;;  %v6519_v29 = vpop.f32.mrf.mxu1 }
 0x3bc   : > { %6358 = vmatprep.subr.bf16.mxu0 %v7234_v3  ;;  %v7239_v3 = vld [vmem:[%s12012_s6 + $0x68] sm:$0xff]  }
 0x3bd   : > { %v2984_v51 = vrot.slane %v10625_v22, 2 }
 0x3bf   : > { %v10634_v4 = vsel %vm934_vm1, %v2983_v47, %v2984_v51  ;;  %v2863_v47 = vadd.f32 %v6515_v14, %v2766_v44  ;;  %v7240_v44 = vld [vmem:[%s12012_s6 + $0xf0] sm:$0xff]  }
 0x3c0   : > { %v10642_v56 = vmul.f32 %v10634_v4, %v12964_v5  ;;  %v7233_v5 = vld [vmem:[%s12012_s6 + $0x78] sm:$0xff]  }
 0x3c1   : > { %v10659_v1 = vmax.f32 %v2863_v47, 0.0  ;;  %6294 = vmatprep.subr.bf16.mxu1 %v7233_v5  ;;  %v7242_v47 = vld [vmem:[%s12012_s6 + $0xb0] sm:$0xff]  }
 0x3c2   : > { %12965 = vst [vmem:[#allocation80_spill] sm:$0xff] %v10642_v56  ;;  %6295 = vmatpush3.bf16.msra.mxu1 %v7235_v21  ;;  %v12966_v56 = vld [vmem:[#allocation99_spill] sm:$0xff] }
 0x3c3   : > { %v2985_v5 = vrot.slane %v10659_v1, 2 }
 0x3e1   : > { %v6260_v16 = vpop.f32.mrf.mxu0 }
 0x3e3   : > { %v6261_v17 = vpop.f32.mrf.mxu0 }
 0x3e4   : > { %v6262_v9 = vadd.f32 %v6261_v17, %v6260_v16  ;;  %v7236_v17 = vld [vmem:[%s12012_s6 + $0xb8] sm:$0xff]   ;;  %v7238_v16 = vld [vmem:[%s12012_s6 + $0x30] sm:$0xff]  }
 0x3e5   : > { %6359 = vmatpush3.bf16.msra.mxu0 %v7236_v17  ;;  %v7248_v17 = vld [vmem:[%s12012_s6 + $0xa8] sm:$0xff]  }
 0x3e6   : > { %v2771_v25 = vadd.f32 %v6262_v9, %v10560_v52  ;;  %v7237_v9 = vld [vmem:[%s12012_s6 + $0x70] sm:$0xff]   ;;  %6360 = vmatprep.subr.bf16.mxu0 %v7240_v44  ;;  %v10701_v44 = vsel %vm934_vm1, %v2984_v51, %v2985_v5 }
 0x3e7   : > { %6296 = vmatprep.subr.bf16.mxu1 %v7237_v9 }
 0x3e8   : > { %v2868_v14 = vadd.f32 %v2867_v43, %v2771_v25  ;;  %v7246_v25 = vld [vmem:[%s12012_s6 + $0xe8] sm:$0xff]   ;;  %6297 = vmatpush3.bf16.msra.mxu1 %v7238_v16  ;;  %v6263_v16 = vpop.f32.mrf.mxu0 }
 0x3e9   : > { %v7241_v43 = vld [vmem:[%s12012_s6 + $0x28] sm:$0xff]   ;;  %6361 = vmatpush3.bf16.msra.mxu0 %v7242_v47  ;;  %6298 = vmatprep.subr.bf16.mxu1 %v7239_v3  ;;  %v7244_v47 = vld [vmem:[%s12012_s6 + $0x20] sm:$0xff]   ;;  %v7245_v3 = vld [vmem:[%s12012_s6 + $0x58] sm:$0xff]  }
 0x3ea   : > { %v10676_v57 = vmax.f32 %v2868_v14, 0.0  ;;  %v7243_v14 = vld [vmem:[%s12012_s6 + $0x60] sm:$0xff]   ;;  %6362 = vmatprep.subr.bf16.mxu0 %v7246_v25 }
 0x3eb   : > { %v12968_v25 = vld [vmem:[#allocation114_spill] sm:$0xff] }
 0x3ec   : > { %v2986_v21 = vrot.slane %v10676_v57, 2  ;;  %6299 = vmatpush3.bf16.msra.mxu1 %v7241_v43  ;;  %v10715_v51 = vmul.f32 %v10701_v44, %v12968_v25  ;;  %v7250_v25 = vld [vmem:[%s12012_s6 + $0x10] sm:$0xff]  }
 0x3ed   : > { %6363 = vmatpush3.bf16.msra.mxu0 %v7248_v17  ;;  %6300 = vmatprep.subr.bf16.mxu1 %v7243_v14  ;;  %v7247_v17 = vld [vmem:[%s12012_s6 + $0x18] sm:$0xff]  }
 0x3ee   : > { %v10694_v9 = vsel %vm934_vm1, %v2985_v5, %v2986_v21  ;;  %12969 = vst [vmem:[#allocation135_spill] sm:$0xff] %v10715_v51  ;;  %v6264_v5 = vpop.f32.mrf.mxu0  ;;  %v2870_v51 = vpop.f32.mrf.mxu1 }
 0x3ef   : > { %v10708_v8 = vmul.f32 %v10694_v9, %v12966_v56  ;;  %v7249_v56 = vld [vmem:[%s12012_s6 + $0x50] sm:$0xff]   ;;  %v6265_v14 = vadd.f32 %v6264_v5, %v6263_v16 }
 0x3f0   : > { %6301 = vmatpush3.bf16.msra.mxu1 %v7244_v47 }
 0x3f1   : > { %12967 = vst [vmem:[#allocation145_spill] sm:$0xff] %v10708_v8  ;;  %6302 = vmatprep.subr.bf16.mxu1 %v7245_v3  ;;  %v2774_v43 = vadd.f32 %v6265_v14, %v10560_v52 }
 0x3f3   : > { %v2871_v37 = vadd.f32 %v2870_v51, %v2774_v43  ;;  %v6522_v51 = vpop.f32.mrf.mxu1 }
 0x3f4   : > { %6303 = vmatpush3.bf16.msra.mxu1 %v7247_v17 }
 0x3f5   : > { %6304 = vmatprep.subr.bf16.mxu1 %v7249_v56  ;;  %v10730_v16 = vmax.f32 %v2871_v37, 0.0 }
 0x3f7   : > { %v2987_v14 = vrot.slane %v10730_v16, 2 }
 0x3f8   : > { %6305 = vmatpush3.bf16.msra.mxu1 %v7250_v25 }
 0x3fc   : > { %v6266_v47 = vpop.f32.mrf.mxu0 }
 0x3fe   : > { %v6267_v8 = vpop.f32.mrf.mxu0 }
 0x3ff   : > { %v6268_v3 = vadd.f32 %v6267_v8, %v6266_v47 }
 0x400   : > { %v6269_v32 = vpop.f32.mrf.mxu0 }
 0x401   : > { %v2779_v31 = vadd.f32 %v6268_v3, %v10560_v52  ;;  %v2883_v3 = vpop.f32.mrf.mxu1 }
 0x402   : > { %v6270_v41 = vpop.f32.mrf.mxu0 }
 0x403   : > { %v2876_v5 = vadd.f32 %v10647_v20, %v2779_v31  ;;  %v6271_v17 = vadd.f32 %v6270_v41, %v6269_v32  ;;  %v10744_v32 = vsel %vm934_vm1, %v2986_v21, %v2987_v14 }
 0x405   : > { %v10733_v62 = vmax.f32 %v2876_v5, 0.0  ;;  %v2782_v56 = vadd.f32 %v6271_v17, %v10560_v52  ;;  %v10753_v17 = vmul.f32 %v10744_v32, %v12872_v49 }
 0x407   : > { %v2988_v25 = vrot.slane %v10733_v62, 2  ;;  %v2879_v37 = vadd.f32 %v6519_v29, %v2782_v56  ;;  %12971 = vst [vmem:[#allocation146_spill] sm:$0xff] %v10753_v17 }
 0x408   : > { %v6272_v58 = vpop.f32.mrf.mxu0 }
 0x409   : > { %v10740_v8 = vsel %vm934_vm1, %v2987_v14, %v2988_v25  ;;  %v10755_v18 = vmax.f32 %v2879_v37, 0.0  ;;  %v6523_v14 = vpop.f32.mrf.mxu1 }
 0x40a   : > { %v6273_v43 = vpop.f32.mrf.mxu0  ;;  %v10748_v31 = vmul.f32 %v10740_v8, %v12875_v28 }
 0x40b   : > { %v6274_v47 = vadd.f32 %v6273_v43, %v6272_v58  ;;  %v2989_v28 = vrot.slane %v10755_v18, 2 }
 0x40c   : > { %v6275_v41 = vpop.f32.mrf.mxu0  ;;  %12970 = vst [vmem:[#allocation60_spill] sm:$0xff] %v10748_v31  ;;  %v12973_v31 = vld [vmem:[#allocation165_spill] sm:$0xff] }
 0x40d   : > { %v2787_v20 = vadd.f32 %v6274_v47, %v10560_v52 }
 0x40e   : > { %v6276_v5 = vpop.f32.mrf.mxu0 }
 0x40f   : > { %v2884_v58 = vadd.f32 %v2883_v3, %v2787_v20  ;;  %v6277_v29 = vadd.f32 %v6276_v5, %v6275_v41  ;;  %v2886_v20 = vpop.f32.mrf.mxu1  ;;  %v10770_v3 = vsel %vm934_vm1, %v2988_v25, %v2989_v28 }
 0x410   : > { %v10779_v61 = vmul.f32 %v10770_v3, %v12973_v31  ;;  %v7252_v31 = vld [vmem:[%s12012_s6 + $0xe0] sm:$0xff]  }
 0x411   : > { %v10759_v56 = vmax.f32 %v2884_v58, 0.0  ;;  %v2790_v47 = vadd.f32 %v6277_v29, %v10560_v52  ;;  %6364 = vmatprep.subr.bf16.mxu0 %v7252_v31  ;;  %v7257_v31 = vld [vmem:[%s12012_s6 + $0xd8] sm:$0xff]  }
 0x412   : > { %12974 = vst [vmem:[#allocation34_spill] sm:$0xff] %v10779_v61 }
 0x413   : > { %v2990_v43 = vrot.slane %v10759_v56, 2  ;;  %v2887_v5 = vadd.f32 %v2886_v20, %v2790_v47  ;;  %v2914_v20 = vrot.slane %v10567_v60, 6 }
 0x414   : > { %v6278_v33 = vpop.f32.mrf.mxu0 }
 0x415   : > { %v10766_v49 = vsel %vm934_vm1, %v2989_v28, %v2990_v43 }
 0x416   : > { %v6279_v37 = vpop.f32.mrf.mxu0  ;;  %v10774_v21 = vmul.f32 %v10766_v49, %v9927_v11  ;;  %v7251_v11 = vld [vmem:[%s12012_s6 + $0x48] sm:$0xff]  }
 0x417   : > { %v6280_v41 = vadd.f32 %v6279_v37, %v6278_v33  ;;  %v10781_v33 = vmax.f32 %v2887_v5, 0.0  ;;  %6306 = vmatprep.subr.bf16.mxu1 %v7251_v11 }
 0x418   : > { %v6281_v58 = vpop.f32.mrf.mxu0  ;;  %12972 = vst [vmem:[#allocation157_spill] sm:$0xff] %v10774_v21 }
 0x419   : > { %v2795_v29 = vadd.f32 %v6280_v41, %v10560_v52  ;;  %v2917_v41 = vrot.slane %v10590_v59, 6  ;;  %v2991_v5 = vrot.slane %v10781_v33, 2 }
 0x41a   : > { %v6282_v17 = vpop.f32.mrf.mxu0 }
 0x41b   : > { %v2892_v2 = vadd.f32 %v6522_v51, %v2795_v29  ;;  %v6283_v0 = vadd.f32 %v6282_v17, %v6281_v58  ;;  %v7253_v51 = vld [vmem:[%s12012_s6 + $0x8] sm:$0xff]   ;;  %v2915_v17 = vrot.slane %v10565_v39, 6  ;;  %v7256_v58 = vld [vmem:[%s12012_s6] sm:$0xff]  }
 0x41c   : > { %6307 = vmatpush3.bf16.msra.mxu1 %v7253_v51  ;;  %v10828_v51 = vld [vmem:[%s12012_s6 + $0x118] sm:$0xff]  }
 0x41d   : > { %v10785_v28 = vmax.f32 %v2892_v2, 0.0  ;;  %v2798_v47 = vadd.f32 %v6283_v0, %v10560_v52  ;;  %v7254_v2 = vld [vmem:[%s12012_s6 + $0xa0] sm:$0xff]   ;;  %12977 = vst [vmem:[#allocation128_spill] sm:$0xff] %v10828_v51 }
 0x41e   : > { %v7255_v0 = vld [vmem:[%s12012_s6 + $0x40] sm:$0xff]   ;;  %6365 = vmatpush3.bf16.msra.mxu0 %v7254_v2  ;;  %v12978_v2 = vld [vmem:[#allocation69_spill] sm:$0xff] }
 0x41f   : > { %v2895_v52 = vadd.f32 %v6523_v14, %v2798_v47  ;;  %v2992_v37 = vrot.slane %v10785_v28, 2  ;;  %6308 = vmatprep.subr.bf16.mxu1 %v7255_v0  ;;  %v10815_v14 = vsel %vm653_vm0, %v2914_v20, %v2915_v17  ;;  %v2916_v47 = vrot.slane %v10569_v30, 6  ;;  %6366 = vmatprep.subr.bf16.mxu0 %v7257_v31  ;;  %v12983_v39 = vld [vmem:[#allocation78_spill] sm:$0xff] }
 0x420   : > { %12976 = vst [vmem:[#allocation31_spill] sm:$0xff] %v10815_v14  ;;  %v2962_v0 = vmul.f32 %v10785_v28, %v12978_v2  ;;  %v10847_v2 = vsel %vm934_vm1, %v2990_v43, %v2991_v5  ;;  %6309 = vmatpush3.bf16.msra.mxu1 %v7256_v58  ;;  %v12985_v58 = vld [vmem:[#allocation61_spill] sm:$0xff] }
 0x421   : > { %v10811_v29 = vmax.f32 %v2895_v52, 0.0  ;;  %v10820_v11 = vsel %vm934_vm1, %v2991_v5, %v2992_v37  ;;  %v12979_v52 = vld [vmem:[#allocation59_spill] sm:$0xff]  ;;  %v10843_v13 = vsel %vm653_vm0, %v2916_v47, %v2917_v41  ;;  %6524 = vmatprep.subr.bf16.mxu1 %v10828_v51  ;;  %v12984_v5 = vld [vmem:[#allocation106_spill] sm:$0xff]  ;;  %v2964_v31 = vmul.f32 %v10567_v60, %v12985_v58 }
 0x422   : > { %v10859_v15 = vmul.f32 %v10820_v11, %v12857_v19  ;;  %6367 = vmatpush3.bf16.msra.mxu0 %v7259_v38  ;;  %v7261_v19 = vld [vmem:[%s12012_s6 + $0x90] sm:$0xff]   ;;  %v12988_v51 = vld [vmem:[#allocation83_spill] sm:$0xff] }
 0x423   : > { %12975 = vst [vmem:[#allocation68_spill] sm:$0xff] %v10811_v29  ;;  %v2963_v25 = vmul.f32 %v10811_v29, %v12979_v52  ;;  %v12352_v61 = vrot.slane %v10811_v29, 6  ;;  %v2993_v21 = vrot.slane %v10811_v29, 2 }
 0x424   : > { %12982 = vst [vmem:[#allocation141_spill] sm:$0xff] %v10859_v15  ;;  %v12998_v15 = vld [vmem:[#allocation136_spill] sm:$0xff] }
 0x425   : > { %v6979_v52 = vpack.i.bf16 %v2963_v25, %v2962_v0  ;;  %v10853_v50 = vsel %vm653_vm0, %v12352_v61, %v2914_v20  ;;  %v3027_v25 = vmul.f32 %v10815_v14, %v12984_v5  ;;  %v10869_v20 = vsel %vm653_vm0, %v2915_v17, %v2916_v47  ;;  %v7260_v0 = vld [vmem:[%s12012_s6 + $0xd0] sm:$0xff]   ;;  %v12989_v14 = vld [vmem:[#allocation91_spill] sm:$0xff] }
 0x426   : > { %12981 = vst [vmem:[#allocation140_spill] sm:$0xff] %v10853_v50  ;;  %v3026_v43 = vmul.f32 %v10853_v50, %v12983_v39  ;;  %v2918_v39 = vrot.slane %v10598_v35, 6  ;;  %v10881_v5 = vsel %vm934_vm1, %v2992_v37, %v2993_v21  ;;  %v12986_v17 = vrot.slane %v10567_v60, 2  ;;  %6368 = vmatprep.subr.bf16.mxu0 %v7260_v0 }
 0x427   : > { %6980 = vrot.lane.b32.xlu1 %v6979_v52, %s7756_s30  ;;  %v10891_v47 = vmul.f32 %v10847_v2, %v10150_v23  ;;  %v6989_v61 = vpack.i.bf16 %v2965_v34, %v2964_v31  ;;  %v3029_v52 = vmul.f32 %v10843_v13, %v12988_v51  ;;  %v2967_v37 = vmul.f32 %v10590_v59, %v12989_v14  ;;  %v12991_v23 = vld [vmem:[#allocation81_spill] sm:$0xff]  ;;  %v12994_v14 = vld [vmem:[#allocation35_spill] sm:$0xff] }
 0x428   : > { %v10887_v38 = vsel %vm934_vm1, %v2993_v21, %v12986_v17  ;;  %v6974_v58 = vpack.i.bf16 %v3027_v25, %v3026_v43  ;;  %v10899_v50 = vsel %vm653_vm0, %v2918_v39, %v2919_v63  ;;  %v2921_v21 = vrot.slane %v10659_v1, 6  ;;  %6369 = vmatpush3.bf16.msra.mxu0 %v7261_v19  ;;  %v12992_v51 = vld [vmem:[#allocation33_spill] sm:$0xff] }
 0x429   : > { %12987 = vst [vmem:[#allocation24_spill] sm:$0xff] %v10891_v47  ;;  %12990 = vst [vmem:[#allocation85_spill] sm:$0xff] %v10899_v50  ;;  %v3028_v34 = vmul.f32 %v10869_v20, %v12991_v23  ;;  %v10909_v43 = vmul.f32 %v10881_v5, %v12992_v51  ;;  %v10913_v25 = vmul.f32 %v10887_v38, %v12994_v14  ;;  %v12996_v31 = vld [vmem:[#allocation73_spill] sm:$0xff]  ;;  %v2920_v23 = vrot.slane %v10625_v22, 6 }
 0x42a   : > { %6975 = vrot.lane.b32.xlu0 %v6974_v58, %s7756_s30  ;;  %v2966_v0 = vmul.f32 %v10569_v30, %v12996_v31  ;;  %v10920_v58 = vsel %vm653_vm0, %v2917_v41, %v2918_v39  ;;  %v12997_v17 = vld [vmem:[#allocation109_spill] sm:$0xff]  ;;  %v7262_v41 = vld [vmem:[%s12012_s6 + $0xc8] sm:$0xff]  }
 0x42b   : > { %12993 = vst [vmem:[#allocation95_spill] sm:$0xff] %v10909_v43  ;;  %12995 = vst [vmem:[#allocation97_spill] sm:$0xff] %v10913_v25  ;;  %6990 = vrot.lane.b32.xlu1 %v6989_v61, %s7756_s30  ;;  %v6984_v19 = vpack.i.bf16 %v3029_v52, %v3028_v34  ;;  %v3031_v51 = vmul.f32 %v10899_v50, %v12997_v17  ;;  %v2969_v61 = vmul.f32 %v10621_v36, %v12998_v15  ;;  %v7263_v39 = vld [vmem:[%s12012_s6 + $0x88] sm:$0xff]   ;;  %v7264_v15 = vld [vmem:[%s12012_s6 + $0xc0] sm:$0xff]  }
 0x42c   : > { %v6999_v14 = vpack.i.bf16 %v2967_v37, %v2966_v0  ;;  %v10931_v31 = vsel %vm653_vm0, %v2920_v23, %v2921_v21  ;;  %v12999_v52 = vld [vmem:[#allocation119_spill] sm:$0xff]  ;;  %v13000_v17 = vld [vmem:[#allocation76_spill] sm:$0xff]  ;;  %v10950_v0 = vsel %vm653_vm0, %v2919_v63, %v2920_v23  ;;  %6370 = vmatprep.subr.bf16.mxu0 %v7262_v41  ;;  %v13001_v43 = vld [vmem:[#allocation53_spill] sm:$0xff]  ;;  %v2922_v41 = vrot.slane %v10676_v57, 6 }
 0x42d   : > { %v3030_v37 = vmul.f32 %v10920_v58, %v12999_v52  ;;  %v2968_v34 = vmul.f32 %v10598_v35, %v13000_v17  ;;  %6371 = vmatpush3.bf16.msra.mxu0 %v7263_v39  ;;  %v7265_v52 = vld [vmem:[%s12012_s6 + $0x80] sm:$0xff]   ;;  %v13002_v50 = vld [vmem:[#allocation89_spill] sm:$0xff]  ;;  %v2923_v17 = vrot.slane %v10730_v16, 6 }
 0x42e   : > { %6985 = vrot.lane.b32.xlu0 %v6984_v19, %s7756_s30  ;;  %v3033_v19 = vmul.f32 %v10931_v31, %v13001_v43  ;;  %6372 = vmatprep.subr.bf16.mxu0 %v7264_v15  ;;  %v13003_v63 = vld [vmem:[#allocation113_spill] sm:$0xff]  ;;  %v13004_v43 = vld [vmem:[#allocation87_spill] sm:$0xff] }
 0x42f   : > { %7000 = vrot.lane.b32.xlu1 %v6999_v14, %s7756_s30  ;;  %v6994_v47 = vpack.i.bf16 %v3031_v51, %v3030_v37  ;;  %v7009_v25 = vpack.i.bf16 %v2969_v61, %v2968_v34  ;;  %v3043_v14 = vmul.f32 %v10577_v48, %v13002_v50  ;;  %v3032_v23 = vmul.f32 %v10950_v0, %v13003_v63  ;;  %v13005_v61 = vld [vmem:[#allocation84_spill] sm:$0xff]  ;;  %v13006_v34 = vld [vmem:[#allocation79_spill] sm:$0xff] }
 0x430   : > { %v3042_v51 = vmul.f32 %v10583_v26, %v13004_v43  ;;  %v3075_v37 = vmul.f32 %v10590_v59, %v13005_v61  ;;  %v2971_v15 = vmul.f32 %v10659_v1, %v13006_v34  ;;  %v13009_v43 = vld [vmem:[#allocation156_spill] sm:$0xff]  ;;  %v13010_v34 = vld [vmem:[#allocation93_spill] sm:$0xff]  ;;  %v2925_v59 = vrot.slane %v10755_v18, 6 }
 0x431   : > { %v7004_v39 = vpack.i.bf16 %v3033_v19, %v3032_v23  ;;  %6373 = vmatpush3.bf16.msra.mxu0 %v7265_v52  ;;  %v13008_v19 = vld [vmem:[#allocation118_spill] sm:$0xff]  ;;  %v10983_v52 = vsel %vm653_vm0, %v2921_v21, %v2922_v41 }
 0x432   : > { %6995 = vrot.lane.b32.xlu0 %v6994_v47, %s7756_s30  ;;  %v7019_v50 = vpack.i.bf16 %v3043_v14, %v3042_v51  ;;  %v10973_v47 = vsel %vm653_vm0, %v2922_v41, %v2923_v17  ;;  %v2970_v23 = vmul.f32 %v10625_v22, %v13008_v19  ;;  %v13012_v19 = vld [vmem:[#allocation94_spill] sm:$0xff]  ;;  %v2924_v41 = vrot.slane %v10733_v62, 6 }
 0x433   : > { %7010 = vrot.lane.b32.xlu1 %v7009_v25, %s7756_s30  ;;  %v13007_v25 = vld [vmem:[#allocation125_spill] sm:$0xff]  ;;  %v3035_v51 = vmul.f32 %v10973_v47, %v13009_v43  ;;  %v3044_v21 = vmul.f32 %v10608_v55, %v13012_v19  ;;  %v13014_v43 = vld [vmem:[#allocation164_spill] sm:$0xff]  ;;  %v13016_v19 = vld [vmem:[#allocation82_spill] sm:$0xff] }
 0x434   : > { %v3074_v63 = vmul.f32 %v10569_v30, %v13007_v25  ;;  %v7029_v61 = vpack.i.bf16 %v2971_v15, %v2970_v23  ;;  %v2927_v30 = vrot.slane %v10781_v33, 6 }
 0x436   : > { %7005 = vrot.lane.b32.xlu0 %v7004_v39, %s7756_s30  ;;  %v7014_v14 = vpack.i.bf16 %v3075_v37, %v3074_v63  ;;  %v3045_v39 = vmul.f32 %v10604_v12, %v13010_v34  ;;  %v13013_v63 = vld [vmem:[#allocation86_spill] sm:$0xff]  ;;  %v2973_v34 = vmul.f32 %v10730_v16, %v13014_v43 }
 0x437   : > { %7020 = vrot.lane.b32.xlu1 %v7019_v50, %s7756_s30  ;;  %v13011_v50 = vld [vmem:[#allocation25_spill] sm:$0xff]  ;;  %v3077_v15 = vmul.f32 %v10621_v36, %v13013_v63  ;;  %v13018_v36 = vld [vmem:[#allocation104_spill] sm:$0xff] }
 0x438   : > { %v3034_v25 = vmul.f32 %v10983_v52, %v13011_v50  ;;  %v7039_v23 = vpack.i.bf16 %v3045_v39, %v3044_v21  ;;  %v11013_v39 = vsel %vm653_vm0, %v2923_v17, %v2924_v41  ;;  %v13017_v21 = vld [vmem:[#allocation169_spill] sm:$0xff] }
 0x43a   : > { %7015 = vrot.lane.b32.xlu0 %v7014_v14, %s7756_s30  ;;  %v7024_v37 = vpack.i.bf16 %v3035_v51, %v3034_v25  ;;  %v11003_v14 = vsel %vm653_vm0, %v2924_v41, %v2925_v59  ;;  %v2972_v51 = vmul.f32 %v10676_v57, %v13016_v19  ;;  %v13020_v19 = vld [vmem:[#allocation132_spill] sm:$0xff]  ;;  %v2926_v41 = vrot.slane %v10759_v56, 6 }
 0x43b   : > { %7030 = vrot.lane.b32.xlu1 %v7029_v61, %s7756_s30  ;;  %v13015_v61 = vld [vmem:[#allocation129_spill] sm:$0xff]  ;;  %v3037_v63 = vmul.f32 %v11003_v14, %v13017_v21  ;;  %v3046_v17 = vmul.f32 %v10630_v53, %v13020_v19  ;;  %v13024_v19 = vld [vmem:[#allocation171_spill] sm:$0xff] }
 0x43c   : > { %v3076_v50 = vmul.f32 %v10598_v35, %v13015_v61  ;;  %v7049_v43 = vpack.i.bf16 %v2973_v34, %v2972_v51 }
 0x43e   : > { %7025 = vrot.lane.b32.xlu0 %v7024_v37, %s7756_s30  ;;  %v7034_v25 = vpack.i.bf16 %v3077_v15, %v3076_v50  ;;  %v3047_v37 = vmul.f32 %v10634_v4, %v13018_v36  ;;  %v13021_v50 = vld [vmem:[#allocation28_spill] sm:$0xff] }
 0x43f   : > { %7040 = vrot.lane.b32.xlu1 %v7039_v23, %s7756_s30  ;;  %v13019_v23 = vld [vmem:[#allocation168_spill] sm:$0xff]  ;;  %v3079_v34 = vmul.f32 %v10659_v1, %v13021_v50 }
 0x440   : > { %v3036_v61 = vmul.f32 %v11013_v39, %v13019_v23  ;;  %v7059_v51 = vpack.i.bf16 %v3047_v37, %v3046_v17  ;;  %v13022_v36 = vld [vmem:[#allocation172_spill] sm:$0xff]  ;;  %v11043_v37 = vsel %vm653_vm0, %v2925_v59, %v2926_v41  ;;  %v2928_v59 = vrot.slane %v10785_v28, 6 }
 0x441   : > { %v2975_v21 = vmul.f32 %v10755_v18, %v13022_v36  ;;  %v13025_v36 = vld [vmem:[#allocation152_spill] sm:$0xff] }
 0x442   : > { %7035 = vrot.lane.b32.xlu0 %v7034_v25, %s7756_s30  ;;  %v7044_v15 = vpack.i.bf16 %v3037_v63, %v3036_v61  ;;  %v11033_v25 = vsel %vm653_vm0, %v2926_v41, %v2927_v30  ;;  %v2974_v63 = vmul.f32 %v10733_v62, %v13024_v19 }
 0x443   : > { %7050 = vrot.lane.b32.xlu1 %v7049_v43, %s7756_s30  ;;  %v13023_v43 = vld [vmem:[#allocation123_spill] sm:$0xff]  ;;  %v3039_v17 = vmul.f32 %v11033_v25, %v12847_v7 }
 0x444   : > { %v3078_v23 = vmul.f32 %v10625_v22, %v13023_v43  ;;  %v7069_v50 = vpack.i.bf16 %v2975_v21, %v2974_v63  ;;  %v13026_v43 = vld [vmem:[#allocation149_spill] sm:$0xff]  ;;  %v13028_v63 = vrot.slane %v10811_v29, 6 }
 0x445   : > { %v3048_v19 = vmul.f32 %v10701_v44, %v13026_v43 }
 0x446   : > { %7045 = vrot.lane.b32.xlu0 %v7044_v15, %s7756_s30  ;;  %v7054_v61 = vpack.i.bf16 %v3079_v34, %v3078_v23  ;;  %v3049_v15 = vmul.f32 %v10694_v9, %v13025_v36  ;;  %v13027_v34 = vld [vmem:[#allocation90_spill] sm:$0xff]  ;;  %v2977_v23 = vmul.f32 %v10781_v33, %v12910_v6 }
 0x447   : > { %7060 = vrot.lane.b32.xlu1 %v7059_v51, %s7756_s30  ;;  %v3038_v51 = vmul.f32 %v11043_v37, %v10094_v27  ;;  %v3081_v7 = vmul.f32 %v10730_v16, %v13027_v34  ;;  %v11064_v27 = vsel %vm653_vm0, %v2928_v59, %v13028_v63 }
 0x448   : > { %v7079_v21 = vpack.i.bf16 %v3049_v15, %v3048_v19  ;;  %v11074_v15 = vsel %vm653_vm0, %v2927_v30, %v2928_v59  ;;  %v13031_v19 = vld [vmem:[#allocation96_spill] sm:$0xff]  ;;  %v13033_v59 = vld [vmem:[#allocation37_spill] sm:$0xff] }
 0x449   : > { %v7064_v41 = vpack.i.bf16 %v3039_v17, %v3038_v51  ;;  %v13030_v17 = vld [vmem:[#allocation66_spill] sm:$0xff]  ;;  %v3041_v51 = vmul.f32 %v11064_v27, %v12919_v40  ;;  %v3040_v34 = vmul.f32 %v11074_v15, %v12918_v42  ;;  %v13034_v40 = vld [vmem:[#allocation175_spill] sm:$0xff] }
 0x44a   : > { %7055 = vrot.lane.b32.xlu0 %v7054_v61, %s7756_s30  ;;  %v13029_v61 = vld [vmem:[#allocation30_spill] sm:$0xff]  ;;  %v2976_v36 = vmul.f32 %v10759_v56, %v13030_v17 }
 0x44b   : > { %7070 = vrot.lane.b32.xlu1 %v7069_v50, %s7756_s30  ;;  %v3080_v50 = vmul.f32 %v10676_v57, %v13029_v61  ;;  %v7089_v30 = vpack.i.bf16 %v3041_v51, %v3040_v34  ;;  %v13036_v42 = vld [vmem:[#allocation98_spill] sm:$0xff] }
 0x44c   : > { %v7084_v43 = vpack.i.bf16 %v2977_v23, %v2976_v36  ;;  %v3053_v23 = vmul.f32 %v10766_v49, %v13034_v40  ;;  %v3052_v36 = vmul.f32 %v10770_v3, %v13036_v42  ;;  %v13038_v34 = vld [vmem:[#allocation122_spill] sm:$0xff]  ;;  %v3056_v40 = vmul.f32 %v10881_v5, %v12920_v24  ;;  %v13041_v42 = vld [vmem:[#allocation88_spill] sm:$0xff] }
 0x44d   : > { %v7074_v6 = vpack.i.bf16 %v3081_v7, %v3080_v50  ;;  %v3083_v7 = vmul.f32 %v10755_v18, %v13033_v59  ;;  %v13035_v50 = vld [vmem:[#allocation92_spill] sm:$0xff] }
 0x44e   : > { %7065 = vrot.lane.b32.xlu0 %v7064_v41, %s7756_s30  ;;  %v3051_v41 = vmul.f32 %v10740_v8, %v13031_v19  ;;  %v3082_v17 = vmul.f32 %v10733_v62, %v13035_v50  ;;  %v7109_v19 = vpack.i.bf16 %v3053_v23, %v3052_v36  ;;  %v13040_v23 = vld [vmem:[#allocation40_spill] sm:$0xff]  ;;  %v13042_v36 = vld [vmem:[#allocation130_spill] sm:$0xff] }
 0x44f   : > { %7080 = vrot.lane.b32.xlu1 %v7079_v21, %s7756_s30  ;;  %v13032_v21 = vld [vmem:[#allocation161_spill] sm:$0xff]  ;;  %v3086_v50 = vmul.f32 %v10785_v28, %v13040_v23 }
 0x450   : > { %v3050_v63 = vmul.f32 %v10744_v32, %v13032_v21  ;;  %v3084_v21 = vmul.f32 %v10759_v56, %v13038_v34  ;;  %v13044_v34 = vld [vmem:[#allocation42_spill] sm:$0xff] }
 0x452   : > { %7075 = vrot.lane.b32.xlu0 %v7074_v6, %s7756_s30  ;;  %v7099_v61 = vpack.i.bf16 %v3051_v41, %v3050_v63  ;;  %v7094_v6 = vpack.i.bf16 %v3083_v7, %v3082_v17  ;;  %v3055_v41 = vmul.f32 %v10820_v11, %v10202_v45  ;;  %v13039_v63 = vld [vmem:[#allocation56_spill] sm:$0xff]  ;;  %v3087_v7 = vmul.f32 %v10811_v29, %v12890_v54  ;;  %v13043_v54 = vld [vmem:[#allocation101_spill] sm:$0xff] }
 0x453   : > { %7085 = vrot.lane.b32.xlu1 %v7084_v43, %s7756_s30  ;;  %v13037_v43 = vld [vmem:[#allocation110_spill] sm:$0xff]  ;;  %v3057_v45 = vmul.f32 %v10887_v38, %v12921_v10  ;;  %v3088_v24 = vmul.f32 %v10567_v60, %v13043_v54 }
 0x454   : > { %v3085_v51 = vmul.f32 %v10781_v33, %v13037_v43  ;;  %v7114_v17 = vpack.i.bf16 %v3087_v7, %v3086_v50 }
 0x455   : > { %v7129_v43 = vpack.i.bf16 %v3057_v45, %v3056_v40  ;;  %v13046_v40 = vld [vmem:[#allocation103_spill] sm:$0xff] }
 0x456   : > { %7090 = vrot.lane.b32.xlu0 %v7089_v30, %s7756_s30  ;;  %v3054_v30 = vmul.f32 %v10847_v2, %v13039_v63  ;;  %v7104_v59 = vpack.i.bf16 %v3085_v51, %v3084_v21  ;;  %v2946_v21 = vmul.f32 %v11074_v15, %v13044_v34  ;;  %v13045_v63 = vld [vmem:[#allocation41_spill] sm:$0xff]  ;;  %v3010_v45 = vmul.f32 %v10881_v5, %v13046_v40 }
 0x457   : > { %7100 = vrot.lane.b32.xlu1 %v7099_v61, %s7756_s30 }
 0x458   : > { %v7119_v61 = vpack.i.bf16 %v3055_v41, %v3054_v30  ;;  %v2947_v30 = vmul.f32 %v11064_v27, %v13045_v63  ;;  %v13050_v63 = vld [vmem:[#allocation43_spill] sm:$0xff] }
 0x45a   : > { %7095 = vrot.lane.b32.xlu0 %v7094_v6, %s7756_s30  ;;  %v3089_v6 = vmul.f32 %v13042_v36, %v13041_v42 }
 0x45b   : > { %7110 = vrot.lane.b32.xlu1 %v7109_v19, %s7756_s30 }
 0x45c   : > { %v7124_v10 = vpack.i.bf16 %v3089_v6, %v3088_v24  ;;  %v13047_v6 = vld [vmem:[#allocation70_spill] sm:$0xff] }
 0x45e   : > { %7105 = vrot.lane.b32.xlu0 %v7104_v59, %s7756_s30 }
 0x45f   : > { %7120 = vrot.lane.b32.xlu1 %v7119_v61, %s7756_s30 }
 0x462   : > { %7115 = vrot.lane.b32.xlu0 %v7114_v17, %s7756_s30 }
 0x463   : > { %7130 = vrot.lane.b32.xlu1 %v7129_v43, %s7756_s30  ;;  %v3011_v43 = vmul.f32 %v10887_v38, %v13047_v6 }
 0x466   : > { %7125 = vrot.lane.b32.xlu0 %v7124_v10, %s7756_s30  ;;  %v13048_v10 = vld [vmem:[#allocation44_spill] sm:$0xff] }
 0x499   : > { %v6981_v51 = vpop.permute.xlu1 %6980 }
 0x49a   : > { %v6983_v19 = vunpack.i.h.bf16 %v6981_v51  ;;  %v6982_v41 = vunpack.i.l.bf16 %v6981_v51  ;;  %v13049_v51 = vld [vmem:[#allocation140_spill] sm:$0xff] }
 0x49b   : > { %v2948_v34 = vmul.f32 %v13049_v51, %v13048_v10  ;;  %v13053_v10 = vld [vmem:[#allocation112_spill] sm:$0xff] }
 0x49c   : > { %v3362_v59 = vsel %vm2423_vm3, %v2946_v21, %v6982_v41  ;;  %v3363_v7 = vsel %vm2423_vm3, %v2947_v30, %v6983_v19  ;;  %v6976_v61 = vpop.permute.xlu0 %6975  ;;  %v13051_v41 = vld [vmem:[#allocation31_spill] sm:$0xff]  ;;  %v3013_v29 = vmul.f32 %v10577_v48, %v13053_v10  ;;  %v13056_v48 = vld [vmem:[#allocation128_spill] sm:$0xff] }
 0x49d   : > { %v3426_v23 = vpack.c.bf16 %v3363_v7, %v3362_v59  ;;  %v6978_v50 = vunpack.i.h.bf16 %v6976_v61  ;;  %v6977_v17 = vunpack.i.l.bf16 %v6976_v61  ;;  %v6991_v42 = vpop.permute.xlu1 %6990  ;;  %v2949_v21 = vmul.f32 %v13051_v41, %v13050_v63  ;;  %v13052_v7 = vld [vmem:[#allocation72_spill] sm:$0xff] }
 0x49e   : > { %v6993_v54 = vunpack.i.h.bf16 %v6991_v42  ;;  %v6992_v24 = vunpack.i.l.bf16 %v6991_v42  ;;  %v3012_v61 = vmul.f32 %v10583_v26, %v13052_v7  ;;  %v13058_v10 = vld [vmem:[#allocation120_spill] sm:$0xff] }
 0x49f   : > { %v3378_v19 = vsel %vm2423_vm3, %v3010_v45, %v6977_v17  ;;  %v3379_v30 = vsel %vm2423_vm3, %v3011_v43, %v6978_v50  ;;  %v7266_v45 = vld [vmem:[%s12012_s6 + $0x110] sm:$0xff]   ;;  %v13054_v43 = vld [vmem:[#allocation46_spill] sm:$0xff] }
 0x4a0   : > { %v6986_v5 = vpop.permute.xlu0 %6985  ;;  %v3427_v59 = vpack.c.bf16 %v3379_v30, %v3378_v19  ;;  %v3364_v40 = vsel %vm2423_vm3, %v2948_v34, %v6992_v24  ;;  %v3365_v38 = vsel %vm2423_vm3, %v2949_v21, %v6993_v54  ;;  %v2950_v26 = vmul.f32 %v10869_v20, %v13054_v43  ;;  %v13055_v24 = vld [vmem:[#allocation45_spill] sm:$0xff]  ;;  %v13060_v43 = vld [vmem:[#allocation47_spill] sm:$0xff] }
 0x4a1   : > { %v6988_v42 = vunpack.i.h.bf16 %v6986_v5  ;;  %v6987_v6 = vunpack.i.l.bf16 %v6986_v5  ;;  %v7001_v46 = vpop.permute.xlu1 %7000  ;;  %v3431_v63 = vpack.c.bf16 %v3365_v38, %v3364_v40  ;;  %v2951_v54 = vmul.f32 %v10843_v13, %v13055_v24  ;;  %v13057_v5 = vld [vmem:[#allocation117_spill] sm:$0xff] }
 0x4a2   : > { %v7003_v50 = vunpack.i.h.bf16 %v7001_v46  ;;  %v7002_v17 = vunpack.i.l.bf16 %v7001_v46  ;;  %3817 = vmatprep.mubr.bf16.mxu1 %v3427_v59  ;;  %v3014_v7 = vmul.f32 %v10608_v55, %v13057_v5  ;;  %v7267_v55 = vld [vmem:[%s12012_s6 + $0x108] sm:$0xff]  }
 0x4a3   : > { %3818 = vmatmul.mubr.bf16.vlgmr.msra.gmra.mxu1 %v3426_v23  ;;  %v3380_v34 = vsel %vm2423_vm3, %v3012_v61, %v6987_v6  ;;  %v3381_v21 = vsel %vm2423_vm3, %v3013_v29, %v6988_v42  ;;  %v3015_v61 = vmul.f32 %v10604_v12, %v13058_v10  ;;  %v13063_v10 = vld [vmem:[#allocation108_spill] sm:$0xff] }
 0x4a4   : > { %6525 = vmatpush3.bf16.msra.mxu1 %v13056_v48  ;;  %v6996_v19 = vpop.permute.xlu0 %6995  ;;  %v3432_v30 = vpack.c.bf16 %v3381_v21, %v3380_v34  ;;  %v11158_v46 = vsel %vm2423_vm3, %v2950_v26, %v7002_v17  ;;  %v11161_v59 = vsel %vm2423_vm3, %v2951_v54, %v7003_v50  ;;  %v13059_v17 = vld [vmem:[#allocation48_spill] sm:$0xff]  ;;  %v13061_v26 = vld [vmem:[#allocation85_spill] sm:$0xff] }
 0x4a5   : > { %v6998_v40 = vunpack.i.h.bf16 %v6996_v19  ;;  %v6997_v38 = vunpack.i.l.bf16 %v6996_v19  ;;  %v7011_v23 = vpop.permute.xlu1 %7010  ;;  %6526 = vmatprep.subr.bf16.mxu1 %v7266_v45  ;;  %v3436_v29 = vpack.c.bf16 %v11161_v59, %v11158_v46  ;;  %v2952_v50 = vmul.f32 %v10920_v58, %v13059_v17  ;;  %v13062_v48 = vld [vmem:[#allocation124_spill] sm:$0xff]  ;;  %v13064_v17 = vld [vmem:[#allocation62_spill] sm:$0xff] }
 0x4a6   : > { %v7013_v42 = vunpack.i.h.bf16 %v7011_v23  ;;  %v7012_v6 = vunpack.i.l.bf16 %v7011_v23  ;;  %3825 = vmatprep.mubr.bf16.mxu1 %v3432_v30  ;;  %v2953_v24 = vmul.f32 %v13061_v26, %v13060_v43  ;;  %v3016_v19 = vmul.f32 %v10630_v53, %v13062_v48  ;;  %v7268_v53 = vld [vmem:[%s12012_s6 + $0x100] sm:$0xff]  }
 0x4a7   : > { %v3382_v54 = vsel %vm2423_vm3, %v3014_v7, %v6997_v38  ;;  %v3383_v12 = vsel %vm2423_vm3, %v3015_v61, %v6998_v40  ;;  %v3017_v7 = vmul.f32 %v10634_v4, %v13063_v10  ;;  %v3058_v4 = vmul.f32 %v10869_v20, %v13064_v17  ;;  %v13066_v48 = vld [vmem:[#allocation50_spill] sm:$0xff]  ;;  %v13068_v10 = vld [vmem:[#allocation153_spill] sm:$0xff] }
 0x4a8   : > { %v7006_v34 = vpop.permute.xlu0 %7005  ;;  %v3437_v21 = vpack.c.bf16 %v3383_v12, %v3382_v54  ;;  %6527 = vmatpush3.bf16.msra.mxu1 %v7266_v45  ;;  %v11179_v5 = vsel %vm2423_vm3, %v2952_v50, %v7012_v6  ;;  %v11182_v30 = vsel %vm2423_vm3, %v2953_v24, %v7013_v42  ;;  %v13065_v50 = vld [vmem:[#allocation102_spill] sm:$0xff] }
 0x4a9   : > { %v7008_v46 = vunpack.i.h.bf16 %v7006_v34  ;;  %v7007_v59 = vunpack.i.l.bf16 %v7006_v34  ;;  %v7021_v23 = vpop.permute.xlu1 %7020  ;;  %v3441_v40 = vpack.c.bf16 %v11182_v30, %v11179_v5  ;;  %6528 = vmatprep.subr.bf16.mxu1 %v7267_v55  ;;  %v3059_v43 = vmul.f32 %v10843_v13, %v13065_v50  ;;  %v13081_v30 = vld [vmem:[#allocation54_spill] sm:$0xff] }
 0x4aa   : > { %v7023_v45 = vunpack.i.h.bf16 %v7021_v23  ;;  %v7022_v38 = vunpack.i.l.bf16 %v7021_v23  ;;  %v13067_v23 = vld [vmem:[#allocation49_spill] sm:$0xff] }
 0x4ab   : > { %3826 = vmatmul.mubr.bf16.gmra.mxu1 %v3431_v63  ;;  %v3384_v61 = vsel %vm2423_vm3, %v3016_v19, %v7007_v59  ;;  %v3385_v42 = vsel %vm2423_vm3, %v3017_v7, %v7008_v46  ;;  %v2954_v63 = vmul.f32 %v10950_v0, %v13066_v48  ;;  %v2955_v19 = vmul.f32 %v10931_v31, %v13067_v23  ;;  %v13070_v48 = vld [vmem:[#allocation111_spill] sm:$0xff] }
 0x4ac   : > { %v7016_v6 = vpop.permute.xlu0 %7015  ;;  %3833 = vmatprep.mubr.bf16.mxu1 %v3437_v21  ;;  %v3442_v24 = vpack.c.bf16 %v3385_v42, %v3384_v61  ;;  %6529 = vmatpush3.bf16.msra.mxu1 %v7267_v55  ;;  %v3395_v21 = vsel %vm2423_vm3, %v13042_v36, %v7023_v45  ;;  %v3394_v20 = vsel %vm2423_vm3, %v10567_v60, %v7022_v38 }
 0x4ad   : > { %v7018_v54 = vunpack.i.h.bf16 %v7016_v6  ;;  %v7017_v12 = vunpack.i.l.bf16 %v7016_v6  ;;  %v7031_v34 = vpop.permute.xlu1 %7030  ;;  %6530 = vmatprep.subr.bf16.mxu1 %v7268_v53  ;;  %v3018_v7 = vmul.f32 %v10701_v44, %v13068_v10  ;;  %v13069_v6 = vld [vmem:[#allocation154_spill] sm:$0xff]  ;;  %v3428_v60 = vpack.c.bf16 %v3395_v21, %v3394_v20 }
 0x4ae   : > { %v7033_v46 = vunpack.i.h.bf16 %v7031_v34  ;;  %v7032_v13 = vunpack.i.l.bf16 %v7031_v34  ;;  %v3019_v17 = vmul.f32 %v10694_v9, %v13069_v6 }
 0x4af   : > { %v3410_v55 = vsel %vm2423_vm3, %v3058_v4, %v7017_v12  ;;  %v3411_v59 = vsel %vm2423_vm3, %v3059_v43, %v7018_v54 }
 0x4b0   : > { %v7026_v61 = vpop.permute.xlu0 %7025  ;;  %v3429_v42 = vpack.c.bf16 %v3411_v59, %v3410_v55  ;;  %v11212_v50 = vsel %vm2423_vm3, %v2954_v63, %v7032_v13  ;;  %v11215_v36 = vsel %vm2423_vm3, %v2955_v19, %v7033_v46  ;;  %6531 = vmatpush3.bf16.msra.mxu1 %v7268_v53  ;;  %v3060_v53 = vmul.f32 %v10920_v58, %v13070_v48  ;;  %v13071_v63 = vld [vmem:[#allocation115_spill] sm:$0xff]  ;;  %v13072_v13 = vld [vmem:[#allocation52_spill] sm:$0xff] }
 0x4b1   : > { %v7028_v45 = vunpack.i.h.bf16 %v7026_v61  ;;  %v7027_v38 = vunpack.i.l.bf16 %v7026_v61  ;;  %v7041_v4 = vpop.permute.xlu1 %7040  ;;  %v3446_v43 = vpack.c.bf16 %v11215_v36, %v11212_v50  ;;  %v3061_v23 = vmul.f32 %v13061_v26, %v13071_v63  ;;  %v13073_v55 = vld [vmem:[#allocation51_spill] sm:$0xff]  ;;  %v13074_v61 = vld [vmem:[#allocation158_spill] sm:$0xff] }
 0x4b2   : > { %v7043_v44 = vunpack.i.h.bf16 %v7041_v4  ;;  %v7042_v54 = vunpack.i.l.bf16 %v7041_v4  ;;  %3914 = vmatprep.mubr.bf16.mxu0 %v3429_v42  ;;  %v2957_v59 = vmul.f32 %v10973_v47, %v13073_v55  ;;  %v13075_v42 = vld [vmem:[#allocation126_spill] sm:$0xff]  ;;  %v13077_v4 = vld [vmem:[#allocation127_spill] sm:$0xff] }
 0x4b3   : > { %3834 = vmatmul.mubr.bf16.gmra.mxu1 %v3436_v29  ;;  %3915 = vmatmul.mubr.bf16.vlgmr.msra.gmra.mxu0 %v3428_v60  ;;  %v3386_v9 = vsel %vm2423_vm3, %v3018_v7, %v7027_v38  ;;  %v3387_v12 = vsel %vm2423_vm3, %v3019_v17, %v7028_v45  ;;  %v2956_v29 = vmul.f32 %v10983_v52, %v13072_v13  ;;  %v13076_v17 = vld [vmem:[#allocation138_spill] sm:$0xff] }
 0x4b4   : > { %v7036_v34 = vpop.permute.xlu0 %7035  ;;  %3841 = vmatprep.mubr.bf16.mxu1 %v3442_v24  ;;  %v3447_v19 = vpack.c.bf16 %v3387_v12, %v3386_v9  ;;  %v3396_v24 = vsel %vm2423_vm3, %v13074_v61, %v7042_v54  ;;  %v3397_v58 = vsel %vm2423_vm3, %v13075_v42, %v7043_v44  ;;  %v3020_v60 = vmul.f32 %v10744_v32, %v13076_v17  ;;  %v13083_v17 = vld [vmem:[#allocation23_spill] sm:$0xff]  ;;  %v13088_v36 = vld [vmem:[#allocation58_spill] sm:$0xff] }
 0x4b5   : > { %v7038_v21 = vunpack.i.h.bf16 %v7036_v34  ;;  %v7037_v20 = vunpack.i.l.bf16 %v7036_v34  ;;  %v7051_v46 = vpop.permute.xlu1 %7050  ;;  %v3021_v9 = vmul.f32 %v10740_v8, %v13077_v4  ;;  %v13084_v4 = vld [vmem:[#allocation38_spill] sm:$0xff] }
 0x4b6   : > { %v7053_v10 = vunpack.i.h.bf16 %v7051_v46  ;;  %v7052_v7 = vunpack.i.l.bf16 %v7051_v46  ;;  %v13078_v46 = vld [vmem:[#allocation144_spill] sm:$0xff] }
 0x4b7   : > { %v3412_v26 = vsel %vm2423_vm3, %v3060_v53, %v7037_v20  ;;  %v3413_v6 = vsel %vm2423_vm3, %v3061_v23, %v7038_v21  ;;  %v3433_v53 = vpack.c.bf16 %v3397_v58, %v3396_v24  ;;  %v3062_v13 = vmul.f32 %v10950_v0, %v13078_v46  ;;  %v13080_v24 = vld [vmem:[#allocation55_spill] sm:$0xff] }
 0x4b8   : > { %v7046_v45 = vpop.permute.xlu0 %7045  ;;  %v3434_v38 = vpack.c.bf16 %v3413_v6, %v3412_v26  ;;  %v11240_v12 = vsel %vm2423_vm3, %v2956_v29, %v7052_v7  ;;  %v11243_v54 = vsel %vm2423_vm3, %v2957_v59, %v7053_v10  ;;  %v13079_v29 = vld [vmem:[#allocation65_spill] sm:$0xff]  ;;  %v2958_v5 = vmul.f32 %v11013_v39, %v13080_v24  ;;  %v13082_v26 = vld [vmem:[#allocation170_spill] sm:$0xff]  ;;  %v13085_v46 = vld [vmem:[#allocation67_spill] sm:$0xff] }
 0x4b9   : > { %v7048_v34 = vunpack.i.h.bf16 %v7046_v45  ;;  %v7047_v44 = vunpack.i.l.bf16 %v7046_v45  ;;  %v7061_v48 = vpop.permute.xlu1 %7060  ;;  %v3451_v63 = vpack.c.bf16 %v11243_v54, %v11240_v12  ;;  %v3063_v55 = vmul.f32 %v10931_v31, %v13079_v29  ;;  %v13086_v29 = vld [vmem:[#allocation26_spill] sm:$0xff] }
 0x4ba   : > { %v7063_v23 = vunpack.i.h.bf16 %v7061_v48  ;;  %v7062_v32 = vunpack.i.l.bf16 %v7061_v48  ;;  %3922 = vmatprep.mubr.bf16.mxu0 %v3434_v38 }
 0x4bb   : > { %3842 = vmatmul.mubr.bf16.gmra.mxu1 %v3441_v40  ;;  %3923 = vmatmul.mubr.bf16.gmra.mxu0 %v3433_v53  ;;  %v3388_v8 = vsel %vm2423_vm3, %v3020_v60, %v7047_v44  ;;  %v3389_v21 = vsel %vm2423_vm3, %v3021_v9, %v7048_v34  ;;  %v2959_v40 = vmul.f32 %v11003_v14, %v13081_v30 }
 0x4bc   : > { %v7056_v20 = vpop.permute.xlu0 %7055  ;;  %3849 = vmatprep.mubr.bf16.mxu1 %v3447_v19  ;;  %v3452_v59 = vpack.c.bf16 %v3389_v21, %v3388_v8  ;;  %v3398_v19 = vsel %vm2423_vm3, %v10598_v35, %v7062_v32  ;;  %v3399_v0 = vsel %vm2423_vm3, %v13082_v26, %v7063_v23  ;;  %v3022_v60 = vmul.f32 %v10770_v3, %v13083_v17 }
 0x4bd   : > { %v7058_v10 = vunpack.i.h.bf16 %v7056_v20  ;;  %v7057_v7 = vunpack.i.l.bf16 %v7056_v20  ;;  %v7071_v61 = vpop.permute.xlu1 %7070  ;;  %v3023_v9 = vmul.f32 %v10766_v49, %v13084_v4  ;;  %v3438_v23 = vpack.c.bf16 %v3399_v0, %v3398_v19 }
 0x4be   : > { %v7073_v42 = vunpack.i.h.bf16 %v7071_v61  ;;  %v7072_v58 = vunpack.i.l.bf16 %v7071_v61 }
 0x4bf   : > { %v3414_v31 = vsel %vm2423_vm3, %v3062_v13, %v7057_v7  ;;  %v3415_v6 = vsel %vm2423_vm3, %v3063_v55, %v7058_v10  ;;  %v3064_v13 = vmul.f32 %v10983_v52, %v13085_v46  ;;  %v3065_v55 = vmul.f32 %v10973_v47, %v13086_v29 }
 0x4c0   : > { %v7066_v45 = vpop.permute.xlu0 %7065  ;;  %v3439_v38 = vpack.c.bf16 %v3415_v6, %v3414_v31  ;;  %v11271_v34 = vsel %vm2423_vm3, %v2958_v5, %v7072_v58  ;;  %v11274_v35 = vsel %vm2423_vm3, %v2959_v40, %v7073_v42  ;;  %v13087_v5 = vld [vmem:[#allocation64_spill] sm:$0xff]  ;;  %v13089_v58 = vld [vmem:[#allocation75_spill] sm:$0xff] }
 0x4c1   : > { %v7068_v44 = vunpack.i.h.bf16 %v7066_v45  ;;  %v7067_v48 = vunpack.i.l.bf16 %v7066_v45  ;;  %v7081_v53 = vpop.permute.xlu1 %7080  ;;  %v3456_v32 = vpack.c.bf16 %v11274_v35, %v11271_v34  ;;  %v2960_v50 = vmul.f32 %v11043_v37, %v13087_v5  ;;  %v13090_v31 = vld [vmem:[#allocation116_spill] sm:$0xff] }
 0x4c2   : > { %v7083_v8 = vunpack.i.h.bf16 %v7081_v53  ;;  %v7082_v3 = vunpack.i.l.bf16 %v7081_v53  ;;  %3930 = vmatprep.mubr.bf16.mxu0 %v3439_v38  ;;  %v3024_v19 = vmul.f32 %v10847_v2, %v13089_v58  ;;  %v3025_v6 = vmul.f32 %v10820_v11, %v13090_v31 }
 0x4c3   : > { %3850 = vmatmul.mubr.bf16.gmra.mxu1 %v3446_v43  ;;  %3931 = vmatmul.mubr.bf16.gmra.mxu0 %v3438_v23  ;;  %v3390_v49 = vsel %vm2423_vm3, %v3022_v60, %v7067_v48  ;;  %v3391_v21 = vsel %vm2423_vm3, %v3023_v9, %v7068_v44  ;;  %v2961_v43 = vmul.f32 %v11033_v25, %v13088_v36 }
 0x4c4   : > { %v7076_v20 = vpop.permute.xlu0 %7075  ;;  %3857 = vmatprep.mubr.bf16.mxu1 %v3452_v59  ;;  %v3457_v10 = vpack.c.bf16 %v3391_v21, %v3390_v49  ;;  %v3400_v59 = vsel %vm2423_vm3, %v10625_v22, %v7082_v3  ;;  %v3401_v52 = vsel %vm2423_vm3, %v10659_v1, %v7083_v8  ;;  %v13091_v3 = vld [vmem:[#allocation139_spill] sm:$0xff]  ;;  %v13092_v21 = vld [vmem:[#allocation166_spill] sm:$0xff] }
 0x4c5   : > { %v7078_v7 = vunpack.i.h.bf16 %v7076_v20  ;;  %v7077_v61 = vunpack.i.l.bf16 %v7076_v20  ;;  %v7086_v24 = vpop.permute.xlu1 %7085  ;;  %v3443_v1 = vpack.c.bf16 %v3401_v52, %v3400_v59  ;;  %v3066_v49 = vmul.f32 %v11013_v39, %v13091_v3  ;;  %v13095_v59 = vld [vmem:[#allocation167_spill] sm:$0xff]  ;;  %v13096_v52 = vld [vmem:[#allocation36_spill] sm:$0xff]  ;;  %v13105_v3 = vld [vmem:[#allocation145_spill] sm:$0xff] }
 0x4c6   : > { %v7088_v30 = vunpack.i.h.bf16 %v7086_v24  ;;  %v7087_v40 = vunpack.i.l.bf16 %v7086_v24  ;;  %v3067_v20 = vmul.f32 %v11003_v14, %v13092_v21  ;;  %v13094_v14 = vld [vmem:[#allocation143_spill] sm:$0xff] }
 0x4c7   : > { %v3416_v47 = vsel %vm2423_vm3, %v3064_v13, %v7077_v61  ;;  %v3417_v42 = vsel %vm2423_vm3, %v3065_v55, %v7078_v7  ;;  %v3069_v5 = vmul.f32 %v11033_v25, %v13094_v14  ;;  %v3070_v25 = vmul.f32 %v11074_v15, %v13095_v59  ;;  %v13121_v14 = vld [vmem:[#allocation159_spill] sm:$0xff] }
 0x4c8   : > { %v7091_v26 = vpop.permute.xlu0 %7090  ;;  %v3444_v0 = vpack.c.bf16 %v3417_v42, %v3416_v47  ;;  %v3376_v17 = vsel %vm2423_vm3, %v2960_v50, %v7087_v40  ;;  %v3377_v60 = vsel %vm2423_vm3, %v2961_v43, %v7088_v30  ;;  %v3071_v47 = vmul.f32 %v11064_v27, %v13096_v52 }
 0x4c9   : > { %v7093_v22 = vunpack.i.h.bf16 %v7091_v26  ;;  %v7092_v45 = vunpack.i.l.bf16 %v7091_v26  ;;  %v7101_v38 = vpop.permute.xlu1 %7100  ;;  %v3461_v4 = vpack.c.bf16 %v3377_v60, %v3376_v17  ;;  %v13098_v17 = vld [vmem:[#allocation63_spill] sm:$0xff] }
 0x4ca   : > { %v7103_v9 = vunpack.i.h.bf16 %v7101_v38  ;;  %v7102_v44 = vunpack.i.l.bf16 %v7101_v38  ;;  %3938 = vmatprep.mubr.bf16.mxu0 %v3444_v0  ;;  %v13097_v0 = vld [vmem:[#allocation121_spill] sm:$0xff]  ;;  %v3072_v60 = vmul.f32 %v13049_v51, %v13098_v17 }
 0x4cb   : > { %3858 = vmatmul.mubr.bf16.gmra.mxu1 %v3451_v63  ;;  %3939 = vmatmul.mubr.bf16.gmra.mxu0 %v3443_v1  ;;  %v3392_v2 = vsel %vm2423_vm3, %v3024_v19, %v7092_v45  ;;  %v3393_v11 = vsel %vm2423_vm3, %v3025_v6, %v7093_v22  ;;  %v3073_v15 = vmul.f32 %v13051_v41, %v13097_v0  ;;  %v13099_v38 = vld [vmem:[#allocation77_spill] sm:$0xff]  ;;  %v13100_v1 = vld [vmem:[#allocation39_spill] sm:$0xff] }
 0x4cc   : > { %v7096_v48 = vpop.permute.xlu0 %7095  ;;  %3865 = vmatprep.mubr.bf16.mxu1 %v3457_v10  ;;  %v3462_v53 = vpack.c.bf16 %v3393_v11, %v3392_v2  ;;  %v3402_v12 = vsel %vm2423_vm3, %v10676_v57, %v7102_v44  ;;  %v3403_v54 = vsel %vm2423_vm3, %v10730_v16, %v7103_v9  ;;  %v13093_v10 = vld [vmem:[#allocation176_spill] sm:$0xff]  ;;  %v13101_v9 = vpack.c.bf16 %v13099_v38, %v13100_v1 }
 0x4cd   : > { %v7098_v23 = vunpack.i.h.bf16 %v7096_v48  ;;  %v7097_v8 = vunpack.i.l.bf16 %v7096_v48  ;;  %v7111_v63 = vpop.permute.xlu1 %7110  ;;  %v3068_v7 = vmul.f32 %v11043_v37, %v13093_v10  ;;  %v3448_v24 = vpack.c.bf16 %v3403_v54, %v3402_v12  ;;  %v13109_v54 = vld [vmem:[#allocation60_spill] sm:$0xff]  ;;  %v13115_v10 = vld [vmem:[#allocation141_spill] sm:$0xff] }
 0x4ce   : > { %v7113_v57 = vunpack.i.h.bf16 %v7111_v63  ;;  %v7112_v50 = vunpack.i.l.bf16 %v7111_v63  ;;  %v13110_v63 = vld [vmem:[#allocation146_spill] sm:$0xff] }
 0x4cf   : > { %v3418_v46 = vsel %vm2423_vm3, %v3066_v49, %v7097_v8  ;;  %v3419_v13 = vsel %vm2423_vm3, %v3067_v20, %v7098_v23  ;;  %v13103_v23 = vld [vmem:[#allocation137_spill] sm:$0xff]  ;;  %v13106_v49 = vld [vmem:[#allocation135_spill] sm:$0xff] }
 0x4d0   : > { %v7106_v29 = vpop.permute.xlu0 %7105  ;;  %v3449_v55 = vpack.c.bf16 %v3419_v13, %v3418_v46  ;;  %v3404_v34 = vsel %vm2423_vm3, %v10733_v62, %v7112_v50  ;;  %v3405_v35 = vsel %vm2423_vm3, %v10755_v18, %v7113_v57  ;;  %v13107_v21 = vpack.c.bf16 %v13105_v3, %v13106_v49  ;;  %v13112_v13 = vld [vmem:[#allocation157_spill] sm:$0xff] }
 0x4d1   : > { %v7108_v39 = vunpack.i.h.bf16 %v7106_v29  ;;  %v7107_v61 = vunpack.i.l.bf16 %v7106_v29  ;;  %v3453_v27 = vpack.c.bf16 %v3405_v35, %v3404_v34  ;;  %v13111_v46 = vpack.c.bf16 %v13109_v54, %v13110_v63  ;;  %v13113_v29 = vld [vmem:[#allocation34_spill] sm:$0xff] }
 0x4d2   : > { %3946 = vmatprep.mubr.bf16.mxu0 %v3449_v55  ;;  %v13114_v55 = vpack.c.bf16 %v13112_v13, %v13113_v29 }
 0x4d3   : > { %3866 = vmatmul.mubr.bf16.gmra.mxu1 %v3456_v32  ;;  %3947 = vmatmul.mubr.bf16.gmra.mxu0 %v3448_v24  ;;  %v3420_v16 = vsel %vm2423_vm3, %v3068_v7, %v7107_v61  ;;  %v3421_v36 = vsel %vm2423_vm3, %v3069_v5, %v7108_v39  ;;  %v7121_v32 = vpop.permute.xlu1 %7120  ;;  %v13116_v7 = vld [vmem:[#allocation24_spill] sm:$0xff]  ;;  %v13119_v61 = vld [vmem:[#allocation95_spill] sm:$0xff] }
 0x4d4   : > { %v7116_v43 = vpop.permute.xlu0 %7115  ;;  %3873 = vmatprep.mubr.bf16.mxu1 %v3462_v53  ;;  %v3454_v37 = vpack.c.bf16 %v3421_v36, %v3420_v16  ;;  %v7123_v62 = vunpack.i.h.bf16 %v7121_v32  ;;  %v7122_v22 = vunpack.i.l.bf16 %v7121_v32  ;;  %v13102_v53 = vld [vmem:[#allocation80_spill] sm:$0xff]  ;;  %v13117_v39 = vpack.c.bf16 %v13115_v10, %v13116_v7  ;;  %v13122_v5 = vld [vmem:[#allocation155_spill] sm:$0xff]  ;;  %v11411_v7 = vld [vmem:[#allocation10] ss:$0 sm:$0xff] }
 0x4d5   : > { %v7118_v30 = vunpack.i.h.bf16 %v7116_v43  ;;  %v7117_v40 = vunpack.i.l.bf16 %v7116_v43  ;;  %v13104_v8 = vpack.c.bf16 %v13102_v53, %v13103_v23  ;;  %v13123_v57 = vpack.c.bf16 %v13121_v14, %v13122_v5 }
 0x4d6   : > { %3954 = vmatprep.mubr.bf16.mxu0 %v3454_v37  ;;  %v3406_v44 = vsel %vm2423_vm3, %v10759_v56, %v7122_v22  ;;  %v3407_v51 = vsel %vm2423_vm3, %v10781_v33, %v7123_v62  ;;  %v13108_v33 = vld [vmem:[#allocation68_spill] sm:$0xff] }
 0x4d7   : > { %v3422_v42 = vsel %vm2423_vm3, %v3070_v25, %v7117_v40  ;;  %v3423_v58 = vsel %vm2423_vm3, %v3071_v47, %v7118_v30  ;;  %v7131_v2 = vpop.permute.xlu1 %7130 }
 0x4d8   : > { %v7126_v19 = vpop.permute.xlu0 %7125  ;;  %v3459_v26 = vpack.c.bf16 %v3423_v58, %v3422_v42  ;;  %v7133_v11 = vunpack.i.h.bf16 %v7131_v2  ;;  %v7132_v48 = vunpack.i.l.bf16 %v7131_v2 }
 0x4d9   : > { %v7128_v31 = vunpack.i.h.bf16 %v7126_v19  ;;  %v7127_v6 = vunpack.i.l.bf16 %v7126_v19 }
 0x4da   : > { %v3408_v56 = vsel %vm2423_vm3, %v10785_v28, %v7132_v48  ;;  %v3409_v20 = vsel %vm2423_vm3, %v13108_v33, %v7133_v11  ;;  %v13118_v28 = vld [vmem:[#allocation97_spill] sm:$0xff] }
 0x4db   : > { %3874 = vmatmul.mubr.bf16.gmra.mxu1 %v3461_v4  ;;  %3955 = vmatmul.mubr.bf16.gmra.mxu0 %v3453_v27  ;;  %v3424_v18 = vsel %vm2423_vm3, %v3072_v60, %v7127_v6  ;;  %v3425_v45 = vsel %vm2423_vm3, %v3073_v15, %v7128_v31  ;;  %v3458_v4 = vpack.c.bf16 %v3407_v51, %v3406_v44 }
 0x4dc   : > { %3962 = vmatprep.mubr.bf16.mxu0 %v3459_v26  ;;  %6532 = vmatprep.mubr.msk.bf16.mxu1 %vm2423_vm3, %v13101_v9  ;;  %v3464_v41 = vpack.c.bf16 %v3425_v45, %v3424_v18  ;;  %v3463_v12 = vpack.c.bf16 %v3409_v20, %v3408_v56  ;;  %v13120_v24 = vpack.c.bf16 %v13118_v28, %v13119_v61 }
 0x4e3   : > { %3963 = vmatmul.mubr.bf16.gmra.mxu0 %v3458_v4  ;;  %6533 = vmatmul.mubr.msk.bf16.vlgmr.msra.gmra.mxu1 %vm2423_vm3, %v13104_v8 }
 0x4e4   : > { %3970 = vmatprep.mubr.bf16.mxu0 %v3464_v41  ;;  %6536 = vmatprep.mubr.msk.bf16.mxu1 %vm2423_vm3, %v13107_v21 }
 0x4eb   : > { %3971 = vmatmul.mubr.bf16.gmra.mxu0 %v3463_v12  ;;  %6537 = vmatmul.mubr.msk.bf16.gmra.mxu1 %vm2423_vm3, %v13111_v46 }
 0x4ec   : > { %6540 = vmatprep.mubr.msk.bf16.mxu1 %vm2423_vm3, %v13114_v55 }
 0x4f3   : > { %6541 = vmatmul.mubr.msk.bf16.gmra.mxu1 %vm2423_vm3, %v13117_v39 }
 0x4f4   : > { %6544 = vmatprep.mubr.msk.bf16.mxu1 %vm2423_vm3, %v13120_v24 }
 0x4fb   : > { %6545 = vmatmul.mubr.msk.bf16.gmra.mxu1 %vm2423_vm3, %v13123_v57 }
 0x563   : > { %v6310_v50 = vpop.f32.mrf.mxu1 }
 0x565   : > { %v6311_v16 = vpop.f32.mrf.mxu1 }
 0x566   : > { %v6312_v29 = vadd.f32 %v6311_v16, %v6310_v50 }
 0x567   : > { %v6313_v36 = vpop.f32.mrf.mxu1 }
 0x568   : > { %v3820_v50 = vadd.f32 %v6312_v29, %v11411_v7 }
 0x569   : > { %v6314_v43 = vpop.f32.mrf.mxu1 }
 0x56a   : > { %v6315_v55 = vadd.f32 %v6314_v43, %v6313_v36 }
 0x56b   : > { %v6316_v37 = vpop.f32.mrf.mxu1 }
 0x56c   : > { %v3823_v16 = vadd.f32 %v6315_v55, %v11411_v7 }
 0x56d   : > { %v6317_v30 = vpop.f32.mrf.mxu1 }
 0x56e   : > { %v6318_v63 = vadd.f32 %v6317_v30, %v6316_v37 }
 0x56f   : > { %v6319_v40 = vpop.f32.mrf.mxu1 }
 0x570   : > { %v3828_v24 = vadd.f32 %v6318_v63, %v11411_v7 }
 0x571   : > { %v6320_v59 = vpop.f32.mrf.mxu1 }
 0x572   : > { %v6321_v39 = vadd.f32 %v6320_v59, %v6319_v40 }
 0x573   : > { %v6322_v25 = vpop.f32.mrf.mxu1  ;;  %v6374_v52 = vpop.f32.mrf.mxu0 }
 0x574   : > { %v3831_v43 = vadd.f32 %v6321_v39, %v11411_v7 }
 0x575   : > { %v6323_v47 = vpop.f32.mrf.mxu1  ;;  %v6375_v34 = vpop.f32.mrf.mxu0 }
 0x576   : > { %v6324_v14 = vadd.f32 %v6323_v47, %v6322_v25  ;;  %v6376_v5 = vadd.f32 %v6375_v34, %v6374_v52 }
 0x577   : > { %v6325_v35 = vpop.f32.mrf.mxu1  ;;  %v6377_v32 = vpop.f32.mrf.mxu0 }
 0x578   : > { %v3836_v25 = vadd.f32 %v6324_v14, %v11411_v7  ;;  %v3917_v34 = vadd.f32 %v6376_v5, %v3820_v50 }
 0x579   : > { %v6326_v42 = vpop.f32.mrf.mxu1  ;;  %v6378_v58 = vpop.f32.mrf.mxu0 }
 0x57a   : > { %v6327_v57 = vadd.f32 %v6326_v42, %v6325_v35  ;;  %v6379_v40 = vadd.f32 %v6378_v58, %v6377_v32 }
 0x57b   : > { %v6328_v19 = vpop.f32.mrf.mxu1  ;;  %v6380_v26 = vpop.f32.mrf.mxu0 }
 0x57c   : > { %v3839_v52 = vadd.f32 %v6327_v57, %v11411_v7  ;;  %v3920_v5 = vadd.f32 %v6379_v40, %v3823_v16 }
 0x57d   : > { %v6329_v0 = vpop.f32.mrf.mxu1  ;;  %v6381_v15 = vpop.f32.mrf.mxu0 }
 0x57e   : > { %v6382_v10 = vadd.f32 %v6381_v15, %v6380_v26  ;;  %v6330_v59 = vadd.f32 %v6329_v0, %v6328_v19 }
 0x57f   : > { %v6331_v31 = vpop.f32.mrf.mxu1  ;;  %v6383_v6 = vpop.f32.mrf.mxu0 }
 0x580   : > { %v3925_v36 = vadd.f32 %v6382_v10, %v3828_v24  ;;  %v3844_v0 = vadd.f32 %v6330_v59, %v11411_v7 }
 0x581   : > { %v6332_v27 = vpop.f32.mrf.mxu1  ;;  %v6384_v17 = vpop.f32.mrf.mxu0 }
 0x582   : > { %v6385_v26 = vadd.f32 %v6384_v17, %v6383_v6  ;;  %v6333_v35 = vadd.f32 %v6332_v27, %v6331_v31 }
 0x583   : > { %v6334_v60 = vpop.f32.mrf.mxu1  ;;  %v6386_v62 = vpop.f32.mrf.mxu0 }
 0x584   : > { %v3928_v24 = vadd.f32 %v6385_v26, %v3831_v43 }
 0x585   : > { %v6335_v22 = vpop.f32.mrf.mxu1  ;;  %v6387_v18 = vpop.f32.mrf.mxu0 }
 0x586   : > { %v6336_v42 = vadd.f32 %v6335_v22, %v6334_v60  ;;  %v6388_v29 = vadd.f32 %v6387_v18, %v6386_v62  ;;  %v3847_v22 = vadd.f32 %v6333_v35, %v11411_v7 }
 0x587   : > { %v6337_v45 = vpop.f32.mrf.mxu1  ;;  %v6389_v38 = vpop.f32.mrf.mxu0 }
 0x588   : > { %v3852_v18 = vadd.f32 %v6336_v42, %v11411_v7 }
 0x589   : > { %v6338_v1 = vpop.f32.mrf.mxu1  ;;  %v6390_v9 = vpop.f32.mrf.mxu0 }
 0x58a   : > { %v6391_v39 = vadd.f32 %v6390_v9, %v6389_v38  ;;  %v3933_v9 = vadd.f32 %v6388_v29, %v3836_v25 }
 0x58b   : > { %v6340_v41 = vpop.f32.mrf.mxu1  ;;  %v6392_v44 = vpop.f32.mrf.mxu0 }
 0x58d   : > { %v6341_v51 = vpop.f32.mrf.mxu1  ;;  %v6393_v2 = vpop.f32.mrf.mxu0 }
 0x58e   : > { %v6394_v32 = vadd.f32 %v6393_v2, %v6392_v44  ;;  %v6342_v6 = vadd.f32 %v6341_v51, %v6340_v41  ;;  %v3936_v2 = vadd.f32 %v6391_v39, %v3839_v52 }
 0x58f   : > { %v11383_v4 = vpop.f32.mrf.mxu1  ;;  %v6395_v11 = vpop.f32.mrf.mxu0 }
 0x590   : > { %v3941_v51 = vadd.f32 %v6394_v32, %v3844_v0  ;;  %v3860_v43 = vadd.f32 %v6342_v6, %v11411_v7 }
 0x591   : > { %v11385_v48 = vpop.f32.mrf.mxu1  ;;  %v6396_v53 = vpop.f32.mrf.mxu0 }
 0x592   : > { %v6397_v31 = vadd.f32 %v6396_v53, %v6395_v11  ;;  %v6345_v40 = vadd.f32 %v11385_v48, %v11383_v4 }
 0x593   : > { %v11387_v23 = vpop.f32.mrf.mxu1  ;;  %v11389_v8 = vpop.f32.mrf.mxu0 }
 0x594   : > { %v3944_v26 = vadd.f32 %v6397_v31, %v3847_v22 }
 0x595   : > { %v11391_v3 = vpop.f32.mrf.mxu1  ;;  %v11393_v49 = vpop.f32.mrf.mxu0 }
 0x597   : > { %v11395_v21 = vpop.f32.mrf.mxu1  ;;  %v11397_v56 = vpop.f32.mrf.mxu0 }
 0x599   : > { %v11399_v33 = vpop.f32.mrf.mxu1  ;;  %v11401_v20 = vpop.f32.mrf.mxu0 }
 0x59a   : > { %v6403_v32 = vadd.f32 %v11401_v20, %v11397_v56 }
 0x59b   : > { %v11403_v12 = vpop.f32.mrf.mxu1  ;;  %v11405_v54 = vpop.f32.mrf.mxu0 }
 0x59d   : > { %v11407_v46 = vpop.f32.mrf.mxu1  ;;  %v11409_v13 = vpop.f32.mrf.mxu0 }
 0x59e   : > { %v6406_v4 = vadd.f32 %v11409_v13, %v11405_v54  ;;  %v3863_v54 = vadd.f32 %v6345_v40, %v11411_v7 }
 0x59f   : > { %v11413_v28 = vpop.f32.mrf.mxu1  ;;  %v11415_v61 = vpop.f32.mrf.mxu0 }
 0x5a1   : > { %v11418_v37 = vpop.f32.mrf.mxu1  ;;  %v11420_v30 = vpop.f32.mrf.mxu0 }
 0x5a2   : > { %13124 = vst [vmem:[#allocation32_spill] sm:$0xff] %v11418_v37  ;;  %v6339_v37 = vadd.f32 %v6338_v1, %v6337_v45  ;;  %v6409_v56 = vadd.f32 %v11420_v30, %v11415_v61  ;;  %v6354_v61 = vadd.f32 %v11407_v46, %v11403_v12 }
 0x5a3   : > { %v11425_v15 = vpop.f32.mrf.mxu0  ;;  %v6534_v63 = vpop.f32.mrf.mxu1 }
 0x5a4   : > { %v4022_v47 = vadd.f32 %v6534_v63, %v3925_v36  ;;  %v3855_v41 = vadd.f32 %v6339_v37, %v11411_v7  ;;  %v6348_v37 = vadd.f32 %v11391_v3, %v11387_v23 }
 0x5a5   : > { %v11429_v55 = vpop.f32.mrf.mxu0  ;;  %v4013_v10 = vpop.f32.mrf.mxu1 }
 0x5a6   : > { %v11431_v58 = vmax.f32 %v4022_v47, 0.0  ;;  %v4014_v19 = vadd.f32 %v4013_v10, %v3917_v34  ;;  %v6400_v34 = vadd.f32 %v11393_v49, %v11389_v8  ;;  %v11475_v13 = vadd.f32 %v6348_v37, %v11411_v7 }
 0x5a7   : > { %v11434_v17 = vpop.f32.mrf.mxu0  ;;  %v6535_v14 = vpop.f32.mrf.mxu1 }
 0x5a8   : > { %v4153_v27 = vrot.slane %v11431_v58, 2  ;;  %v4159_v60 = vrot.slane %v11431_v58, 6  ;;  %v11438_v62 = vmax.f32 %v4014_v19, 0.0  ;;  %v4025_v45 = vadd.f32 %v6535_v14, %v3928_v24 }
 0x5a9   : > { %v11442_v38 = vpop.f32.mrf.mxu0  ;;  %v4016_v1 = vpop.f32.mrf.mxu1  ;;  %v3957_v24 = vadd.f32 %v6406_v4, %v3860_v43 }
 0x5aa   : > { %v4093_v44 = vrot.slane %v11438_v62, 2  ;;  %v4099_v11 = vrot.slane %v11438_v62, 6  ;;  %v11447_v53 = vmax.f32 %v4025_v45, 0.0  ;;  %v4017_v57 = vadd.f32 %v4016_v1, %v3920_v5 }
 0x5ab   : > { %v6416_v50 = vpop.f32.mrf.mxu0  ;;  %v6538_v16 = vpop.f32.mrf.mxu1  ;;  %v7134_v36 = vpack.i.bf16 %v4159_v60, %v4153_v27  ;;  %v6351_v1 = vadd.f32 %v11399_v33, %v11395_v21  ;;  %v3960_v33 = vadd.f32 %v6409_v56, %v3863_v54 }
 0x5ac   : > { %v4038_v59 = vadd.f32 %v6538_v16, %v3941_v51  ;;  %v4164_v63 = vrot.slane %v11447_v53, 2  ;;  %v4170_v25 = vrot.slane %v11447_v53, 6  ;;  %v11456_v52 = vmax.f32 %v4017_v57, 0.0 }
 0x5ad   : > { %7135 = vrot.lane.b32.xlu0 %v7134_v36, %s7756_s30  ;;  %v4029_v47 = vpop.f32.mrf.mxu1  ;;  %v6417_v42 = vpop.f32.mrf.mxu0  ;;  %v7139_v39 = vpack.i.bf16 %v4099_v11, %v4093_v44  ;;  %v3949_v44 = vadd.f32 %v6400_v34, %v3852_v18  ;;  %v3952_v51 = vadd.f32 %v6403_v32, %v3855_v41 }
 0x5ae   : > { %v11463_v48 = vmax.f32 %v4038_v59, 0.0  ;;  %v4030_v35 = vadd.f32 %v4029_v47, %v3933_v9  ;;  %v4104_v23 = vrot.slane %v11456_v52, 2  ;;  %v4110_v3 = vrot.slane %v11456_v52, 6  ;;  %v13125_v59 = vld [vmem:[#allocation32_spill] sm:$0xff] }
 0x5af   : > { %v6539_v29 = vpop.f32.mrf.mxu1  ;;  %v7144_v10 = vpack.i.bf16 %v4170_v25, %v4164_v63  ;;  %v6419_v31 = vpop.f32.mrf.mxu0  ;;  %v6418_v16 = vadd.f32 %v6417_v42, %v6416_v50  ;;  %v3876_v25 = vadd.f32 %v6354_v61, %v11411_v7  ;;  %v6412_v47 = vadd.f32 %v11429_v55, %v11425_v15 }
 0x5b0   : > { %v4275_v19 = vrot.slane %v11463_v48, 2  ;;  %v4281_v8 = vrot.slane %v11463_v48, 6  ;;  %v11471_v49 = vmax.f32 %v4030_v35, 0.0  ;;  %v4041_v0 = vadd.f32 %v6539_v29, %v3944_v26 }
 0x5b1   : > { %7145 = vrot.lane.b32.xlu1 %v7144_v10, %s7756_s30  ;;  %7140 = vrot.lane.b32.xlu0 %v7139_v39, %s7756_s30  ;;  %v4032_v6 = vpop.f32.mrf.mxu1  ;;  %v7149_v14 = vpack.i.bf16 %v4110_v3, %v4104_v23  ;;  %v6420_v18 = vpop.f32.mrf.mxu0  ;;  %v6357_v26 = vadd.f32 %v13125_v59, %v11413_v28  ;;  %v3973_v29 = vadd.f32 %v6418_v16, %v3876_v25  ;;  %v4157_v25 = vrot.slane %v11431_v58, 4 }
 0x5b2   : > { %v4214_v20 = vrot.slane %v11471_v49, 2  ;;  %v4220_v5 = vrot.slane %v11471_v49, 6  ;;  %v11483_v27 = vmax.f32 %v4041_v0, 0.0  ;;  %v4033_v60 = vadd.f32 %v4032_v6, %v3936_v2 }
 0x5b3   : > { %v6542_v22 = vpop.f32.mrf.mxu1  ;;  %v7154_v45 = vpack.i.bf16 %v4281_v8, %v4275_v19  ;;  %v6421_v35 = vadd.f32 %v6420_v18, %v6419_v31  ;;  %v3879_v15 = vadd.f32 %v6357_v26, %v11411_v7  ;;  %v6415_v55 = vadd.f32 %v11442_v38, %v11434_v17 }
 0x5b4   : > { %v4054_v9 = vadd.f32 %v6542_v22, %v3957_v24  ;;  %v4286_v30 = vrot.slane %v11483_v27, 2  ;;  %v4292_v11 = vrot.slane %v11483_v27, 6  ;;  %v11491_v57 = vmax.f32 %v4033_v60, 0.0 }
 0x5b5   : > { %7150 = vrot.lane.b32.xlu1 %v7149_v14, %s7756_s30  ;;  %7155 = vrot.lane.b32.xlu0 %v7154_v45, %s7756_s30  ;;  %v4045_v2 = vpop.f32.mrf.mxu1  ;;  %v7159_v40 = vpack.i.bf16 %v4220_v5, %v4214_v20  ;;  %v3965_v6 = vadd.f32 %v6412_v47, %v11475_v13  ;;  %v3871_v20 = vadd.f32 %v6351_v1, %v11411_v7  ;;  %v7759_v26 = vmov 1966171168  }
 0x5b6   : > { %v11495_v36 = vmax.f32 %v4054_v9, 0.0  ;;  %v4046_v21 = vadd.f32 %v4045_v2, %v3949_v44  ;;  %v4225_v41 = vrot.slane %v11491_v57, 2  ;;  %v4231_v12 = vrot.slane %v11491_v57, 6 }
 0x5b7   : > { %v6543_v46 = vpop.f32.mrf.mxu1  ;;  %v7164_v43 = vpack.i.bf16 %v4292_v11, %v4286_v30  ;;  %v3976_v24 = vadd.f32 %v6421_v35, %v3879_v15  ;;  %v3968_v45 = vadd.f32 %v6415_v55, %v3871_v20 }
 0x5b8   : > { %v4397_v37 = vrot.slane %v11495_v36, 2  ;;  %v4403_v63 = vrot.slane %v11495_v36, 6  ;;  %v11503_v50 = vmax.f32 %v4046_v21, 0.0  ;;  %v4057_v34 = vadd.f32 %v6543_v46, %v3960_v33 }
 0x5b9   : > { %7165 = vrot.lane.b32.xlu1 %v7164_v43, %s7756_s30  ;;  %7160 = vrot.lane.b32.xlu0 %v7159_v40, %s7756_s30  ;;  %v4048_v4 = vpop.f32.mrf.mxu1  ;;  %v7169_v39 = vpack.i.bf16 %v4231_v12, %v4225_v41  ;;  %v7758_v40 = vmov 0.0  }
 0x5ba   : > { %v4336_v28 = vrot.slane %v11503_v50, 2  ;;  %v4342_v23 = vrot.slane %v11503_v50, 6  ;;  %v4049_v3 = vadd.f32 %v4048_v4, %v3952_v51  ;;  %v11512_v42 = vmax.f32 %v4057_v34, 0.0  ;;  %4579 = vst [vmem:[#allocation3] sm:$0xff] %v7758_v40 }
 0x5bb   : > { %v6546_v10 = vpop.f32.mrf.mxu1  ;;  %v7174_v32 = vpack.i.bf16 %v4403_v63, %v4397_v37  ;;  %v4129_v37 = vunpack.c.l.s4 %v7759_v26 }
 0x5bc   : > { %v11517_v19 = vmax.f32 %v4049_v3, 0.0  ;;  %v4408_v8 = vrot.slane %v11512_v42, 2  ;;  %v4414_v54 = vrot.slane %v11512_v42, 6  ;;  %v4070_v0 = vadd.f32 %v6546_v10, %v3973_v29 }
 0x5bd   : > { %7170 = vrot.lane.b32.xlu1 %v7169_v39, %s7756_s30  ;;  %7175 = vrot.lane.b32.xlu0 %v7174_v32, %s7756_s30  ;;  %v4061_v56 = vpop.f32.mrf.mxu1  ;;  %v7179_v14 = vpack.i.bf16 %v4342_v23, %v4336_v28  ;;  %v4130_v4 = vunpack.c.0.s8 %v4129_v37  ;;  %v4097_v23 = vrot.slane %v11438_v62, 4  ;;  %v4168_v3 = vrot.slane %v11447_v53, 4 }
 0x5be   : > { %v4347_v17 = vrot.slane %v11517_v19, 2  ;;  %v4353_v38 = vrot.slane %v11517_v19, 6  ;;  %v4062_v5 = vadd.f32 %v4061_v56, %v3965_v6  ;;  %v7184_v60 = vpack.i.bf16 %v4414_v54, %v4408_v8  ;;  %v13126_v8 = vld [vmem:[#allocation27_spill] sm:$0xff] }
 0x5bf   : > { %v6547_v31 = vpop.f32.mrf.mxu1  ;;  %v11527_v9 = vmax.f32 %v4070_v0, 0.0  ;;  %v11557_v54 = vsub.s32 %v4130_v4, %v13126_v8 }
 0x5c0   : > { %v4073_v22 = vadd.f32 %v6547_v31, %v3976_v24  ;;  %v11529_v44 = vmax.f32 %v4062_v5, 0.0  ;;  %v7189_v61 = vpack.i.bf16 %v4353_v38, %v4347_v17  ;;  %v4108_v24 = vrot.slane %v11456_v52, 4 }
 0x5c1   : > { %7185 = vrot.lane.b32.xlu1 %v7184_v60, %s7756_s30  ;;  %7180 = vrot.lane.b32.xlu0 %v7179_v14, %s7756_s30  ;;  %v4064_v7 = vpop.f32.mrf.mxu1  ;;  %v4519_v2 = vrot.slane %v11527_v9, 2  ;;  %v4525_v16 = vrot.slane %v11527_v9, 6  ;;  %v4279_v14 = vrot.slane %v11463_v48, 4 }
 0x5c2   : > { %v4065_v13 = vadd.f32 %v4064_v7, %v3968_v45  ;;  %v4458_v1 = vrot.slane %v11529_v44, 2  ;;  %v4464_v51 = vrot.slane %v11529_v44, 6  ;;  %v11535_v30 = vmax.f32 %v4073_v22, 0.0 }
 0x5c3   : > { %v7204_v43 = vpack.i.bf16 %v4525_v16, %v4519_v2  ;;  %v4218_v2 = vrot.slane %v11471_v49, 4  ;;  %v4290_v16 = vrot.slane %v11483_v27, 4 }
 0x5c4   : > { %v11537_v11 = vmax.f32 %v4065_v13, 0.0  ;;  %v7194_v21 = vpack.i.bf16 %v4464_v51, %v4458_v1  ;;  %v4530_v41 = vrot.slane %v11535_v30, 2  ;;  %v4536_v12 = vrot.slane %v11535_v30, 6 }
 0x5c5   : > { %7190 = vrot.lane.b32.xlu1 %v7189_v61, %s7756_s30 }
 0x5c6   : > { %v4469_v33 = vrot.slane %v11537_v11, 2  ;;  %v4475_v18 = vrot.slane %v11537_v11, 6  ;;  %7195 = vrot.lane.b32.xlu0 %v7194_v21, %s7756_s30  ;;  %v7209_v59 = vpack.i.bf16 %v4536_v12, %v4530_v41 }
 0x5c8   : > { %v7199_v46 = vpack.i.bf16 %v4475_v18, %v4469_v33 }
 0x5ca   : > { %7200 = vrot.lane.b32.xlu1 %v7199_v46, %s7756_s30  ;;  %7205 = vrot.lane.b32.xlu0 %v7204_v43, %s7756_s30 }
 0x5ce   : > { %7210 = vrot.lane.b32.xlu1 %v7209_v59, %s7756_s30 }
 0x61f   : > { %v7136_v63 = vpop.permute.xlu0 %7135 }
 0x620   : > { %v7138_v47 = vunpack.i.h.bf16 %v7136_v63  ;;  %v7137_v34 = vunpack.i.l.bf16 %v7136_v63 }
 0x622   : > { %v4175_v35 = vsel %vm2423_vm3, %v4157_v25, %v7138_v47  ;;  %v4174_v28 = vsel %vm2423_vm3, %v11431_v58, %v7137_v34  ;;  %v4229_v47 = vrot.slane %v11491_v57, 4  ;;  %v4401_v34 = vrot.slane %v11495_v36, 4 }
 0x623   : > { %v7146_v29 = vpop.permute.xlu1 %7145  ;;  %v7141_v10 = vpop.permute.xlu0 %7140  ;;  %v6061_v0 = vpack.c.bf16 %v4175_v35, %v4174_v28 }
 0x624   : > { %v7148_v39 = vunpack.i.h.bf16 %v7146_v29  ;;  %v7147_v32 = vunpack.i.l.bf16 %v7146_v29  ;;  %v7143_v15 = vunpack.i.h.bf16 %v7141_v10  ;;  %v7142_v55 = vunpack.i.l.bf16 %v7141_v10 }
 0x625   : > { %v4194_v7 = vrot.slane %v6061_v0, %v11557_v54 }
 0x626   : > { %v4177_v6 = vsel %vm2423_vm3, %v4168_v3, %v7148_v39  ;;  %v4176_v56 = vsel %vm2423_vm3, %v11447_v53, %v7147_v32  ;;  %v4115_v58 = vsel %vm2423_vm3, %v4097_v23, %v7143_v15  ;;  %v4114_v20 = vsel %vm2423_vm3, %v11438_v62, %v7142_v55 }
 0x627   : > { %v6062_v17 = vpack.c.bf16 %v4177_v6, %v4176_v56  ;;  %v7151_v38 = vpop.permute.xlu1 %7150  ;;  %v7156_v5 = vpop.permute.xlu0 %7155  ;;  %v6058_v13 = vpack.c.bf16 %v4115_v58, %v4114_v20  ;;  %v4340_v6 = vrot.slane %v11503_v50, 4  ;;  %v4412_v56 = vrot.slane %v11512_v42, 4 }
 0x628   : > { %v7153_v31 = vunpack.i.h.bf16 %v7151_v38  ;;  %v7152_v60 = vunpack.i.l.bf16 %v7151_v38  ;;  %v7158_v22 = vunpack.i.h.bf16 %v7156_v5  ;;  %v7157_v45 = vunpack.i.l.bf16 %v7156_v5 }
 0x629   : > { %v4201_v53 = vrot.slane %v6062_v17, %v11557_v54 }
 0x62a   : > { %v4117_v1 = vsel %vm2423_vm3, %v4108_v24, %v7153_v31  ;;  %v4116_v62 = vsel %vm2423_vm3, %v11456_v52, %v7152_v60  ;;  %v4297_v51 = vsel %vm2423_vm3, %v4279_v14, %v7158_v22  ;;  %v4296_v61 = vsel %vm2423_vm3, %v11463_v48, %v7157_v45 }
 0x62b   : > { %v4202_v21 = vcombine.low %v4194_v7, %v4201_v53  ;;  %v6059_v33 = vpack.c.bf16 %v4117_v1, %v4116_v62  ;;  %v7166_v18 = vpop.permute.xlu1 %7165  ;;  %v7161_v41 = vpop.permute.xlu0 %7160  ;;  %v4134_v52 = vrot.slane %v6058_v13, %v11557_v54  ;;  %v6067_v26 = vpack.c.bf16 %v4297_v51, %v4296_v61 }
 0x62c   : > { %v7168_v12 = vunpack.i.h.bf16 %v7166_v18  ;;  %v7167_v46 = vunpack.i.l.bf16 %v7166_v18  ;;  %v7163_v43 = vunpack.i.h.bf16 %v7161_v41  ;;  %v7162_v40 = vunpack.i.l.bf16 %v7161_v41 }
 0x62d   : > { %6063 = vst.sshfl [vmem:[#allocation2 + $0x4] sm:$0x55 pattern:$0x73625140] %v4202_v21  ;;  %v4141_v59 = vrot.slane %v6059_v33, %v11557_v54  ;;  %v4351_v51 = vrot.slane %v11517_v19, 4 }
 0x62e   : > { %v4299_v48 = vsel %vm2423_vm3, %v4290_v16, %v7168_v12  ;;  %v4298_v37 = vsel %vm2423_vm3, %v11483_v27, %v7167_v46  ;;  %v4236_v63 = vsel %vm2423_vm3, %v4218_v2, %v7163_v43  ;;  %v4235_v25 = vsel %vm2423_vm3, %v11471_v49, %v7162_v40 }
 0x62f   : > { %v4142_v4 = vcombine.low %v4134_v52, %v4141_v59  ;;  %v6068_v35 = vpack.c.bf16 %v4299_v48, %v4298_v37  ;;  %v7171_v28 = vpop.permute.xlu1 %7170  ;;  %v7176_v23 = vpop.permute.xlu0 %7175  ;;  %v4316_v27 = vrot.slane %v6067_v26, %v11557_v54  ;;  %v6064_v15 = vpack.c.bf16 %v4236_v63, %v4235_v25 }
 0x630   : > { %v7173_v3 = vunpack.i.h.bf16 %v7171_v28  ;;  %v7172_v29 = vunpack.i.l.bf16 %v7171_v28  ;;  %v7178_v10 = vunpack.i.h.bf16 %v7176_v23  ;;  %v7177_v39 = vunpack.i.l.bf16 %v7176_v23 }
 0x631   : > { %6060 = vst.sshfl [vmem:[#allocation2] sm:$0x55 pattern:$0x73625140] %v4142_v4  ;;  %v4323_v32 = vrot.slane %v6068_v35, %v11557_v54  ;;  %v4462_v16 = vrot.slane %v11529_v44, 4  ;;  %v4473_v52 = vrot.slane %v11537_v11, 4 }
 0x632   : > { %v4238_v49 = vsel %vm2423_vm3, %v4229_v47, %v7173_v3  ;;  %v4237_v55 = vsel %vm2423_vm3, %v11491_v57, %v7172_v29  ;;  %v4419_v8 = vsel %vm2423_vm3, %v4401_v34, %v7178_v10  ;;  %v4418_v0 = vsel %vm2423_vm3, %v11495_v36, %v7177_v39 }
 0x633   : > { %v4324_v58 = vcombine.low %v4316_v27, %v4323_v32  ;;  %v6065_v20 = vpack.c.bf16 %v4238_v49, %v4237_v55  ;;  %v7186_v24 = vpop.permute.xlu1 %7185  ;;  %v7181_v14 = vpop.permute.xlu0 %7180  ;;  %v4255_v57 = vrot.slane %v6064_v15, %v11557_v54  ;;  %v6073_v22 = vpack.c.bf16 %v4419_v8, %v4418_v0 }
 0x634   : > { %v7188_v17 = vunpack.i.h.bf16 %v7186_v24  ;;  %v7187_v38 = vunpack.i.l.bf16 %v7186_v24  ;;  %v7183_v5 = vunpack.i.h.bf16 %v7181_v14  ;;  %v7182_v31 = vunpack.i.l.bf16 %v7181_v14 }
 0x635   : > { %6069 = vst.sshfl [vmem:[#allocation2 + $0xc] sm:$0x55 pattern:$0x73625140] %v4324_v58  ;;  %v4262_v60 = vrot.slane %v6065_v20, %v11557_v54  ;;  %v4438_v21 = vrot.slane %v6073_v22, %v11557_v54  ;;  %v4523_v34 = vrot.slane %v11527_v9, 4  ;;  %v4534_v32 = vrot.slane %v11535_v30, 4 }
 0x636   : > { %v4421_v36 = vsel %vm2423_vm3, %v4412_v56, %v7188_v17  ;;  %v4420_v45 = vsel %vm2423_vm3, %v11512_v42, %v7187_v38  ;;  %v4358_v7 = vsel %vm2423_vm3, %v4340_v6, %v7183_v5  ;;  %v4357_v53 = vsel %vm2423_vm3, %v11503_v50, %v7182_v31 }
 0x637   : > { %v4263_v13 = vcombine.low %v4255_v57, %v4262_v60  ;;  %v6074_v1 = vpack.c.bf16 %v4421_v36, %v4420_v45  ;;  %v7191_v62 = vpop.permute.xlu1 %7190  ;;  %v6070_v42 = vpack.c.bf16 %v4358_v7, %v4357_v53 }
 0x638   : > { %v7193_v61 = vunpack.i.h.bf16 %v7191_v62  ;;  %v7192_v2 = vunpack.i.l.bf16 %v7191_v62  ;;  %v7196_v18 = vpop.permute.xlu0 %7195 }
 0x639   : > { %6066 = vst.sshfl [vmem:[#allocation2 + $0x8] sm:$0x55 pattern:$0x73625140] %v4263_v13  ;;  %v4445_v33 = vrot.slane %v6074_v1, %v11557_v54  ;;  %v7198_v12 = vunpack.i.h.bf16 %v7196_v18  ;;  %v7197_v46 = vunpack.i.l.bf16 %v7196_v18  ;;  %v4377_v37 = vrot.slane %v6070_v42, %v11557_v54 }
 0x63a   : > { %v4360_v41 = vsel %vm2423_vm3, %v4351_v51, %v7193_v61  ;;  %v4359_v50 = vsel %vm2423_vm3, %v11517_v19, %v7192_v2 }
 0x63b   : > { %v4446_v43 = vcombine.low %v4438_v21, %v4445_v33  ;;  %v6071_v40 = vpack.c.bf16 %v4360_v41, %v4359_v50  ;;  %v4480_v59 = vsel %vm2423_vm3, %v4462_v16, %v7198_v12  ;;  %v4479_v26 = vsel %vm2423_vm3, %v11529_v44, %v7197_v46 }
 0x63c   : > { %v7201_v48 = vpop.permute.xlu1 %7200  ;;  %v7206_v19 = vpop.permute.xlu0 %7205  ;;  %v6076_v4 = vpack.c.bf16 %v4480_v59, %v4479_v26 }
 0x63d   : > { %6075 = vst.sshfl [vmem:[#allocation2 + $0x14] sm:$0x55 pattern:$0x73625140] %v4446_v43  ;;  %v4384_v63 = vrot.slane %v6071_v40, %v11557_v54  ;;  %v7203_v25 = vunpack.i.h.bf16 %v7201_v48  ;;  %v7202_v47 = vunpack.i.l.bf16 %v7201_v48  ;;  %v7208_v35 = vunpack.i.h.bf16 %v7206_v19 }
 0x63e   : > { %v7207_v28 = vunpack.i.l.bf16 %v7206_v19  ;;  %v4499_v55 = vrot.slane %v6076_v4, %v11557_v54 }
 0x63f   : > { %v4385_v23 = vcombine.low %v4377_v37, %v4384_v63  ;;  %v4482_v3 = vsel %vm2423_vm3, %v4473_v52, %v7203_v25  ;;  %v4481_v44 = vsel %vm2423_vm3, %v11537_v11, %v7202_v47  ;;  %v4541_v10 = vsel %vm2423_vm3, %v4523_v34, %v7208_v35 }
 0x640   : > { %v6077_v29 = vpack.c.bf16 %v4482_v3, %v4481_v44  ;;  %v4540_v39 = vsel %vm2423_vm3, %v11527_v9, %v7207_v28  ;;  %v7211_v27 = vpop.permute.xlu1 %7210 }
 0x641   : > { %6072 = vst.sshfl [vmem:[#allocation2 + $0x10] sm:$0x55 pattern:$0x73625140] %v4385_v23  ;;  %v7213_v15 = vunpack.i.h.bf16 %v7211_v27  ;;  %v7212_v49 = vunpack.i.l.bf16 %v7211_v27  ;;  %v6079_v0 = vpack.c.bf16 %v4541_v10, %v4540_v39 }
 0x642   : > { %v4506_v8 = vrot.slane %v6077_v29, %v11557_v54 }
 0x643   : > { %v4543_v6 = vsel %vm2423_vm3, %v4534_v32, %v7213_v15  ;;  %v4542_v11 = vsel %vm2423_vm3, %v11535_v30, %v7212_v49  ;;  %v4560_v9 = vrot.slane %v6079_v0, %v11557_v54 }
 0x644   : > { %v4507_v56 = vcombine.low %v4499_v55, %v4506_v8  ;;  %v6080_v58 = vpack.c.bf16 %v4543_v6, %v4542_v11 }
 0x646   : > { %6078 = vst.sshfl [vmem:[#allocation2 + $0x18] sm:$0x55 pattern:$0x73625140] %v4507_v56  ;;  %v4567_v20 = vrot.slane %v6080_v58, %v11557_v54 }
 0x648   : > { %v4568_v24 = vcombine.low %v4560_v9, %v4567_v20 }
 0x64a   : > { %6081 = vst.sshfl [vmem:[#allocation2 + $0x1c] sm:$0x55 pattern:$0x73625140] %v4568_v24 }
 0x64b PF: > { %v7276_v30 = vld [vmem:[%s8002_s13 + $0xe4] ss:$16 sps:$4 sm:$0xff]   ;;  %v7280_v17 = vld [vmem:[%s8002_s13 + $0xe0] ss:$16 sps:$4 sm:$0xff]   ;;  %v7760_v47 = vmov 1966171168   ;;  %v4724_v34 = vlaneseq }
 0x64c   : > { %v7278_v14 = vld [vmem:[%s8002_s13 + $0x2e4] ss:$16 sps:$4 sm:$0xff]   ;;  %5381 = vmatprep.subr.bf16.mxu0 %v7276_v30  ;;  %v7281_v54 = vld [vmem:[%s8002_s13 + $0x2e0] ss:$16 sps:$4 sm:$0xff]   ;;  %v4722_v19 = vunpack.c.l.s4 %v7760_v47  ;;  %s6082_s30 = sshll.u32 %s7849_s27, 2  ;;  %p6212_p3 = scmp.ne.s32.totalorder %s7849_s27, 7 }
 0x64d   : > { %5422 = vmatprep.subr.bf16.mxu1 %v7278_v14  ;;  %v7282_v38 = vld [vmem:[%s8002_s13 + $0xc4] ss:$16 sps:$4 sm:$0xff]   ;;  %5382 = vmatpush1.bf16.msra.mxu0 %v7280_v17  ;;  %v7286_v31 = vld [vmem:[%s8002_s13 + $0xc0] ss:$16 sps:$4 sm:$0xff]   ;;  %v11676_v44 = vshrl.u32 %v4724_v34, 7  ;;  %s4582_s29 = scalar_lea.vmem [#allocation2], %s6082_s30 }
 0x64e   : > { %5423 = vmatpush1.bf16.msra.mxu1 %v7281_v54  ;;  %v7284_v5 = vld [vmem:[%s8002_s13 + $0x2c4] ss:$16 sps:$4 sm:$0xff]   ;;  %5383 = vmatprep.subr.bf16.mxu0 %v7282_v38  ;;  %v7287_v57 = vld [vmem:[%s8002_s13 + $0x2c0] ss:$16 sps:$4 sm:$0xff]   ;;  %v4723_v3 = vunpack.c.0.s8 %v4722_v19  ;;  %v7408_v47 = vld [vmem:[%s8002_s13 + $0x28] ss:$16 sps:$4 sm:$0xff]  }
 0x64f   : > { %5424 = vmatprep.subr.bf16.mxu1 %v7284_v5  ;;  %v7288_v60 = vld [vmem:[%s8002_s13 + $0xa4] ss:$16 sps:$4 sm:$0xff]   ;;  %v7292_v36 = vld [vmem:[%s8002_s13 + $0xa0] ss:$16 sps:$4 sm:$0xff]   ;;  %v7411_v19 = vld [vmem:[%s8002_s13 + $0x228] ss:$16 sps:$4 sm:$0xff]  }
 0x650   : > { %v7290_v22 = vld [vmem:[%s8002_s13 + $0x2a4] ss:$16 sps:$4 sm:$0xff]   ;;  %v7293_v45 = vld [vmem:[%s8002_s13 + $0x2a0] ss:$16 sps:$4 sm:$0xff]   ;;  %v4726_v32 = vsub.s32 %v4723_v3, %v11676_v44  ;;  %v7416_v34 = vld [vmem:[%s8002_s13 + $0xc] ss:$16 sps:$4 sm:$0xff]  }
 0x651   : > { %5384 = vmatpush1.bf16.msra.mxu0 %v7286_v31  ;;  %v7294_v7 = vld [vmem:[%s8002_s13 + $0x84] ss:$16 sps:$4 sm:$0xff]   ;;  %v7298_v13 = vld [vmem:[%s8002_s13 + $0x80] ss:$16 sps:$4 sm:$0xff]   ;;  %v7425_v3 = vld [vmem:[%s8002_s13 + $0x3ec] ss:$16 sps:$4 sm:$0xff]  }
 0x652   : > { %5425 = vmatpush1.bf16.msra.mxu1 %v7287_v57  ;;  %5385 = vmatprep.subr.bf16.mxu0 %v7288_v60  ;;  %v7296_v53 = vld [vmem:[%s8002_s13 + $0x284] ss:$16 sps:$4 sm:$0xff]   ;;  %v7299_v1 = vld [vmem:[%s8002_s13 + $0x280] ss:$16 sps:$4 sm:$0xff]  }
 0x653   : > { %5426 = vmatprep.subr.bf16.mxu1 %v7290_v22  ;;  %v7300_v62 = vld [vmem:[%s8002_s13 + $0x64] ss:$16 sps:$4 sm:$0xff]   ;;  %v7304_v61 = vld [vmem:[%s8002_s13 + $0x60] ss:$16 sps:$4 sm:$0xff]  }
 0x654   : > { %v7302_v51 = vld [vmem:[%s8002_s13 + $0x264] ss:$16 sps:$4 sm:$0xff]   ;;  %v7305_v2 = vld [vmem:[%s8002_s13 + $0x260] ss:$16 sps:$4 sm:$0xff]  }
 0x655   : > { %5386 = vmatpush1.bf16.msra.mxu0 %v7292_v36  ;;  %v7306_v16 = vld [vmem:[%s8002_s13 + $0x44] ss:$16 sps:$4 sm:$0xff]   ;;  %v7310_v33 = vld [vmem:[%s8002_s13 + $0x40] ss:$16 sps:$4 sm:$0xff]  }
 0x656   : > { %5427 = vmatpush1.bf16.msra.mxu1 %v7293_v45  ;;  %5387 = vmatprep.subr.bf16.mxu0 %v7294_v7  ;;  %v7308_v21 = vld [vmem:[%s8002_s13 + $0x244] ss:$16 sps:$4 sm:$0xff]   ;;  %v7311_v42 = vld [vmem:[%s8002_s13 + $0x240] ss:$16 sps:$4 sm:$0xff]   ;;  %v7374_v45 = vld [vmem:[%s8002_s13 + $0xec] ss:$16 sps:$4 sm:$0xff]  }
 0x657   : > { %5428 = vmatprep.subr.bf16.mxu1 %v7296_v53  ;;  %v7312_v18 = vld [vmem:[%s8002_s13 + $0x24] ss:$16 sps:$4 sm:$0xff]   ;;  %v7316_v50 = vld [vmem:[%s8002_s13 + $0x20] ss:$16 sps:$4 sm:$0xff]   ;;  %v7377_v7 = vld [vmem:[%s8002_s13 + $0x2ec] ss:$16 sps:$4 sm:$0xff]  }
 0x658   : > { %v7314_v41 = vld [vmem:[%s8002_s13 + $0x224] ss:$16 sps:$4 sm:$0xff]   ;;  %v7317_v12 = vld [vmem:[%s8002_s13 + $0x220] ss:$16 sps:$4 sm:$0xff]  }
 0x659   : > { %5388 = vmatpush1.bf16.msra.mxu0 %v7298_v13  ;;  %v7318_v46 = vld [vmem:[%s8002_s13 + $0x4] ss:$16 sps:$4 sm:$0xff]   ;;  %v7322_v40 = vld [vmem:[%s8002_s13] ss:$16 sps:$4 sm:$0xff]   ;;  %v7372_v13 = vld [vmem:[%s8002_s13 + $0xe8] ss:$16 sps:$4 sm:$0xff]  }
 0x65a   : > { %5429 = vmatpush1.bf16.msra.mxu1 %v7299_v1  ;;  %5389 = vmatprep.subr.bf16.mxu0 %v7300_v62  ;;  %v7320_v43 = vld [vmem:[%s8002_s13 + $0x204] ss:$16 sps:$4 sm:$0xff]   ;;  %v7323_v52 = vld [vmem:[%s8002_s13 + $0x200] ss:$16 sps:$4 sm:$0xff]   ;;  %v7375_v1 = vld [vmem:[%s8002_s13 + $0x2e8] ss:$16 sps:$4 sm:$0xff]  }
 0x65b   : > { %5430 = vmatprep.subr.bf16.mxu1 %v7302_v51  ;;  %v7324_v59 = vld [vmem:[%s8002_s13 + $0x1e4] ss:$16 sps:$4 sm:$0xff]   ;;  %v7328_v48 = vld [vmem:[%s8002_s13 + $0x1e0] ss:$16 sps:$4 sm:$0xff]   ;;  %v7380_v62 = vld [vmem:[%s8002_s13 + $0xcc] ss:$16 sps:$4 sm:$0xff]  }
 0x65c   : > { %v7326_v26 = vld [vmem:[%s8002_s13 + $0x3e4] ss:$16 sps:$4 sm:$0xff]   ;;  %v7329_v37 = vld [vmem:[%s8002_s13 + $0x3e0] ss:$16 sps:$4 sm:$0xff]   ;;  %v7383_v51 = vld [vmem:[%s8002_s13 + $0x2cc] ss:$16 sps:$4 sm:$0xff]  }
 0x65d   : > { %5390 = vmatpush1.bf16.msra.mxu0 %v7304_v61  ;;  %v7330_v63 = vld [vmem:[%s8002_s13 + $0x1c4] ss:$16 sps:$4 sm:$0xff]   ;;  %v7334_v4 = vld [vmem:[%s8002_s13 + $0x1c0] ss:$16 sps:$4 sm:$0xff]   ;;  %v7378_v61 = vld [vmem:[%s8002_s13 + $0xc8] ss:$16 sps:$4 sm:$0xff]  }
 0x65e   : > { %5431 = vmatpush1.bf16.msra.mxu1 %v7305_v2  ;;  %5391 = vmatprep.subr.bf16.mxu0 %v7306_v16  ;;  %v7332_v25 = vld [vmem:[%s8002_s13 + $0x3c4] ss:$16 sps:$4 sm:$0xff]   ;;  %v7335_v35 = vld [vmem:[%s8002_s13 + $0x3c0] ss:$16 sps:$4 sm:$0xff]   ;;  %v7381_v2 = vld [vmem:[%s8002_s13 + $0x2c8] ss:$16 sps:$4 sm:$0xff]  }
 0x65f   : > { %5432 = vmatprep.subr.bf16.mxu1 %v7308_v21  ;;  %v7336_v28 = vld [vmem:[%s8002_s13 + $0x1a4] ss:$16 sps:$4 sm:$0xff]   ;;  %v7340_v29 = vld [vmem:[%s8002_s13 + $0x1a0] ss:$16 sps:$4 sm:$0xff]   ;;  %v7386_v16 = vld [vmem:[%s8002_s13 + $0xac] ss:$16 sps:$4 sm:$0xff]  }
 0x660   : > { %v7338_v23 = vld [vmem:[%s8002_s13 + $0x3a4] ss:$16 sps:$4 sm:$0xff]   ;;  %v7341_v10 = vld [vmem:[%s8002_s13 + $0x3a0] ss:$16 sps:$4 sm:$0xff]   ;;  %v7389_v21 = vld [vmem:[%s8002_s13 + $0x2ac] ss:$16 sps:$4 sm:$0xff]  }
 0x661   : > { %5392 = vmatpush1.bf16.msra.mxu0 %v7310_v33  ;;  %v7342_v39 = vld [vmem:[%s8002_s13 + $0x184] ss:$16 sps:$4 sm:$0xff]   ;;  %v7346_v49 = vld [vmem:[%s8002_s13 + $0x180] ss:$16 sps:$4 sm:$0xff]   ;;  %v7384_v33 = vld [vmem:[%s8002_s13 + $0xa8] ss:$16 sps:$4 sm:$0xff]  }
 0x662   : > { %5433 = vmatpush1.bf16.msra.mxu1 %v7311_v42  ;;  %5393 = vmatprep.subr.bf16.mxu0 %v7312_v18  ;;  %v7344_v27 = vld [vmem:[%s8002_s13 + $0x384] ss:$16 sps:$4 sm:$0xff]   ;;  %v7347_v55 = vld [vmem:[%s8002_s13 + $0x380] ss:$16 sps:$4 sm:$0xff]   ;;  %v7387_v42 = vld [vmem:[%s8002_s13 + $0x2a8] ss:$16 sps:$4 sm:$0xff]  }
 0x663   : > { %5434 = vmatprep.subr.bf16.mxu1 %v7314_v41  ;;  %v6083_v15 = vld.sshfl [vmem:[%s4582_s29] sm:$0x33 pattern:$0x75316420]  ;;  %v7392_v18 = vld [vmem:[%s8002_s13 + $0x8c] ss:$16 sps:$4 sm:$0xff]  }
 0x664   : > { %v4720_v8 = vcombine.high %v6083_v15, %v6083_v15  ;;  %v7348_v0 = vld [vmem:[%s8002_s13 + $0x164] ss:$16 sps:$4 sm:$0xff]   ;;  %v7352_v56 = vld [vmem:[%s8002_s13 + $0x160] ss:$16 sps:$4 sm:$0xff]   ;;  %v11700_v22 = vrot.slane %v6083_v15, %v4726_v32  ;;  %v7395_v41 = vld [vmem:[%s8002_s13 + $0x28c] ss:$16 sps:$4 sm:$0xff]  }
 0x665   : > { %5394 = vmatpush1.bf16.msra.mxu0 %v7316_v50  ;;  %v7350_v6 = vld [vmem:[%s8002_s13 + $0x364] ss:$16 sps:$4 sm:$0xff]   ;;  %v7353_v58 = vld [vmem:[%s8002_s13 + $0x360] ss:$16 sps:$4 sm:$0xff]   ;;  %v7390_v50 = vld [vmem:[%s8002_s13 + $0x88] ss:$16 sps:$4 sm:$0xff]  }
 0x666   : > { %5435 = vmatpush1.bf16.msra.mxu1 %v7317_v12  ;;  %5395 = vmatprep.subr.bf16.mxu0 %v7318_v46  ;;  %v4734_v11 = vrot.slane %v4720_v8, %v4726_v32  ;;  %v7354_v20 = vld [vmem:[%s8002_s13 + $0x144] ss:$16 sps:$4 sm:$0xff]   ;;  %v7358_v30 = vld [vmem:[%s8002_s13 + $0x140] ss:$16 sps:$4 sm:$0xff]   ;;  %v11707_v53 = vcombine.high %v11700_v22, %v11700_v22  ;;  %v7393_v12 = vld [vmem:[%s8002_s13 + $0x288] ss:$16 sps:$4 sm:$0xff]  }
 0x667   : > { %5436 = vmatprep.subr.bf16.mxu1 %v7320_v43  ;;  %v7356_v24 = vld [vmem:[%s8002_s13 + $0x344] ss:$16 sps:$4 sm:$0xff]   ;;  %v7359_v14 = vld [vmem:[%s8002_s13 + $0x340] ss:$16 sps:$4 sm:$0xff]   ;;  %v7398_v46 = vld [vmem:[%s8002_s13 + $0x6c] ss:$16 sps:$4 sm:$0xff]  }
 0x668   : > { %v4736_v9 = vcombine.high %v4734_v11, %v4734_v11  ;;  %5413 = vmatprep.mubr.bf16.mxu0 %v4734_v11  ;;  %v7360_v17 = vld [vmem:[%s8002_s13 + $0x124] ss:$16 sps:$4 sm:$0xff]   ;;  %v7364_v38 = vld [vmem:[%s8002_s13 + $0x120] ss:$16 sps:$4 sm:$0xff]   ;;  %v7401_v43 = vld [vmem:[%s8002_s13 + $0x26c] ss:$16 sps:$4 sm:$0xff]  }
 0x669   : > { %5396 = vmatpush1.bf16.msra.mxu0 %v7322_v40  ;;  %v7362_v54 = vld [vmem:[%s8002_s13 + $0x324] ss:$16 sps:$4 sm:$0xff]   ;;  %v7365_v5 = vld [vmem:[%s8002_s13 + $0x320] ss:$16 sps:$4 sm:$0xff]   ;;  %v7396_v40 = vld [vmem:[%s8002_s13 + $0x68] ss:$16 sps:$4 sm:$0xff]  }
 0x66a   : > { %5437 = vmatpush1.bf16.msra.mxu1 %v7323_v52  ;;  %5397 = vmatprep.subr.bf16.mxu0 %v7324_v59  ;;  %v7366_v31 = vld [vmem:[%s8002_s13 + $0x104] ss:$16 sps:$4 sm:$0xff]   ;;  %v7370_v60 = vld [vmem:[%s8002_s13 + $0x100] ss:$16 sps:$4 sm:$0xff]   ;;  %v7399_v52 = vld [vmem:[%s8002_s13 + $0x268] ss:$16 sps:$4 sm:$0xff]  }
 0x66b   : > { %5438 = vmatprep.subr.bf16.mxu1 %v7326_v26  ;;  %5454 = vmatprep.mubr.bf16.mxu1 %v4736_v9  ;;  %v7368_v57 = vld [vmem:[%s8002_s13 + $0x304] ss:$16 sps:$4 sm:$0xff]   ;;  %v7371_v36 = vld [vmem:[%s8002_s13 + $0x300] ss:$16 sps:$4 sm:$0xff]   ;;  %v7404_v59 = vld [vmem:[%s8002_s13 + $0x4c] ss:$16 sps:$4 sm:$0xff]  }
 0x66c   : > { %v7407_v26 = vld [vmem:[%s8002_s13 + $0x24c] ss:$16 sps:$4 sm:$0xff]   ;;  %v7426_v32 = vld [vmem:[%s8002_s13 + $0x1c8] ss:$16 sps:$4 sm:$0xff]  }
 0x66d   : > { %5398 = vmatpush2.bf16.msra.mxu0 %v7328_v48  ;;  %v7402_v48 = vld [vmem:[%s8002_s13 + $0x48] ss:$16 sps:$4 sm:$0xff]  }
 0x66e   : > { %5439 = vmatpush2.bf16.msra.mxu1 %v7329_v37  ;;  %5399 = vmatprep.subr.bf16.mxu0 %v7330_v63  ;;  %v7405_v37 = vld [vmem:[%s8002_s13 + $0x248] ss:$16 sps:$4 sm:$0xff]   ;;  %v7410_v63 = vld [vmem:[%s8002_s13 + $0x2c] ss:$16 sps:$4 sm:$0xff]  }
 0x66f   : > { %5440 = vmatprep.subr.bf16.mxu1 %v7332_v25  ;;  %v7413_v25 = vld [vmem:[%s8002_s13 + $0x22c] ss:$16 sps:$4 sm:$0xff]   ;;  %v7429_v15 = vld [vmem:[%s8002_s13 + $0x3c8] ss:$16 sps:$4 sm:$0xff]  }
 0x670   : > { %v7432_v8 = vld [vmem:[%s8002_s13 + $0x1a8] ss:$16 sps:$4 sm:$0xff]  }
 0x671   : > { %5400 = vmatpush2.bf16.msra.mxu0 %v7334_v4  ;;  %v7419_v4 = vld [vmem:[%s8002_s13 + $0x20c] ss:$16 sps:$4 sm:$0xff]  }
 0x672   : > { %5441 = vmatpush2.bf16.msra.mxu1 %v7335_v35  ;;  %5401 = vmatprep.subr.bf16.mxu0 %v7336_v28  ;;  %v7414_v35 = vld [vmem:[%s8002_s13 + $0x8] ss:$16 sps:$4 sm:$0xff]  }
 0x673   : > { %5442 = vmatprep.subr.bf16.mxu1 %v7338_v23  ;;  %v7417_v28 = vld [vmem:[%s8002_s13 + $0x208] ss:$16 sps:$4 sm:$0xff]   ;;  %v7422_v23 = vld [vmem:[%s8002_s13 + $0x1ec] ss:$16 sps:$4 sm:$0xff]  }
 0x675   : > { %5402 = vmatpush2.bf16.msra.mxu0 %v7340_v29  ;;  %v7420_v29 = vld [vmem:[%s8002_s13 + $0x1e8] ss:$16 sps:$4 sm:$0xff]  }
 0x676   : > { %5443 = vmatpush2.bf16.msra.mxu1 %v7341_v10  ;;  %5403 = vmatprep.subr.bf16.mxu0 %v7342_v39  ;;  %v7423_v10 = vld [vmem:[%s8002_s13 + $0x3e8] ss:$16 sps:$4 sm:$0xff]   ;;  %v7428_v39 = vld [vmem:[%s8002_s13 + $0x1cc] ss:$16 sps:$4 sm:$0xff]  }
 0x677   : > { %5444 = vmatprep.subr.bf16.mxu1 %v7344_v27  ;;  %v7431_v27 = vld [vmem:[%s8002_s13 + $0x3cc] ss:$16 sps:$4 sm:$0xff]  }
 0x679   : > { %5404 = vmatpush2.bf16.msra.mxu0 %v7346_v49  ;;  %v7434_v49 = vld [vmem:[%s8002_s13 + $0x1ac] ss:$16 sps:$4 sm:$0xff]  }
 0x67a   : > { %5445 = vmatpush2.bf16.msra.mxu1 %v7347_v55  ;;  %5405 = vmatprep.subr.bf16.mxu0 %v7348_v0  ;;  %v7437_v55 = vld [vmem:[%s8002_s13 + $0x3ac] ss:$16 sps:$4 sm:$0xff]   ;;  %v7435_v0 = vld [vmem:[%s8002_s13 + $0x3a8] ss:$16 sps:$4 sm:$0xff]  }
 0x67b   : > { %5446 = vmatprep.subr.bf16.mxu1 %v7350_v6  ;;  %v7440_v6 = vld [vmem:[%s8002_s13 + $0x18c] ss:$16 sps:$4 sm:$0xff]  }
 0x67d   : > { %5406 = vmatpush2.bf16.msra.mxu0 %v7352_v56  ;;  %v7438_v56 = vld [vmem:[%s8002_s13 + $0x188] ss:$16 sps:$4 sm:$0xff]  }
 0x67e   : > { %5447 = vmatpush2.bf16.msra.mxu1 %v7353_v58  ;;  %5407 = vmatprep.subr.bf16.mxu0 %v7354_v20  ;;  %v7441_v58 = vld [vmem:[%s8002_s13 + $0x388] ss:$16 sps:$4 sm:$0xff]   ;;  %v7449_v20 = vld [vmem:[%s8002_s13 + $0x36c] ss:$16 sps:$4 sm:$0xff]  }
 0x67f   : > { %5448 = vmatprep.subr.bf16.mxu1 %v7356_v24  ;;  %v7444_v24 = vld [vmem:[%s8002_s13 + $0x168] ss:$16 sps:$4 sm:$0xff]  }
 0x681   : > { %5408 = vmatpush2.bf16.msra.mxu0 %v7358_v30  ;;  %v7447_v30 = vld [vmem:[%s8002_s13 + $0x368] ss:$16 sps:$4 sm:$0xff]  }
 0x682   : > { %5449 = vmatpush2.bf16.msra.mxu1 %v7359_v14  ;;  %5409 = vmatprep.subr.bf16.mxu0 %v7360_v17  ;;  %v7452_v14 = vld [vmem:[%s8002_s13 + $0x14c] ss:$16 sps:$4 sm:$0xff]  }
 0x683   : > { %5450 = vmatprep.subr.bf16.mxu1 %v7362_v54  ;;  %v7455_v17 = vld [vmem:[%s8002_s13 + $0x34c] ss:$16 sps:$4 sm:$0xff]   ;;  %v7450_v54 = vld [vmem:[%s8002_s13 + $0x148] ss:$16 sps:$4 sm:$0xff]  }
 0x685   : > { %5410 = vmatpush2.bf16.msra.mxu0 %v7364_v38  ;;  %v7453_v38 = vld [vmem:[%s8002_s13 + $0x348] ss:$16 sps:$4 sm:$0xff]  }
 0x686   : > { %5451 = vmatpush2.bf16.msra.mxu1 %v7365_v5  ;;  %5411 = vmatprep.subr.bf16.mxu0 %v7366_v31  ;;  %v7458_v5 = vld [vmem:[%s8002_s13 + $0x12c] ss:$16 sps:$4 sm:$0xff]  }
 0x687   : > { %5452 = vmatprep.subr.bf16.mxu1 %v7368_v57  ;;  %v7461_v31 = vld [vmem:[%s8002_s13 + $0x32c] ss:$16 sps:$4 sm:$0xff]   ;;  %v7456_v57 = vld [vmem:[%s8002_s13 + $0x128] ss:$16 sps:$4 sm:$0xff]  }
 0x689   : > { %5412 = vmatpush2.bf16.msra.mxu0 %v7370_v60  ;;  %v7459_v60 = vld [vmem:[%s8002_s13 + $0x328] ss:$16 sps:$4 sm:$0xff]  }
 0x68a   : > { %5453 = vmatpush2.bf16.msra.mxu1 %v7371_v36  ;;  %5463 = vmatprep.subr.bf16.mxu0 %v7374_v45  ;;  %v7464_v36 = vld [vmem:[%s8002_s13 + $0x10c] ss:$16 sps:$4 sm:$0xff]  }
 0x68b   : > { %5504 = vmatprep.subr.bf16.mxu1 %v7377_v7  ;;  %v7467_v45 = vld [vmem:[%s8002_s13 + $0x30c] ss:$16 sps:$4 sm:$0xff]   ;;  %v7462_v7 = vld [vmem:[%s8002_s13 + $0x108] ss:$16 sps:$4 sm:$0xff]  }
 0x68c   : > { %5414 = vmatmul.mubr.bf16.vlgmr.msra.gmra.mxu0 %v11700_v22 }
 0x68d   : > { %5455 = vmatmul.mubr.bf16.vlgmr.msra.gmra.mxu1 %v11707_v53  ;;  %5464 = vmatpush1.bf16.msra.mxu0 %v7372_v13  ;;  %v7465_v13 = vld [vmem:[%s8002_s13 + $0x308] ss:$16 sps:$4 sm:$0xff]  }
 0x68e   : > { %5505 = vmatpush1.bf16.msra.mxu1 %v7375_v1  ;;  %5465 = vmatprep.subr.bf16.mxu0 %v7380_v62 }
 0x68f   : > { %5506 = vmatprep.subr.bf16.mxu1 %v7383_v51  ;;  %5495 = vmatprep.mubr.bf16.mxu0 %v4734_v11  ;;  %v7443_v11 = vld [vmem:[%s8002_s13 + $0x38c] ss:$16 sps:$4 sm:$0xff]  }
 0x690   : > { %5536 = vmatprep.mubr.bf16.mxu1 %v4736_v9  ;;  %v7446_v9 = vld [vmem:[%s8002_s13 + $0x16c] ss:$16 sps:$4 sm:$0xff]  }
 0x691   : > { %5466 = vmatpush1.bf16.msra.mxu0 %v7378_v61 }
 0x692   : > { %5507 = vmatpush1.bf16.msra.mxu1 %v7381_v2  ;;  %5467 = vmatprep.subr.bf16.mxu0 %v7386_v16 }
 0x693   : > { %5508 = vmatprep.subr.bf16.mxu1 %v7389_v21 }
 0x695   : > { %5468 = vmatpush1.bf16.msra.mxu0 %v7384_v33 }
 0x696   : > { %5509 = vmatpush1.bf16.msra.mxu1 %v7387_v42  ;;  %5469 = vmatprep.subr.bf16.mxu0 %v7392_v18 }
 0x697   : > { %5510 = vmatprep.subr.bf16.mxu1 %v7395_v41 }
 0x699   : > { %5470 = vmatpush1.bf16.msra.mxu0 %v7390_v50  ;;  %v7761_v50 = vmov 1983009808  }
 0x69a   : > { %5511 = vmatpush1.bf16.msra.mxu1 %v7393_v12  ;;  %5471 = vmatprep.subr.bf16.mxu0 %v7398_v46  ;;  %v5552_v12 = vunpack.c.l.s4 %v7761_v50 }
 0x69b   : > { %5512 = vmatprep.subr.bf16.mxu1 %v7401_v43 }
 0x69c   : > { %v5553_v46 = vunpack.c.0.s8 %v5552_v12 }
 0x69d   : > { %5472 = vmatpush1.bf16.msra.mxu0 %v7396_v40 }
 0x69e   : > { %5513 = vmatpush1.bf16.msra.mxu1 %v7399_v52  ;;  %5473 = vmatprep.subr.bf16.mxu0 %v7404_v59 }
 0x69f   : > { %5514 = vmatprep.subr.bf16.mxu1 %v7407_v26 }
 0x6a1   : > { %5474 = vmatpush1.bf16.msra.mxu0 %v7402_v48 }
 0x6a2   : > { %5515 = vmatpush1.bf16.msra.mxu1 %v7405_v37  ;;  %5475 = vmatprep.subr.bf16.mxu0 %v7410_v63 }
 0x6a3   : > { %5516 = vmatprep.subr.bf16.mxu1 %v7413_v25 }
 0x6a5   : > { %5476 = vmatpush1.bf16.msra.mxu0 %v7408_v47 }
 0x6a6   : > { %5517 = vmatpush1.bf16.msra.mxu1 %v7411_v19  ;;  %5477 = vmatprep.subr.bf16.mxu0 %v7416_v34 }
 0x6a7   : > { %5518 = vmatprep.subr.bf16.mxu1 %v7419_v4  ;;  %v4580_v4 = vld [vmem:[#allocation3] sm:$0xff] }
 0x6a9   : > { %5478 = vmatpush1.bf16.msra.mxu0 %v7414_v35 }
 0x6aa   : > { %5519 = vmatpush1.bf16.msra.mxu1 %v7417_v28  ;;  %5479 = vmatprep.subr.bf16.mxu0 %v7422_v23 }
 0x6ab   : > { %5520 = vmatprep.subr.bf16.mxu1 %v7425_v3 }
 0x6ad   : > { %5480 = vmatpush2.bf16.msra.mxu0 %v7420_v29 }
 0x6ae   : > { %5521 = vmatpush2.bf16.msra.mxu1 %v7423_v10  ;;  %5481 = vmatprep.subr.bf16.mxu0 %v7428_v39 }
 0x6af   : > { %5522 = vmatprep.subr.bf16.mxu1 %v7431_v27 }
 0x6b1   : > { %5482 = vmatpush2.bf16.msra.mxu0 %v7426_v32 }
 0x6b2   : > { %5523 = vmatpush2.bf16.msra.mxu1 %v7429_v15  ;;  %5483 = vmatprep.subr.bf16.mxu0 %v7434_v49 }
 0x6b3   : > { %5524 = vmatprep.subr.bf16.mxu1 %v7437_v55 }
 0x6b5   : > { %5484 = vmatpush2.bf16.msra.mxu0 %v7432_v8 }
 0x6b6   : > { %5525 = vmatpush2.bf16.msra.mxu1 %v7435_v0  ;;  %5485 = vmatprep.subr.bf16.mxu0 %v7440_v6 }
 0x6b7   : > { %5526 = vmatprep.subr.bf16.mxu1 %v7443_v11 }
 0x6b9   : > { %5486 = vmatpush2.bf16.msra.mxu0 %v7438_v56 }
 0x6ba   : > { %5527 = vmatpush2.bf16.msra.mxu1 %v7441_v58  ;;  %5487 = vmatprep.subr.bf16.mxu0 %v7446_v9 }
 0x6bb   : > { %5528 = vmatprep.subr.bf16.mxu1 %v7449_v20 }
 0x6bd   : > { %5488 = vmatpush2.bf16.msra.mxu0 %v7444_v24 }
 0x6be   : > { %5529 = vmatpush2.bf16.msra.mxu1 %v7447_v30  ;;  %5489 = vmatprep.subr.bf16.mxu0 %v7452_v14 }
 0x6bf   : > { %5530 = vmatprep.subr.bf16.mxu1 %v7455_v17 }
 0x6c1   : > { %5490 = vmatpush2.bf16.msra.mxu0 %v7450_v54 }
 0x6c2   : > { %5531 = vmatpush2.bf16.msra.mxu1 %v7453_v38  ;;  %5491 = vmatprep.subr.bf16.mxu0 %v7458_v5 }
 0x6c3   : > { %5532 = vmatprep.subr.bf16.mxu1 %v7461_v31 }
 0x6c5   : > { %5492 = vmatpush2.bf16.msra.mxu0 %v7456_v57 }
 0x6c6   : > { %5533 = vmatpush2.bf16.msra.mxu1 %v7459_v60  ;;  %5493 = vmatprep.subr.bf16.mxu0 %v7464_v36 }
 0x6c7   : > { %5534 = vmatprep.subr.bf16.mxu1 %v7467_v45 }
 0x6c9   : > { %5494 = vmatpush2.bf16.msra.mxu0 %v7462_v7 }
 0x6ca   : > { %5535 = vmatpush2.bf16.msra.mxu1 %v7465_v13 }
 0x6cc   : > { %5496 = vmatmul.mubr.bf16.vlgmr.msra.gmra.mxu0 %v11700_v22 }
 0x6cd   : > { %5537 = vmatmul.mubr.bf16.vlgmr.msra.gmra.mxu1 %v11707_v53  ;;  %v11776_v53 = vsub.s32 %v5553_v46, %v11676_v44 }
 0x74c   : > { %v5415_v1 = vpop.f32.mrf.mxu0 }
 0x74d   : > { %v5456_v62 = vpop.f32.mrf.mxu1 }
 0x74e   : > { %v5457_v51 = vadd.f32 %v5456_v62, %v5415_v1  ;;  %v5417_v61 = vpop.f32.mrf.mxu0 }
 0x74f   : > { %v5458_v2 = vpop.f32.mrf.mxu1 }
 0x750   : > { %v5459_v16 = vadd.f32 %v5458_v2, %v5417_v61  ;;  %v5419_v21 = vpop.f32.mrf.mxu0 }
 0x751   : > { %v5460_v33 = vpop.f32.mrf.mxu1 }
 0x752   : > { %v5549_v42 = vcombine.low %v5457_v51, %v5459_v16  ;;  %v5420_v18 = vpop.f32.mrf.mxu0 }
 0x753   : > { %v5461_v41 = vpop.f32.mrf.mxu1 }
 0x754   : > { %v5557_v19 = vrot.slane %v5549_v42, %v11776_v53 }
 0x78c   : > { %v5497_v43 = vpop.f32.mrf.mxu0 }
 0x78d   : > { %v5538_v40 = vpop.f32.mrf.mxu1 }
 0x78e   : > { %v5499_v52 = vpop.f32.mrf.mxu0  ;;  %v5539_v59 = vadd.f32 %v5538_v40, %v5497_v43 }
 0x78f   : > { %v5540_v22 = vpop.f32.mrf.mxu1 }
 0x790   : > { %v5541_v26 = vadd.f32 %v5540_v22, %v5499_v52  ;;  %v5501_v48 = vpop.f32.mrf.mxu0 }
 0x791   : > { %v5542_v37 = vpop.f32.mrf.mxu1 }
 0x792   : > { %v5550_v63 = vcombine.low %v5539_v59, %v5541_v26  ;;  %v5502_v25 = vpop.f32.mrf.mxu0 }
 0x793   : > { %v5543_v47 = vpop.f32.mrf.mxu1 }
 0x794   : > { %v5564_v34 = vrot.slane %v5550_v63, %v11776_v53 }
 0x796   : > { %v5565_v35 = vcombine.low %v5557_v19, %v5564_v34  ;;  %5572 = sbr.rel (%p6212_p3) target bundleno = 2184 (0x888), region = 104 }
 0x798   : > { %v5567_v28 = vadd.f32 %v5565_v35, %v4580_v4 }
 0x79a   : > { %5568 = vst [vmem:[#allocation3] sm:$0xff] %v5567_v28 }
 0x79b   : > { %v5643_v23 = vld [vmem:[%s12016_s10 + $0xf8] sm:$0xff]  ;;  %v5642_v39 = vld [vmem:[%s12016_s10 + $0xf0] sm:$0xff]  ;;  %v5641_v49 = vld [vmem:[%s12016_s10 + $0xe8] sm:$0xff]  ;;  %v5578_v41 = vsub.s32 0, %v11676_v44  ;;  %v5582_v50 = vsub.s32 1, %v11676_v44  ;;  %v5586_v12 = vsub.s32 2, %v11676_v44 }
 0x79c   : > { %v5675_v3 = vld [vmem:[%s12016_s10 + $0x1f8] sm:$0xff]  ;;  %6434 = vmatprep.subr.mxu0 %v5643_v23  ;;  %v5674_v27 = vld [vmem:[%s12016_s10 + $0x1f0] sm:$0xff]  ;;  %v5673_v55 = vld [vmem:[%s12016_s10 + $0x1e8] sm:$0xff]  ;;  %v5590_v40 = vsub.s32 3, %v11676_v44  ;;  %vm5845_vm5 = vcmask 33792  }
 0x79d   : > { %v5627_v29 = vld [vmem:[%s12016_s10 + $0x78] sm:$0xff]  ;;  %6469 = vmatprep.subr.mxu1 %v5675_v3  ;;  %v5626_v32 = vld [vmem:[%s12016_s10 + $0x70] sm:$0xff]  ;;  %v5625_v8 = vld [vmem:[%s12016_s10 + $0x68] sm:$0xff] }
 0x79e   : > { %v5659_v10 = vld [vmem:[%s12016_s10 + $0x178] sm:$0xff]  ;;  %6435 = vmatpush3.msra.mxu0 %v5627_v29  ;;  %v5658_v15 = vld [vmem:[%s12016_s10 + $0x170] sm:$0xff]  ;;  %v5657_v0 = vld [vmem:[%s12016_s10 + $0x168] sm:$0xff] }
 0x79f   : > { %6470 = vmatpush3.msra.mxu1 %v5659_v10  ;;  %6436 = vmatprep.subr.mxu0 %v5642_v39  ;;  %v5640_v6 = vld [vmem:[%s12016_s10 + $0xe0] sm:$0xff]  ;;  %v5639_v9 = vld [vmem:[%s12016_s10 + $0xd8] sm:$0xff]  ;;  %v5638_v14 = vld [vmem:[%s12016_s10 + $0xd0] sm:$0xff] }
 0x7a0   : > { %6471 = vmatprep.subr.mxu1 %v5674_v27  ;;  %6437 = vmatpush3.msra.mxu0 %v5626_v32  ;;  %v5672_v11 = vld [vmem:[%s12016_s10 + $0x1e0] sm:$0xff]  ;;  %v5671_v20 = vld [vmem:[%s12016_s10 + $0x1d8] sm:$0xff]  ;;  %v5670_v17 = vld [vmem:[%s12016_s10 + $0x1d0] sm:$0xff] }
 0x7a1   : > { %6472 = vmatpush3.msra.mxu1 %v5658_v15  ;;  %6438 = vmatprep.subr.mxu0 %v5641_v49  ;;  %v5624_v56 = vld [vmem:[%s12016_s10 + $0x60] sm:$0xff]  ;;  %v5623_v24 = vld [vmem:[%s12016_s10 + $0x58] sm:$0xff]  ;;  %v5622_v54 = vld [vmem:[%s12016_s10 + $0x50] sm:$0xff] }
 0x7a2   : > { %6473 = vmatprep.subr.mxu1 %v5673_v55  ;;  %v5656_v58 = vld [vmem:[%s12016_s10 + $0x160] sm:$0xff]  ;;  %6439 = vmatpush3.msra.mxu0 %v5625_v8  ;;  %v5655_v30 = vld [vmem:[%s12016_s10 + $0x158] sm:$0xff]  ;;  %v5654_v38 = vld [vmem:[%s12016_s10 + $0x150] sm:$0xff] }
 0x7a3   : > { %6474 = vmatpush3.msra.mxu1 %v5657_v0  ;;  %6440 = vmatprep.subr.mxu0 %v5640_v6  ;;  %v5637_v5 = vld [vmem:[%s12016_s10 + $0xc8] sm:$0xff]  ;;  %v5636_v36 = vld [vmem:[%s12016_s10 + $0xc0] sm:$0xff]  ;;  %v5635_v1 = vld [vmem:[%s12016_s10 + $0xb8] sm:$0xff] }
 0x7a4   : > { %6475 = vmatprep.subr.mxu1 %v5672_v11  ;;  %6441 = vmatpush3.msra.mxu0 %v5624_v56  ;;  %v5669_v31 = vld [vmem:[%s12016_s10 + $0x1c8] sm:$0xff]  ;;  %v5668_v45 = vld [vmem:[%s12016_s10 + $0x1c0] sm:$0xff]  ;;  %v5667_v62 = vld [vmem:[%s12016_s10 + $0x1b8] sm:$0xff] }
 0x7a5   : > { %6476 = vmatpush3.msra.mxu1 %v5656_v58  ;;  %6442 = vmatprep.subr.mxu0 %v5639_v9  ;;  %v5621_v57 = vld [vmem:[%s12016_s10 + $0x48] sm:$0xff]  ;;  %v5620_v7 = vld [vmem:[%s12016_s10 + $0x40] sm:$0xff]  ;;  %v5619_v51 = vld [vmem:[%s12016_s10 + $0x38] sm:$0xff] }
 0x7a6   : > { %6477 = vmatprep.subr.mxu1 %v5671_v20  ;;  %6443 = vmatpush3.msra.mxu0 %v5623_v24  ;;  %v5653_v60 = vld [vmem:[%s12016_s10 + $0x148] sm:$0xff]  ;;  %v5652_v13 = vld [vmem:[%s12016_s10 + $0x140] sm:$0xff]  ;;  %v5651_v61 = vld [vmem:[%s12016_s10 + $0x138] sm:$0xff] }
 0x7a7   : > { %6478 = vmatpush3.msra.mxu1 %v5655_v30  ;;  %6444 = vmatprep.subr.mxu0 %v5638_v14  ;;  %v5634_v2 = vld [vmem:[%s12016_s10 + $0xb0] sm:$0xff]  ;;  %v5633_v42 = vld [vmem:[%s12016_s10 + $0xa8] sm:$0xff]  ;;  %v5632_v52 = vld [vmem:[%s12016_s10 + $0xa0] sm:$0xff] }
 0x7a8   : > { %6479 = vmatprep.subr.mxu1 %v5670_v17  ;;  %6445 = vmatpush3.msra.mxu0 %v5622_v54  ;;  %v5666_v16 = vld [vmem:[%s12016_s10 + $0x1b0] sm:$0xff]  ;;  %v5665_v18 = vld [vmem:[%s12016_s10 + $0x1a8] sm:$0xff]  ;;  %v5664_v22 = vld [vmem:[%s12016_s10 + $0x1a0] sm:$0xff] }
 0x7a9   : > { %6480 = vmatpush3.msra.mxu1 %v5654_v38  ;;  %6446 = vmatprep.subr.mxu0 %v5637_v5  ;;  %v5618_v21 = vld [vmem:[%s12016_s10 + $0x30] sm:$0xff]  ;;  %v5617_v46 = vld [vmem:[%s12016_s10 + $0x28] sm:$0xff]  ;;  %v5616_v59 = vld [vmem:[%s12016_s10 + $0x20] sm:$0xff] }
 0x7aa   : > { %6481 = vmatprep.subr.mxu1 %v5669_v31  ;;  %6447 = vmatpush3.msra.mxu0 %v5621_v57  ;;  %v5650_v33 = vld [vmem:[%s12016_s10 + $0x130] sm:$0xff]  ;;  %v5649_v43 = vld [vmem:[%s12016_s10 + $0x128] sm:$0xff]  ;;  %v5648_v44 = vld [vmem:[%s12016_s10 + $0x120] sm:$0xff] }
 0x7ab   : > { %6482 = vmatpush3.msra.mxu1 %v5653_v60  ;;  %6448 = vmatprep.subr.mxu0 %v5636_v36  ;;  %v5574_v26 = vld [vmem:[#allocation13] sm:$0xf]  ;;  %v5630_v35 = vld [vmem:[%s12016_s10 + $0x90] sm:$0xff]  ;;  %v5629_v39 = vld [vmem:[%s12016_s10 + $0x88] sm:$0xff] }
 0x7ac   : > { %6483 = vmatprep.subr.mxu1 %v5668_v45  ;;  %6449 = vmatpush3.msra.mxu0 %v5620_v7  ;;  %v5631_v48 = vld [vmem:[%s12016_s10 + $0x98] sm:$0xff]  ;;  %v5579_v63 = vrot.slane %v5574_v26, %v5578_v41  ;;  %v5583_v25 = vrot.slane %v5574_v26, %v5582_v50  ;;  %v5587_v47 = vrot.slane %v5574_v26, %v5586_v12  ;;  %v5662_v28 = vld [vmem:[%s12016_s10 + $0x190] sm:$0xff]  ;;  %v5661_v27 = vld [vmem:[%s12016_s10 + $0x188] sm:$0xff] }
 0x7ad   : > { %6484 = vmatpush3.msra.mxu1 %v5652_v13  ;;  %6450 = vmatprep.subr.mxu0 %v5635_v1  ;;  %v5663_v37 = vld [vmem:[%s12016_s10 + $0x198] sm:$0xff]  ;;  %v5591_v4 = vrot.slane %v5574_v26, %v5590_v40  ;;  %v5614_v3 = vld [vmem:[%s12016_s10 + $0x10] sm:$0xff]  ;;  %v5613_v15 = vld [vmem:[%s12016_s10 + $0x8] sm:$0xff] }
 0x7ae   : > { %6485 = vmatprep.subr.mxu1 %v5667_v62  ;;  %6451 = vmatpush3.msra.mxu0 %v5619_v51  ;;  %v5615_v19 = vld [vmem:[%s12016_s10 + $0x18] sm:$0xff]  ;;  %v5592_v23 = vcombine.low %v5579_v63, %v5583_v25  ;;  %v5646_v29 = vld [vmem:[%s12016_s10 + $0x110] sm:$0xff]  ;;  %v5645_v49 = vld [vmem:[%s12016_s10 + $0x108] sm:$0xff] }
 0x7af   : > { %6486 = vmatpush3.msra.mxu1 %v5651_v61  ;;  %6452 = vmatprep.subr.mxu0 %v5634_v2  ;;  %v5647_v34 = vld [vmem:[%s12016_s10 + $0x118] sm:$0xff]  ;;  %v5593_v10 = vcombine.low %v5587_v47, %v5591_v4  ;;  %v5628_v8 = vld [vmem:[%s12016_s10 + $0x80] sm:$0xff] }
 0x7b0   : > { %6487 = vmatprep.subr.mxu1 %v5666_v16  ;;  %6453 = vmatpush3.msra.mxu0 %v5618_v21  ;;  %v5600_v32 = vrot.slane %v5592_v23, %v11776_v53  ;;  %v5660_v0 = vld [vmem:[%s12016_s10 + $0x180] sm:$0xff] }
 0x7b1   : > { %6488 = vmatpush3.msra.mxu1 %v5650_v33  ;;  %6454 = vmatprep.subr.mxu0 %v5633_v42  ;;  %v5607_v55 = vrot.slane %v5593_v10, %v11776_v53  ;;  %v5573_v6 = vld [vmem:[#allocation3] sm:$0xff] }
 0x7b2   : > { %6489 = vmatprep.subr.mxu1 %v5665_v18  ;;  %6455 = vmatpush3.msra.mxu0 %v5617_v46  ;;  %v5612_v11 = vld [vmem:[%s12016_s10] sm:$0xff] }
 0x7b3   : > { %6490 = vmatpush3.msra.mxu1 %v5649_v43  ;;  %6456 = vmatprep.subr.mxu0 %v5632_v52  ;;  %v5608_v56 = vcombine.low %v5600_v32, %v5607_v55  ;;  %v5644_v58 = vld [vmem:[%s12016_s10 + $0x100] sm:$0xff] }
 0x7b4   : > { %6491 = vmatprep.subr.mxu1 %v5664_v22  ;;  %6457 = vmatpush3.msra.mxu0 %v5616_v59  ;;  %v6213_v31 = vld [vmem:[#allocation14] ss:$0 sm:$0xff] }
 0x7b5   : > { %6492 = vmatpush3.msra.mxu1 %v5648_v44  ;;  %6458 = vmatprep.subr.mxu0 %v5631_v48  ;;  %v5610_v9 = vadd.f32 %v5608_v56, %v5573_v6 }
 0x7b6   : > { %6493 = vmatprep.subr.mxu1 %v5663_v37  ;;  %6459 = vmatpush3.msra.mxu0 %v5615_v19 }
 0x7b7   : > { %6494 = vmatpush3.msra.mxu1 %v5647_v34  ;;  %6460 = vmatprep.subr.mxu0 %v5630_v35  ;;  %v5611_v20 = vmax.f32 %v5610_v9, 0.0 }
 0x7b8   : > { %6495 = vmatprep.subr.mxu1 %v5662_v28  ;;  %6461 = vmatpush3.msra.mxu0 %v5614_v3 }
 0x7b9   : > { %6496 = vmatpush3.msra.mxu1 %v5646_v29  ;;  %6462 = vmatprep.subr.mxu0 %v5629_v39  ;;  %v5691_v24 = vrot.slane %v5611_v20, %v11776_v53  ;;  %v5684_v30 = vcombine.high %v5611_v20, %v5611_v20 }
 0x7ba   : > { %6497 = vmatprep.subr.mxu1 %v5661_v27  ;;  %6463 = vmatpush3.msra.mxu0 %v5613_v15 }
 0x7bb   : > { %6498 = vmatpush3.msra.mxu1 %v5645_v49  ;;  %6464 = vmatprep.subr.mxu0 %v5628_v8  ;;  %v5699_v14 = vcombine.high %v5691_v24, %v5691_v24  ;;  %v5698_v17 = vrot.slane %v5684_v30, %v11776_v53 }
 0x7bc   : > { %6499 = vmatprep.subr.mxu1 %v5660_v0  ;;  %6465 = vmatpush3.msra.mxu0 %v5612_v11 }
 0x7bd   : > { %6500 = vmatpush3.msra.mxu1 %v5644_v58  ;;  %5769 = vmatprep.mubr.f32.mxu0 %v5699_v14  ;;  %v5700_v54 = vcombine.high %v5698_v17, %v5698_v17 }
 0x7be   : > { %5770 = vmatmul.mubr.f32.vlgmr.msra.gmra.mxu0 %v5691_v24 }
 0x7bf   : > { %5839 = vmatprep.mubr.f32.mxu1 %v5700_v54 }
 0x7c0   : > { %5840 = vmatmul.mubr.f32.vlgmr.msra.gmra.mxu1 %v5698_v17 }
 0x87e   : > { %v6466_v38 = vpop.f32.mrf.mxu0 }
 0x880   : > { %v6501_v5 = vpop.f32.mrf.mxu1  ;;  %v6467_v57 = vpop.f32.mrf.mxu0 }
 0x881   : > { %v6468_v60 = vadd.f32 %v6467_v57, %v6466_v38 }
 0x882   : > { %v6502_v36 = vpop.f32.mrf.mxu1 }
 0x883   : > { %v5772_v45 = vadd.f32 %v6468_v60, %v6213_v31  ;;  %v6503_v7 = vadd.f32 %v6502_v36, %v6501_v5 }
 0x885   : > { %v5842_v13 = vadd.f32 %v6503_v7, %v5772_v45 }
 0x887   : > { %5846 = vst.msk [vmem:[#allocation15] sm:$0x3] %vm5845_vm5, %v5842_v13 }
 0x888 PF: > { %p6614_p5 = scmp.eq.s32.totalorder %s7849_s27, 7  ;;  %s7762_s2 = smov [#allocation15]  }
 0x889   : > { %s5854_s3 = sshll.u32 %s7762_s2, 4  ;;  %s5855_s3 = int_to_ptr.vmem [resolvable:$true] %s5854_s3 }
 0x88a   : > { %s7652_s28 = scalar_lea.vmem %s5855_s3, 32  ;;  %p7659_p0 = scmp.lt.s32.totalorder %s5855_s3, %s5855_s3 }
 0x88b   : > { %p7653_p1 = scmp.ne.s32.totalorder %s5855_s3, %s7652_s28  ;;  %p7660_p8 = scmp.lt.s32.totalorder %s7652_s28, %s7652_s28 }
 0x88d   : > { %p7654_p4 = pnand %p7653_p1, %p6614_p5  ;;  %p7661_p6 = por %p7660_p8, %p7659_p0 }
 0x88f   : > { %p7655_p7 = pneg %p7654_p4 }
 0x891   : > { %p7662_p9 = pnand %p7661_p6, %p7655_p7 }
 0x893   : > { %7665 = shalt.err (!%p7662_p9)
}
 0x894   : > { %6575 = dma.vmem_to_hbm [thread:$0]  (%p6614_p5), %s5855_s3, 32, %s12018_s12, [#allocation6]  }
 0x895   : > { %7717 = dma.done.wait (%p6614_p5), [#allocation6], 32  }
 0x896   : > { %7719 = vsyncadd (%p6614_p5), [#allocation6], 4294967264 }
 0x897 PF: > { %p23_p11 = scmp.ge.s32.totalorder %s7931_s16, 10   ;;  %s13127_s21 = smov %s7726_s22 }
 0x898   : > { %s13128_s22 = smov %s7730_s23  ;;  %s13129_s23 = smov %s7943_s20 }
 0x899   : > { %s13130_s24 = smov %s7931_s16  ;;  %25 = sbr.rel (!%p23_p11) target bundleno = 8 (0x8), region = 144 }
 0x89e   :  { %5867 = vsyncpa [#allocation5], 1 }
 0x89f   :  { %5869 = vsyncpa [#allocation5 + $0x1], 1 }
 0x8a0   :  { %5870 = vsyncpa [#allocation8], 1 }
 0x8a1   :  { %5871 = vsyncpa [#allocation11], 1 }
 0x8a2   :  { %5872 = vsyncpa [#allocation6], 1 }
 0x8a3   :  { %5874 = vsyncpa [#allocation6 + $0x1], 1 }

</bundles_post_ra>
